<compile_context>
chip_gen: v6e
topology: v6e:2x2x1
jax: 0.10.0
libtpu: 0.0.40
codegen_flags: <defaults>
</compile_context>

<pallas_src>
import functools

import jax
import jax.numpy as jnp
from jax import lax
from jax.experimental import pallas as pl
from jax.experimental.pallas import tpu as pltpu

# --- config (matches gpt.py structure; T kept small but tile-friendly) -------
N_EMBED = 384
N_HEADS = 6
HEAD_SIZE = N_EMBED // N_HEADS   # 64
BLOCK_SIZE = 256                 # causal-mask context limit (T <= BLOCK_SIZE)
BATCH = 2
SEQ = 128


# --- fused kernel -------------------------------------------------------------
def _fused_mha_kernel(x_ref, wqkv_ref, wproj_ref, b_ref, o_ref,
                      qkv_ref, cat_ref, *, num_heads, seq_len):
    """rows = T (grid=(B,), one batch element / step) or B*T (flattened batch).

    x_ref    : (rows, C)        f32   (cast to bf16 in-kernel)
    wqkv_ref : (C, 3*H*Hs)      bf16  packed as [Wq*C**-0.5 | Wk | Wv]
    wproj_ref: (C, C)           bf16
    b_ref    : (1, C)           f32
    o_ref    : (rows, C)        bf16  (lane-dense: C = 384 = 3*128)
    qkv_ref  : (rows, 3*H*Hs)   bf16  VMEM scratch (bounds per-head live ranges)
    cat_ref  : (rows, H*Hs)     bf16  VMEM scratch (concatenated head outputs)
    """
    rows, C = x_ref.shape
    hhs = cat_ref.shape[1]              # H * Hs
    hs = hhs // num_heads               # Hs
    T = seq_len

    # One fat QKV matmul at M=rows with f32 accumulation on the MXU; stage the
    # bf16 result in VMEM scratch so per-head slices are short-lived ref loads.
    x_bf = x_ref[...].astype(jnp.bfloat16)
    qkv_ref[...] = jnp.dot(
        x_bf, wqkv_ref[...],
        preferred_element_type=jnp.float32).astype(jnp.bfloat16)

    row_i = lax.broadcasted_iota(jnp.int32, (T, T), 0)
    col_i = lax.broadcasted_iota(jnp.int32, (T, T), 1)
    causal = col_i <= row_i             # == tril[:T, :T]

    # The C**-0.5 scale is already folded into the packed Wq columns.
    for s in range(rows // T):          # one causal block per batch element
        r0 = s * T
        for h in range(num_heads):
            q = qkv_ref[r0:r0 + T, h * hs:(h + 1) * hs]                      # (T, Hs)
            k = qkv_ref[r0:r0 + T, hhs + h * hs:hhs + (h + 1) * hs]          # (T, Hs)
            v = qkv_ref[r0:r0 + T, 2 * hhs + h * hs:2 * hhs + (h + 1) * hs]  # (T, Hs)

            # q @ k.T (contract head dims directly; no explicit transpose)
            sc = lax.dot_general(q, k, (((1,), (1,)), ((), ())),
                                 preferred_element_type=jnp.float32)         # (T, T)
            sc = jnp.where(causal, sc, -jnp.inf)

            # numerically-stable softmax with deferred normalization
            m = jnp.max(sc, axis=-1, keepdims=True)
            p = jnp.exp(sc - m)                                              # (T, T) f32
            l = jnp.sum(p, axis=-1, keepdims=True)                           # (T, 1)
            acc = jnp.dot(p.astype(jnp.bfloat16), v,
                          preferred_element_type=jnp.float32)                # (T, Hs)
            o_h = acc * pl.reciprocal(l, approx=True)
            cat_ref[r0:r0 + T, h * hs:(h + 1) * hs] = o_h.astype(cat_ref.dtype)

    # Output projection on the concatenated heads: (rows, H*Hs) @ (C, C) + bias.
    out = jnp.dot(cat_ref[...], wproj_ref[...],
                  preferred_element_type=jnp.float32) + b_ref[...]
    o_ref[...] = out.astype(o_ref.dtype)


# --- one-time parameter packing (call ONCE at init, not per forward) ----------
def pack_params(wq, wk, wv, w_proj, b_proj):
    """Pack per-head Q/K/V weights into one lane-dense (C, 3*H*Hs) bf16 slab,
    fold the reference's C**-0.5 softmax scale into the Wq columns, and pre-cast
    the projection weight to bf16. Keeps all of this out of the per-call path."""
    H, C, Hs = wq.shape
    scale = jnp.float32(C) ** jnp.float32(-0.5)   # reference uses n_embed, not head_size
    pack = lambda w: jnp.transpose(w, (1, 0, 2)).reshape(C, H * Hs)
    w_qkv = jnp.concatenate([pack(wq) * scale, pack(wk), pack(wv)], axis=-1)
    return (w_qkv.astype(jnp.bfloat16),
            w_proj.astype(jnp.bfloat16),
            b_proj.reshape(1, C).astype(jnp.float32))


def _single_tensorcore_device():
    """True on single-TC chips (v5e/v6e) where flattening batch into the matmul
    M dim helps; False (keep grid=(B,) 'parallel') for multi-TC chips (v7x)."""
    try:
        kind = jax.devices()[0].device_kind.lower()
    except Exception:
        return False
    return any(tag in kind for tag in
               ("v5e", "v5 lite", "v5lite", "v6e", "v6 lite", "v6lite"))


# --- wrapper -------------------------------------------------------------------
@functools.partial(jax.jit, static_argnames=("num_heads", "flatten_batch"))
def multi_head_attention(x, w_qkv, w_proj, b_proj2, *, num_heads, flatten_batch):
    """x: (B,T,C) f32; w_qkv: (C,3*H*Hs) bf16; w_proj: (C,C) bf16; b: (1,C) f32."""
    B, T, C = x.shape
    hhs = w_qkv.shape[1] // 3

    kernel = functools.partial(_fused_mha_kernel, num_heads=num_heads, seq_len=T)
    weight_specs = [
        pl.BlockSpec((C, 3 * hhs), lambda *_: (0, 0)),   # packed QKV weights
        pl.BlockSpec((C, C), lambda *_: (0, 0)),         # proj weight
        pl.BlockSpec((1, C), lambda *_: (0, 0)),         # proj bias
    ]

    if flatten_batch:
        # Single-TC chips: one grid step; QKV / proj matmuls at M = B*T.
        rows = B * T
        out = pl.pallas_call(
            kernel,
            out_shape=jax.ShapeDtypeStruct((rows, C), jnp.bfloat16),
            grid=(1,),
            in_specs=[pl.BlockSpec((rows, C), lambda *_: (0, 0))] + weight_specs,
            out_specs=pl.BlockSpec((rows, C), lambda *_: (0, 0)),
            scratch_shapes=[pltpu.VMEM((rows, 3 * hhs), jnp.bfloat16),
                            pltpu.VMEM((rows, hhs), jnp.bfloat16)],
            compiler_params=pltpu.CompilerParams(
                dimension_semantics=("arbitrary",)),
        )(x.reshape(rows, C), w_qkv, w_proj, b_proj2)
        out = out.reshape(B, T, C)
    else:
        # Multi-TC chips (v7x): one batch element per grid step, both cores busy.
        out = pl.pallas_call(
            kernel,
            out_shape=jax.ShapeDtypeStruct((B, T, C), jnp.bfloat16),
            grid=(B,),
            in_specs=[pl.BlockSpec((None, T, C), lambda b: (b, 0, 0))] + weight_specs,
            out_specs=pl.BlockSpec((None, T, C), lambda b: (b, 0, 0)),
            scratch_shapes=[pltpu.VMEM((T, 3 * hhs), jnp.bfloat16),
                            pltpu.VMEM((T, hhs), jnp.bfloat16)],
            compiler_params=pltpu.CompilerParams(
                dimension_semantics=("parallel",)),
        )(x, w_qkv, w_proj, b_proj2)

    # TODO(synk): nn.Dropout(0.2) of the enclosing MultiHeadAttention omitted —
    # forward implemented in eval/inference mode where dropout is the identity.
    return out


# --- pure-JAX f32 reference for a correctness check ----------------------------
def _reference(x, wq, wk, wv, w_proj, b_proj):
    B, T, C = x.shape
    outs = []
    mask = jnp.tril(jnp.ones((T, T), dtype=bool))
    for h in range(wq.shape[0]):
        q = x @ wq[h]
        k = x @ wk[h]
        v = x @ wv[h]
        s = (q @ jnp.swapaxes(k, -1, -2)) * (C ** -0.5)
        s = jnp.where(mask, s, -jnp.inf)
        p = jax.nn.softmax(s, axis=-1)
        outs.append(p @ v)
    cat = jnp.concatenate(outs, axis=-1)
    return cat @ w_proj + b_proj


if __name__ == "__main__":
    assert SEQ <= BLOCK_SIZE
    key = jax.random.PRNGKey(0)
    kx, kq, kk, kv, kp, kb = jax.random.split(key, 6)

    x = jax.random.normal(kx, (BATCH, SEQ, N_EMBED), dtype=jnp.float32)

    # deterministic parameter init (shapes from the module's __init__)
    wq = jax.random.normal(kq, (N_HEADS, N_EMBED, HEAD_SIZE), jnp.float32) * 0.02
    wk = jax.random.normal(kk, (N_HEADS, N_EMBED, HEAD_SIZE), jnp.float32) * 0.02
    wv = jax.random.normal(kv, (N_HEADS, N_EMBED, HEAD_SIZE), jnp.float32) * 0.02
    w_proj = jax.random.normal(kp, (N_EMBED, N_EMBED), jnp.float32) * 0.02
    b_proj = jax.random.normal(kb, (N_EMBED,), jnp.float32) * 0.02

    # One-time parameter packing / bf16 casting (outside the per-call path).
    w_qkv_p, w_proj_p, b_proj_p = jax.block_until_ready(
        pack_params(wq, wk, wv, w_proj, b_proj))

    out = multi_head_attention(x, w_qkv_p, w_proj_p, b_proj_p,
                               num_heads=N_HEADS,
                               flatten_batch=_single_tensorcore_device())
    out = jax.block_until_ready(out)

    ref = _reference(x, wq, wk, wv, w_proj, b_proj)
    assert out.shape == (BATCH, SEQ, N_EMBED), out.shape
    assert out.dtype == jnp.bfloat16, out.dtype
    # tolerance for bf16 matmul operands + bf16 output (f32 accumulation inside)
    err = float(jnp.max(jnp.abs(out.astype(jnp.float32) - ref)))
    assert err < 3e-2, err

    print("KERNEL_OK")
</pallas_src>

<mosaic_0001>
module attributes {stable_mosaic.version = 11 : i64} {
  func.func @_fused_mha_kernel(%arg0: i32, %arg1: memref<1x128x384xf32, #tpu.memory_space<vmem>>, %arg2: memref<384x1152xbf16, #tpu.memory_space<vmem>>, %arg3: memref<384x384xbf16, #tpu.memory_space<vmem>>, %arg4: memref<1x384xf32, #tpu.memory_space<vmem>>, %arg5: memref<1x128x384xbf16, #tpu.memory_space<vmem>>, %arg6: memref<128x1152xbf16, #tpu.memory_space<vmem>>, %arg7: memref<128x384xbf16, #tpu.memory_space<vmem>>) attributes {dimension_semantics = [#tpu.dimension_semantics<parallel>], iteration_bounds = array<i64: 2>, scalar_prefetch = 0 : i64, scratch_operands = 2 : i64, tpu.core_type = #tpu.core_type<tc>, window_params = [{transform_indices = @transform_0, window_bounds = array<i64: 1, 128, 384>}, {pipeline_mode = #tpu.pipeline_mode<synchronous>, transform_indices = @transform_1, window_bounds = array<i64: 384, 1152>}, {pipeline_mode = #tpu.pipeline_mode<synchronous>, transform_indices = @transform_2, window_bounds = array<i64: 384, 384>}, {pipeline_mode = #tpu.pipeline_mode<synchronous>, transform_indices = @transform_3, window_bounds = array<i64: 1, 384>}, {transform_indices = @transform_4, window_bounds = array<i64: 1, 128, 384>}]} {
    %c0 = arith.constant 0 : index
    %c0_0 = arith.constant 0 : index
    %c0_1 = arith.constant 0 : index
    %0 = vector.load %arg1[%c0, %c0_0, %c0_1] : memref<1x128x384xf32, #tpu.memory_space<vmem>>, vector<1x128x384xf32>
    %1 = vector.shape_cast %0 : vector<1x128x384xf32> to vector<128x384xf32>
    %2 = arith.truncf %1 : vector<128x384xf32> to vector<128x384xbf16>
    %c0_2 = arith.constant 0 : index
    %c0_3 = arith.constant 0 : index
    %3 = vector.load %arg2[%c0_2, %c0_3] : memref<384x1152xbf16, #tpu.memory_space<vmem>>, vector<384x1152xbf16>
    %cst = arith.constant dense<0.000000e+00> : vector<128x1152xf32>
    %4 = tpu.matmul %2, %3, %cst {dimension_numbers = #tpu.dot_dimension_numbers<[1], [0], [0], [1], [0, 0, 1, 1], [], []>} : vector<128x384xbf16>, vector<384x1152xbf16>, vector<128x1152xf32> -> vector<128x1152xf32>
    %5 = arith.truncf %4 : vector<128x1152xf32> to vector<128x1152xbf16>
    %c0_4 = arith.constant 0 : index
    %c0_5 = arith.constant 0 : index
    %6 = vector.load %arg6[%c0_4, %c0_5] : memref<128x1152xbf16, #tpu.memory_space<vmem>>, vector<128x1152xbf16>
    tpu.vector_store %arg6[%c0_4, %c0_5], %5 {strides = array<i32>} : memref<128x1152xbf16, #tpu.memory_space<vmem>>, vector<128x1152xbf16>,
    %7 = tpu.iota {dimensions = array<i32: 0>} : vector<128x128xi32>
    %8 = tpu.iota {dimensions = array<i32: 1>} : vector<128x128xi32>
    %9 = arith.cmpi sle, %8, %7 : vector<128x128xi32>
    %c0_6 = arith.constant 0 : index
    %c0_7 = arith.constant 0 : index
    %10 = vector.load %arg6[%c0_6, %c0_7] : memref<128x1152xbf16, #tpu.memory_space<vmem>>, vector<128x64xbf16>
    %c0_8 = arith.constant 0 : index
    %c384 = arith.constant 384 : index
    %11 = vector.load %arg6[%c0_8, %c384] : memref<128x1152xbf16, #tpu.memory_space<vmem>>, vector<128x64xbf16>
    %c0_9 = arith.constant 0 : index
    %c768 = arith.constant 768 : index
    %12 = vector.load %arg6[%c0_9, %c768] : memref<128x1152xbf16, #tpu.memory_space<vmem>>, vector<128x64xbf16>
    %cst_10 = arith.constant dense<0.000000e+00> : vector<128x128xf32>
    %13 = tpu.matmul %10, %11, %cst_10 {dimension_numbers = #tpu.dot_dimension_numbers<[1], [1], [0], [0], [0, 0, 1, 0], [], []>} : vector<128x64xbf16>, vector<128x64xbf16>, vector<128x128xf32> -> vector<128x128xf32>
    %cst_11 = arith.constant 0xFF800000 : f32
    %14 = vector.broadcast %cst_11 : f32 to vector<128x128xf32>
    %15 = arith.select %9, %13, %14 : vector<128x128xi1>, vector<128x128xf32>
    %cst_12 = arith.constant dense<0xFF800000> : vector<128xf32>
    %16 = vector.multi_reduction <maximumf>, %15, %cst_12 [1] : vector<128x128xf32> to vector<128xf32>
    %17 = vector.shape_cast %16 : vector<128xf32> to vector<128x1xf32>
    %18 = vector.broadcast %17 : vector<128x1xf32> to vector<128x128xf32>
    %19 = arith.subf %15, %18 : vector<128x128xf32>
    %20 = math.exp %19 : vector<128x128xf32>
    %cst_13 = arith.constant dense<0.000000e+00> : vector<128xf32>
    %21 = vector.multi_reduction <add>, %20, %cst_13 [1] : vector<128x128xf32> to vector<128xf32>
    %22 = vector.shape_cast %21 : vector<128xf32> to vector<128x1xf32>
    %23 = arith.truncf %20 : vector<128x128xf32> to vector<128x128xbf16>
    %cst_14 = arith.constant dense<0.000000e+00> : vector<128x64xf32>
    %24 = tpu.matmul %23, %12, %cst_14 {dimension_numbers = #tpu.dot_dimension_numbers<[1], [0], [0], [1], [0, 0, 1, 1], [], []>} : vector<128x128xbf16>, vector<128x64xbf16>, vector<128x64xf32> -> vector<128x64xf32>
    %25 = tpu.reciprocal %22 {approx = true} : vector<128x1xf32> -> vector<128x1xf32>
    %26 = vector.broadcast %25 : vector<128x1xf32> to vector<128x64xf32>
    %27 = arith.mulf %24, %26 : vector<128x64xf32>
    %28 = arith.truncf %27 : vector<128x64xf32> to vector<128x64xbf16>
    %c0_15 = arith.constant 0 : index
    %c0_16 = arith.constant 0 : index
    %29 = vector.load %arg7[%c0_15, %c0_16] : memref<128x384xbf16, #tpu.memory_space<vmem>>, vector<128x64xbf16>
    tpu.vector_store %arg7[%c0_15, %c0_16], %28 {strides = array<i32>} : memref<128x384xbf16, #tpu.memory_space<vmem>>, vector<128x64xbf16>,
    %c0_17 = arith.constant 0 : index
    %c64 = arith.constant 64 : index
    %30 = vector.load %arg6[%c0_17, %c64] : memref<128x1152xbf16, #tpu.memory_space<vmem>>, vector<128x64xbf16>
    %c0_18 = arith.constant 0 : index
    %c448 = arith.constant 448 : index
    %31 = vector.load %arg6[%c0_18, %c448] : memref<128x1152xbf16, #tpu.memory_space<vmem>>, vector<128x64xbf16>
    %c0_19 = arith.constant 0 : index
    %c832 = arith.constant 832 : index
    %32 = vector.load %arg6[%c0_19, %c832] : memref<128x1152xbf16, #tpu.memory_space<vmem>>, vector<128x64xbf16>
    %cst_20 = arith.constant dense<0.000000e+00> : vector<128x128xf32>
    %33 = tpu.matmul %30, %31, %cst_20 {dimension_numbers = #tpu.dot_dimension_numbers<[1], [1], [0], [0], [0, 0, 1, 0], [], []>} : vector<128x64xbf16>, vector<128x64xbf16>, vector<128x128xf32> -> vector<128x128xf32>
    %cst_21 = arith.constant 0xFF800000 : f32
    %34 = vector.broadcast %cst_21 : f32 to vector<128x128xf32>
    %35 = arith.select %9, %33, %34 : vector<128x128xi1>, vector<128x128xf32>
    %cst_22 = arith.constant dense<0xFF800000> : vector<128xf32>
    %36 = vector.multi_reduction <maximumf>, %35, %cst_22 [1] : vector<128x128xf32> to vector<128xf32>
    %37 = vector.shape_cast %36 : vector<128xf32> to vector<128x1xf32>
    %38 = vector.broadcast %37 : vector<128x1xf32> to vector<128x128xf32>
    %39 = arith.subf %35, %38 : vector<128x128xf32>
    %40 = math.exp %39 : vector<128x128xf32>
    %cst_23 = arith.constant dense<0.000000e+00> : vector<128xf32>
    %41 = vector.multi_reduction <add>, %40, %cst_23 [1] : vector<128x128xf32> to vector<128xf32>
    %42 = vector.shape_cast %41 : vector<128xf32> to vector<128x1xf32>
    %43 = arith.truncf %40 : vector<128x128xf32> to vector<128x128xbf16>
    %cst_24 = arith.constant dense<0.000000e+00> : vector<128x64xf32>
    %44 = tpu.matmul %43, %32, %cst_24 {dimension_numbers = #tpu.dot_dimension_numbers<[1], [0], [0], [1], [0, 0, 1, 1], [], []>} : vector<128x128xbf16>, vector<128x64xbf16>, vector<128x64xf32> -> vector<128x64xf32>
    %45 = tpu.reciprocal %42 {approx = true} : vector<128x1xf32> -> vector<128x1xf32>
    %46 = vector.broadcast %45 : vector<128x1xf32> to vector<128x64xf32>
    %47 = arith.mulf %44, %46 : vector<128x64xf32>
    %48 = arith.truncf %47 : vector<128x64xf32> to vector<128x64xbf16>
    %c0_25 = arith.constant 0 : index
    %c64_26 = arith.constant 64 : index
    %49 = vector.load %arg7[%c0_25, %c64_26] : memref<128x384xbf16, #tpu.memory_space<vmem>>, vector<128x64xbf16>
    tpu.vector_store %arg7[%c0_25, %c64_26], %48 {strides = array<i32>} : memref<128x384xbf16, #tpu.memory_space<vmem>>, vector<128x64xbf16>,
    %c0_27 = arith.constant 0 : index
    %c128 = arith.constant 128 : index
    %50 = vector.load %arg6[%c0_27, %c128] : memref<128x1152xbf16, #tpu.memory_space<vmem>>, vector<128x64xbf16>
    %c0_28 = arith.constant 0 : index
    %c512 = arith.constant 512 : index
    %51 = vector.load %arg6[%c0_28, %c512] : memref<128x1152xbf16, #tpu.memory_space<vmem>>, vector<128x64xbf16>
    %c0_29 = arith.constant 0 : index
    %c896 = arith.constant 896 : index
    %52 = vector.load %arg6[%c0_29, %c896] : memref<128x1152xbf16, #tpu.memory_space<vmem>>, vector<128x64xbf16>
    %cst_30 = arith.constant dense<0.000000e+00> : vector<128x128xf32>
    %53 = tpu.matmul %50, %51, %cst_30 {dimension_numbers = #tpu.dot_dimension_numbers<[1], [1], [0], [0], [0, 0, 1, 0], [], []>} : vector<128x64xbf16>, vector<128x64xbf16>, vector<128x128xf32> -> vector<128x128xf32>
    %cst_31 = arith.constant 0xFF800000 : f32
    %54 = vector.broadcast %cst_31 : f32 to vector<128x128xf32>
    %55 = arith.select %9, %53, %54 : vector<128x128xi1>, vector<128x128xf32>
    %cst_32 = arith.constant dense<0xFF800000> : vector<128xf32>
    %56 = vector.multi_reduction <maximumf>, %55, %cst_32 [1] : vector<128x128xf32> to vector<128xf32>
    %57 = vector.shape_cast %56 : vector<128xf32> to vector<128x1xf32>
    %58 = vector.broadcast %57 : vector<128x1xf32> to vector<128x128xf32>
    %59 = arith.subf %55, %58 : vector<128x128xf32>
    %60 = math.exp %59 : vector<128x128xf32>
    %cst_33 = arith.constant dense<0.000000e+00> : vector<128xf32>
    %61 = vector.multi_reduction <add>, %60, %cst_33 [1] : vector<128x128xf32> to vector<128xf32>
    %62 = vector.shape_cast %61 : vector<128xf32> to vector<128x1xf32>
    %63 = arith.truncf %60 : vector<128x128xf32> to vector<128x128xbf16>
    %cst_34 = arith.constant dense<0.000000e+00> : vector<128x64xf32>
    %64 = tpu.matmul %63, %52, %cst_34 {dimension_numbers = #tpu.dot_dimension_numbers<[1], [0], [0], [1], [0, 0, 1, 1], [], []>} : vector<128x128xbf16>, vector<128x64xbf16>, vector<128x64xf32> -> vector<128x64xf32>
    %65 = tpu.reciprocal %62 {approx = true} : vector<128x1xf32> -> vector<128x1xf32>
    %66 = vector.broadcast %65 : vector<128x1xf32> to vector<128x64xf32>
    %67 = arith.mulf %64, %66 : vector<128x64xf32>
    %68 = arith.truncf %67 : vector<128x64xf32> to vector<128x64xbf16>
    %c0_35 = arith.constant 0 : index
    %c128_36 = arith.constant 128 : index
    %69 = vector.load %arg7[%c0_35, %c128_36] : memref<128x384xbf16, #tpu.memory_space<vmem>>, vector<128x64xbf16>
    tpu.vector_store %arg7[%c0_35, %c128_36], %68 {strides = array<i32>} : memref<128x384xbf16, #tpu.memory_space<vmem>>, vector<128x64xbf16>,
    %c0_37 = arith.constant 0 : index
    %c192 = arith.constant 192 : index
    %70 = vector.load %arg6[%c0_37, %c192] : memref<128x1152xbf16, #tpu.memory_space<vmem>>, vector<128x64xbf16>
    %c0_38 = arith.constant 0 : index
    %c576 = arith.constant 576 : index
    %71 = vector.load %arg6[%c0_38, %c576] : memref<128x1152xbf16, #tpu.memory_space<vmem>>, vector<128x64xbf16>
    %c0_39 = arith.constant 0 : index
    %c960 = arith.constant 960 : index
    %72 = vector.load %arg6[%c0_39, %c960] : memref<128x1152xbf16, #tpu.memory_space<vmem>>, vector<128x64xbf16>
    %cst_40 = arith.constant dense<0.000000e+00> : vector<128x128xf32>
    %73 = tpu.matmul %70, %71, %cst_40 {dimension_numbers = #tpu.dot_dimension_numbers<[1], [1], [0], [0], [0, 0, 1, 0], [], []>} : vector<128x64xbf16>, vector<128x64xbf16>, vector<128x128xf32> -> vector<128x128xf32>
    %cst_41 = arith.constant 0xFF800000 : f32
    %74 = vector.broadcast %cst_41 : f32 to vector<128x128xf32>
    %75 = arith.select %9, %73, %74 : vector<128x128xi1>, vector<128x128xf32>
    %cst_42 = arith.constant dense<0xFF800000> : vector<128xf32>
    %76 = vector.multi_reduction <maximumf>, %75, %cst_42 [1] : vector<128x128xf32> to vector<128xf32>
    %77 = vector.shape_cast %76 : vector<128xf32> to vector<128x1xf32>
    %78 = vector.broadcast %77 : vector<128x1xf32> to vector<128x128xf32>
    %79 = arith.subf %75, %78 : vector<128x128xf32>
    %80 = math.exp %79 : vector<128x128xf32>
    %cst_43 = arith.constant dense<0.000000e+00> : vector<128xf32>
    %81 = vector.multi_reduction <add>, %80, %cst_43 [1] : vector<128x128xf32> to vector<128xf32>
    %82 = vector.shape_cast %81 : vector<128xf32> to vector<128x1xf32>
    %83 = arith.truncf %80 : vector<128x128xf32> to vector<128x128xbf16>
    %cst_44 = arith.constant dense<0.000000e+00> : vector<128x64xf32>
    %84 = tpu.matmul %83, %72, %cst_44 {dimension_numbers = #tpu.dot_dimension_numbers<[1], [0], [0], [1], [0, 0, 1, 1], [], []>} : vector<128x128xbf16>, vector<128x64xbf16>, vector<128x64xf32> -> vector<128x64xf32>
    %85 = tpu.reciprocal %82 {approx = true} : vector<128x1xf32> -> vector<128x1xf32>
    %86 = vector.broadcast %85 : vector<128x1xf32> to vector<128x64xf32>
    %87 = arith.mulf %84, %86 : vector<128x64xf32>
    %88 = arith.truncf %87 : vector<128x64xf32> to vector<128x64xbf16>
    %c0_45 = arith.constant 0 : index
    %c192_46 = arith.constant 192 : index
    %89 = vector.load %arg7[%c0_45, %c192_46] : memref<128x384xbf16, #tpu.memory_space<vmem>>, vector<128x64xbf16>
    tpu.vector_store %arg7[%c0_45, %c192_46], %88 {strides = array<i32>} : memref<128x384xbf16, #tpu.memory_space<vmem>>, vector<128x64xbf16>,
    %c0_47 = arith.constant 0 : index
    %c256 = arith.constant 256 : index
    %90 = vector.load %arg6[%c0_47, %c256] : memref<128x1152xbf16, #tpu.memory_space<vmem>>, vector<128x64xbf16>
    %c0_48 = arith.constant 0 : index
    %c640 = arith.constant 640 : index
    %91 = vector.load %arg6[%c0_48, %c640] : memref<128x1152xbf16, #tpu.memory_space<vmem>>, vector<128x64xbf16>
    %c0_49 = arith.constant 0 : index
    %c1024 = arith.constant 1024 : index
    %92 = vector.load %arg6[%c0_49, %c1024] : memref<128x1152xbf16, #tpu.memory_space<vmem>>, vector<128x64xbf16>
    %cst_50 = arith.constant dense<0.000000e+00> : vector<128x128xf32>
    %93 = tpu.matmul %90, %91, %cst_50 {dimension_numbers = #tpu.dot_dimension_numbers<[1], [1], [0], [0], [0, 0, 1, 0], [], []>} : vector<128x64xbf16>, vector<128x64xbf16>, vector<128x128xf32> -> vector<128x128xf32>
    %cst_51 = arith.constant 0xFF800000 : f32
    %94 = vector.broadcast %cst_51 : f32 to vector<128x128xf32>
    %95 = arith.select %9, %93, %94 : vector<128x128xi1>, vector<128x128xf32>
    %cst_52 = arith.constant dense<0xFF800000> : vector<128xf32>
    %96 = vector.multi_reduction <maximumf>, %95, %cst_52 [1] : vector<128x128xf32> to vector<128xf32>
    %97 = vector.shape_cast %96 : vector<128xf32> to vector<128x1xf32>
    %98 = vector.broadcast %97 : vector<128x1xf32> to vector<128x128xf32>
    %99 = arith.subf %95, %98 : vector<128x128xf32>
    %100 = math.exp %99 : vector<128x128xf32>
    %cst_53 = arith.constant dense<0.000000e+00> : vector<128xf32>
    %101 = vector.multi_reduction <add>, %100, %cst_53 [1] : vector<128x128xf32> to vector<128xf32>
    %102 = vector.shape_cast %101 : vector<128xf32> to vector<128x1xf32>
    %103 = arith.truncf %100 : vector<128x128xf32> to vector<128x128xbf16>
    %cst_54 = arith.constant dense<0.000000e+00> : vector<128x64xf32>
    %104 = tpu.matmul %103, %92, %cst_54 {dimension_numbers = #tpu.dot_dimension_numbers<[1], [0], [0], [1], [0, 0, 1, 1], [], []>} : vector<128x128xbf16>, vector<128x64xbf16>, vector<128x64xf32> -> vector<128x64xf32>
    %105 = tpu.reciprocal %102 {approx = true} : vector<128x1xf32> -> vector<128x1xf32>
    %106 = vector.broadcast %105 : vector<128x1xf32> to vector<128x64xf32>
    %107 = arith.mulf %104, %106 : vector<128x64xf32>
    %108 = arith.truncf %107 : vector<128x64xf32> to vector<128x64xbf16>
    %c0_55 = arith.constant 0 : index
    %c256_56 = arith.constant 256 : index
    %109 = vector.load %arg7[%c0_55, %c256_56] : memref<128x384xbf16, #tpu.memory_space<vmem>>, vector<128x64xbf16>
    tpu.vector_store %arg7[%c0_55, %c256_56], %108 {strides = array<i32>} : memref<128x384xbf16, #tpu.memory_space<vmem>>, vector<128x64xbf16>,
    %c0_57 = arith.constant 0 : index
    %c320 = arith.constant 320 : index
    %110 = vector.load %arg6[%c0_57, %c320] : memref<128x1152xbf16, #tpu.memory_space<vmem>>, vector<128x64xbf16>
    %c0_58 = arith.constant 0 : index
    %c704 = arith.constant 704 : index
    %111 = vector.load %arg6[%c0_58, %c704] : memref<128x1152xbf16, #tpu.memory_space<vmem>>, vector<128x64xbf16>
    %c0_59 = arith.constant 0 : index
    %c1088 = arith.constant 1088 : index
    %112 = vector.load %arg6[%c0_59, %c1088] : memref<128x1152xbf16, #tpu.memory_space<vmem>>, vector<128x64xbf16>
    %cst_60 = arith.constant dense<0.000000e+00> : vector<128x128xf32>
    %113 = tpu.matmul %110, %111, %cst_60 {dimension_numbers = #tpu.dot_dimension_numbers<[1], [1], [0], [0], [0, 0, 1, 0], [], []>} : vector<128x64xbf16>, vector<128x64xbf16>, vector<128x128xf32> -> vector<128x128xf32>
    %cst_61 = arith.constant 0xFF800000 : f32
    %114 = vector.broadcast %cst_61 : f32 to vector<128x128xf32>
    %115 = arith.select %9, %113, %114 : vector<128x128xi1>, vector<128x128xf32>
    %cst_62 = arith.constant dense<0xFF800000> : vector<128xf32>
    %116 = vector.multi_reduction <maximumf>, %115, %cst_62 [1] : vector<128x128xf32> to vector<128xf32>
    %117 = vector.shape_cast %116 : vector<128xf32> to vector<128x1xf32>
    %118 = vector.broadcast %117 : vector<128x1xf32> to vector<128x128xf32>
    %119 = arith.subf %115, %118 : vector<128x128xf32>
    %120 = math.exp %119 : vector<128x128xf32>
    %cst_63 = arith.constant dense<0.000000e+00> : vector<128xf32>
    %121 = vector.multi_reduction <add>, %120, %cst_63 [1] : vector<128x128xf32> to vector<128xf32>
    %122 = vector.shape_cast %121 : vector<128xf32> to vector<128x1xf32>
    %123 = arith.truncf %120 : vector<128x128xf32> to vector<128x128xbf16>
    %cst_64 = arith.constant dense<0.000000e+00> : vector<128x64xf32>
    %124 = tpu.matmul %123, %112, %cst_64 {dimension_numbers = #tpu.dot_dimension_numbers<[1], [0], [0], [1], [0, 0, 1, 1], [], []>} : vector<128x128xbf16>, vector<128x64xbf16>, vector<128x64xf32> -> vector<128x64xf32>
    %125 = tpu.reciprocal %122 {approx = true} : vector<128x1xf32> -> vector<128x1xf32>
    %126 = vector.broadcast %125 : vector<128x1xf32> to vector<128x64xf32>
    %127 = arith.mulf %124, %126 : vector<128x64xf32>
    %128 = arith.truncf %127 : vector<128x64xf32> to vector<128x64xbf16>
    %c0_65 = arith.constant 0 : index
    %c320_66 = arith.constant 320 : index
    %129 = vector.load %arg7[%c0_65, %c320_66] : memref<128x384xbf16, #tpu.memory_space<vmem>>, vector<128x64xbf16>
    tpu.vector_store %arg7[%c0_65, %c320_66], %128 {strides = array<i32>} : memref<128x384xbf16, #tpu.memory_space<vmem>>, vector<128x64xbf16>,
    %c0_67 = arith.constant 0 : index
    %c0_68 = arith.constant 0 : index
    %130 = vector.load %arg7[%c0_67, %c0_68] : memref<128x384xbf16, #tpu.memory_space<vmem>>, vector<128x384xbf16>
    %c0_69 = arith.constant 0 : index
    %c0_70 = arith.constant 0 : index
    %131 = vector.load %arg3[%c0_69, %c0_70] : memref<384x384xbf16, #tpu.memory_space<vmem>>, vector<384x384xbf16>
    %cst_71 = arith.constant dense<0.000000e+00> : vector<128x384xf32>
    %132 = tpu.matmul %130, %131, %cst_71 {dimension_numbers = #tpu.dot_dimension_numbers<[1], [0], [0], [1], [0, 0, 1, 1], [], []>} : vector<128x384xbf16>, vector<384x384xbf16>, vector<128x384xf32> -> vector<128x384xf32>
    %c0_72 = arith.constant 0 : index
    %c0_73 = arith.constant 0 : index
    %133 = vector.load %arg4[%c0_72, %c0_73] : memref<1x384xf32, #tpu.memory_space<vmem>>, vector<1x384xf32>
    %134 = vector.broadcast %133 : vector<1x384xf32> to vector<128x384xf32>
    %135 = arith.addf %132, %134 : vector<128x384xf32>
    %136 = arith.truncf %135 : vector<128x384xf32> to vector<128x384xbf16>
    %c0_74 = arith.constant 0 : index
    %c0_75 = arith.constant 0 : index
    %c0_76 = arith.constant 0 : index
    %137 = vector.load %arg5[%c0_74, %c0_75, %c0_76] : memref<1x128x384xbf16, #tpu.memory_space<vmem>>, vector<1x128x384xbf16>
    %138 = vector.shape_cast %137 : vector<1x128x384xbf16> to vector<128x384xbf16>
    %139 = vector.shape_cast %136 : vector<128x384xbf16> to vector<1x128x384xbf16>
    tpu.vector_store %arg5[%c0_74, %c0_75, %c0_76], %139 {strides = array<i32>} : memref<1x128x384xbf16, #tpu.memory_space<vmem>>, vector<1x128x384xbf16>,
    return
  }
  func.func @transform_0(%arg0: i32) -> (i32, i32, i32) {
    %c0_i32 = arith.constant 0 : i32
    %c0_i32_0 = arith.constant 0 : i32
    %c0_i32_1 = arith.constant 0 : i32
    return %arg0, %c0_i32, %c0_i32_0 : i32, i32, i32
  }
  func.func @transform_1(%arg0: i32) -> (i32, i32) {
    %c0_i32 = arith.constant 0 : i32
    %c0_i32_0 = arith.constant 0 : i32
    %c0_i32_1 = arith.constant 0 : i32
    return %c0_i32, %c0_i32_0 : i32, i32
  }
  func.func @transform_2(%arg0: i32) -> (i32, i32) {
    %c0_i32 = arith.constant 0 : i32
    %c0_i32_0 = arith.constant 0 : i32
    %c0_i32_1 = arith.constant 0 : i32
    return %c0_i32, %c0_i32_0 : i32, i32
  }
  func.func @transform_3(%arg0: i32) -> (i32, i32) {
    %c0_i32 = arith.constant 0 : i32
    %c0_i32_0 = arith.constant 0 : i32
    %c0_i32_1 = arith.constant 0 : i32
    return %c0_i32, %c0_i32_0 : i32, i32
  }
  func.func @transform_4(%arg0: i32) -> (i32, i32, i32) {
    %c0_i32 = arith.constant 0 : i32
    %c0_i32_0 = arith.constant 0 : i32
    %c0_i32_1 = arith.constant 0 : i32
    return %arg0, %c0_i32, %c0_i32_0 : i32, i32, i32
  }
}

</mosaic_0001>

<bundles_post_ra>
// kernel: multi_head_attention.1
= control target key start
LH: loop header
LB: loop body
LE: loop exit
PB: predicated region body
PF: predicated region fallthrough
CT: control target
= control target key end

     0   :  { %9 = vsyncpa [#allocation5], 0  ;;  %s14855_s0 = inlined_call_operand.hbm [shape: f32[2,128,384], index: 0, kind: input, shape index: {}]   ;;  %s14856_s1 = inlined_call_operand.hbm [shape: bf16[384,1152], index: 1, kind: input, shape index: {}]   ;;  %s14857_s2 = inlined_call_operand.hbm [shape: bf16[384,384], index: 2, kind: input, shape index: {}]   ;;  %s14858_s3 = inlined_call_operand.vmem [shape: f32[1,384], index: 3, kind: input, shape index: {}]   ;;  %s14859_s4 = inlined_call_operand.hbm [shape: bf16[2,128,384], index: 4, kind: output, shape index: {}]  }
   0x1   :  { %11 = vsyncpa [#allocation5 + $0x1], 0 }
   0x2   :  { %12 = vsyncpa [#allocation8], 0 }
   0x3   :  { %13 = vsyncpa [#allocation6], 0 }
   0x4   :  { %15 = vsyncpa [#allocation6 + $0x1], 0  ;;  %s11956_s15 = smov 0   ;;  %s11958_s16 = smov 0  }
   0x5   :  { %s11960_s17 = smov 0   ;;  %s11962_s18 = smov 0  }
   0x6 LB: > { %s11977_s19 = sadd.s32 4294967295, %s11915_s18   ;;  %s8937_s20 = sadd.s32 4294967294, %s11915_s18   ;;  %s11915_s18 = sphi %s11962_s18, %s15325_s18   ;;  %s11911_s17 = sphi %s11960_s17, %s15324_s17   ;;  %s11907_s16 = sphi %s11958_s16, %s15323_s16   ;;  %s11903_s15 = sphi %s11956_s15, %s15322_s15  }
   0x7   : > { %p41_p0 = scmp.ne.s32.totalorder %s11907_s16, %s11903_s15  ;;  %p14860_p1 = scmp.eq.s32.totalorder %s11977_s19, 0 }
   0x8   : > { %p134_p3 = scmp.eq.s32.totalorder %s8937_s20, 1  ;;  %p8938_p5 = scmp.ge.s32.totalorder %s11915_s18, 1 }
   0x9   : > { %p11986_p4 = por %p14860_p1, %p41_p0  ;;  %p141_p7 = scmp.lt.s32.totalorder %s11915_s18, 3 }
   0xa   : > { %p11991_p6 = por %p134_p3, %p41_p0  ;;  %s11917_s24 = smov [#allocation7]  }
   0xb   : > { %s14932_s21 = scalar_select %p11986_p4, 1, 0 }
   0xc   : > { %s14933_s22 = scalar_select %p11991_p6, 1, 0 }
   0xd   : > { %p11996_p8 = pnand %p8938_p5, %p141_p7  ;;  %s153_s25 = sshll.u32 %s11917_s24, 4  ;;  %s154_s25 = int_to_ptr.vmem [resolvable:$true] %s153_s25 }
   0xe   : > { %s11918_s27 = smov [#allocation9]   ;;  %s11778_s29 = scalar_lea.vmem %s154_s25, 27648 }
   0xf   : > { %s14934_s23 = scalar_select %p11996_p8, 1, 0 }
  0x10   : > { %p10734_p9 = pneg %p11996_p8  ;;  %s166_s28 = sshll.u32 %s11918_s27, 4  ;;  %s167_s28 = int_to_ptr.vmem [resolvable:$true] %s166_s28 }
  0x11   : > { %p11779_p13 = scmp.ne.s32.totalorder %s154_s25, %s11778_s29  ;;  %p11786_p5 = scmp.lt.s32.totalorder %s154_s25, %s154_s25 }
  0x12   : > { %p12005_p11 = pnand %p10734_p9, %p14860_p1  ;;  %p11787_p7 = scmp.lt.s32.totalorder %s11778_s29, %s11778_s29 }
  0x14   : > { %p11769_p12 = pneg %p12005_p11  ;;  %p11788_p10 = por %p11787_p7, %p11786_p5 }
  0x16   : > { %p11781_p0 = pnand %p11779_p13, %p11769_p12 }
  0x18   : > { %p11782_p3 = pneg %p11781_p0 }
  0x1a   : > { %p11789_p9 = pnand %p11788_p10, %p11782_p3 }
  0x1c   : > { %11792 = shalt.err (!%p11789_p9)
}
  0x1d   : > { %s11919_s30 = smov 576   ;;  %s11920_s5 = smov 36  }
  0x1e   : > { %10737 = dma.hbm_to_vmem [thread:$0]  (!%p12005_p11), %s14856_s1, 27648, %s154_s25, [#allocation8], %s11919_s30, %s11919_s30, %s11920_s5  }
  0x1f   : > { %s11804_s8 = scalar_lea.vmem %s167_s28, 9216  ;;  %p11812_p2 = scmp.lt.s32.totalorder %s167_s28, %s167_s28 }
  0x20   : > { %p11805_p1 = scmp.ne.s32.totalorder %s167_s28, %s11804_s8  ;;  %p11813_p6 = scmp.lt.s32.totalorder %s11804_s8, %s11804_s8 }
  0x22   : > { %p11807_p13 = pnand %p11805_p1, %p11769_p12  ;;  %p11814_p5 = por %p11813_p6, %p11812_p2 }
  0x24   : > { %p11808_p0 = pneg %p11807_p13 }
  0x26   : > { %p11815_p10 = pnand %p11814_p5, %p11808_p0 }
  0x28   : > { %11818 = shalt.err (!%p11815_p10)
}
  0x29   : > { %s11921_s9 = smov 192   ;;  %s11922_s10 = smov 12  }
  0x2a   : > { %10740 = dma.hbm_to_vmem [thread:$0]  (!%p12005_p11), %s14857_s2, 9216, %s167_s28, [#allocation8], %s11921_s9, %s11921_s9, %s11922_s10  }
  0x2b   : > { %s12028_s13 = sadd.s32 1, %s11915_s18   ;;  %s28_s20 = sadd.s32 1, %s11911_s17 }
  0x2c   : > { %s25_s14 = ssub.s32 %s11915_s18, %s12028_s13  ;;  %p35_p2 = scmp.ne.s32.totalorder %s11911_s17, %s11907_s16 }
  0x2d   : > { %p26_p1 = scmp.eq.s32.totalorder %s25_s14, 0  ;;  %p36_p6 = scmp.eq.s32.totalorder %s11915_s18, 0 }
  0x2e   : > { %p14936_p3 = scmp.eq.s32.totalorder %s11977_s19, 1  ;;  %p10751_p9 = scmp.lt.s32.totalorder %s11915_s18, 2 }
  0x2f   : > { %s12037_s24 = scalar_select %p26_p1, %s11911_s17, %s28_s20  }
  0x30   : > { %p37_p12 = por %p36_p6, %p35_p2  ;;  %p12041_p7 = por %p14936_p3, %p35_p2 }
  0x31   : > { %s183_s26 = sand.u32 1, %s11911_s17   ;;  %s10718_s28 = smul.u32 6144, %s11915_s18 }
  0x32   : > { %s14937_s25 = scalar_select %p12041_p7, 1, 0 }
  0x33   : > { %s10717_s27 = smul.u32 384, %s183_s26  ;;  %p12048_p11 = pnand %p10751_p9, %p37_p12 }
  0x34   : > { %s12055_s6 = scalar_lea.hbm %s14855_s0, %s10718_s28  ;;  %s12059_s9 = scalar_lea.sflag [#allocation5], %s183_s26 }
  0x35   : > { %s187_s7 = scalar_lea.vmem [#allocation4], %s10717_s27  ;;  %s11819_s10 = scalar_lea.hbm %s12055_s6, 6144 }
  0x36   : > { %s194_s8 = sshll.u32 %s187_s7, 4  ;;  %p11820_p13 = scmp.ne.s32.totalorder %s12055_s6, %s11819_s10  ;;  %s12057_s8 = int_to_ptr.vmem [resolvable:$true] %s194_s8 }
  0x37   : > { %p11821_p0 = pneg %p12048_p11  ;;  %s11824_s14 = scalar_lea.hbm %s14855_s0, 12288 }
  0x38   : > { %p11825_p1 = scmp.lt.s32.totalorder %s12055_s6, %s14855_s0  ;;  %p11826_p2 = scmp.lt.s32.totalorder %s11824_s14, %s11819_s10 }
  0x39   : > { %p11822_p5 = pnand %p11821_p0, %p11820_p13 }
  0x3a   : > { %p11827_p6 = por %p11826_p2, %p11825_p1 }
  0x3b   : > { %p11823_p10 = pneg %p11822_p5 }
  0x3d   : > { %p11828_p12 = pnand %p11827_p6, %p11823_p10 }
  0x3f   : > { %11831 = shalt.err (!%p11828_p12)
}
  0x40   : > { %s11832_s26 = scalar_lea.vmem %s12057_s8, 6144  ;;  %s11923_s27 = smov [#allocation4]  }
  0x41   : > { %p11833_p3 = scmp.ne.s32.totalorder %s12057_s8, %s11832_s26  ;;  %s11837_s30 = sshll.u32 %s11923_s27, 4  ;;  %s11838_s30 = int_to_ptr.vmem [resolvable:$false] %s11837_s30 }
  0x42   : > { %s11839_s5 = scalar_lea.vmem %s11838_s30, 12288  ;;  %p11840_p5 = scmp.lt.s32.totalorder %s12057_s8, %s11838_s30 }
  0x43   : > { %p11835_p9 = pnand %p11833_p3, %p11821_p0  ;;  %p11841_p7 = scmp.lt.s32.totalorder %s11839_s5, %s11832_s26 }
  0x45   : > { %p11836_p13 = pneg %p11835_p9  ;;  %p11842_p4 = por %p11841_p7, %p11840_p5 }
  0x47   : > { %p11843_p8 = pnand %p11842_p4, %p11836_p13 }
  0x49   : > { %11846 = shalt.err (!%p11843_p8)
}
  0x4a   : > { %s11924_s7 = smov 384   ;;  %s11925_s10 = smov 24  }
  0x4b   : > { %10744 = dma.hbm_to_vmem [thread:$0]  (!%p12048_p11), %s12055_s6, 6144, %s12057_s8, %s12059_s9, %s11924_s7, %s11924_s7, %s11925_s10  }
  0x4c   : > { %p14939_p0 = scmp.ne.s32.totalorder %s14934_s23, 0 }
  0x4e   : > { %206 = sbr.rel (%p14939_p0) target bundleno = 4011 (0xfab), region = 36 }
  0x53   : > { %s12083_s11 = sand.u32 1, %s11907_s16   ;;  %p14940_p4 = scmp.ne.s32.totalorder %s14932_s21, 0 }
  0x54   : > { %s10719_s12 = smul.u32 384, %s12083_s11  ;;  %s209_s14 = scalar_lea.sflag [#allocation5], %s12083_s11 }
  0x56   : > { %s12087_s20 = scalar_lea.vmem [#allocation4], %s10719_s12 }
  0x57   : > { %11890 = dma.done.wait (%p14940_p4), %s209_s14, 6144  }
  0x58   : > { %11892 = vsyncadd (%p14940_p4), %s209_s14, 4294961152  ;;  %p14941_p8 = scmp.eq.s32.totalorder %s11977_s19, 0 }
  0x5a   : > { %11894 = dma.done.wait (%p14941_p8), [#allocation8], 36864   ;;  %p14942_p7 = pmov %p14941_p8 }
  0x5b   : > { %v14875_v0 = vmov 0   ;;  %v10799_v1 = vld [vmem:[#allocation7 + $0x1fc] ss:$36 sps:$4 sm:$0xff]   ;;  %v10805_v5 = vld [vmem:[#allocation7 + $0x1b4] ss:$36 sps:$4 sm:$0xff]   ;;  %v251_v35 = vld [vmem:[%s12087_s20 + $0x28] sm:$0xff] }
  0x5c   : > { %11896 = vsyncadd (%p14942_p7), [#allocation8], 4294930432  ;;  %1807 = vmatprep.mubr.bf16.mxu1 %v14875_v0  ;;  %v10801_v2 = vld [vmem:[#allocation7 + $0x67c] ss:$36 sps:$4 sm:$0xff]   ;;  %1662 = vmatprep.subr.bf16.mxu0 %v10799_v1  ;;  %v10807_v6 = vld [vmem:[#allocation7 + $0x634] ss:$36 sps:$4 sm:$0xff]  }
  0x5d   : > { %v10803_v3 = vld [vmem:[#allocation7 + $0x1f8] ss:$36 sps:$4 sm:$0xff]   ;;  %1775 = vmatprep.subr.bf16.mxu1 %v10801_v2  ;;  %v10809_v7 = vld [vmem:[#allocation7 + $0x1b0] ss:$36 sps:$4 sm:$0xff]   ;;  %v10815_v11 = vld [vmem:[#allocation7 + $0x168] ss:$36 sps:$4 sm:$0xff]  }
  0x5e   : > { %v10804_v4 = vld [vmem:[#allocation7 + $0x678] ss:$36 sps:$4 sm:$0xff]   ;;  %1663 = vmatpush1.bf16.msra.mxu0 %v10803_v3  ;;  %v10810_v8 = vld [vmem:[#allocation7 + $0x630] ss:$36 sps:$4 sm:$0xff]   ;;  %v10816_v12 = vld [vmem:[#allocation7 + $0x5e8] ss:$36 sps:$4 sm:$0xff]  }
  0x5f   : > { %1776 = vmatpush1.bf16.msra.mxu1 %v10804_v4  ;;  %1664 = vmatprep.subr.bf16.mxu0 %v10805_v5  ;;  %v10811_v9 = vld [vmem:[#allocation7 + $0x16c] ss:$36 sps:$4 sm:$0xff]   ;;  %v10817_v13 = vld [vmem:[#allocation7 + $0x124] ss:$36 sps:$4 sm:$0xff]   ;;  %v10823_v17 = vld [vmem:[#allocation7 + $0xdc] ss:$36 sps:$4 sm:$0xff]  }
  0x60   : > { %1777 = vmatprep.subr.bf16.mxu1 %v10807_v6  ;;  %v10813_v10 = vld [vmem:[#allocation7 + $0x5ec] ss:$36 sps:$4 sm:$0xff]   ;;  %v10819_v14 = vld [vmem:[#allocation7 + $0x5a4] ss:$36 sps:$4 sm:$0xff]   ;;  %v10825_v18 = vld [vmem:[#allocation7 + $0x55c] ss:$36 sps:$4 sm:$0xff]  }
  0x61   : > { %v10821_v15 = vld [vmem:[#allocation7 + $0x120] ss:$36 sps:$4 sm:$0xff]   ;;  %v10827_v19 = vld [vmem:[#allocation7 + $0xd8] ss:$36 sps:$4 sm:$0xff]   ;;  %v10833_v23 = vld [vmem:[#allocation7 + $0x90] ss:$36 sps:$4 sm:$0xff]  }
  0x62   : > { %1665 = vmatpush1.bf16.msra.mxu0 %v10809_v7  ;;  %v10822_v16 = vld [vmem:[#allocation7 + $0x5a0] ss:$36 sps:$4 sm:$0xff]   ;;  %v10828_v20 = vld [vmem:[#allocation7 + $0x558] ss:$36 sps:$4 sm:$0xff]   ;;  %v10834_v24 = vld [vmem:[#allocation7 + $0x510] ss:$36 sps:$4 sm:$0xff]  }
  0x63   : > { %1778 = vmatpush1.bf16.msra.mxu1 %v10810_v8  ;;  %1666 = vmatprep.subr.bf16.mxu0 %v10811_v9  ;;  %v10829_v21 = vld [vmem:[#allocation7 + $0x94] ss:$36 sps:$4 sm:$0xff]   ;;  %v10835_v25 = vld [vmem:[#allocation7 + $0x4c] ss:$36 sps:$4 sm:$0xff]   ;;  %v10841_v29 = vld [vmem:[#allocation7 + $0x4] ss:$36 sps:$4 sm:$0xff]  }
  0x64   : > { %1779 = vmatprep.subr.bf16.mxu1 %v10813_v10  ;;  %v10831_v22 = vld [vmem:[#allocation7 + $0x514] ss:$36 sps:$4 sm:$0xff]   ;;  %v10837_v26 = vld [vmem:[#allocation7 + $0x4cc] ss:$36 sps:$4 sm:$0xff]   ;;  %v10843_v30 = vld [vmem:[#allocation7 + $0x484] ss:$36 sps:$4 sm:$0xff]  }
  0x65   : > { %v10839_v27 = vld [vmem:[#allocation7 + $0x48] ss:$36 sps:$4 sm:$0xff]   ;;  %v10845_v31 = vld [vmem:[#allocation7] ss:$36 sps:$4 sm:$0xff]   ;;  %v248_v34 = vld [vmem:[%s12087_s20 + $0x10] sm:$0xff]  ;;  %vm14864_vm0 = vcmask 523264  }
  0x66   : > { %1667 = vmatpush1.bf16.msra.mxu0 %v10815_v11  ;;  %v10840_v28 = vld [vmem:[#allocation7 + $0x4c8] ss:$36 sps:$4 sm:$0xff]   ;;  %v10846_v32 = vld [vmem:[#allocation7 + $0x480] ss:$36 sps:$4 sm:$0xff]   ;;  %v12100_v37 = vpack.c.bf16 %v251_v35, %v248_v34  ;;  %v10852_v39 = vld [vmem:[#allocation7 + $0x438] ss:$36 sps:$4 sm:$0xff]  }
  0x67   : > { %1780 = vmatpush1.bf16.msra.mxu1 %v10816_v12  ;;  %1668 = vmatprep.subr.bf16.mxu0 %v10817_v13  ;;  %v10847_v33 = vld [vmem:[#allocation7 + $0x43c] ss:$36 sps:$4 sm:$0xff]   ;;  %v10851_v36 = vld [vmem:[#allocation7 + $0x204] ss:$36 sps:$4 sm:$0xff]   ;;  %v10853_v40 = vld [vmem:[#allocation7 + $0x3f4] ss:$36 sps:$4 sm:$0xff]  }
  0x68   : > { %1781 = vmatprep.subr.bf16.mxu1 %v10819_v14  ;;  %v10849_v38 = vld [vmem:[#allocation7 + $0x200] ss:$36 sps:$4 sm:$0xff]   ;;  %v10855_v42 = vld [vmem:[#allocation7 + $0x1b8] ss:$36 sps:$4 sm:$0xff]   ;;  %v10858_v43 = vld [vmem:[#allocation7 + $0x3f0] ss:$36 sps:$4 sm:$0xff]  }
  0x69   : > { %v10857_v41 = vld [vmem:[#allocation7 + $0x1bc] ss:$36 sps:$4 sm:$0xff]   ;;  %v10859_v44 = vld [vmem:[#allocation7 + $0x3ac] ss:$36 sps:$4 sm:$0xff]   ;;  %v10863_v47 = vld [vmem:[#allocation7 + $0x174] ss:$36 sps:$4 sm:$0xff]  }
  0x6a   : > { %1669 = vmatpush1.bf16.msra.mxu0 %v10821_v15  ;;  %v254_v45 = vld [vmem:[%s12087_s20 + $0x40] sm:$0xff]  ;;  %v257_v46 = vld [vmem:[%s12087_s20 + $0x58] sm:$0xff]  ;;  %v10861_v49 = vld [vmem:[#allocation7 + $0x170] ss:$36 sps:$4 sm:$0xff]   ;;  %s11927_s21 = smov 64   ;;  %s10720_s6 = smul.u32 192, %s12083_s11 }
  0x6b   : > { %1782 = vmatpush1.bf16.msra.mxu1 %v10822_v16  ;;  %1670 = vmatprep.subr.bf16.mxu0 %v10823_v17  ;;  %v12106_v48 = vpack.c.bf16 %v257_v46, %v254_v45  ;;  %v10864_v50 = vld [vmem:[#allocation7 + $0x3a8] ss:$36 sps:$4 sm:$0xff]   ;;  %v10870_v54 = vld [vmem:[#allocation7 + $0x360] ss:$36 sps:$4 sm:$0xff]   ;;  %v260_v56 = vld [vmem:[%s12087_s20 + $0x70] sm:$0xff]  ;;  %s10721_s9 = smul.u32 3072, %s11977_s19 }
  0x6c   : > { %1783 = vmatprep.subr.bf16.mxu1 %v10825_v18  ;;  %v10865_v51 = vld [vmem:[#allocation7 + $0x364] ss:$36 sps:$4 sm:$0xff]   ;;  %v10869_v52 = vld [vmem:[#allocation7 + $0x12c] ss:$36 sps:$4 sm:$0xff]   ;;  %v10871_v55 = vld [vmem:[#allocation7 + $0x31c] ss:$36 sps:$4 sm:$0xff]  }
  0x6d   : > { %v10867_v53 = vld [vmem:[#allocation7 + $0x128] ss:$36 sps:$4 sm:$0xff]   ;;  %v250_v60 = vld [vmem:[%s12087_s20 + $0x20] sm:$0xff]  ;;  %v10876_v1 = vld [vmem:[#allocation7 + $0x318] ss:$36 sps:$4 sm:$0xff]   ;;  %s14610_s8 = scalar_lea.vmem [#allocation10], %s10720_s6  ;;  %s14808_s30 = scalar_lea.hbm %s14859_s4, %s10721_s9 }
  0x6e   : > { %1671 = vmatpush1.bf16.msra.mxu0 %v10827_v19  ;;  %v263_v57 = vld [vmem:[%s12087_s20 + $0x88] sm:$0xff]  ;;  %v10873_v63 = vld [vmem:[#allocation7 + $0xe0] ss:$36 sps:$4 sm:$0xff]   ;;  %v10877_v2 = vld [vmem:[#allocation7 + $0x2d4] ss:$36 sps:$4 sm:$0xff]   ;;  %s8845_s28 = sshll.u32 %s14610_s8, 4  ;;  %s14811_s28 = int_to_ptr.vmem [resolvable:$true] %s8845_s28 }
  0x6f   : > { %1784 = vmatpush1.bf16.msra.mxu1 %v10828_v20  ;;  %1672 = vmatprep.subr.bf16.mxu0 %v10829_v21  ;;  %v10875_v58 = vld [vmem:[#allocation7 + $0xe4] ss:$36 sps:$4 sm:$0xff]   ;;  %v12116_v62 = vpack.c.bf16 %v263_v57, %v260_v56  ;;  %v10881_v3 = vld [vmem:[#allocation7 + $0x9c] ss:$36 sps:$4 sm:$0xff]   ;;  %v10882_v5 = vld [vmem:[#allocation7 + $0x2d0] ss:$36 sps:$4 sm:$0xff]  }
  0x70   : > { %1785 = vmatprep.subr.bf16.mxu1 %v10831_v22  ;;  %v247_v59 = vld [vmem:[%s12087_s20 + $0x8] sm:$0xff]  ;;  %v10879_v4 = vld [vmem:[#allocation7 + $0x98] ss:$36 sps:$4 sm:$0xff]   ;;  %v266_v7 = vld [vmem:[%s12087_s20 + $0xa0] sm:$0xff]  ;;  %s8832_s19 = scalar_lea.sflag [#allocation6], %s12083_s11  ;;  %s11847_s5 = scalar_lea.vmem %s14811_s28, 3072 }
  0x71   : > { %v12114_v61 = vpack.c.bf16 %v250_v60, %v247_v59  ;;  %v10883_v6 = vld [vmem:[#allocation7 + $0x28c] ss:$36 sps:$4 sm:$0xff]   ;;  %v269_v8 = vld [vmem:[%s12087_s20 + $0xb8] sm:$0xff]  ;;  %v10889_v13 = vld [vmem:[#allocation7 + $0x244] ss:$36 sps:$4 sm:$0xff]   ;;  %p11848_p11 = scmp.ne.s32.totalorder %s14811_s28, %s11847_s5  ;;  %p15319_p10 = scmp.ne.s32.totalorder %s14937_s25, 0 }
  0x72   : > { %1673 = vmatpush1.bf16.msra.mxu0 %v10833_v23  ;;  %v10887_v9 = vld [vmem:[#allocation7 + $0x54] ss:$36 sps:$4 sm:$0xff]   ;;  %v12123_v10 = vpack.c.bf16 %v269_v8, %v266_v7  ;;  %v10888_v12 = vld [vmem:[#allocation7 + $0x288] ss:$36 sps:$4 sm:$0xff]   ;;  %v10894_v16 = vld [vmem:[#allocation7 + $0x240] ss:$36 sps:$4 sm:$0xff]  }
  0x73   : > { %1786 = vmatpush1.bf16.msra.mxu1 %v10834_v24  ;;  %1674 = vmatprep.subr.bf16.mxu0 %v10835_v25  ;;  %v10885_v11 = vld [vmem:[#allocation7 + $0x50] ss:$36 sps:$4 sm:$0xff]   ;;  %v10891_v15 = vld [vmem:[#allocation7 + $0x8] ss:$36 sps:$4 sm:$0xff]   ;;  %v246_v17 = vld [vmem:[%s12087_s20] sm:$0xff]  ;;  %p11849_p1 = pnand %p11848_p11, %p15319_p10  ;;  %s11928_s7 = smov [#allocation10]  }
  0x74   : > { %1787 = vmatprep.subr.bf16.mxu1 %v10837_v26  ;;  %1694 = vmatprep.mubr.bf16.mxu0 %v12114_v61  ;;  %v10893_v14 = vld [vmem:[#allocation7 + $0xc] ss:$36 sps:$4 sm:$0xff]   ;;  %v249_v18 = vld [vmem:[%s12087_s20 + $0x18] sm:$0xff]  ;;  %v10897_v21 = vld [vmem:[#allocation7 + $0x444] ss:$36 sps:$4 sm:$0xff]   ;;  %s11851_s10 = sshll.u32 %s11928_s7, 4  ;;  %s11852_s10 = int_to_ptr.vmem [resolvable:$false] %s11851_s10 }
  0x75   : > { %v272_v19 = vld [vmem:[%s12087_s20 + $0xd0] sm:$0xff]  ;;  %v275_v20 = vld [vmem:[%s12087_s20 + $0xe8] sm:$0xff]  ;;  %v253_v23 = vld [vmem:[%s12087_s20 + $0x38] sm:$0xff]  ;;  %v12133_v25 = vpack.c.bf16 %v249_v18, %v246_v17  ;;  %p11850_p2 = pneg %p11849_p1  ;;  %s11853_s12 = scalar_lea.vmem %s11852_s10, 6144 }
  0x76   : > { %1675 = vmatpush1.bf16.msra.mxu0 %v10839_v27  ;;  %v10900_v22 = vld [vmem:[#allocation7 + $0x684] ss:$36 sps:$4 sm:$0xff]   ;;  %v256_v24 = vld [vmem:[%s12087_s20 + $0x50] sm:$0xff]  ;;  %v12135_v26 = vpack.c.bf16 %v275_v20, %v272_v19  ;;  %v10909_v35 = vld [vmem:[#allocation7 + $0x63c] ss:$36 sps:$4 sm:$0xff]   ;;  %p11854_p6 = scmp.lt.s32.totalorder %s14811_s28, %s11852_s10  ;;  %p11855_p12 = scmp.lt.s32.totalorder %s11853_s12, %s11847_s5 }
  0x77   : > { %1788 = vmatpush1.bf16.msra.mxu1 %v10840_v28  ;;  %1676 = vmatprep.subr.bf16.mxu0 %v10841_v29  ;;  %v10895_v27 = vld [vmem:[#allocation7 + $0x440] ss:$36 sps:$4 sm:$0xff]   ;;  %v10904_v45 = vld [vmem:[#allocation7 + $0x3b0] ss:$36 sps:$4 sm:$0xff]   ;;  %v265_v57 = vld [vmem:[%s12087_s20 + $0x98] sm:$0xff] }
  0x78   : > { %1789 = vmatprep.subr.bf16.mxu1 %v10843_v30  ;;  %v10898_v28 = vld [vmem:[#allocation7 + $0x680] ss:$36 sps:$4 sm:$0xff]   ;;  %v12137_v30 = vpack.c.bf16 %v256_v24, %v253_v23  ;;  %v10927_v56 = vld [vmem:[#allocation7 + $0x5ac] ss:$36 sps:$4 sm:$0xff]   ;;  %v273_v23 = vld [vmem:[%s12087_s20 + $0xd8] sm:$0xff]  ;;  %p11856_p3 = por %p11855_p12, %p11854_p6 }
  0x79   : > { %v10903_v29 = vld [vmem:[#allocation7 + $0x3fc] ss:$36 sps:$4 sm:$0xff]   ;;  %v10925_v59 = vld [vmem:[#allocation7 + $0x5a8] ss:$36 sps:$4 sm:$0xff]   ;;  %v10922_v18 = vld [vmem:[#allocation7 + $0x290] ss:$36 sps:$4 sm:$0xff]  }
  0x7a   : > { %1677 = vmatpush1.bf16.msra.mxu0 %v10845_v31  ;;  %v10901_v31 = vld [vmem:[#allocation7 + $0x3f8] ss:$36 sps:$4 sm:$0xff]   ;;  %v278_v34 = vld [vmem:[%s12087_s20 + $0x100] sm:$0xff]  ;;  %v10930_v20 = vld [vmem:[#allocation7 + $0x24c] ss:$36 sps:$4 sm:$0xff]   ;;  %p11857_p9 = pnand %p11856_p3, %p11850_p2 }
  0x7b   : > { %1790 = vmatpush1.bf16.msra.mxu1 %v10846_v32  ;;  %1678 = vmatprep.subr.bf16.mxu0 %v10847_v33  ;;  %v252_v32 = vld [vmem:[%s12087_s20 + $0x30] sm:$0xff]  ;;  %v255_v33 = vld [vmem:[%s12087_s20 + $0x48] sm:$0xff]  ;;  %v290_v7 = vld [vmem:[%s12087_s20 + $0x160] sm:$0xff] }
  0x7c   : > { %1888 = vmatprep.subr.bf16.mxu1 %v10851_v36  ;;  %v281_v36 = vld [vmem:[%s12087_s20 + $0x118] sm:$0xff]  ;;  %v10933_v8 = vld [vmem:[#allocation7 + $0x564] ss:$36 sps:$4 sm:$0xff]  }
  0x7d   : > { %v10940_v24 = vld [vmem:[#allocation7 + $0x518] ss:$36 sps:$4 sm:$0xff]  }
  0x7e   : > { %1808 = vmatmul.mubr.bf16.vlgmr.msra.gmra.mxu1 %v12100_v37  ;;  %1679 = vmatpush2.bf16.msra.mxu0 %v10852_v39  ;;  %v10907_v39 = vld [vmem:[#allocation7 + $0x638] ss:$36 sps:$4 sm:$0xff]  }
  0x7f   : > { %1889 = vmatpush1.bf16.msra.mxu1 %v10849_v38  ;;  %1680 = vmatprep.subr.bf16.mxu0 %v10853_v40  ;;  %v10906_v38 = vld [vmem:[#allocation7 + $0x3b4] ss:$36 sps:$4 sm:$0xff]   ;;  %v259_v40 = vld [vmem:[%s12087_s20 + $0x68] sm:$0xff] }
  0x80   : > { %1890 = vmatprep.subr.bf16.mxu1 %v10857_v41  ;;  %1817 = vmatprep.mubr.bf16.mxu1 %v14875_v0  ;;  %v262_v41 = vld [vmem:[%s12087_s20 + $0x80] sm:$0xff] }
  0x81   : > { %v12153_v46 = vpack.c.bf16 %v262_v41, %v259_v40  ;;  %v279_v40 = vld [vmem:[%s12087_s20 + $0x108] sm:$0xff] }
  0x82   : > { %1681 = vmatpush2.bf16.msra.mxu0 %v10858_v43  ;;  %v12149_v43 = vpack.c.bf16 %v255_v33, %v252_v32  ;;  %v10949_v32 = vld [vmem:[#allocation7 + $0x4d0] ss:$36 sps:$4 sm:$0xff]  }
  0x83   : > { %1891 = vmatpush1.bf16.msra.mxu1 %v10855_v42  ;;  %1682 = vmatprep.subr.bf16.mxu0 %v10859_v44  ;;  %v10918_v42 = vld [vmem:[#allocation7 + $0x5f4] ss:$36 sps:$4 sm:$0xff]   ;;  %v12151_v44 = vpack.c.bf16 %v281_v36, %v278_v34  ;;  %v10934_v34 = vld [vmem:[#allocation7 + $0x208] ss:$36 sps:$4 sm:$0xff]  }
  0x84   : > { %1892 = vmatprep.subr.bf16.mxu1 %v10863_v47  ;;  %v10912_v47 = vld [vmem:[#allocation7 + $0x36c] ss:$36 sps:$4 sm:$0xff]   ;;  %v10939_v36 = vld [vmem:[#allocation7 + $0x1c4] ss:$36 sps:$4 sm:$0xff]  }
  0x85   : > { %v10960_v41 = vld [vmem:[#allocation7 + $0x48c] ss:$36 sps:$4 sm:$0xff]  }
  0x86   : > { %1818 = vmatmul.mubr.bf16.gmra.mxu1 %v12106_v48  ;;  %1683 = vmatpush2.bf16.msra.mxu0 %v10864_v50  ;;  %v258_v50 = vld [vmem:[%s12087_s20 + $0x60] sm:$0xff] }
  0x87   : > { %1893 = vmatpush1.bf16.msra.mxu1 %v10861_v49  ;;  %1684 = vmatprep.subr.bf16.mxu0 %v10865_v51  ;;  %v10910_v49 = vld [vmem:[#allocation7 + $0x368] ss:$36 sps:$4 sm:$0xff]   ;;  %v261_v51 = vld [vmem:[%s12087_s20 + $0x78] sm:$0xff] }
  0x88   : > { %1894 = vmatprep.subr.bf16.mxu1 %v10869_v52  ;;  %1827 = vmatprep.mubr.bf16.mxu1 %v14875_v0  ;;  %v284_v52 = vld [vmem:[%s12087_s20 + $0x130] sm:$0xff]  ;;  %v12165_v60 = vpack.c.bf16 %v261_v51, %v258_v50 }
  0x89   : > { %v10993_v50 = vld [vmem:[#allocation7 + $0x68c] ss:$36 sps:$4 sm:$0xff]  }
  0x8a   : > { %1685 = vmatpush2.bf16.msra.mxu0 %v10870_v54  ;;  %v287_v54 = vld [vmem:[%s12087_s20 + $0x148] sm:$0xff] }
  0x8b   : > { %1895 = vmatpush1.bf16.msra.mxu1 %v10867_v53  ;;  %1686 = vmatprep.subr.bf16.mxu0 %v10871_v55  ;;  %v10916_v53 = vld [vmem:[#allocation7 + $0x5f0] ss:$36 sps:$4 sm:$0xff]   ;;  %v10915_v55 = vld [vmem:[#allocation7 + $0x324] ss:$36 sps:$4 sm:$0xff]  }
  0x8c   : > { %1896 = vmatprep.subr.bf16.mxu1 %v10875_v58  ;;  %v268_v58 = vld [vmem:[%s12087_s20 + $0xb0] sm:$0xff] }
  0x8e   : > { %1828 = vmatmul.mubr.bf16.gmra.mxu1 %v12116_v62  ;;  %1687 = vmatpush2.bf16.msra.mxu0 %v10876_v1  ;;  %v10913_v1 = vld [vmem:[#allocation7 + $0x320] ss:$36 sps:$4 sm:$0xff]  }
  0x8f   : > { %1897 = vmatpush1.bf16.msra.mxu1 %v10873_v63  ;;  %1688 = vmatprep.subr.bf16.mxu0 %v10877_v2  ;;  %v12167_v63 = vpack.c.bf16 %v287_v54, %v284_v52  ;;  %v12169_v2 = vpack.c.bf16 %v268_v58, %v265_v57  ;;  %v10943_v52 = vld [vmem:[#allocation7 + $0x178] ss:$36 sps:$4 sm:$0xff]   ;;  %v10954_v58 = vld [vmem:[#allocation7 + $0xec] ss:$36 sps:$4 sm:$0xff]  }
  0x90   : > { %1898 = vmatprep.subr.bf16.mxu1 %v10881_v3  ;;  %1837 = vmatprep.mubr.bf16.mxu1 %v14875_v0  ;;  %v10921_v3 = vld [vmem:[#allocation7 + $0x2dc] ss:$36 sps:$4 sm:$0xff]   ;;  %v10948_v54 = vld [vmem:[#allocation7 + $0x134] ss:$36 sps:$4 sm:$0xff]  }
  0x91   : > { %v285_v57 = vld [vmem:[%s12087_s20 + $0x138] sm:$0xff] }
  0x92   : > { %1689 = vmatpush2.bf16.msra.mxu0 %v10882_v5  ;;  %v264_v5 = vld [vmem:[%s12087_s20 + $0x90] sm:$0xff] }
  0x93   : > { %1899 = vmatpush1.bf16.msra.mxu1 %v10879_v4  ;;  %1690 = vmatprep.subr.bf16.mxu0 %v10883_v6  ;;  %v10919_v4 = vld [vmem:[#allocation7 + $0x2d8] ss:$36 sps:$4 sm:$0xff]   ;;  %v267_v6 = vld [vmem:[%s12087_s20 + $0xa8] sm:$0xff] }
  0x94   : > { %1900 = vmatprep.subr.bf16.mxu1 %v10887_v9  ;;  %v293_v9 = vld [vmem:[%s12087_s20 + $0x178] sm:$0xff] }
  0x95   : > { %v12183_v17 = vpack.c.bf16 %v293_v9, %v290_v7  ;;  %v10955_v7 = vld [vmem:[#allocation7 + $0xa0] ss:$36 sps:$4 sm:$0xff]   ;;  %v291_v9 = vld [vmem:[%s12087_s20 + $0x168] sm:$0xff] }
  0x96   : > { %1838 = vmatmul.mubr.bf16.gmra.mxu1 %v12123_v10  ;;  %1691 = vmatpush2.bf16.msra.mxu0 %v10888_v12  ;;  %v10942_v12 = vld [vmem:[#allocation7 + $0x51c] ss:$36 sps:$4 sm:$0xff]  }
  0x97   : > { %1901 = vmatpush1.bf16.msra.mxu1 %v10885_v11  ;;  %1692 = vmatprep.subr.bf16.mxu0 %v10889_v13  ;;  %v10931_v11 = vld [vmem:[#allocation7 + $0x560] ss:$36 sps:$4 sm:$0xff]   ;;  %v10924_v13 = vld [vmem:[#allocation7 + $0x294] ss:$36 sps:$4 sm:$0xff]  }
  0x98   : > { %1902 = vmatprep.subr.bf16.mxu1 %v10893_v14  ;;  %1847 = vmatprep.mubr.bf16.mxu1 %v14875_v0  ;;  %v271_v14 = vld [vmem:[%s12087_s20 + $0xc8] sm:$0xff] }
  0x9a   : > { %1693 = vmatpush2.bf16.msra.mxu0 %v10894_v16  ;;  %v12181_v16 = vpack.c.bf16 %v267_v6, %v264_v5  ;;  %v10957_v6 = vld [vmem:[#allocation7 + $0xa4] ss:$36 sps:$4 sm:$0xff]  }
  0x9b   : > { %1903 = vmatpush1.bf16.msra.mxu1 %v10891_v15  ;;  %2001 = vmatprep.subr.bf16.mxu0 %v10900_v22  ;;  %v274_v15 = vld [vmem:[%s12087_s20 + $0xe0] sm:$0xff] }
  0x9c   : > { %1904 = vmatprep.subr.bf16.mxu1 %v10897_v21  ;;  %v12185_v19 = vpack.c.bf16 %v274_v15, %v271_v14  ;;  %v10928_v21 = vld [vmem:[#allocation7 + $0x248] ss:$36 sps:$4 sm:$0xff]   ;;  %v270_v22 = vld [vmem:[%s12087_s20 + $0xc0] sm:$0xff]  ;;  %v10966_v14 = vld [vmem:[#allocation7 + $0x14] ss:$36 sps:$4 sm:$0xff]  }
  0x9d   : > { %1695 = vmatmul.mubr.bf16.vlgmr.msra.gmra.mxu0 %v12133_v25  ;;  %v12195_v33 = vpack.c.bf16 %v273_v23, %v270_v22  ;;  %v10964_v15 = vld [vmem:[#allocation7 + $0x10] ss:$36 sps:$4 sm:$0xff]   ;;  %v10991_v22 = vld [vmem:[#allocation7 + $0x688] ss:$36 sps:$4 sm:$0xff]  }
  0x9e   : > { %1848 = vmatmul.mubr.bf16.gmra.mxu1 %v12135_v26  ;;  %2002 = vmatpush1.bf16.msra.mxu0 %v10898_v28  ;;  %v10951_v28 = vld [vmem:[#allocation7 + $0x4d4] ss:$36 sps:$4 sm:$0xff]   ;;  %v10999_v23 = vld [vmem:[#allocation7 + $0x644] ss:$36 sps:$4 sm:$0xff]  }
  0x9f   : > { %1905 = vmatpush2.bf16.msra.mxu1 %v10895_v27  ;;  %1704 = vmatprep.mubr.bf16.mxu0 %v12137_v30  ;;  %v10936_v27 = vld [vmem:[#allocation7 + $0x20c] ss:$36 sps:$4 sm:$0xff]  }
  0xa0   : > { %1906 = vmatprep.subr.bf16.mxu1 %v10903_v29  ;;  %1857 = vmatprep.mubr.bf16.mxu1 %v14875_v0  ;;  %v277_v29 = vld [vmem:[%s12087_s20 + $0xf8] sm:$0xff] }
  0xa1   : > { %2003 = vmatprep.subr.bf16.mxu0 %v10909_v35 }
  0xa2   : > { %2004 = vmatpush1.bf16.msra.mxu0 %v10907_v39  ;;  %v276_v39 = vld [vmem:[%s12087_s20 + $0xf0] sm:$0xff] }
  0xa3   : > { %1907 = vmatpush2.bf16.msra.mxu1 %v10901_v31  ;;  %2005 = vmatprep.subr.bf16.mxu0 %v10918_v42  ;;  %v280_v31 = vld [vmem:[%s12087_s20 + $0x110] sm:$0xff]  ;;  %v10945_v42 = vld [vmem:[#allocation7 + $0x17c] ss:$36 sps:$4 sm:$0xff]   ;;  %v12207_v51 = vpack.c.bf16 %v279_v40, %v276_v39  ;;  %v10979_v40 = vld [vmem:[#allocation7 + $0x328] ss:$36 sps:$4 sm:$0xff]  }
  0xa4   : > { %1908 = vmatprep.subr.bf16.mxu1 %v10906_v38  ;;  %v12197_v35 = vpack.c.bf16 %v280_v31, %v277_v29  ;;  %v10937_v38 = vld [vmem:[#allocation7 + $0x1c0] ss:$36 sps:$4 sm:$0xff]   ;;  %v10973_v29 = vld [vmem:[#allocation7 + $0x3b8] ss:$36 sps:$4 sm:$0xff]   ;;  %v10981_v39 = vld [vmem:[#allocation7 + $0x32c] ss:$36 sps:$4 sm:$0xff]  }
  0xa5   : > { %1705 = vmatmul.mubr.bf16.gmra.mxu0 %v12149_v43  ;;  %v10978_v31 = vld [vmem:[#allocation7 + $0x374] ss:$36 sps:$4 sm:$0xff]  }
  0xa6   : > { %1858 = vmatmul.mubr.bf16.gmra.mxu1 %v12151_v44  ;;  %1714 = vmatprep.mubr.bf16.mxu0 %v12153_v46 }
  0xa7   : > { %1909 = vmatpush2.bf16.msra.mxu1 %v10904_v45  ;;  %1867 = vmatprep.mubr.bf16.mxu1 %v14875_v0  ;;  %v10958_v45 = vld [vmem:[#allocation7 + $0x488] ss:$36 sps:$4 sm:$0xff]  }
  0xa8   : > { %1910 = vmatprep.subr.bf16.mxu1 %v10912_v47  ;;  %2006 = vmatpush1.bf16.msra.mxu0 %v10916_v53  ;;  %v283_v47 = vld [vmem:[%s12087_s20 + $0x128] sm:$0xff] }
  0xa9   : > { %2007 = vmatprep.subr.bf16.mxu0 %v10927_v56  ;;  %v282_v56 = vld [vmem:[%s12087_s20 + $0x120] sm:$0xff] }
  0xab   : > { %1911 = vmatpush2.bf16.msra.mxu1 %v10910_v49  ;;  %v286_v49 = vld [vmem:[%s12087_s20 + $0x140] sm:$0xff] }
  0xac   : > { %1912 = vmatprep.subr.bf16.mxu1 %v10915_v55  ;;  %2008 = vmatpush1.bf16.msra.mxu0 %v10925_v59  ;;  %v12209_v53 = vpack.c.bf16 %v286_v49, %v283_v47  ;;  %v10946_v55 = vld [vmem:[#allocation7 + $0x130] ss:$36 sps:$4 sm:$0xff]   ;;  %v289_v59 = vld [vmem:[%s12087_s20 + $0x158] sm:$0xff]  ;;  %v10982_v47 = vld [vmem:[#allocation7 + $0x2e0] ss:$36 sps:$4 sm:$0xff]  }
  0xad   : > { %1715 = vmatmul.mubr.bf16.gmra.mxu0 %v12165_v60  ;;  %2009 = vmatprep.subr.bf16.mxu0 %v10933_v8  ;;  %v288_v8 = vld [vmem:[%s12087_s20 + $0x150] sm:$0xff]  ;;  %v10987_v49 = vld [vmem:[#allocation7 + $0x29c] ss:$36 sps:$4 sm:$0xff]  }
  0xae   : > { %1868 = vmatmul.mubr.bf16.gmra.mxu1 %v12167_v63  ;;  %1724 = vmatprep.mubr.bf16.mxu0 %v12169_v2 }
  0xaf   : > { %1913 = vmatpush2.bf16.msra.mxu1 %v10913_v1  ;;  %1877 = vmatprep.mubr.bf16.mxu1 %v14875_v0  ;;  %v292_v1 = vld [vmem:[%s12087_s20 + $0x170] sm:$0xff] }
  0xb0   : > { %1914 = vmatprep.subr.bf16.mxu1 %v10921_v3  ;;  %2010 = vmatpush1.bf16.msra.mxu0 %v10931_v11  ;;  %v12219_v3 = vpack.c.bf16 %v285_v57, %v282_v56  ;;  %v12221_v5 = vpack.c.bf16 %v292_v1, %v289_v59  ;;  %v10963_v11 = vld [vmem:[#allocation7 + $0x5c] ss:$36 sps:$4 sm:$0xff]   ;;  %v11023_v56 = vld [vmem:[#allocation7 + $0x524] ss:$36 sps:$4 sm:$0xff]   ;;  %v10996_v59 = vld [vmem:[#allocation7 + $0x214] ss:$36 sps:$4 sm:$0xff]  }
  0xb1   : > { %2011 = vmatprep.subr.bf16.mxu0 %v10942_v12  ;;  %v12229_v12 = vpack.c.bf16 %v291_v9, %v288_v8  ;;  %v11021_v57 = vld [vmem:[#allocation7 + $0x520] ss:$36 sps:$4 sm:$0xff]   ;;  %v10994_v1 = vld [vmem:[#allocation7 + $0x210] ss:$36 sps:$4 sm:$0xff]   ;;  %v11000_v8 = vld [vmem:[#allocation7 + $0x1c8] ss:$36 sps:$4 sm:$0xff]  }
  0xb2   : > { %v11008_v9 = vld [vmem:[#allocation7 + $0x184] ss:$36 sps:$4 sm:$0xff]  }
  0xb3   : > { %1915 = vmatpush2.bf16.msra.mxu1 %v10919_v4  ;;  %v10952_v4 = vld [vmem:[#allocation7 + $0xe8] ss:$36 sps:$4 sm:$0xff]  }
  0xb4   : > { %1916 = vmatprep.subr.bf16.mxu1 %v10924_v13  ;;  %2012 = vmatpush1.bf16.msra.mxu0 %v10940_v24  ;;  %v10961_v13 = vld [vmem:[#allocation7 + $0x58] ss:$36 sps:$4 sm:$0xff]   ;;  %v10970_v24 = vld [vmem:[#allocation7 + $0x400] ss:$36 sps:$4 sm:$0xff]  }
  0xb5   : > { %1725 = vmatmul.mubr.bf16.gmra.mxu0 %v12181_v16  ;;  %2013 = vmatprep.subr.bf16.mxu0 %v10951_v28  ;;  %v10997_v28 = vld [vmem:[#allocation7 + $0x640] ss:$36 sps:$4 sm:$0xff]  }
  0xb6   : > { %1878 = vmatmul.mubr.bf16.gmra.mxu1 %v12183_v17  ;;  %1734 = vmatprep.mubr.bf16.mxu0 %v12185_v19 }
  0xb7   : > { %1917 = vmatpush2.bf16.msra.mxu1 %v10922_v18  ;;  %1920 = vmatprep.mubr.bf16.mxu1 %v12114_v61  ;;  %v10969_v18 = vld [vmem:[#allocation7 + $0x44c] ss:$36 sps:$4 sm:$0xff]  }
  0xb8   : > { %1918 = vmatprep.subr.bf16.mxu1 %v10930_v20  ;;  %2014 = vmatpush1.bf16.msra.mxu0 %v10949_v32  ;;  %v10967_v20 = vld [vmem:[#allocation7 + $0x448] ss:$36 sps:$4 sm:$0xff]   ;;  %v11005_v32 = vld [vmem:[#allocation7 + $0x5fc] ss:$36 sps:$4 sm:$0xff]  }
  0xb9   : > { %2015 = vmatprep.subr.bf16.mxu0 %v10960_v41  ;;  %v10984_v41 = vld [vmem:[#allocation7 + $0x2e4] ss:$36 sps:$4 sm:$0xff]  }
  0xbb   : > { %1919 = vmatpush2.bf16.msra.mxu1 %v10928_v21  ;;  %v10972_v21 = vld [vmem:[#allocation7 + $0x404] ss:$36 sps:$4 sm:$0xff]  }
  0xbc   : > { %2114 = vmatprep.subr.bf16.mxu1 %v10936_v27  ;;  %2016 = vmatpush1.bf16.msra.mxu0 %v10958_v45  ;;  %v10975_v27 = vld [vmem:[#allocation7 + $0x3bc] ss:$36 sps:$4 sm:$0xff]   ;;  %v11017_v45 = vld [vmem:[#allocation7 + $0x56c] ss:$36 sps:$4 sm:$0xff]  }
  0xbd   : > { %1735 = vmatmul.mubr.bf16.gmra.mxu0 %v12195_v33  ;;  %2227 = vmatprep.subr.bf16.mxu0 %v10993_v50  ;;  %v11015_v50 = vld [vmem:[#allocation7 + $0x568] ss:$36 sps:$4 sm:$0xff]  }
  0xbe   : > { %1921 = vmatmul.mubr.bf16.vlgmr.msra.gmra.mxu1 %v12133_v25  ;;  %1744 = vmatprep.mubr.bf16.mxu0 %v12197_v35 }
  0xbf   : > { %2115 = vmatpush1.bf16.msra.mxu1 %v10934_v34  ;;  %1930 = vmatprep.mubr.bf16.mxu1 %v12137_v30  ;;  %v10976_v34 = vld [vmem:[#allocation7 + $0x370] ss:$36 sps:$4 sm:$0xff]  }
  0xc0   : > { %2116 = vmatprep.subr.bf16.mxu1 %v10939_v36  ;;  %v11003_v36 = vld [vmem:[#allocation7 + $0x5f8] ss:$36 sps:$4 sm:$0xff]  }
  0xc3   : > { %2117 = vmatpush1.bf16.msra.mxu1 %v10937_v38  ;;  %v11011_v38 = vld [vmem:[#allocation7 + $0x5b4] ss:$36 sps:$4 sm:$0xff]  }
  0xc4   : > { %2118 = vmatprep.subr.bf16.mxu1 %v10945_v42  ;;  %v11009_v42 = vld [vmem:[#allocation7 + $0x5b0] ss:$36 sps:$4 sm:$0xff]  }
  0xc5   : > { %1745 = vmatmul.mubr.bf16.gmra.mxu0 %v12207_v51 }
  0xc6   : > { %1931 = vmatmul.mubr.bf16.gmra.mxu1 %v12149_v43  ;;  %1754 = vmatprep.mubr.bf16.mxu0 %v12209_v53 }
  0xc7   : > { %2119 = vmatpush1.bf16.msra.mxu1 %v10943_v52  ;;  %1940 = vmatprep.mubr.bf16.mxu1 %v12153_v46  ;;  %v10985_v52 = vld [vmem:[#allocation7 + $0x298] ss:$36 sps:$4 sm:$0xff]  }
  0xc8   : > { %2120 = vmatprep.subr.bf16.mxu1 %v10948_v54  ;;  %v10990_v54 = vld [vmem:[#allocation7 + $0x254] ss:$36 sps:$4 sm:$0xff]  }
  0xcb   : > { %2121 = vmatpush1.bf16.msra.mxu1 %v10946_v55  ;;  %v10988_v55 = vld [vmem:[#allocation7 + $0x250] ss:$36 sps:$4 sm:$0xff]  }
  0xcc   : > { %2122 = vmatprep.subr.bf16.mxu1 %v10954_v58  ;;  %v11029_v58 = vld [vmem:[#allocation7 + $0x4dc] ss:$36 sps:$4 sm:$0xff]  }
  0xcd   : > { %1755 = vmatmul.mubr.bf16.gmra.mxu0 %v12219_v3 }
  0xce   : > { %1941 = vmatmul.mubr.bf16.gmra.mxu1 %v12165_v60  ;;  %1764 = vmatprep.mubr.bf16.mxu0 %v12221_v5 }
  0xcf   : > { %2123 = vmatpush1.bf16.msra.mxu1 %v10952_v4  ;;  %1950 = vmatprep.mubr.bf16.mxu1 %v12169_v2  ;;  %v11002_v4 = vld [vmem:[#allocation7 + $0x1cc] ss:$36 sps:$4 sm:$0xff]  }
  0xd0   : > { %2124 = vmatprep.subr.bf16.mxu1 %v10957_v6  ;;  %v11027_v6 = vld [vmem:[#allocation7 + $0x4d8] ss:$36 sps:$4 sm:$0xff]  }
  0xd3   : > { %2125 = vmatpush1.bf16.msra.mxu1 %v10955_v7  ;;  %v11035_v7 = vld [vmem:[#allocation7 + $0x494] ss:$36 sps:$4 sm:$0xff]  }
  0xd4   : > { %2126 = vmatprep.subr.bf16.mxu1 %v10963_v11  ;;  %v11033_v11 = vld [vmem:[#allocation7 + $0x490] ss:$36 sps:$4 sm:$0xff]  }
  0xd5   : > { %1765 = vmatmul.mubr.bf16.gmra.mxu0 %v12229_v12 }
  0xd6   : > { %1951 = vmatmul.mubr.bf16.gmra.mxu1 %v12181_v16  ;;  %2033 = vmatprep.mubr.bf16.mxu0 %v14875_v0 }
  0xd7   : > { %2127 = vmatpush1.bf16.msra.mxu1 %v10961_v13  ;;  %1960 = vmatprep.mubr.bf16.mxu1 %v12185_v19  ;;  %v11006_v13 = vld [vmem:[#allocation7 + $0x180] ss:$36 sps:$4 sm:$0xff]  }
  0xd8   : > { %2128 = vmatprep.subr.bf16.mxu1 %v10966_v14  ;;  %v11014_v14 = vld [vmem:[#allocation7 + $0x13c] ss:$36 sps:$4 sm:$0xff]  }
  0xdb   : > { %2129 = vmatpush1.bf16.msra.mxu1 %v10964_v15  ;;  %v11065_v15 = vld [vmem:[#allocation7 + $0x694] ss:$36 sps:$4 sm:$0xff]  }
  0xdc   : > { %2130 = vmatprep.subr.bf16.mxu1 %v10969_v18  ;;  %v11012_v18 = vld [vmem:[#allocation7 + $0x138] ss:$36 sps:$4 sm:$0xff]  }
  0xdd   : > { %2034 = vmatmul.mubr.bf16.vlgmr.msra.gmra.mxu0 %v12100_v37 }
  0xde   : > { %1961 = vmatmul.mubr.bf16.gmra.mxu1 %v12195_v33  ;;  %2043 = vmatprep.mubr.bf16.mxu0 %v14875_v0 }
  0xdf   : > { %2131 = vmatpush2.bf16.msra.mxu1 %v10967_v20  ;;  %1970 = vmatprep.mubr.bf16.mxu1 %v12197_v35  ;;  %v11020_v20 = vld [vmem:[#allocation7 + $0xf4] ss:$36 sps:$4 sm:$0xff]  }
  0xe0   : > { %2132 = vmatprep.subr.bf16.mxu1 %v10972_v21  ;;  %2228 = vmatpush1.bf16.msra.mxu0 %v10991_v22  ;;  %v11018_v21 = vld [vmem:[#allocation7 + $0xf0] ss:$36 sps:$4 sm:$0xff]  }
  0xe1   : > { %2229 = vmatprep.subr.bf16.mxu0 %v10999_v23  ;;  %v11026_v22 = vld [vmem:[#allocation7 + $0xac] ss:$36 sps:$4 sm:$0xff]  }
  0xe2   : > { %v11024_v23 = vld [vmem:[#allocation7 + $0xa8] ss:$36 sps:$4 sm:$0xff]  }
  0xe3   : > { %2133 = vmatpush2.bf16.msra.mxu1 %v10970_v24  ;;  %v11032_v24 = vld [vmem:[#allocation7 + $0x64] ss:$36 sps:$4 sm:$0xff]  }
  0xe4   : > { %2134 = vmatprep.subr.bf16.mxu1 %v10975_v27  ;;  %2230 = vmatpush1.bf16.msra.mxu0 %v10997_v28  ;;  %v11030_v27 = vld [vmem:[#allocation7 + $0x60] ss:$36 sps:$4 sm:$0xff]  }
  0xe5   : > { %2044 = vmatmul.mubr.bf16.gmra.mxu0 %v12106_v48  ;;  %2231 = vmatprep.subr.bf16.mxu0 %v11005_v32  ;;  %v11038_v28 = vld [vmem:[#allocation7 + $0x1c] ss:$36 sps:$4 sm:$0xff]   ;;  %v11039_v32 = vld [vmem:[#allocation7 + $0x450] ss:$36 sps:$4 sm:$0xff]  }
  0xe6   : > { %1971 = vmatmul.mubr.bf16.gmra.mxu1 %v12207_v51  ;;  %2053 = vmatprep.mubr.bf16.mxu0 %v14875_v0 }
  0xe7   : > { %2135 = vmatpush2.bf16.msra.mxu1 %v10973_v29  ;;  %1980 = vmatprep.mubr.bf16.mxu1 %v12209_v53  ;;  %v11036_v29 = vld [vmem:[#allocation7 + $0x18] ss:$36 sps:$4 sm:$0xff]  }
  0xe8   : > { %2136 = vmatprep.subr.bf16.mxu1 %v10978_v31  ;;  %2232 = vmatpush1.bf16.msra.mxu0 %v11003_v36  ;;  %v11041_v31 = vld [vmem:[#allocation7 + $0x454] ss:$36 sps:$4 sm:$0xff]  }
  0xe9   : > { %2233 = vmatprep.subr.bf16.mxu0 %v11011_v38  ;;  %v11063_v36 = vld [vmem:[#allocation7 + $0x690] ss:$36 sps:$4 sm:$0xff]  }
  0xea   : > { %v11068_v38 = vld [vmem:[#allocation7 + $0x64c] ss:$36 sps:$4 sm:$0xff]  }
  0xeb   : > { %2137 = vmatpush2.bf16.msra.mxu1 %v10976_v34  ;;  %v11044_v34 = vld [vmem:[#allocation7 + $0x40c] ss:$36 sps:$4 sm:$0xff]  }
  0xec   : > { %2138 = vmatprep.subr.bf16.mxu1 %v10981_v39  ;;  %2234 = vmatpush1.bf16.msra.mxu0 %v11009_v42  ;;  %v11042_v39 = vld [vmem:[#allocation7 + $0x408] ss:$36 sps:$4 sm:$0xff]   ;;  %v11045_v42 = vld [vmem:[#allocation7 + $0x3c0] ss:$36 sps:$4 sm:$0xff]  }
  0xed   : > { %2054 = vmatmul.mubr.bf16.gmra.mxu0 %v12116_v62  ;;  %2235 = vmatprep.subr.bf16.mxu0 %v11017_v45  ;;  %v11050_v45 = vld [vmem:[#allocation7 + $0x37c] ss:$36 sps:$4 sm:$0xff]  }
  0xee   : > { %1981 = vmatmul.mubr.bf16.gmra.mxu1 %v12219_v3  ;;  %2063 = vmatprep.mubr.bf16.mxu0 %v14875_v0 }
  0xef   : > { %2139 = vmatpush2.bf16.msra.mxu1 %v10979_v40  ;;  %1990 = vmatprep.mubr.bf16.mxu1 %v12221_v5  ;;  %v11047_v40 = vld [vmem:[#allocation7 + $0x3c4] ss:$36 sps:$4 sm:$0xff]  }
  0xf0   : > { %2140 = vmatprep.subr.bf16.mxu1 %v10984_v41  ;;  %2236 = vmatpush1.bf16.msra.mxu0 %v11015_v50  ;;  %v11066_v41 = vld [vmem:[#allocation7 + $0x648] ss:$36 sps:$4 sm:$0xff]   ;;  %v11048_v50 = vld [vmem:[#allocation7 + $0x378] ss:$36 sps:$4 sm:$0xff]  }
  0xf1   : > { %2237 = vmatprep.subr.bf16.mxu0 %v11023_v56  ;;  %v11056_v56 = vld [vmem:[#allocation7 + $0x2ec] ss:$36 sps:$4 sm:$0xff]  }
  0xf3   : > { %2141 = vmatpush2.bf16.msra.mxu1 %v10982_v47  ;;  %v11071_v47 = vld [vmem:[#allocation7 + $0x604] ss:$36 sps:$4 sm:$0xff]  }
  0xf4   : > { %2142 = vmatprep.subr.bf16.mxu1 %v10987_v49  ;;  %2238 = vmatpush1.bf16.msra.mxu0 %v11021_v57  ;;  %v11069_v49 = vld [vmem:[#allocation7 + $0x600] ss:$36 sps:$4 sm:$0xff]   ;;  %v11072_v57 = vld [vmem:[#allocation7 + $0x5b8] ss:$36 sps:$4 sm:$0xff]  }
  0xf5   : > { %2064 = vmatmul.mubr.bf16.gmra.mxu0 %v12123_v10  ;;  %2239 = vmatprep.subr.bf16.mxu0 %v11029_v58  ;;  %v11077_v58 = vld [vmem:[#allocation7 + $0x574] ss:$36 sps:$4 sm:$0xff]  }
  0xf6   : > { %1991 = vmatmul.mubr.bf16.gmra.mxu1 %v12229_v12  ;;  %2073 = vmatprep.mubr.bf16.mxu0 %v14875_v0 }
  0xf7   : > { %2143 = vmatpush2.bf16.msra.mxu1 %v10985_v52  ;;  %2146 = vmatprep.mubr.bf16.mxu1 %v12114_v61  ;;  %v11074_v52 = vld [vmem:[#allocation7 + $0x5bc] ss:$36 sps:$4 sm:$0xff]  }
  0xf8   : > { %2144 = vmatprep.subr.bf16.mxu1 %v10990_v54  ;;  %2240 = vmatpush1.bf16.msra.mxu0 %v11027_v6  ;;  %v11053_v54 = vld [vmem:[#allocation7 + $0x334] ss:$36 sps:$4 sm:$0xff]   ;;  %v11057_v6 = vld [vmem:[#allocation7 + $0x2a0] ss:$36 sps:$4 sm:$0xff]  }
  0xf9   : > { %2241 = vmatprep.subr.bf16.mxu0 %v11035_v7  ;;  %v11062_v7 = vld [vmem:[#allocation7 + $0x25c] ss:$36 sps:$4 sm:$0xff]  }
  0xfb   : > { %2145 = vmatpush2.bf16.msra.mxu1 %v10988_v55  ;;  %v11051_v55 = vld [vmem:[#allocation7 + $0x330] ss:$36 sps:$4 sm:$0xff]  }
  0xfc   : > { %2340 = vmatprep.subr.bf16.mxu1 %v10996_v59  ;;  %2242 = vmatpush1.bf16.msra.mxu0 %v11033_v11  ;;  %v11054_v59 = vld [vmem:[#allocation7 + $0x2e8] ss:$36 sps:$4 sm:$0xff]   ;;  %v11060_v11 = vld [vmem:[#allocation7 + $0x258] ss:$36 sps:$4 sm:$0xff]  }
  0xfd   : > { %2074 = vmatmul.mubr.bf16.gmra.mxu0 %v12135_v26  ;;  %2453 = vmatprep.subr.bf16.mxu0 %v11065_v15  ;;  %v11081_v15 = vld [vmem:[#allocation7 + $0x4e0] ss:$36 sps:$4 sm:$0xff]  }
  0xfe   : > { %2147 = vmatmul.mubr.bf16.vlgmr.msra.gmra.mxu1 %v12133_v25  ;;  %2083 = vmatprep.mubr.bf16.mxu0 %v14875_v0 }
  0xff   : > { %2341 = vmatpush1.bf16.msra.mxu1 %v10994_v1  ;;  %2156 = vmatprep.mubr.bf16.mxu1 %v12137_v30  ;;  %v11059_v1 = vld [vmem:[#allocation7 + $0x2a4] ss:$36 sps:$4 sm:$0xff]  }
 0x100   : > { %2342 = vmatprep.subr.bf16.mxu1 %v11002_v4  ;;  %v11075_v4 = vld [vmem:[#allocation7 + $0x570] ss:$36 sps:$4 sm:$0xff]  }
 0x103   : > { %2343 = vmatpush1.bf16.msra.mxu1 %v11000_v8  ;;  %v11080_v8 = vld [vmem:[#allocation7 + $0x52c] ss:$36 sps:$4 sm:$0xff]  }
 0x104   : > { %2344 = vmatprep.subr.bf16.mxu1 %v11008_v9  ;;  %v11078_v9 = vld [vmem:[#allocation7 + $0x528] ss:$36 sps:$4 sm:$0xff]  }
 0x105   : > { %2084 = vmatmul.mubr.bf16.gmra.mxu0 %v12151_v44 }
 0x106   : > { %2157 = vmatmul.mubr.bf16.gmra.mxu1 %v12149_v43  ;;  %2093 = vmatprep.mubr.bf16.mxu0 %v14875_v0 }
 0x107   : > { %2345 = vmatpush1.bf16.msra.mxu1 %v11006_v13  ;;  %2166 = vmatprep.mubr.bf16.mxu1 %v12153_v46  ;;  %v11083_v13 = vld [vmem:[#allocation7 + $0x4e4] ss:$36 sps:$4 sm:$0xff]  }
 0x108   : > { %2346 = vmatprep.subr.bf16.mxu1 %v11014_v14  ;;  %v11087_v14 = vld [vmem:[#allocation7 + $0x458] ss:$36 sps:$4 sm:$0xff]  }
 0x10b   : > { %2347 = vmatpush1.bf16.msra.mxu1 %v11012_v18  ;;  %v11088_v18 = vld [vmem:[#allocation7 + $0x218] ss:$36 sps:$4 sm:$0xff]  }
 0x10c   : > { %2348 = vmatprep.subr.bf16.mxu1 %v11020_v20  ;;  %v11086_v20 = vld [vmem:[#allocation7 + $0x49c] ss:$36 sps:$4 sm:$0xff]  }
 0x10d   : > { %2094 = vmatmul.mubr.bf16.gmra.mxu0 %v12167_v63 }
 0x10e   : > { %2167 = vmatmul.mubr.bf16.gmra.mxu1 %v12165_v60  ;;  %2103 = vmatprep.mubr.bf16.mxu0 %v14875_v0 }
 0x10f   : > { %2349 = vmatpush1.bf16.msra.mxu1 %v11018_v21  ;;  %2176 = vmatprep.mubr.bf16.mxu1 %v12169_v2  ;;  %v11089_v21 = vld [vmem:[#allocation7 + $0x410] ss:$36 sps:$4 sm:$0xff]  }
 0x110   : > { %2350 = vmatprep.subr.bf16.mxu1 %v11026_v22 }
 0x113   : > { %2351 = vmatpush1.bf16.msra.mxu1 %v11024_v23 }
 0x114   : > { %2352 = vmatprep.subr.bf16.mxu1 %v11032_v24  ;;  %v11084_v24 = vld [vmem:[#allocation7 + $0x498] ss:$36 sps:$4 sm:$0xff]  }
 0x115   : > { %2104 = vmatmul.mubr.bf16.gmra.mxu0 %v12183_v17 }
 0x116   : > { %2177 = vmatmul.mubr.bf16.gmra.mxu1 %v12181_v16  ;;  %2259 = vmatprep.mubr.bf16.mxu0 %v14875_v0 }
 0x117   : > { %2353 = vmatpush1.bf16.msra.mxu1 %v11030_v27  ;;  %2186 = vmatprep.mubr.bf16.mxu1 %v12185_v19  ;;  %v11090_v27 = vld [vmem:[#allocation7 + $0x1d0] ss:$36 sps:$4 sm:$0xff]  }
 0x118   : > { %2354 = vmatprep.subr.bf16.mxu1 %v11038_v28  ;;  %v11091_v28 = vld [vmem:[#allocation7 + $0x3c8] ss:$36 sps:$4 sm:$0xff]  }
 0x11b   : > { %2355 = vmatpush1.bf16.msra.mxu1 %v11036_v29 }
 0x11c   : > { %2356 = vmatprep.subr.bf16.mxu1 %v11041_v31 }
 0x11d   : > { %2260 = vmatmul.mubr.bf16.vlgmr.msra.gmra.mxu0 %v12100_v37 }
 0x11e   : > { %2187 = vmatmul.mubr.bf16.gmra.mxu1 %v12195_v33  ;;  %2269 = vmatprep.mubr.bf16.mxu0 %v14875_v0 }
 0x11f   : > { %2357 = vmatpush2.bf16.msra.mxu1 %v11039_v32  ;;  %2196 = vmatprep.mubr.bf16.mxu1 %v12197_v35  ;;  %v11092_v32 = vld [vmem:[#allocation7 + $0x188] ss:$36 sps:$4 sm:$0xff]  }
 0x120   : > { %2358 = vmatprep.subr.bf16.mxu1 %v11044_v34  ;;  %2454 = vmatpush1.bf16.msra.mxu0 %v11063_v36  ;;  %v11104_v34 = vld [vmem:[#allocation7 + $0x698] ss:$36 sps:$4 sm:$0xff]   ;;  %v11093_v36 = vld [vmem:[#allocation7 + $0x380] ss:$36 sps:$4 sm:$0xff]  }
 0x121   : > { %2455 = vmatprep.subr.bf16.mxu0 %v11068_v38 }
 0x123   : > { %2359 = vmatpush2.bf16.msra.mxu1 %v11042_v39 }
 0x124   : > { %2360 = vmatprep.subr.bf16.mxu1 %v11047_v40  ;;  %2456 = vmatpush1.bf16.msra.mxu0 %v11066_v41  ;;  %v11094_v40 = vld [vmem:[#allocation7 + $0x140] ss:$36 sps:$4 sm:$0xff]   ;;  %v11095_v41 = vld [vmem:[#allocation7 + $0x338] ss:$36 sps:$4 sm:$0xff]  }
 0x125   : > { %2270 = vmatmul.mubr.bf16.gmra.mxu0 %v12106_v48  ;;  %2457 = vmatprep.subr.bf16.mxu0 %v11071_v47  ;;  %v11096_v47 = vld [vmem:[#allocation7 + $0xf8] ss:$36 sps:$4 sm:$0xff]  }
 0x126   : > { %2197 = vmatmul.mubr.bf16.gmra.mxu1 %v12207_v51  ;;  %2279 = vmatprep.mubr.bf16.mxu0 %v14875_v0 }
 0x127   : > { %2361 = vmatpush2.bf16.msra.mxu1 %v11045_v42  ;;  %2206 = vmatprep.mubr.bf16.mxu1 %v12209_v53 }
 0x128   : > { %2362 = vmatprep.subr.bf16.mxu1 %v11050_v45  ;;  %2458 = vmatpush1.bf16.msra.mxu0 %v11069_v49  ;;  %v11097_v49 = vld [vmem:[#allocation7 + $0x2f0] ss:$36 sps:$4 sm:$0xff]  }
 0x129   : > { %2459 = vmatprep.subr.bf16.mxu0 %v11074_v52 }
 0x12b   : > { %2363 = vmatpush2.bf16.msra.mxu1 %v11048_v50 }
 0x12c   : > { %2364 = vmatprep.subr.bf16.mxu1 %v11053_v54  ;;  %2460 = vmatpush1.bf16.msra.mxu0 %v11072_v57  ;;  %v11098_v54 = vld [vmem:[#allocation7 + $0xb0] ss:$36 sps:$4 sm:$0xff]  }
 0x12d   : > { %2280 = vmatmul.mubr.bf16.gmra.mxu0 %v12116_v62  ;;  %2461 = vmatprep.subr.bf16.mxu0 %v11077_v58  ;;  %v11100_v58 = vld [vmem:[#allocation7 + $0x68] ss:$36 sps:$4 sm:$0xff]  }
 0x12e   : > { %2207 = vmatmul.mubr.bf16.gmra.mxu1 %v12219_v3  ;;  %2289 = vmatprep.mubr.bf16.mxu0 %v14875_v0 }
 0x12f   : > { %2365 = vmatpush2.bf16.msra.mxu1 %v11051_v55  ;;  %2216 = vmatprep.mubr.bf16.mxu1 %v12221_v5  ;;  %v11099_v55 = vld [vmem:[#allocation7 + $0x2a8] ss:$36 sps:$4 sm:$0xff]  }
 0x130   : > { %2366 = vmatprep.subr.bf16.mxu1 %v11056_v56  ;;  %2462 = vmatpush1.bf16.msra.mxu0 %v11075_v4 }
 0x131   : > { %2463 = vmatprep.subr.bf16.mxu0 %v11080_v8 }
 0x133   : > { %2367 = vmatpush2.bf16.msra.mxu1 %v11054_v59  ;;  %v11101_v59 = vld [vmem:[#allocation7 + $0x260] ss:$36 sps:$4 sm:$0xff]  }
 0x134   : > { %2368 = vmatprep.subr.bf16.mxu1 %v11059_v1  ;;  %2464 = vmatpush1.bf16.msra.mxu0 %v11078_v9  ;;  %v11105_v9 = vld [vmem:[#allocation7 + $0x650] ss:$36 sps:$4 sm:$0xff]  }
 0x135   : > { %2290 = vmatmul.mubr.bf16.gmra.mxu0 %v12123_v10  ;;  %2465 = vmatprep.subr.bf16.mxu0 %v11083_v13 }
 0x136   : > { %2217 = vmatmul.mubr.bf16.gmra.mxu1 %v12229_v12  ;;  %2299 = vmatprep.mubr.bf16.mxu0 %v14875_v0 }
 0x137   : > { %2369 = vmatpush2.bf16.msra.mxu1 %v11057_v6  ;;  %2372 = vmatprep.mubr.bf16.mxu1 %v12114_v61  ;;  %v11102_v6 = vld [vmem:[#allocation7 + $0x20] ss:$36 sps:$4 sm:$0xff]  }
 0x138   : > { %2370 = vmatprep.subr.bf16.mxu1 %v11062_v7  ;;  %2466 = vmatpush1.bf16.msra.mxu0 %v11081_v15 }
 0x139   : > { %2467 = vmatprep.subr.bf16.mxu0 %v11086_v20 }
 0x13b   : > { %2371 = vmatpush2.bf16.msra.mxu1 %v11060_v11 }
 0x13c   : > { %9869 = vmatprep.subr.bf16.mxu1 %v11087_v14  ;;  %2468 = vmatpush1.bf16.msra.mxu0 %v11084_v24 }
 0x13d   : > { %2300 = vmatmul.mubr.bf16.gmra.mxu0 %v12135_v26  ;;  %10221 = vmatprep.subr.bf16.mxu0 %v11104_v34 }
 0x13e   : > { %2373 = vmatmul.mubr.bf16.vlgmr.msra.gmra.mxu1 %v12133_v25  ;;  %v12285_v22 = vpop.f32.mrf.mxu1  ;;  %2309 = vmatprep.mubr.bf16.mxu0 %v14875_v0 }
 0x13f   : > { %2382 = vmatprep.mubr.bf16.mxu1 %v12137_v30  ;;  %9870 = vmatpush3.bf16.msra.mxu1 %v11088_v18 }
 0x140   : > { %v12289_v23 = vpop.f32.mrf.mxu1  ;;  %9871 = vmatprep.subr.bf16.mxu1 %v11089_v21  ;;  %v11106_v21 = vld [vmem:[#allocation7 + $0x608] ss:$36 sps:$4 sm:$0xff]  }
 0x142   : > { %v12291_v29 = vpop.f32.mrf.mxu1 }
 0x143   : > { %9872 = vmatpush3.bf16.msra.mxu1 %v11090_v27 }
 0x144   : > { %v12293_v31 = vpop.f32.mrf.mxu1  ;;  %9873 = vmatprep.subr.bf16.mxu1 %v11091_v28 }
 0x145   : > { %2310 = vmatmul.mubr.bf16.gmra.mxu0 %v12151_v44 }
 0x146   : > { %2383 = vmatmul.mubr.bf16.gmra.mxu1 %v12149_v43  ;;  %v12297_v38 = vpop.f32.mrf.mxu1  ;;  %2319 = vmatprep.mubr.bf16.mxu0 %v14875_v0 }
 0x147   : > { %2392 = vmatprep.mubr.bf16.mxu1 %v12153_v46  ;;  %9874 = vmatpush3.bf16.msra.mxu1 %v11092_v32 }
 0x148   : > { %v12301_v39 = vpop.f32.mrf.mxu1  ;;  %9875 = vmatprep.subr.bf16.mxu1 %v11093_v36 }
 0x14a   : > { %v12303_v42 = vpop.f32.mrf.mxu1 }
 0x14b   : > { %9876 = vmatpush3.bf16.msra.mxu1 %v11094_v40 }
 0x14c   : > { %v12305_v45 = vpop.f32.mrf.mxu1  ;;  %9877 = vmatprep.subr.bf16.mxu1 %v11095_v41 }
 0x14d   : > { %2320 = vmatmul.mubr.bf16.gmra.mxu0 %v12167_v63 }
 0x14e   : > { %2393 = vmatmul.mubr.bf16.gmra.mxu1 %v12165_v60  ;;  %v12309_v50 = vpop.f32.mrf.mxu1  ;;  %2329 = vmatprep.mubr.bf16.mxu0 %v14875_v0 }
 0x14f   : > { %2402 = vmatprep.mubr.bf16.mxu1 %v12169_v2  ;;  %9878 = vmatpush3.bf16.msra.mxu1 %v11096_v47 }
 0x150   : > { %v12313_v52 = vpop.f32.mrf.mxu1  ;;  %9879 = vmatprep.subr.bf16.mxu1 %v11097_v49 }
 0x152   : > { %v12315_v56 = vpop.f32.mrf.mxu1 }
 0x153   : > { %9880 = vmatpush3.bf16.msra.mxu1 %v11098_v54 }
 0x154   : > { %v12317_v57 = vpop.f32.mrf.mxu1  ;;  %9881 = vmatprep.subr.bf16.mxu1 %v11099_v55  ;;  %v11108_v55 = vld [vmem:[#allocation7 + $0x578] ss:$36 sps:$4 sm:$0xff]  }
 0x155   : > { %2330 = vmatmul.mubr.bf16.gmra.mxu0 %v12183_v17 }
 0x156   : > { %2403 = vmatmul.mubr.bf16.gmra.mxu1 %v12181_v16  ;;  %v12321_v1 = vpop.f32.mrf.mxu1  ;;  %2485 = vmatprep.mubr.bf16.mxu0 %v14875_v0 }
 0x157   : > { %2412 = vmatprep.mubr.bf16.mxu1 %v12185_v19  ;;  %9882 = vmatpush3.bf16.msra.mxu1 %v11100_v58 }
 0x158   : > { %v12325_v4 = vpop.f32.mrf.mxu1  ;;  %9883 = vmatprep.subr.bf16.mxu1 %v11101_v59 }
 0x15a   : > { %v12327_v7 = vpop.f32.mrf.mxu1 }
 0x15b   : > { %9884 = vmatpush3.bf16.msra.mxu1 %v11102_v6 }
 0x15c   : > { %v12329_v8 = vpop.f32.mrf.mxu1 }
 0x15d   : > { %v1696_v11 = vpop.f32.mrf.mxu0  ;;  %2486 = vmatmul.mubr.bf16.vlgmr.msra.gmra.mxu0 %v12100_v37 }
 0x15e   : > { %2413 = vmatmul.mubr.bf16.gmra.mxu1 %v12195_v33  ;;  %v12333_v13 = vpop.f32.mrf.mxu1  ;;  %2495 = vmatprep.mubr.bf16.mxu0 %v14875_v0  ;;  %v1810_v18 = vadd.f32 %v12285_v22, %v1696_v11 }
 0x15f   : > { %2422 = vmatprep.mubr.bf16.mxu1 %v12197_v35  ;;  %v1698_v14 = vpop.f32.mrf.mxu0  ;;  %10222 = vmatpush3.bf16.msra.mxu0 %v11104_v34  ;;  %v11107_v34 = vld [vmem:[#allocation7 + $0x5c0] ss:$36 sps:$4 sm:$0xff]  }
 0x160   : > { %v12337_v15 = vpop.f32.mrf.mxu1  ;;  %v1812_v20 = vadd.f32 %v12289_v23, %v1698_v14  ;;  %10223 = vmatprep.subr.bf16.mxu0 %v11105_v9 }
 0x161   : > { %v1700_v24 = vpop.f32.mrf.mxu0 }
 0x162   : > { %v12341_v27 = vpop.f32.mrf.mxu1  ;;  %v9661_v28 = vpack.c.bf16 %v1812_v20, %v1810_v18  ;;  %v1814_v40 = vadd.f32 %v12291_v29, %v1700_v24  ;;  %v11110_v20 = vld [vmem:[#allocation7 + $0x530] ss:$36 sps:$4 sm:$0xff]  }
 0x163   : > { %v1702_v32 = vpop.f32.mrf.mxu0  ;;  %10224 = vmatpush3.bf16.msra.mxu0 %v11105_v9 }
 0x164   : > { %v12343_v36 = vpop.f32.mrf.mxu1  ;;  %3208 = vst [vmem:[#allocation2] sm:$0xff] %v9661_v28  ;;  %v1816_v41 = vadd.f32 %v12293_v31, %v1702_v32  ;;  %10225 = vmatprep.subr.bf16.mxu0 %v11106_v21  ;;  %v11111_v32 = vld [vmem:[#allocation7 + $0x4e8] ss:$36 sps:$4 sm:$0xff]  }
 0x165   : > { %v1706_v22 = vpop.f32.mrf.mxu0  ;;  %2496 = vmatmul.mubr.bf16.gmra.mxu0 %v12106_v48 }
 0x166   : > { %2423 = vmatmul.mubr.bf16.gmra.mxu1 %v12207_v51  ;;  %v12349_v23 = vpop.f32.mrf.mxu1  ;;  %v9666_v47 = vpack.c.bf16 %v1816_v41, %v1814_v40  ;;  %2505 = vmatprep.mubr.bf16.mxu0 %v14875_v0  ;;  %v1820_v29 = vadd.f32 %v12297_v38, %v1706_v22 }
 0x167   : > { %2432 = vmatprep.mubr.bf16.mxu1 %v12209_v53  ;;  %v1708_v49 = vpop.f32.mrf.mxu0  ;;  %10226 = vmatpush3.bf16.msra.mxu0 %v11106_v21 }
 0x168   : > { %v12353_v54 = vpop.f32.mrf.mxu1  ;;  %3213 = vst [vmem:[#allocation2 + $0x24] sm:$0xff] %v9666_v47  ;;  %v1822_v31 = vadd.f32 %v12301_v39, %v1708_v49  ;;  %10227 = vmatprep.subr.bf16.mxu0 %v11107_v34 }
 0x169   : > { %v1710_v58 = vpop.f32.mrf.mxu0 }
 0x16a   : > { %v12357_v59 = vpop.f32.mrf.mxu1  ;;  %v9671_v6 = vpack.c.bf16 %v1822_v31, %v1820_v29  ;;  %v1824_v14 = vadd.f32 %v12303_v42, %v1710_v58  ;;  %v11113_v31 = vld [vmem:[#allocation7 + $0x4a0] ss:$36 sps:$4 sm:$0xff]  }
 0x16b   : > { %v1712_v9 = vpop.f32.mrf.mxu0  ;;  %10228 = vmatpush3.bf16.msra.mxu0 %v11107_v34 }
 0x16c   : > { %v12359_v11 = vpop.f32.mrf.mxu1  ;;  %3218 = vst [vmem:[#allocation2 + $0x48] sm:$0xff] %v9671_v6  ;;  %v1826_v18 = vadd.f32 %v12305_v45, %v1712_v9  ;;  %10229 = vmatprep.subr.bf16.mxu0 %v11108_v55 }
 0x16d   : > { %v1716_v38 = vpop.f32.mrf.mxu0  ;;  %2506 = vmatmul.mubr.bf16.gmra.mxu0 %v12116_v62 }
 0x16e   : > { %2433 = vmatmul.mubr.bf16.gmra.mxu1 %v12219_v3  ;;  %v12365_v39 = vpop.f32.mrf.mxu1  ;;  %v9676_v21 = vpack.c.bf16 %v1826_v18, %v1824_v14  ;;  %2515 = vmatprep.mubr.bf16.mxu0 %v14875_v0  ;;  %v1830_v42 = vadd.f32 %v12309_v50, %v1716_v38 }
 0x16f   : > { %2442 = vmatprep.mubr.bf16.mxu1 %v12221_v5  ;;  %v1718_v24 = vpop.f32.mrf.mxu0  ;;  %10230 = vmatpush3.bf16.msra.mxu0 %v11108_v55 }
 0x170   : > { %v12369_v28 = vpop.f32.mrf.mxu1  ;;  %3223 = vst [vmem:[#allocation2 + $0x6c] sm:$0xff] %v9676_v21  ;;  %v1832_v45 = vadd.f32 %v12313_v52, %v1718_v24  ;;  %10231 = vmatprep.subr.bf16.mxu0 %v11110_v20 }
 0x171   : > { %v1720_v40 = vpop.f32.mrf.mxu0 }
 0x172   : > { %v12373_v41 = vpop.f32.mrf.mxu1  ;;  %v9681_v34 = vpack.c.bf16 %v1832_v45, %v1830_v42  ;;  %v1834_v49 = vadd.f32 %v12315_v56, %v1720_v40 }
 0x173   : > { %v1722_v22 = vpop.f32.mrf.mxu0  ;;  %10232 = vmatpush3.bf16.msra.mxu0 %v11110_v20 }
 0x174   : > { %v12375_v47 = vpop.f32.mrf.mxu1  ;;  %3228 = vst [vmem:[#allocation2 + $0x90] sm:$0xff] %v9681_v34  ;;  %v1836_v29 = vadd.f32 %v12317_v57, %v1722_v22  ;;  %10233 = vmatprep.subr.bf16.mxu0 %v11111_v32 }
 0x175   : > { %v1726_v50 = vpop.f32.mrf.mxu0  ;;  %2516 = vmatmul.mubr.bf16.gmra.mxu0 %v12123_v10 }
 0x176   : > { %2443 = vmatmul.mubr.bf16.gmra.mxu1 %v12229_v12  ;;  %v12381_v52 = vpop.f32.mrf.mxu1  ;;  %v9686_v55 = vpack.c.bf16 %v1836_v29, %v1834_v49  ;;  %2525 = vmatprep.mubr.bf16.mxu0 %v14875_v0  ;;  %v1840_v56 = vadd.f32 %v12321_v1, %v1726_v50 }
 0x177   : > { %2598 = vmatprep.mubr.bf16.mxu1 %v12114_v61  ;;  %v1728_v58 = vpop.f32.mrf.mxu0  ;;  %10234 = vmatpush3.bf16.msra.mxu0 %v11111_v32 }
 0x178   : > { %v12385_v6 = vpop.f32.mrf.mxu1  ;;  %3233 = vst [vmem:[#allocation2 + $0xb4] sm:$0xff] %v9686_v55  ;;  %v1842_v57 = vadd.f32 %v12325_v4, %v1728_v58  ;;  %10235 = vmatprep.subr.bf16.mxu0 %v11113_v31 }
 0x179   : > { %v1730_v9 = vpop.f32.mrf.mxu0 }
 0x17a   : > { %v12389_v14 = vpop.f32.mrf.mxu1  ;;  %v9691_v18 = vpack.c.bf16 %v1842_v57, %v1840_v56  ;;  %v1844_v61 = vadd.f32 %v12327_v7, %v1730_v9 }
 0x17b   : > { %v1732_v20 = vpop.f32.mrf.mxu0  ;;  %10236 = vmatpush3.bf16.msra.mxu0 %v11113_v31 }
 0x17c   : > { %v12391_v38 = vpop.f32.mrf.mxu1  ;;  %3238 = vst [vmem:[#allocation2 + $0xd8] sm:$0xff] %v9691_v18  ;;  %v1846_v21 = vadd.f32 %v12329_v8, %v1732_v20 }
 0x17d   : > { %v1736_v24 = vpop.f32.mrf.mxu0  ;;  %2526 = vmatmul.mubr.bf16.gmra.mxu0 %v12135_v26 }
 0x17e   : > { %2599 = vmatmul.mubr.bf16.vlgmr.msra.gmra.mxu1 %v12133_v25  ;;  %v12397_v1 = vpop.f32.mrf.mxu1  ;;  %v9696_v4 = vpack.c.bf16 %v1846_v21, %v1844_v61  ;;  %2535 = vmatprep.mubr.bf16.mxu0 %v14875_v0  ;;  %v1850_v7 = vadd.f32 %v12333_v13, %v1736_v24 }
 0x17f   : > { %2606 = vmatprep.mubr.bf16.mxu1 %v12137_v30  ;;  %v1738_v42 = vpop.f32.mrf.mxu0 }
 0x180   : > { %v12401_v45 = vpop.f32.mrf.mxu1  ;;  %3243 = vst [vmem:[#allocation2 + $0xfc] sm:$0xff] %v9696_v4  ;;  %v1852_v8 = vadd.f32 %v12337_v15, %v1738_v42 }
 0x181   : > { %v1740_v32 = vpop.f32.mrf.mxu0 }
 0x182   : > { %v12405_v40 = vpop.f32.mrf.mxu1  ;;  %v9701_v34 = vpack.c.bf16 %v1852_v8, %v1850_v7  ;;  %v1854_v49 = vadd.f32 %v12341_v27, %v1740_v32 }
 0x183   : > { %v1742_v25 = vpop.f32.mrf.mxu0 }
 0x184   : > { %v12407_v22 = vpop.f32.mrf.mxu1  ;;  %3248 = vst [vmem:[#allocation2 + $0x120] sm:$0xff] %v9701_v34  ;;  %v1856_v30 = vadd.f32 %v12343_v36, %v1742_v25 }
 0x185   : > { %v1746_v29 = vpop.f32.mrf.mxu0  ;;  %2536 = vmatmul.mubr.bf16.gmra.mxu0 %v12151_v44 }
 0x186   : > { %2607 = vmatmul.mubr.bf16.gmra.mxu1 %v12149_v43  ;;  %v12413_v13 = vpop.f32.mrf.mxu1  ;;  %v9706_v15 = vpack.c.bf16 %v1856_v30, %v1854_v49  ;;  %2545 = vmatprep.mubr.bf16.mxu0 %v14875_v0  ;;  %v1860_v27 = vadd.f32 %v12349_v23, %v1746_v29 }
 0x187   : > { %2614 = vmatprep.mubr.bf16.mxu1 %v12153_v46  ;;  %v1748_v31 = vpop.f32.mrf.mxu0 }
 0x188   : > { %v12417_v50 = vpop.f32.mrf.mxu1  ;;  %3253 = vst [vmem:[#allocation2 + $0x144] sm:$0xff] %v9706_v15  ;;  %v1862_v36 = vadd.f32 %v12353_v54, %v1748_v31 }
 0x189   : > { %v1750_v55 = vpop.f32.mrf.mxu0 }
 0x18a   : > { %v12421_v58 = vpop.f32.mrf.mxu1  ;;  %v9711_v56 = vpack.c.bf16 %v1862_v36, %v1860_v27  ;;  %v1864_v9 = vadd.f32 %v12357_v59, %v1750_v55 }
 0x18b   : > { %v1752_v43 = vpop.f32.mrf.mxu0 }
 0x18c   : > { %v12423_v57 = vpop.f32.mrf.mxu1  ;;  %3258 = vst [vmem:[#allocation2 + $0x168] sm:$0xff] %v9711_v56  ;;  %v1866_v46 = vadd.f32 %v12359_v11, %v1752_v43 }
 0x18d   : > { %v1756_v18 = vpop.f32.mrf.mxu0  ;;  %2546 = vmatmul.mubr.bf16.gmra.mxu0 %v12167_v63 }
 0x18e   : > { %2615 = vmatmul.mubr.bf16.gmra.mxu1 %v12165_v60  ;;  %v12429_v23 = vpop.f32.mrf.mxu1  ;;  %v9716_v54 = vpack.c.bf16 %v1866_v46, %v1864_v9  ;;  %2555 = vmatprep.mubr.bf16.mxu0 %v14875_v0  ;;  %v1870_v59 = vadd.f32 %v12365_v39, %v1756_v18 }
 0x18f   : > { %2622 = vmatprep.mubr.bf16.mxu1 %v12169_v2  ;;  %v1758_v20 = vpop.f32.mrf.mxu0 }
 0x190   : > { %v12433_v61 = vpop.f32.mrf.mxu1  ;;  %3263 = vst [vmem:[#allocation2 + $0x18c] sm:$0xff] %v9716_v54  ;;  %v1872_v11 = vadd.f32 %v12369_v28, %v1758_v20 }
 0x191   : > { %v1760_v21 = vpop.f32.mrf.mxu0 }
 0x192   : > { %v12437_v24 = vpop.f32.mrf.mxu1  ;;  %v9721_v4 = vpack.c.bf16 %v1872_v11, %v1870_v59  ;;  %v1874_v7 = vadd.f32 %v12373_v41, %v1760_v21 }
 0x193   : > { %v1762_v60 = vpop.f32.mrf.mxu0 }
 0x194   : > { %v12439_v42 = vpop.f32.mrf.mxu1  ;;  %3268 = vst [vmem:[#allocation2 + $0x1b0] sm:$0xff] %v9721_v4  ;;  %v1876_v2 = vadd.f32 %v12375_v47, %v1762_v60 }
 0x195   : > { %v1766_v8 = vpop.f32.mrf.mxu0  ;;  %2556 = vmatmul.mubr.bf16.gmra.mxu0 %v12183_v17 }
 0x196   : > { %2623 = vmatmul.mubr.bf16.gmra.mxu1 %v12181_v16  ;;  %v12445_v39 = vpop.f32.mrf.mxu1  ;;  %v9726_v28 = vpack.c.bf16 %v1876_v2, %v1874_v7  ;;  %10237 = vmatprep.mubr.bf16.mxu0 %v12100_v37  ;;  %v1880_v41 = vadd.f32 %v12381_v52, %v1766_v8 }
 0x197   : > { %2630 = vmatprep.mubr.bf16.mxu1 %v12185_v19  ;;  %v1768_v32 = vpop.f32.mrf.mxu0 }
 0x198   : > { %v12449_v34 = vpop.f32.mrf.mxu1  ;;  %3273 = vst [vmem:[#allocation2 + $0x1d4] sm:$0xff] %v9726_v28  ;;  %v1882_v47 = vadd.f32 %v12385_v6, %v1768_v32 }
 0x199   : > { %v1770_v25 = vpop.f32.mrf.mxu0 }
 0x19a   : > { %v12453_v49 = vpop.f32.mrf.mxu1  ;;  %v9731_v30 = vpack.c.bf16 %v1882_v47, %v1880_v41  ;;  %v1884_v19 = vadd.f32 %v12389_v14, %v1770_v25 }
 0x19b   : > { %v1772_v16 = vpop.f32.mrf.mxu0 }
 0x19c   : > { %v12455_v29 = vpop.f32.mrf.mxu1  ;;  %3278 = vst [vmem:[#allocation2 + $0x1f8] sm:$0xff] %v9731_v30  ;;  %v1886_v37 = vadd.f32 %v12391_v38, %v1772_v16 }
 0x19d   : > { %v2035_v15 = vpop.f32.mrf.mxu0  ;;  %10238 = vmatmul.mubr.bf16.vlgmr.msra.gmra.mxu0 %v12106_v48 }
 0x19e   : > { %2631 = vmatmul.mubr.bf16.gmra.mxu1 %v12195_v33  ;;  %v12460_v31 = vpop.f32.mrf.mxu1  ;;  %v9736_v52 = vpack.c.bf16 %v1886_v37, %v1884_v19  ;;  %10241 = vmatprep.mubr.bf16.mxu0 %v12116_v62  ;;  %v2036_v14 = vadd.f32 %v2035_v15, %v12397_v1 }
 0x19f   : > { %2638 = vmatprep.mubr.bf16.mxu1 %v12197_v35  ;;  %v2037_v6 = vpop.f32.mrf.mxu0 }
 0x1a0   : > { %v12465_v27 = vpop.f32.mrf.mxu1  ;;  %3283 = vst [vmem:[#allocation2 + $0x21c] sm:$0xff] %v9736_v52  ;;  %v2038_v38 = vadd.f32 %v2037_v6, %v12401_v45 }
 0x1a1   : > { %v2039_v36 = vpop.f32.mrf.mxu0 }
 0x1a2   : > { %v12469_v55 = vpop.f32.mrf.mxu1  ;;  %v9662_v33 = vpack.c.bf16 %v2038_v38, %v2036_v14  ;;  %v2040_v48 = vadd.f32 %v2039_v36, %v12405_v40 }
 0x1a3   : > { %v2041_v56 = vpop.f32.mrf.mxu0 }
 0x1a4   : > { %v12471_v43 = vpop.f32.mrf.mxu1  ;;  %3209 = vst [vmem:[#allocation2 + $0x8] sm:$0xff] %v9662_v33  ;;  %v2042_v62 = vadd.f32 %v2041_v56, %v12407_v22 }
 0x1a5   : > { %v2045_v35 = vpop.f32.mrf.mxu0  ;;  %10242 = vmatmul.mubr.bf16.gmra.mxu0 %v12123_v10 }
 0x1a6   : > { %2639 = vmatmul.mubr.bf16.gmra.mxu1 %v12207_v51  ;;  %v12476_v9 = vpop.f32.mrf.mxu1  ;;  %v9667_v1 = vpack.c.bf16 %v2042_v62, %v2040_v48  ;;  %10245 = vmatprep.mubr.bf16.mxu0 %v12135_v26  ;;  %v2046_v40 = vadd.f32 %v2045_v35, %v12413_v13 }
 0x1a7   : > { %2646 = vmatprep.mubr.bf16.mxu1 %v12209_v53  ;;  %v2047_v45 = vpop.f32.mrf.mxu0 }
 0x1a8   : > { %v12481_v46 = vpop.f32.mrf.mxu1  ;;  %3214 = vst [vmem:[#allocation2 + $0x2c] sm:$0xff] %v9667_v1  ;;  %v2048_v22 = vadd.f32 %v2047_v45, %v12417_v50 }
 0x1a9   : > { %v2049_v18 = vpop.f32.mrf.mxu0 }
 0x1aa   : > { %v12485_v54 = vpop.f32.mrf.mxu1  ;;  %v9672_v51 = vpack.c.bf16 %v2048_v22, %v2046_v40  ;;  %v2050_v10 = vadd.f32 %v2049_v18, %v12421_v58 }
 0x1ab   : > { %v2051_v20 = vpop.f32.mrf.mxu0 }
 0x1ac   : > { %v12487_v59 = vpop.f32.mrf.mxu1  ;;  %3219 = vst [vmem:[#allocation2 + $0x50] sm:$0xff] %v9672_v51  ;;  %v2052_v26 = vadd.f32 %v2051_v20, %v12423_v57 }
 0x1ad   : > { %v2055_v53 = vpop.f32.mrf.mxu0  ;;  %10246 = vmatmul.mubr.bf16.gmra.mxu0 %v12151_v44 }
 0x1ae   : > { %2647 = vmatmul.mubr.bf16.gmra.mxu1 %v12219_v3  ;;  %v12492_v11 = vpop.f32.mrf.mxu1  ;;  %v9677_v13 = vpack.c.bf16 %v2052_v26, %v2050_v10  ;;  %10249 = vmatprep.mubr.bf16.mxu0 %v12167_v63  ;;  %v2056_v58 = vadd.f32 %v2055_v53, %v12429_v23 }
 0x1af   : > { %2654 = vmatprep.mubr.bf16.mxu1 %v12221_v5  ;;  %v2057_v50 = vpop.f32.mrf.mxu0  ;;  %v11103_v5 = vld [vmem:[#allocation2] ss:$36 sps:$4 sm:$0xff]  }
 0x1b0   : > { %v12497_v21 = vpop.f32.mrf.mxu1  ;;  %3224 = vst [vmem:[#allocation2 + $0x74] sm:$0xff] %v9677_v13  ;;  %v2058_v57 = vadd.f32 %v2057_v50, %v12433_v61 }
 0x1b1   : > { %v2059_v4 = vpop.f32.mrf.mxu0 }
 0x1b2   : > { %v12501_v60 = vpop.f32.mrf.mxu1  ;;  %v9682_v3 = vpack.c.bf16 %v2058_v57, %v2056_v58  ;;  %v2060_v44 = vadd.f32 %v2059_v4, %v12437_v24 }
 0x1b3   : > { %v2061_v7 = vpop.f32.mrf.mxu0 }
 0x1b4   : > { %v12503_v2 = vpop.f32.mrf.mxu1  ;;  %3229 = vst [vmem:[#allocation2 + $0x98] sm:$0xff] %v9682_v3  ;;  %v2062_v63 = vadd.f32 %v2061_v7, %v12439_v42 }
 0x1b5   : > { %v2065_v8 = vpop.f32.mrf.mxu0  ;;  %10250 = vmatmul.mubr.bf16.gmra.mxu0 %v12183_v17 }
 0x1b6   : > { %2655 = vmatmul.mubr.bf16.gmra.mxu1 %v12229_v12  ;;  %v12508_v23 = vpop.f32.mrf.mxu1  ;;  %v9687_v61 = vpack.c.bf16 %v2062_v63, %v2060_v44  ;;  %v2066_v24 = vadd.f32 %v2065_v8, %v12445_v39 }
 0x1b7   : > { %10269 = vmatprep.mubr.msk.bf16.mxu1 %vm14864_vm0, %v11103_v5  ;;  %v2067_v28 = vpop.f32.mrf.mxu0 }
 0x1b8   : > { %v12512_v32 = vpop.f32.mrf.mxu1  ;;  %3234 = vst [vmem:[#allocation2 + $0xbc] sm:$0xff] %v9687_v61  ;;  %v2068_v42 = vadd.f32 %v2067_v28, %v12449_v34 }
 0x1b9   : > { %v2069_v41 = vpop.f32.mrf.mxu0 }
 0x1ba   : > { %v12516_v47 = vpop.f32.mrf.mxu1  ;;  %v9692_v12 = vpack.c.bf16 %v2068_v42, %v2066_v24  ;;  %v2070_v17 = vadd.f32 %v2069_v41, %v12453_v49 }
 0x1bb   : > { %v2071_v25 = vpop.f32.mrf.mxu0 }
 0x1bc   : > { %v12518_v30 = vpop.f32.mrf.mxu1  ;;  %3239 = vst [vmem:[#allocation2 + $0xe0] sm:$0xff] %v9692_v12  ;;  %v2072_v16 = vadd.f32 %v2071_v25, %v12455_v29 }
 0x1bd   : > { %v2075_v19 = vpop.f32.mrf.mxu0 }
 0x1be   : > { %v12522_v37 = vpop.f32.mrf.mxu1  ;;  %v9697_v15 = vpack.c.bf16 %v2072_v16, %v2070_v17  ;;  %v2076_v34 = vadd.f32 %v2075_v19, %v12460_v31 }
 0x1bf   : > { %v2077_v52 = vpop.f32.mrf.mxu0 }
 0x1c0   : > { %v12524_v39 = vpop.f32.mrf.mxu1  ;;  %3244 = vst [vmem:[#allocation2 + $0x104] sm:$0xff] %v9697_v15  ;;  %v2078_v6 = vadd.f32 %v2077_v52, %v12465_v27 }
 0x1c1   : > { %v2079_v14 = vpop.f32.mrf.mxu0 }
 0x1c2   : > { %v12528_v38 = vpop.f32.mrf.mxu1  ;;  %v9702_v36 = vpack.c.bf16 %v2078_v6, %v2076_v34  ;;  %v2080_v29 = vadd.f32 %v2079_v14, %v12469_v55 }
 0x1c3   : > { %v2081_v33 = vpop.f32.mrf.mxu0 }
 0x1c4   : > { %v12530_v49 = vpop.f32.mrf.mxu1  ;;  %3249 = vst [vmem:[#allocation2 + $0x128] sm:$0xff] %v9702_v36  ;;  %v2082_v56 = vadd.f32 %v2081_v33, %v12471_v43 }
 0x1c5   : > { %v2085_v48 = vpop.f32.mrf.mxu0 }
 0x1c6   : > { %v12534_v62 = vpop.f32.mrf.mxu1  ;;  %v9707_v35 = vpack.c.bf16 %v2082_v56, %v2080_v29  ;;  %v2086_v27 = vadd.f32 %v2085_v48, %v12476_v9 }
 0x1c7   : > { %v2087_v1 = vpop.f32.mrf.mxu0 }
 0x1c8   : > { %v12536_v31 = vpop.f32.mrf.mxu1  ;;  %3254 = vst [vmem:[#allocation2 + $0x14c] sm:$0xff] %v9707_v35  ;;  %v2088_v45 = vadd.f32 %v2087_v1, %v12481_v46 }
 0x1c9   : > { %v2089_v40 = vpop.f32.mrf.mxu0 }
 0x1ca   : > { %v12540_v22 = vpop.f32.mrf.mxu1  ;;  %v9712_v18 = vpack.c.bf16 %v2088_v45, %v2086_v27  ;;  %v2090_v43 = vadd.f32 %v2089_v40, %v12485_v54 }
 0x1cb   : > { %v2091_v51 = vpop.f32.mrf.mxu0 }
 0x1cc   : > { %v12542_v55 = vpop.f32.mrf.mxu1  ;;  %3259 = vst [vmem:[#allocation2 + $0x170] sm:$0xff] %v9712_v18  ;;  %v2092_v20 = vadd.f32 %v2091_v51, %v12487_v59 }
 0x1cd   : > { %v2095_v10 = vpop.f32.mrf.mxu0 }
 0x1ce   : > { %v12546_v26 = vpop.f32.mrf.mxu1  ;;  %v9717_v53 = vpack.c.bf16 %v2092_v20, %v2090_v43  ;;  %v2096_v46 = vadd.f32 %v2095_v10, %v12492_v11 }
 0x1cf   : > { %v2097_v13 = vpop.f32.mrf.mxu0 }
 0x1d0   : > { %v12548_v9 = vpop.f32.mrf.mxu1  ;;  %3264 = vst [vmem:[#allocation2 + $0x194] sm:$0xff] %v9717_v53  ;;  %v2098_v50 = vadd.f32 %v2097_v13, %v12497_v21 }
 0x1d1   : > { %v2099_v58 = vpop.f32.mrf.mxu0 }
 0x1d2   : > { %v12552_v57 = vpop.f32.mrf.mxu1  ;;  %v9722_v4 = vpack.c.bf16 %v2098_v50, %v2096_v46  ;;  %v2100_v59 = vadd.f32 %v2099_v58, %v12501_v60 }
 0x1d3   : > { %v2101_v3 = vpop.f32.mrf.mxu0 }
 0x1d4   : > { %v12554_v54 = vpop.f32.mrf.mxu1  ;;  %3269 = vst [vmem:[#allocation2 + $0x1b8] sm:$0xff] %v9722_v4  ;;  %v2102_v7 = vadd.f32 %v2101_v3, %v12503_v2 }
 0x1d5   : > { %v2105_v44 = vpop.f32.mrf.mxu0 }
 0x1d6   : > { %v12558_v63 = vpop.f32.mrf.mxu1  ;;  %v9727_v5 = vpack.c.bf16 %v2102_v7, %v2100_v59  ;;  %v2106_v21 = vadd.f32 %v2105_v44, %v12508_v23 }
 0x1d7   : > { %v2107_v8 = vpop.f32.mrf.mxu0  ;;  %v11109_v11 = vld [vmem:[#allocation2 + $0x174] ss:$36 sps:$4 sm:$0xff]  }
 0x1d8   : > { %v12560_v61 = vpop.f32.mrf.mxu1  ;;  %3274 = vst [vmem:[#allocation2 + $0x1dc] sm:$0xff] %v9727_v5  ;;  %v2108_v28 = vadd.f32 %v2107_v8, %v12512_v32  ;;  %4145 = vrot.lane.b32.xlu0 %v11109_v11, %s11927_s21  ;;  %v11117_v7 = vld [vmem:[#allocation2 + $0x174] ss:$36 sps:$4 sm:$0xff]  }
 0x1d9   : > { %v2109_v24 = vpop.f32.mrf.mxu0 }
 0x1da   : > { %v12565_v60 = vpop.f32.mrf.mxu1  ;;  %v9732_v2 = vpack.c.bf16 %v2108_v28, %v2106_v21  ;;  %v2110_v12 = vadd.f32 %v2109_v24, %v12516_v47 }
 0x1db   : > { %v2111_v42 = vpop.f32.mrf.mxu0 }
 0x1dc   : > { %v12567_v41 = vpop.f32.mrf.mxu1  ;;  %3279 = vst [vmem:[#allocation2 + $0x200] sm:$0xff] %v9732_v2  ;;  %v2112_v25 = vadd.f32 %v2111_v42, %v12518_v30 }
 0x1dd   : > { %v2261_v17 = vpop.f32.mrf.mxu0 }
 0x1de   : > { %v12571_v16 = vpop.f32.mrf.mxu1  ;;  %v9737_v23 = vpack.c.bf16 %v2112_v25, %v2110_v12  ;;  %v2262_v32 = vadd.f32 %v2261_v17, %v12522_v37  ;;  %v3492_v25 = vsel %vm14864_vm0, %v11117_v7, 0  ;;  %v11118_v17 = vld [vmem:[#allocation2 + $0x12c] ss:$36 sps:$4 sm:$0xff]  }
 0x1df   : > { %v2263_v19 = vpop.f32.mrf.mxu0  ;;  %v11112_v15 = vld [vmem:[#allocation2 + $0x1bc] ss:$36 sps:$4 sm:$0xff]  }
 0x1e0   : > { %v12574_v52 = vpop.f32.mrf.mxu1  ;;  %3284 = vst [vmem:[#allocation2 + $0x224] sm:$0xff] %v9737_v23  ;;  %v2264_v34 = vadd.f32 %v2263_v19, %v12524_v39  ;;  %4147 = vrot.lane.b32.xlu1 %v11112_v15, %s11927_s21 }
 0x1e1   : > { %v2265_v6 = vpop.f32.mrf.mxu0 }
 0x1e2   : > { %v12578_v14 = vpop.f32.mrf.mxu1  ;;  %v9663_v47 = vpack.c.bf16 %v2264_v34, %v2262_v32  ;;  %v2266_v30 = vadd.f32 %v2265_v6, %v12528_v38 }
 0x1e3   : > { %v2267_v36 = vpop.f32.mrf.mxu0 }
 0x1e4   : > { %v12581_v33 = vpop.f32.mrf.mxu1  ;;  %3210 = vst [vmem:[#allocation2 + $0x10] sm:$0xff] %v9663_v47  ;;  %v2268_v37 = vadd.f32 %v2267_v36, %v12530_v49  ;;  %v11116_v49 = vld [vmem:[#allocation2 + $0x1bc] ss:$36 sps:$4 sm:$0xff]  }
 0x1e5   : > { %v2271_v29 = vpop.f32.mrf.mxu0  ;;  %v3495_v59 = vsel %vm14864_vm0, %v11116_v49, 0 }
 0x1e6   : > { %v12584_v56 = vpop.f32.mrf.mxu1  ;;  %v9668_v48 = vpack.c.bf16 %v2268_v37, %v2266_v30  ;;  %v2272_v39 = vadd.f32 %v2271_v29, %v12534_v62  ;;  %v3489_v29 = vsel %vm14864_vm0, %v11118_v17, 0 }
 0x1e7   : > { %v2273_v35 = vpop.f32.mrf.mxu0  ;;  %v11114_v1 = vld [vmem:[#allocation2 + $0x204] ss:$36 sps:$4 sm:$0xff]  }
 0x1e8   : > { %v12587_v27 = vpop.f32.mrf.mxu1  ;;  %3215 = vst [vmem:[#allocation2 + $0x34] sm:$0xff] %v9668_v48  ;;  %v2274_v45 = vadd.f32 %v2273_v35, %v12536_v31  ;;  %v11115_v38 = vld [vmem:[#allocation2 + $0x204] ss:$36 sps:$4 sm:$0xff]   ;;  %10669 = vmatprep.subr.msk.bf16.mxu1 %vm14864_vm0, %v11114_v1  ;;  %v3498_v18 = vsel %vm14864_vm0, %v11114_v1, 0 }
 0x1e9   : > { %v2275_v40 = vpop.f32.mrf.mxu0  ;;  %4149 = vrot.lane.b32.xlu0 %v11115_v38, %s11927_s21  ;;  %10254 = vmatpush3.bf16.xpose.msra.mxu1 %v3498_v18  ;;  %v11119_v48 = vld [vmem:[#allocation2 + $0xe4] ss:$36 sps:$4 sm:$0xff]  }
 0x1ea   : > { %v12592_v51 = vpop.f32.mrf.mxu1  ;;  %v9673_v43 = vpack.c.bf16 %v2274_v45, %v2272_v39  ;;  %v2276_v20 = vadd.f32 %v2275_v40, %v12540_v22  ;;  %10670 = vmatprep.subr.msk.bf16.mxu1 %vm14864_vm0, %v11116_v49 }
 0x1eb   : > { %v2277_v62 = vpop.f32.mrf.mxu0 }
 0x1ec   : > { %v12597_v10 = vpop.f32.mrf.mxu1  ;;  %3220 = vst [vmem:[#allocation2 + $0x58] sm:$0xff] %v9673_v43  ;;  %v2278_v31 = vadd.f32 %v2277_v62, %v12542_v55  ;;  %v3486_v62 = vsel %vm14864_vm0, %v11119_v48, 0 }
 0x1ed   : > { %v2281_v53 = vpop.f32.mrf.mxu0 }
 0x1ee   : > { %v12600_v13 = vpop.f32.mrf.mxu1  ;;  %v9678_v46 = vpack.c.bf16 %v2278_v31, %v2276_v20  ;;  %v2282_v50 = vadd.f32 %v2281_v53, %v12546_v26  ;;  %v11120_v31 = vld [vmem:[#allocation2 + $0x9c] ss:$36 sps:$4 sm:$0xff]  }
 0x1ef   : > { %v2283_v58 = vpop.f32.mrf.mxu0 }
 0x1f0   : > { %v12603_v4 = vpop.f32.mrf.mxu1  ;;  %3225 = vst [vmem:[#allocation2 + $0x7c] sm:$0xff] %v9678_v46  ;;  %v2284_v22 = vadd.f32 %v2283_v58, %v12548_v9 }
 0x1f1   : > { %v2285_v3 = vpop.f32.mrf.mxu0  ;;  %10256 = vmatpush3.bf16.xpose.msra.mxu1 %v3495_v59 }
 0x1f2   : > { %v12607_v44 = vpop.f32.mrf.mxu1  ;;  %v9683_v5 = vpack.c.bf16 %v2284_v22, %v2282_v50  ;;  %v2286_v55 = vadd.f32 %v2285_v3, %v12552_v57  ;;  %10671 = vmatprep.subr.msk.bf16.mxu1 %vm14864_vm0, %v11117_v7 }
 0x1f3   : > { %v2287_v8 = vpop.f32.mrf.mxu0 }
 0x1f4   : > { %v12611_v26 = vpop.f32.mrf.mxu1  ;;  %3230 = vst [vmem:[#allocation2 + $0xa0] sm:$0xff] %v9683_v5  ;;  %v2288_v11 = vadd.f32 %v2287_v8, %v12554_v54  ;;  %v3483_v8 = vsel %vm14864_vm0, %v11120_v31, 0 }
 0x1f5   : > { %v2291_v21 = vpop.f32.mrf.mxu0 }
 0x1f6   : > { %v12614_v9 = vpop.f32.mrf.mxu1  ;;  %v9688_v28 = vpack.c.bf16 %v2288_v11, %v2286_v55  ;;  %v2292_v24 = vadd.f32 %v2291_v21, %v12558_v63  ;;  %v11121_v11 = vld [vmem:[#allocation2 + $0x54] ss:$36 sps:$4 sm:$0xff]  }
 0x1f7   : > { %v2293_v2 = vpop.f32.mrf.mxu0 }
 0x1f8   : > { %v12617_v42 = vpop.f32.mrf.mxu1  ;;  %3235 = vst [vmem:[#allocation2 + $0xc4] sm:$0xff] %v9688_v28  ;;  %v2294_v57 = vadd.f32 %v2293_v2, %v12560_v61 }
 0x1f9   : > { %v2295_v12 = vpop.f32.mrf.mxu0  ;;  %10258 = vmatpush3.bf16.xpose.msra.mxu1 %v3492_v25 }
 0x1fa   : > { %v12621_v23 = vpop.f32.mrf.mxu1  ;;  %v9693_v32 = vpack.c.bf16 %v2294_v57, %v2292_v24  ;;  %v2296_v54 = vadd.f32 %v2295_v12, %v12565_v60  ;;  %10672 = vmatprep.subr.msk.bf16.mxu1 %vm14864_vm0, %v11118_v17 }
 0x1fb   : > { %v2297_v19 = vpop.f32.mrf.mxu0 }
 0x1fc   : > { %v12625_v63 = vpop.f32.mrf.mxu1  ;;  %3240 = vst [vmem:[#allocation2 + $0xe8] sm:$0xff] %v9693_v32  ;;  %v2298_v15 = vadd.f32 %v2297_v19, %v12567_v41  ;;  %v3480_v19 = vsel %vm14864_vm0, %v11121_v11, 0 }
 0x1fd   : > { %v2301_v34 = vpop.f32.mrf.mxu0 }
 0x1fe   : > { %v12628_v61 = vpop.f32.mrf.mxu1  ;;  %v9698_v6 = vpack.c.bf16 %v2298_v15, %v2296_v54  ;;  %v2302_v47 = vadd.f32 %v2301_v34, %v12571_v16  ;;  %v11122_v15 = vld [vmem:[#allocation2 + $0xc] ss:$36 sps:$4 sm:$0xff]  }
 0x1ff   : > { %v2303_v30 = vpop.f32.mrf.mxu0 }
 0x200   : > { %v12631_v36 = vpop.f32.mrf.mxu1  ;;  %3245 = vst [vmem:[#allocation2 + $0x10c] sm:$0xff] %v9698_v6  ;;  %v2304_v60 = vadd.f32 %v2303_v30, %v12574_v52 }
 0x201   : > { %v2305_v37 = vpop.f32.mrf.mxu0  ;;  %10260 = vmatpush3.bf16.xpose.msra.mxu1 %v3489_v29 }
 0x202   : > { %v12635_v39 = vpop.f32.mrf.mxu1  ;;  %v9703_v35 = vpack.c.bf16 %v2304_v60, %v2302_v47  ;;  %v2306_v41 = vadd.f32 %v2305_v37, %v12578_v14  ;;  %10673 = vmatprep.subr.msk.bf16.mxu1 %vm14864_vm0, %v11119_v48 }
 0x203   : > { %v2307_v1 = vpop.f32.mrf.mxu0 }
 0x204   : > { %v12639_v16 = vpop.f32.mrf.mxu1  ;;  %3250 = vst [vmem:[#allocation2 + $0x130] sm:$0xff] %v9703_v35  ;;  %v2308_v45 = vadd.f32 %v2307_v1, %v12581_v33  ;;  %v3477_v1 = vsel %vm14864_vm0, %v11122_v15, 0 }
 0x205   : > { %v2311_v38 = vpop.f32.mrf.mxu0 }
 0x206   : > { %v12642_v52 = vpop.f32.mrf.mxu1  ;;  %v9708_v40 = vpack.c.bf16 %v2308_v45, %v2306_v41  ;;  %v2312_v18 = vadd.f32 %v2311_v38, %v12584_v56 }
 0x207   : > { %v2313_v49 = vpop.f32.mrf.mxu0 }
 0x208   : > { %v12645_v43 = vpop.f32.mrf.mxu1  ;;  %3255 = vst [vmem:[#allocation2 + $0x154] sm:$0xff] %v9708_v40  ;;  %v2314_v14 = vadd.f32 %v2313_v49, %v12587_v27 }
 0x209   : > { %v2315_v20 = vpop.f32.mrf.mxu0  ;;  %10262 = vmatpush3.bf16.xpose.msra.mxu1 %v3486_v62 }
 0x20a   : > { %v12649_v53 = vpop.f32.mrf.mxu1  ;;  %v9713_v46 = vpack.c.bf16 %v2314_v14, %v2312_v18  ;;  %v2316_v33 = vadd.f32 %v2315_v20, %v12592_v51  ;;  %10674 = vmatprep.subr.msk.bf16.mxu1 %vm14864_vm0, %v11120_v31  ;;  %v11123_v31 = vld [vmem:[#allocation2 + $0x48] ss:$36 sps:$4 sm:$0xff]  }
 0x20b   : > { %v2317_v50 = vpop.f32.mrf.mxu0 }
 0x20c   : > { %v12653_v56 = vpop.f32.mrf.mxu1  ;;  %3260 = vst [vmem:[#allocation2 + $0x178] sm:$0xff] %v9713_v46  ;;  %v2318_v58 = vadd.f32 %v2317_v50, %v12597_v10 }
 0x20d   : > { %v2321_v22 = vpop.f32.mrf.mxu0 }
 0x20e   : > { %v12656_v27 = vpop.f32.mrf.mxu1  ;;  %v9718_v3 = vpack.c.bf16 %v2318_v58, %v2316_v33  ;;  %v2322_v59 = vadd.f32 %v2321_v22, %v12600_v13  ;;  %v11124_v33 = vld [vmem:[#allocation2 + $0x90] ss:$36 sps:$4 sm:$0xff]  }
 0x20f   : > { %v2323_v7 = vpop.f32.mrf.mxu0 }
 0x210   : > { %v12659_v5 = vpop.f32.mrf.mxu1  ;;  %3265 = vst [vmem:[#allocation2 + $0x19c] sm:$0xff] %v9718_v3  ;;  %v2324_v51 = vadd.f32 %v2323_v7, %v12603_v4 }
 0x211   : > { %v2325_v55 = vpop.f32.mrf.mxu0  ;;  %10264 = vmatpush3.bf16.xpose.msra.mxu1 %v3483_v8 }
 0x212   : > { %v12663_v21 = vpop.f32.mrf.mxu1  ;;  %v9723_v28 = vpack.c.bf16 %v2324_v51, %v2322_v59  ;;  %v2326_v10 = vadd.f32 %v2325_v55, %v12607_v44  ;;  %10675 = vmatprep.subr.msk.bf16.mxu1 %vm14864_vm0, %v11121_v11  ;;  %v11125_v11 = vld [vmem:[#allocation2 + $0xd8] ss:$36 sps:$4 sm:$0xff]  }
 0x213   : > { %v2327_v24 = vpop.f32.mrf.mxu0 }
 0x214   : > { %v12667_v13 = vpop.f32.mrf.mxu1  ;;  %3270 = vst [vmem:[#allocation2 + $0x1c0] sm:$0xff] %v9723_v28  ;;  %v2328_v2 = vadd.f32 %v2327_v24, %v12611_v26 }
 0x215   : > { %v2331_v57 = vpop.f32.mrf.mxu0 }
 0x216   : > { %v12670_v4 = vpop.f32.mrf.mxu1  ;;  %v9728_v12 = vpack.c.bf16 %v2328_v2, %v2326_v10  ;;  %v2332_v25 = vadd.f32 %v2331_v57, %v12614_v9  ;;  %v11126_v10 = vld [vmem:[#allocation2 + $0x120] ss:$36 sps:$4 sm:$0xff]  }
 0x217   : > { %v2333_v17 = vpop.f32.mrf.mxu0 }
 0x218   : > { %v12673_v32 = vpop.f32.mrf.mxu1  ;;  %3275 = vst [vmem:[#allocation2 + $0x1e4] sm:$0xff] %v9728_v12  ;;  %v2334_v44 = vadd.f32 %v2333_v17, %v12617_v42 }
 0x219   : > { %v2335_v54 = vpop.f32.mrf.mxu0  ;;  %10266 = vmatpush3.bf16.xpose.msra.mxu1 %v3480_v19 }
 0x21a   : > { %v12677_v34 = vpop.f32.mrf.mxu1  ;;  %v9733_v6 = vpack.c.bf16 %v2334_v44, %v2332_v25  ;;  %v2336_v26 = vadd.f32 %v2335_v54, %v12621_v23  ;;  %10676 = vmatprep.subr.msk.bf16.mxu1 %vm14864_vm0, %v11122_v15  ;;  %v11127_v15 = vld [vmem:[#allocation2 + $0x168] ss:$36 sps:$4 sm:$0xff]  }
 0x21b   : > { %v2337_v47 = vpop.f32.mrf.mxu0 }
 0x21c   : > { %v12681_v9 = vpop.f32.mrf.mxu1  ;;  %3280 = vst [vmem:[#allocation2 + $0x208] sm:$0xff] %v9733_v6  ;;  %v2338_v30 = vadd.f32 %v2337_v47, %v12625_v63 }
 0x21d   : > { %v2487_v60 = vpop.f32.mrf.mxu0 }
 0x21e   : > { %v12684_v42 = vpop.f32.mrf.mxu1  ;;  %v9738_v37 = vpack.c.bf16 %v2338_v30, %v2336_v26  ;;  %v2488_v29 = vadd.f32 %v2487_v60, %v12628_v61  ;;  %v11128_v26 = vld [vmem:[#allocation2 + $0x1b0] ss:$36 sps:$4 sm:$0xff]  }
 0x21f   : > { %v2489_v48 = vpop.f32.mrf.mxu0 }
 0x220   : > { %v12687_v35 = vpop.f32.mrf.mxu1  ;;  %3285 = vst [vmem:[#allocation2 + $0x22c] sm:$0xff] %v9738_v37  ;;  %v2490_v23 = vadd.f32 %v2489_v48, %v12631_v36 }
 0x221   : > { %v2491_v41 = vpop.f32.mrf.mxu0  ;;  %10268 = vmatpush3.bf16.xpose.msra.mxu1 %v3477_v1 }
 0x222   : > { %v12691_v45 = vpop.f32.mrf.mxu1  ;;  %v9664_v38 = vpack.c.bf16 %v2490_v23, %v2488_v29  ;;  %v2492_v63 = vadd.f32 %v2491_v41, %v12635_v39 }
 0x223   : > { %v2493_v40 = vpop.f32.mrf.mxu0 }
 0x224   : > { %v12694_v18 = vpop.f32.mrf.mxu1  ;;  %3211 = vst [vmem:[#allocation2 + $0x18] sm:$0xff] %v9664_v38  ;;  %v2494_v61 = vadd.f32 %v2493_v40, %v12639_v16  ;;  %v11129_v38 = vld [vmem:[#allocation2 + $0x1f8] ss:$36 sps:$4 sm:$0xff]  }
 0x225   : > { %v2497_v49 = vpop.f32.mrf.mxu0 }
 0x226   : > { %v12697_v14 = vpop.f32.mrf.mxu1  ;;  %v9669_v20 = vpack.c.bf16 %v2494_v61, %v2492_v63  ;;  %v2498_v36 = vadd.f32 %v2497_v49, %v12642_v52 }
 0x227   : > { %v2499_v62 = vpop.f32.mrf.mxu0 }
 0x228   : > { %v12700_v46 = vpop.f32.mrf.mxu1  ;;  %3216 = vst [vmem:[#allocation2 + $0x3c] sm:$0xff] %v9669_v20  ;;  %v2500_v39 = vadd.f32 %v2499_v62, %v12645_v43  ;;  %10270 = vmatmul.mubr.msk.bf16.vlgmr.msra.gmra.mxu1 %vm14864_vm0, %v11123_v31 }
 0x229   : > { %v2501_v50 = vpop.f32.mrf.mxu0  ;;  %10273 = vmatprep.mubr.msk.bf16.mxu1 %vm14864_vm0, %v11124_v33 }
 0x22a   : > { %v12704_v58 = vpop.f32.mrf.mxu1  ;;  %v9674_v16 = vpack.c.bf16 %v2500_v39, %v2498_v36  ;;  %v2502_v22 = vadd.f32 %v2501_v50, %v12649_v53 }
 0x22b   : > { %v2503_v3 = vpop.f32.mrf.mxu0 }
 0x22c   : > { %v12708_v52 = vpop.f32.mrf.mxu1  ;;  %3221 = vst [vmem:[#allocation2 + $0x60] sm:$0xff] %v9674_v16  ;;  %v2504_v59 = vadd.f32 %v2503_v3, %v12653_v56 }
 0x22d   : > { %v2507_v7 = vpop.f32.mrf.mxu0 }
 0x22e   : > { %v12711_v51 = vpop.f32.mrf.mxu1  ;;  %v9679_v43 = vpack.c.bf16 %v2504_v59, %v2502_v22  ;;  %v2508_v55 = vadd.f32 %v2507_v7, %v12656_v27 }
 0x22f   : > { %v2509_v8 = vpop.f32.mrf.mxu0 }
 0x230   : > { %v12714_v28 = vpop.f32.mrf.mxu1  ;;  %3226 = vst [vmem:[#allocation2 + $0x84] sm:$0xff] %v9679_v43  ;;  %v2510_v53 = vadd.f32 %v2509_v8, %v12659_v5  ;;  %10274 = vmatmul.mubr.msk.bf16.gmra.mxu1 %vm14864_vm0, %v11125_v11 }
 0x231   : > { %v2511_v24 = vpop.f32.mrf.mxu0  ;;  %10277 = vmatprep.mubr.msk.bf16.mxu1 %vm14864_vm0, %v11126_v10 }
 0x232   : > { %v12718_v2 = vpop.f32.mrf.mxu1  ;;  %v9684_v56 = vpack.c.bf16 %v2510_v53, %v2508_v55  ;;  %v2512_v57 = vadd.f32 %v2511_v24, %v12663_v21 }
 0x233   : > { %v2513_v12 = vpop.f32.mrf.mxu0 }
 0x234   : > { %v12722_v27 = vpop.f32.mrf.mxu1  ;;  %3231 = vst [vmem:[#allocation2 + $0xa8] sm:$0xff] %v9684_v56  ;;  %v2514_v25 = vadd.f32 %v2513_v12, %v12667_v13 }
 0x235   : > { %v2517_v17 = vpop.f32.mrf.mxu0 }
 0x236   : > { %v12725_v44 = vpop.f32.mrf.mxu1  ;;  %v9689_v5 = vpack.c.bf16 %v2514_v25, %v2512_v57  ;;  %v2518_v54 = vadd.f32 %v2517_v17, %v12670_v4 }
 0x237   : > { %v2519_v19 = vpop.f32.mrf.mxu0 }
 0x238   : > { %v12728_v6 = vpop.f32.mrf.mxu1  ;;  %3236 = vst [vmem:[#allocation2 + $0xcc] sm:$0xff] %v9689_v5  ;;  %v2520_v21 = vadd.f32 %v2519_v19, %v12673_v32  ;;  %10278 = vmatmul.mubr.msk.bf16.gmra.mxu1 %vm14864_vm0, %v11127_v15 }
 0x239   : > { %v2521_v47 = vpop.f32.mrf.mxu0  ;;  %10281 = vmatprep.mubr.msk.bf16.mxu1 %vm14864_vm0, %v11128_v26 }
 0x23a   : > { %v12732_v30 = vpop.f32.mrf.mxu1  ;;  %v9694_v13 = vpack.c.bf16 %v2520_v21, %v2518_v54  ;;  %v2522_v60 = vadd.f32 %v2521_v47, %v12677_v34 }
 0x23b   : > { %v2523_v37 = vpop.f32.mrf.mxu0 }
 0x23c   : > { %v12736_v4 = vpop.f32.mrf.mxu1  ;;  %3241 = vst [vmem:[#allocation2 + $0xf0] sm:$0xff] %v9694_v13  ;;  %v2524_v29 = vadd.f32 %v2523_v37, %v12681_v9 }
 0x23d   : > { %v2527_v48 = vpop.f32.mrf.mxu0 }
 0x23e   : > { %v12739_v23 = vpop.f32.mrf.mxu1  ;;  %v9699_v32 = vpack.c.bf16 %v2524_v29, %v2522_v60  ;;  %v2528_v41 = vadd.f32 %v2527_v48, %v12684_v42 }
 0x23f   : > { %v2529_v1 = vpop.f32.mrf.mxu0 }
 0x240   : > { %v9886_v63 = vpop.f32.mrf.mxu1  ;;  %3246 = vst [vmem:[#allocation2 + $0x114] sm:$0xff] %v9699_v32  ;;  %v2530_v34 = vadd.f32 %v2529_v1, %v12687_v35  ;;  %10282 = vmatmul.mubr.msk.bf16.gmra.mxu1 %vm14864_vm0, %v11129_v38 }
 0x241   : > { %v2531_v40 = vpop.f32.mrf.mxu0  ;;  %v9887_v37 = vadd.f32 %v9886_v63, %v12739_v23 }
 0x242   : > { %v12744_v61 = vpop.f32.mrf.mxu1  ;;  %v9704_v49 = vpack.c.bf16 %v2530_v34, %v2528_v41  ;;  %v2532_v9 = vadd.f32 %v2531_v40, %v12691_v45 }
 0x243   : > { %v2533_v20 = vpop.f32.mrf.mxu0 }
 0x244   : > { %v9889_v36 = vpop.f32.mrf.mxu1  ;;  %3251 = vst [vmem:[#allocation2 + $0x138] sm:$0xff] %v9704_v49  ;;  %v2534_v62 = vadd.f32 %v2533_v20, %v12694_v18 }
 0x245   : > { %v2537_v42 = vpop.f32.mrf.mxu0  ;;  %v9890_v34 = vadd.f32 %v9889_v36, %v12744_v61 }
 0x246   : > { %v9891_v31 = vpop.f32.mrf.mxu1  ;;  %v9709_v39 = vpack.c.bf16 %v2534_v62, %v2532_v9  ;;  %v2538_v33 = vadd.f32 %v2537_v42, %v12697_v14 }
 0x247   : > { %v2539_v50 = vpop.f32.mrf.mxu0 }
 0x248   : > { %v9892_v35 = vpop.f32.mrf.mxu1  ;;  %3256 = vst [vmem:[#allocation2 + $0x15c] sm:$0xff] %v9709_v39  ;;  %v2540_v16 = vadd.f32 %v2539_v50, %v12700_v46 }
 0x249   : > { %v2541_v22 = vpop.f32.mrf.mxu0  ;;  %v9893_v47 = vadd.f32 %v9892_v35, %v9891_v31 }
 0x24a   : > { %v9894_v3 = vpop.f32.mrf.mxu1  ;;  %v9714_v59 = vpack.c.bf16 %v2540_v16, %v2538_v33  ;;  %v2542_v45 = vadd.f32 %v2541_v22, %v12704_v58 }
 0x24b   : > { %v2543_v7 = vpop.f32.mrf.mxu0 }
 0x24c   : > { %3261 = vst [vmem:[#allocation2 + $0x180] sm:$0xff] %v9714_v59  ;;  %v2544_v43 = vadd.f32 %v2543_v7, %v12708_v52  ;;  %v9895_v18 = vpop.f32.mrf.mxu1 }
 0x24d   : > { %v2547_v55 = vpop.f32.mrf.mxu0  ;;  %v9896_v41 = vadd.f32 %v9895_v18, %v9894_v3 }
 0x24e   : > { %v9719_v8 = vpack.c.bf16 %v2544_v43, %v2542_v45  ;;  %v2548_v11 = vadd.f32 %v2547_v55, %v12711_v51  ;;  %v9897_v14 = vpop.f32.mrf.mxu1 }
 0x24f   : > { %v2549_v53 = vpop.f32.mrf.mxu0 }
 0x250   : > { %3266 = vst [vmem:[#allocation2 + $0x1a4] sm:$0xff] %v9719_v8  ;;  %v2550_v10 = vadd.f32 %v2549_v53, %v12714_v28  ;;  %v9898_v46 = vpop.f32.mrf.mxu1 }
 0x251   : > { %v2551_v24 = vpop.f32.mrf.mxu0  ;;  %v9899_v31 = vadd.f32 %v9898_v46, %v9897_v14 }
 0x252   : > { %v9724_v56 = vpack.c.bf16 %v2550_v10, %v2548_v11  ;;  %v2552_v57 = vadd.f32 %v2551_v24, %v12718_v2  ;;  %v9900_v58 = vpop.f32.mrf.mxu1 }
 0x253   : > { %v2553_v12 = vpop.f32.mrf.mxu0 }
 0x254   : > { %3271 = vst [vmem:[#allocation2 + $0x1c8] sm:$0xff] %v9724_v56  ;;  %v2554_v52 = vadd.f32 %v2553_v12, %v12722_v27  ;;  %v9901_v25 = vpop.f32.mrf.mxu1 }
 0x255   : > { %v2557_v17 = vpop.f32.mrf.mxu0  ;;  %v9902_v45 = vadd.f32 %v9901_v25, %v9900_v58 }
 0x256   : > { %v9729_v5 = vpack.c.bf16 %v2554_v52, %v2552_v57  ;;  %v2558_v51 = vadd.f32 %v2557_v17, %v12725_v44  ;;  %v9903_v54 = vpop.f32.mrf.mxu1 }
 0x257   : > { %v2559_v19 = vpop.f32.mrf.mxu0  ;;  %v11132_v53 = vld [vmem:[#allocation2 + $0x180] ss:$36 sps:$4 sm:$0xff]  }
 0x258   : > { %3276 = vst [vmem:[#allocation2 + $0x1ec] sm:$0xff] %v9729_v5  ;;  %v2560_v28 = vadd.f32 %v2559_v19, %v12728_v6  ;;  %v9904_v15 = vpop.f32.mrf.mxu1  ;;  %v11133_v5 = vld [vmem:[#allocation2 + $0x138] ss:$36 sps:$4 sm:$0xff]  }
 0x259   : > { %v2561_v21 = vpop.f32.mrf.mxu0 }
 0x25a   : > { %v9734_v26 = vpack.c.bf16 %v2560_v28, %v2558_v51  ;;  %v2562_v2 = vadd.f32 %v2561_v21, %v12732_v30  ;;  %v9906_v13 = vpop.f32.mrf.mxu1 }
 0x25b   : > { %v2563_v60 = vpop.f32.mrf.mxu0 }
 0x25c   : > { %3281 = vst [vmem:[#allocation2 + $0x210] sm:$0xff] %v9734_v26  ;;  %v2564_v27 = vadd.f32 %v2563_v60, %v12736_v4  ;;  %v9907_v29 = vpop.f32.mrf.mxu1  ;;  %v9905_v4 = vadd.f32 %v9904_v15, %v9903_v54 }
 0x25d   : > { %v10239_v44 = vpop.f32.mrf.mxu0  ;;  %v9908_v61 = vadd.f32 %v9907_v29, %v9906_v13  ;;  %v11134_v13 = vld [vmem:[#allocation2 + $0xf0] ss:$36 sps:$4 sm:$0xff]  }
 0x25e   : > { %v9739_v48 = vpack.c.bf16 %v2564_v27, %v2562_v2  ;;  %v2706_v32 = vadd.f32 %v10239_v44, %v9893_v47  ;;  %v9909_v1 = vpop.f32.mrf.mxu1 }
 0x25f   : > { %v2697_v6 = vpop.f32.mrf.mxu0  ;;  %v11131_v50 = vld [vmem:[#allocation2 + $0x1c8] ss:$36 sps:$4 sm:$0xff]  }
 0x260   : > { %3286 = vst [vmem:[#allocation2 + $0x234] sm:$0xff] %v9739_v48  ;;  %v2698_v38 = vadd.f32 %v9887_v37, %v2697_v6  ;;  %v9675_v30 = vpack.c.bf16 %v2706_v32, %v2706_v32  ;;  %v9910_v40 = vpop.f32.mrf.mxu1 }
 0x261   : > { %v10240_v49 = vpop.f32.mrf.mxu0  ;;  %v9911_v56 = vadd.f32 %v9910_v40, %v9909_v1  ;;  %v11135_v1 = vld [vmem:[#allocation2 + $0xa8] ss:$36 sps:$4 sm:$0xff]  }
 0x262   : > { %v9665_v9 = vpack.c.bf16 %v2698_v38, %v2698_v38  ;;  %3222 = vst [vmem:[#allocation2 + $0x68] sm:$0xf] %v9675_v30  ;;  %v2709_v20 = vadd.f32 %v10240_v49, %v9896_v41  ;;  %v9912_v62 = vpop.f32.mrf.mxu1 }
 0x263   : > { %v2700_v23 = vpop.f32.mrf.mxu0 }
 0x264   : > { %3212 = vst [vmem:[#allocation2 + $0x20] sm:$0xf] %v9665_v9  ;;  %v2701_v63 = vadd.f32 %v9890_v34, %v2700_v23  ;;  %v9680_v42 = vpack.c.bf16 %v2709_v20, %v2709_v20  ;;  %v9913_v39 = vpop.f32.mrf.mxu1 }
 0x265   : > { %v10243_v33 = vpop.f32.mrf.mxu0  ;;  %v9914_v19 = vadd.f32 %v9913_v39, %v9912_v62 }
 0x266   : > { %v9670_v35 = vpack.c.bf16 %v2701_v63, %v2701_v63  ;;  %3227 = vst [vmem:[#allocation2 + $0x8c] sm:$0xf] %v9680_v42  ;;  %v2722_v16 = vadd.f32 %v10243_v33, %v9905_v4  ;;  %v9915_v36 = vpop.f32.mrf.mxu1  ;;  %v11136_v4 = vld [vmem:[#allocation2 + $0x60] ss:$36 sps:$4 sm:$0xff]  }
 0x267   : > { %v11130_v22 = vld [vmem:[#allocation2 + $0x210] ss:$36 sps:$4 sm:$0xff]   ;;  %v2713_v3 = vpop.f32.mrf.mxu0 }
 0x268   : > { %3217 = vst [vmem:[#allocation2 + $0x44] sm:$0xf] %v9670_v35  ;;  %v2714_v59 = vadd.f32 %v9899_v31, %v2713_v3  ;;  %v9695_v7 = vpack.c.bf16 %v2722_v16, %v2722_v16  ;;  %v9916_v43 = vpop.f32.mrf.mxu1  ;;  %10285 = vmatprep.subr.bf16.mxu0 %v11130_v22  ;;  %v11137_v35 = vld [vmem:[#allocation2 + $0x18] ss:$36 sps:$4 sm:$0xff]  }
 0x269   : > { %v10244_v18 = vpop.f32.mrf.mxu0  ;;  %10286 = vmatpush3.bf16.msra.mxu0 %v11130_v22  ;;  %v9917_v11 = vadd.f32 %v9916_v43, %v9915_v36  ;;  %v3288_v22 = vlaneseq }
 0x26a   : > { %v9685_v55 = vpack.c.bf16 %v2714_v59, %v2714_v59  ;;  %3242 = vst [vmem:[#allocation2 + $0xf8] sm:$0xf] %v9695_v7  ;;  %v2725_v8 = vadd.f32 %v10244_v18, %v9908_v61  ;;  %v9918_v14 = vpop.f32.mrf.mxu1  ;;  %10287 = vmatprep.subr.bf16.mxu0 %v11131_v50  ;;  %v12762_v61 = vpop.permute.xlu0 %4145  ;;  %v14944_v7 = vmov 0 }
 0x26b   : > { %v2716_v10 = vpop.f32.mrf.mxu0  ;;  %v12768_v3 = vshrl.u32 %v3288_v22, 7 }
 0x26c   : > { %3232 = vst [vmem:[#allocation2 + $0xb0] sm:$0xf] %v9685_v55  ;;  %v2717_v46 = vadd.f32 %v9902_v45, %v2716_v10  ;;  %v9700_v24 = vpack.c.bf16 %v2725_v8, %v2725_v8  ;;  %v9919_v57 = vpop.f32.mrf.mxu1  ;;  %v12771_v45 = vand.u32 127, %v3288_v22  ;;  %v14947_v55 = vmov 0 }
 0x26d   : > { %v10247_v12 = vpop.f32.mrf.mxu0  ;;  %10288 = vmatpush3.bf16.msra.mxu0 %v11131_v50  ;;  %v9920_v25 = vadd.f32 %v9919_v57, %v9918_v14  ;;  %14943 = vst [vmem:[#allocation14_spill] sm:$0xff] %v12768_v3  ;;  %v3291_v59 = vadd.s32 16, %v12768_v3  ;;  %v3292_v43 = vadd.s32 24, %v12768_v3  ;;  %v3290_v8 = vadd.s32 8, %v12768_v3 }
 0x26e   : > { %v9690_v58 = vpack.c.bf16 %v2717_v46, %v2717_v46  ;;  %3247 = vst [vmem:[#allocation2 + $0x11c] sm:$0xf] %v9700_v24  ;;  %v2738_v52 = vadd.f32 %v10247_v12, %v9917_v11  ;;  %v9921_v17 = vpop.f32.mrf.mxu1  ;;  %10289 = vmatprep.subr.bf16.mxu0 %v11132_v53  ;;  %v12764_v36 = vpop.permute.xlu0 %4149  ;;  %vm12781_vm2 = vcmp.le.s32.totalorder %v12771_v45, %v12768_v3  ;;  %v3295_v10 = vadd.s32 48, %v12768_v3 }
 0x26f   : > { %v2729_v51 = vpop.f32.mrf.mxu0  ;;  %vm12774_vm1 = vcmp.le.s32.totalorder %v12771_v45, %v3291_v59  ;;  %v14948_v55 = vsel %vm12781_vm2, 4294967295, %v14947_v55  ;;  %vm12792_vm3 = vcmp.le.s32.totalorder %v12771_v45, %v3292_v43  ;;  %vm12803_vm4 = vcmp.le.s32.totalorder %v12771_v45, %v3290_v8  ;;  %v11140_v43 = vld [vmem:[#allocation2 + $0x48] ss:$36 sps:$4 sm:$0xff]  }
 0x270   : > { %3237 = vst [vmem:[#allocation2 + $0xd4] sm:$0xf] %v9690_v58  ;;  %v2730_v54 = vadd.f32 %v9911_v56, %v2729_v51  ;;  %v9715_v28 = vpack.c.bf16 %v2738_v52, %v2738_v52  ;;  %v9922_v15 = vpop.f32.mrf.mxu1  ;;  %v14945_v7 = vsel %vm12774_vm1, 4294967295, %v14944_v7  ;;  %14949 = vst [vmem:[#allocation16_spill] sm:$0xff] %v14948_v55  ;;  %v14953_v56 = vmov 0 }
 0x271   : > { %v10248_v21 = vpop.f32.mrf.mxu0  ;;  %10290 = vmatpush3.bf16.msra.mxu0 %v11132_v53  ;;  %v9923_v29 = vadd.f32 %v9922_v15, %v9921_v17  ;;  %14946 = vst [vmem:[#allocation15_spill] sm:$0xff] %v14945_v7  ;;  %v14950_v53 = vmov 0  ;;  %v14954_v56 = vsel %vm12803_vm4, 4294967295, %v14953_v56  ;;  %vm12813_vm5 = vcmp.le.s32.totalorder %v12771_v45, %v3295_v10  ;;  %v11141_v10 = vld [vmem:[#allocation2 + $0xd8] ss:$36 sps:$4 sm:$0xff]  }
 0x272   : > { %v9705_v26 = vpack.c.bf16 %v2730_v54, %v2730_v54  ;;  %3262 = vst [vmem:[#allocation2 + $0x188] sm:$0xf] %v9715_v28  ;;  %v2741_v2 = vadd.f32 %v10248_v21, %v9920_v25  ;;  %v9924_v47 = vpop.f32.mrf.mxu1  ;;  %10291 = vmatprep.subr.bf16.mxu0 %v11133_v5  ;;  %v14951_v53 = vsel %vm12792_vm3, 4294967295, %v14950_v53  ;;  %14955 = vst [vmem:[#allocation18_spill] sm:$0xff] %v14954_v56  ;;  %v14956_v58 = vmov 0 }
 0x273   : > { %v2732_v60 = vpop.f32.mrf.mxu0  ;;  %14952 = vst [vmem:[#allocation17_spill] sm:$0xff] %v14951_v53  ;;  %v14957_v58 = vsel %vm12813_vm5, 4294967295, %v14956_v58  ;;  %v3293_v52 = vadd.s32 32, %v12768_v3  ;;  %v14959_v54 = vmov 0  ;;  %v3297_v22 = vadd.s32 64, %v12768_v3 }
 0x274   : > { %3252 = vst [vmem:[#allocation2 + $0x140] sm:$0xf] %v9705_v26  ;;  %v2733_v27 = vadd.f32 %v9914_v19, %v2732_v60  ;;  %v9720_v37 = vpack.c.bf16 %v2741_v2, %v2741_v2  ;;  %v9925_v44 = vpop.f32.mrf.mxu1  ;;  %14958 = vst [vmem:[#allocation19_spill] sm:$0xff] %v14957_v58  ;;  %v3296_v19 = vadd.s32 56, %v12768_v3  ;;  %v14962_v26 = vmov 0 }
 0x275   : > { %v10251_v48 = vpop.f32.mrf.mxu0  ;;  %10292 = vmatpush3.bf16.msra.mxu0 %v11133_v5  ;;  %v9926_v34 = vadd.f32 %v9925_v44, %v9924_v47  ;;  %vm12829_vm6 = vcmp.le.s32.totalorder %v12771_v45, %v3293_v52  ;;  %v3294_v2 = vadd.s32 40, %v12768_v3  ;;  %vm12930_vm15 = vcmp.le.s32.totalorder %v12771_v45, %v3297_v22  ;;  %v11142_v52 = vld [vmem:[#allocation2 + $0x168] ss:$36 sps:$4 sm:$0xff]   ;;  %v11235_v58 = vld [vmem:[#allocation2 + $0x134] ss:$36 sps:$4 sm:$0xff]  }
 0x276   : > { %v9710_v32 = vpack.c.bf16 %v2733_v27, %v2733_v27  ;;  %3267 = vst [vmem:[#allocation2 + $0x1ac] sm:$0xf] %v9720_v37  ;;  %v9927_v41 = vpop.f32.mrf.mxu1  ;;  %10293 = vmatprep.subr.bf16.mxu0 %v11134_v13  ;;  %v14960_v54 = vsel %vm12829_vm6, 4294967295, %v14959_v54  ;;  %vm12840_vm7 = vcmp.le.s32.totalorder %v12771_v45, %v3296_v19  ;;  %v14965_v27 = vmov 0  ;;  %v11146_v19 = vld [vmem:[#allocation2 + $0x9c] ss:$36 sps:$4 sm:$0xff]  }
 0x277   : > { %v2745_v6 = vpop.f32.mrf.mxu0  ;;  %14961 = vst [vmem:[#allocation20_spill] sm:$0xff] %v14960_v54  ;;  %v14963_v26 = vsel %vm12840_vm7, 4294967295, %v14962_v26  ;;  %vm12851_vm8 = vcmp.le.s32.totalorder %v12771_v45, %v3294_v2  ;;  %v3298_v37 = vadd.s32 72, %v12768_v3  ;;  %v3300_v8 = vadd.s32 88, %v12768_v3  ;;  %v11149_v2 = vld [vmem:[#allocation2] ss:$36 sps:$4 sm:$0xff]  }
 0x278   : > { %3257 = vst [vmem:[#allocation2 + $0x164] sm:$0xf] %v9710_v32  ;;  %v2746_v38 = vadd.f32 %v9923_v29, %v2745_v6  ;;  %v9928_v30 = vpop.f32.mrf.mxu1  ;;  %14964 = vst [vmem:[#allocation21_spill] sm:$0xff] %v14963_v26  ;;  %v14966_v27 = vsel %vm12851_vm8, 4294967295, %v14965_v27  ;;  %v14968_v32 = vmov 0 }
 0x279   : > { %v10252_v40 = vpop.f32.mrf.mxu0  ;;  %v9929_v49 = vadd.f32 %v9928_v30, %v9927_v41  ;;  %10294 = vmatpush3.bf16.msra.mxu0 %v11134_v13  ;;  %14967 = vst [vmem:[#allocation22_spill] sm:$0xff] %v14966_v27  ;;  %vm12862_vm9 = vcmp.le.s32.totalorder %v12771_v45, %v3298_v37  ;;  %v3303_v41 = vadd.s32 112, %v12768_v3  ;;  %v11138_v30 = vld [vmem:[#allocation2 + $0x12c] ss:$36 sps:$4 sm:$0xff]   ;;  %v11237_v54 = vld [vmem:[#allocation2 + $0xe0] ss:$36 sps:$4 sm:$0xff]  }
 0x27a   : > { %v9725_v9 = vpack.c.bf16 %v2746_v38, %v2746_v38  ;;  %v9930_v20 = vpop.f32.mrf.mxu1  ;;  %10295 = vmatprep.subr.bf16.mxu0 %v11135_v1  ;;  %v14969_v32 = vsel %vm12862_vm9, 4294967295, %v14968_v32  ;;  %v14971_v38 = vmov 0  ;;  %v11152_v37 = vld [vmem:[#allocation2 + $0x1b0] ss:$36 sps:$4 sm:$0xff]   ;;  %v11239_v26 = vld [vmem:[#allocation2 + $0x200] ss:$36 sps:$4 sm:$0xff]  }
 0x27b   : > { %v2748_v62 = vpop.f32.mrf.mxu0  ;;  %v2754_v23 = vadd.f32 %v10251_v48, %v9929_v49  ;;  %14970 = vst [vmem:[#allocation23_spill] sm:$0xff] %v14969_v32  ;;  %vm12873_vm10 = vcmp.le.s32.totalorder %v12771_v45, %v3303_v41  ;;  %v11155_v41 = vld [vmem:[#allocation2 + $0x138] ss:$36 sps:$4 sm:$0xff]  }
 0x27c   : > { %3272 = vst [vmem:[#allocation2 + $0x1d0] sm:$0xf] %v9725_v9  ;;  %v2749_v63 = vadd.f32 %v9926_v34, %v2748_v62  ;;  %v9931_v42 = vpop.f32.mrf.mxu1  ;;  %v14972_v38 = vsel %vm12873_vm10, 4294967295, %v14971_v38  ;;  %v3301_v34 = vadd.s32 96, %v12768_v3  ;;  %v14974_v9 = vmov 0 }
 0x27d   : > { %v9735_v31 = vpack.c.bf16 %v2754_v23, %v2754_v23  ;;  %v9932_v39 = vadd.f32 %v9931_v42, %v9930_v20  ;;  %10296 = vmatpush3.bf16.msra.mxu0 %v11135_v1  ;;  %14973 = vst [vmem:[#allocation24_spill] sm:$0xff] %v14972_v38  ;;  %v3304_v20 = vadd.s32 120, %v12768_v3  ;;  %v14977_v23 = vmov 0 }
 0x27e   : > { %v9730_v33 = vpack.c.bf16 %v2749_v63, %v2749_v63  ;;  %10297 = vmatprep.subr.bf16.mxu0 %v11136_v4  ;;  %vm12885_vm11 = vcmp.le.s32.totalorder %v12771_v45, %v3301_v34  ;;  %v3302_v63 = vadd.s32 104, %v12768_v3  ;;  %v4148_v34 = vpop.permute.xlu1 %4147 }
 0x27f   : > { %3282 = vst [vmem:[#allocation2 + $0x218] sm:$0xf] %v9735_v31  ;;  %v2757_v50 = vadd.f32 %v10252_v40, %v9932_v39  ;;  %v14975_v9 = vsel %vm12885_vm11, 4294967295, %v14974_v9  ;;  %vm12896_vm12 = vcmp.le.s32.totalorder %v12771_v45, %v3304_v20  ;;  %v14979_v39 = vmov 0 }
 0x280   : > { %3277 = vst [vmem:[#allocation2 + $0x1f4] sm:$0xf] %v9730_v33  ;;  %14976 = vst [vmem:[#allocation25_spill] sm:$0xff] %v14975_v9  ;;  %v14978_v23 = vsel %vm12896_vm12, 4294967295, %v14977_v23  ;;  %vm12907_vm13 = vcmp.le.s32.totalorder %v12771_v45, %v3302_v63 }
 0x281   : > { %v9740_v16 = vpack.c.bf16 %v2757_v50, %v2757_v50  ;;  %10298 = vmatpush3.bf16.msra.mxu0 %v11136_v4  ;;  %v14980_v39 = vsel %vm12907_vm13, 4294967295, %v14979_v39  ;;  %v3299_v50 = vadd.s32 80, %v12768_v3 }
 0x282   : > { %10299 = vmatprep.subr.bf16.mxu0 %v11137_v35 }
 0x283   : > { %3287 = vst [vmem:[#allocation2 + $0x23c] sm:$0xf] %v9740_v16  ;;  %vm12918_vm14 = vcmp.le.s32.totalorder %v12771_v45, %v3299_v50  ;;  %v14981_v16 = vmov 0 }
 0x284   : > { %v14982_v16 = vsel %vm12918_vm14, 4294967295, %v14981_v16 }
 0x285   : > { %10300 = vmatpush3.bf16.msra.mxu0 %v11137_v35  ;;  %v11139_v35 = vld [vmem:[#allocation2 + $0xe4] ss:$36 sps:$4 sm:$0xff]   ;;  %14983 = vst [vmem:[#allocation26_spill] sm:$0xff] %v14982_v16 }
 0x286   : > { %10677 = vmatprep.subr.msk.bf16.mxu0 %vm14864_vm0, %v12764_v36  ;;  %vm12942_vm0 = vcmp.le.s32.totalorder %v12771_v45, %v3300_v8  ;;  %v11145_v45 = vld [vmem:[#allocation2 + $0xa8] ss:$36 sps:$4 sm:$0xff]  }
 0x2e8   : > { %v10271_v18 = vpop.f32.mrf.mxu1 }
 0x2e9   : > { %v12788_v11 = vsel %vm12774_vm1, %v10271_v18, -inf  ;;  %v14984_v18 = vmov 0 }
 0x2ea   : > { %3617 = vmax.xlane.f32.xlu1 %v12788_v11  ;;  %v3534_v14 = vpop.f32.mrf.mxu1  ;;  %v14985_v18 = vsel %vm12930_vm15, 4294967295, %v14984_v18 }
 0x2eb   : > { %v12799_v46 = vsel %vm12781_vm2, %v3534_v14, -inf  ;;  %14986 = vst [vmem:[#allocation27_spill] sm:$0xff] %v14985_v18 }
 0x2ec   : > { %3613 = vmax.xlane.f32.xlu0 %v12799_v46  ;;  %v10272_v24 = vpop.f32.mrf.mxu1 }
 0x2ed   : > { %v12809_v57 = vsel %vm12792_vm3, %v10272_v24, -inf  ;;  %v14987_v24 = vmov 0 }
 0x2ee   : > { %3619 = vmax.xlane.f32.xlu1 %v12809_v57  ;;  %v3537_v12 = vpop.f32.mrf.mxu1  ;;  %v14988_v24 = vsel %vm12942_vm0, 4294967295, %v14987_v24 }
 0x2ef   : > { %v12820_v25 = vsel %vm12803_vm4, %v3537_v12, -inf  ;;  %14989 = vst [vmem:[#allocation28_spill] sm:$0xff] %v14988_v24 }
 0x2f0   : > { %3615 = vmax.xlane.f32.xlu0 %v12820_v25  ;;  %v10275_v17 = vpop.f32.mrf.mxu1 }
 0x2f1   : > { %v12825_v5 = vsel %vm12813_vm5, %v10275_v17, -inf  ;;  %v11143_v17 = vld [vmem:[#allocation2 + $0x1f8] ss:$36 sps:$4 sm:$0xff]  }
 0x2f2   : > { %3625 = vmax.xlane.f32.xlu1 %v12825_v5  ;;  %v3550_v51 = vpop.f32.mrf.mxu1 }
 0x2f3   : > { %v12836_v15 = vsel %vm12829_vm6, %v3550_v51, -inf  ;;  %v11144_v51 = vld [vmem:[#allocation2 + $0x1c8] ss:$36 sps:$4 sm:$0xff]  }
 0x2f4   : > { %v10276_v28 = vpop.f32.mrf.mxu1 }
 0x2f5   : > { %v12847_v13 = vsel %vm12840_vm7, %v10276_v28, -inf  ;;  %v11147_v28 = vld [vmem:[#allocation2 + $0x54] ss:$36 sps:$4 sm:$0xff]  }
 0x2f6   : > { %3621 = vmax.xlane.f32.xlu1 %v12836_v15  ;;  %v3553_v21 = vpop.f32.mrf.mxu1 }
 0x2f7   : > { %v12858_v44 = vsel %vm12851_vm8, %v3553_v21, -inf  ;;  %v11148_v21 = vld [vmem:[#allocation2 + $0xc] ss:$36 sps:$4 sm:$0xff]  }
 0x2f8   : > { %v10279_v47 = vpop.f32.mrf.mxu1 }
 0x2f9   : > { %v12926_v59 = vsel %vm12918_vm14, %v10279_v47, -inf  ;;  %v11150_v47 = vld [vmem:[#allocation2 + $0x90] ss:$36 sps:$4 sm:$0xff]  }
 0x2fa   : > { %3627 = vmax.xlane.f32.xlu1 %v12847_v13  ;;  %v3566_v60 = vpop.f32.mrf.mxu1 }
 0x2fb   : > { %v12938_v14 = vsel %vm12930_vm15, %v3566_v60, -inf  ;;  %v11151_v60 = vld [vmem:[#allocation2 + $0x120] ss:$36 sps:$4 sm:$0xff]  }
 0x2fc   : > { %v10280_v29 = vpop.f32.mrf.mxu1 }
 0x2fd   : > { %v12949_v12 = vsel %vm12942_vm0, %v10280_v29, -inf  ;;  %v11153_v29 = vld [vmem:[#allocation2 + $0x210] ss:$36 sps:$4 sm:$0xff]  }
 0x2fe   : > { %3623 = vmax.xlane.f32.xlu1 %v12858_v44  ;;  %v3569_v48 = vpop.f32.mrf.mxu1 }
 0x2ff   : > { %v12869_v1 = vsel %vm12862_vm9, %v3569_v48, -inf  ;;  %v11154_v48 = vld [vmem:[#allocation2 + $0x180] ss:$36 sps:$4 sm:$0xff]  }
 0x300   : > { %v10283_v6 = vpop.f32.mrf.mxu1 }
 0x301   : > { %v12880_v40 = vsel %vm12873_vm10, %v10283_v6, -inf  ;;  %v11156_v6 = vld [vmem:[#allocation2 + $0xf0] ss:$36 sps:$4 sm:$0xff]   ;;  %vm14994_vm10 = vcmask 523264  }
 0x302   : > { %3631 = vmax.xlane.f32.xlu1 %v12869_v1  ;;  %v3582_v49 = vpop.f32.mrf.mxu1  ;;  %vm15005_vm14 = vmmov %vm14994_vm10 }
 0x303   : > { %v12892_v4 = vsel %vm12885_vm11, %v3582_v49, -inf  ;;  %vm14997_vm11 = vmmov %vm14994_vm10 }
 0x304   : > { %v10284_v62 = vpop.f32.mrf.mxu1 }
 0x305   : > { %v12903_v42 = vsel %vm12896_vm12, %v10284_v62, -inf  ;;  %vm14995_vm12 = vmmov %vm14994_vm10 }
 0x306   : > { %4143 = vrot.lane.b32.xlu0 %v11138_v30, %s11927_s21  ;;  %3641 = vmax.xlane.f32.xlu1 %v12880_v40  ;;  %v3585_v31 = vpop.f32.mrf.mxu1 }
 0x307   : > { %v12913_v33 = vsel %vm12907_vm13, %v3585_v31, -inf  ;;  %vm15000_vm13 = vmmov %vm14994_vm10 }
 0x30a   : > { %3637 = vmax.xlane.f32.xlu1 %v12892_v4 }
 0x30e   : > { %3643 = vmax.xlane.f32.xlu1 %v12903_v42 }
 0x312   : > { %3639 = vmax.xlane.f32.xlu1 %v12913_v33 }
 0x323   : > { %4141 = vrot.lane.b32.xlu1 %v11139_v35, %s11927_s21 }
 0x325   : > { %3633 = vmax.xlane.f32.xlu0 %v12926_v59 }
 0x327   : > { %4081 = vrot.lane.b32.xlu1 %v11140_v43, %s11927_s21 }
 0x329   : > { %3629 = vmax.xlane.f32.xlu0 %v12938_v14 }
 0x32b   : > { %4085 = vrot.lane.b32.xlu1 %v11141_v10, %s11927_s21 }
 0x32d   : > { %3635 = vmax.xlane.f32.xlu0 %v12949_v12 }
 0x32f   : > { %4089 = vrot.lane.b32.xlu1 %v11142_v52, %s11927_s21 }
 0x333   : > { %4093 = vrot.lane.b32.xlu1 %v11143_v17, %s11927_s21 }
 0x337   : > { %4484 = vrot.lane.b32.xlu1 %v11144_v51, %s11927_s21 }
 0x33b   : > { %4476 = vrot.lane.b32.xlu1 %v11145_v45, %s11927_s21 }
 0x343   : > { %4139 = vrot.lane.b32.xlu0 %v11146_v19, %s11927_s21 }
 0x347   : > { %4137 = vrot.lane.b32.xlu0 %v11147_v28, %s11927_s21 }
 0x34b   : > { %4135 = vrot.lane.b32.xlu0 %v11148_v21, %s11927_s21 }
 0x34f   : > { %4079 = vrot.lane.b32.xlu0 %v11149_v2, %s11927_s21 }
 0x353   : > { %4083 = vrot.lane.b32.xlu0 %v11150_v47, %s11927_s21 }
 0x357   : > { %4087 = vrot.lane.b32.xlu0 %v11151_v60, %s11927_s21 }
 0x35b   : > { %4091 = vrot.lane.b32.xlu0 %v11152_v37, %s11927_s21 }
 0x35f   : > { %4486 = vrot.lane.b32.xlu0 %v11153_v29, %s11927_s21 }
 0x363   : > { %4482 = vrot.lane.b32.xlu0 %v11154_v48, %s11927_s21 }
 0x367   : > { %4480 = vrot.lane.b32.xlu0 %v11155_v41, %s11927_s21 }
 0x36b   : > { %4478 = vrot.lane.b32.xlu0 %v11156_v6, %s11927_s21 }
 0x373   : > { %v3618_v30 = vpop.xlane.xlu1 %3617 }
 0x374   : > { %v3647_v62 = vsub.f32 %v12788_v11, %v3618_v30  ;;  %v4194_v30 = vsel %vm14997_vm11, %v4148_v34, 0  ;;  %vm15002_vm11 = vmmov %vm14994_vm10 }
 0x375   : > { %v3614_v49 = vpop.xlane.xlu0 %3613 }
 0x376   : > { %v3645_v20 = vsub.f32 %v12799_v46, %v3614_v49  ;;  %v3665_v8 = vmul.f32 1.442695, %v3647_v62 }
 0x377   : > { %v3620_v63 = vpop.xlane.xlu1 %3619 }
 0x378   : > { %v3661_v31 = vmul.f32 1.442695, %v3645_v20  ;;  %v3648_v50 = vsub.f32 %v12809_v57, %v3620_v63 }
 0x379   : > { %v3616_v35 = vpop.xlane.xlu0 %3615 }
 0x37a   : > { %v3667_v22 = vmul.f32 1.442695, %v3648_v50  ;;  %v3646_v43 = vsub.f32 %v12820_v25, %v3616_v35  ;;  %11383 = vpow2.f32 %v3661_v31 }
 0x37b   : > { %v3626_v10 = vpop.xlane.xlu1 %3625 }
 0x37c   : > { %v3663_v52 = vmul.f32 1.442695, %v3646_v43  ;;  %11385 = vpow2.f32 %v3667_v22  ;;  %v3651_v45 = vsub.f32 %v12825_v5, %v3626_v10 }
 0x37d   : > { %v4144_v50 = vpop.permute.xlu0 %4143 }
 0x37e   : > { %11387 = vpow2.f32 %v3663_v52  ;;  %v3673_v2 = vmul.f32 1.442695, %v3651_v45 }
 0x37f   : > { %11389 = vpow2.f32 %v3665_v8  ;;  %v3622_v17 = vpop.xlane.xlu1 %3621 }
 0x380   : > { %v3649_v46 = vsub.f32 %v12836_v15, %v3622_v17 }
 0x382   : > { %v3669_v57 = vmul.f32 1.442695, %v3649_v46 }
 0x383   : > { %v3628_v51 = vpop.xlane.xlu1 %3627 }
 0x384   : > { %v3652_v11 = vsub.f32 %v12847_v13, %v3628_v51  ;;  %11391 = vpow2.f32 %v3669_v57 }
 0x386   : > { %v3675_v19 = vmul.f32 1.442695, %v3652_v11 }
 0x387   : > { %v3624_v28 = vpop.xlane.xlu1 %3623  ;;  %v12975_v21 = vpop.eup %11383 }
 0x388   : > { %v3650_v25 = vsub.f32 %v12858_v44, %v3624_v28  ;;  %14990 = vst [vmem:[#allocation29_spill] sm:$0xff] %v12975_v21  ;;  %11393 = vpow2.f32 %v3675_v19  ;;  %v4197_v44 = vsel %vm14994_vm10, %v12764_v36, 0 }
 0x389   : > { %v12977_v47 = vpop.eup %11385 }
 0x38a   : > { %14991 = vst [vmem:[#allocation30_spill] sm:$0xff] %v12977_v47  ;;  %v3671_v60 = vmul.f32 1.442695, %v3650_v25 }
 0x38b   : > { %v12979_v37 = vpop.eup %11387  ;;  %v3632_v15 = vpop.xlane.xlu1 %3631 }
 0x38c   : > { %14992 = vst [vmem:[#allocation31_spill] sm:$0xff] %v12979_v37  ;;  %v12981_v29 = vpop.eup %11389  ;;  %11395 = vpow2.f32 %v3671_v60  ;;  %v3725_v5 = vpack.c.bf16 %v12979_v37, %v12975_v21  ;;  %v3654_v8 = vsub.f32 %v12869_v1, %v3632_v15 }
 0x38d   : > { %14993 = vst [vmem:[#allocation32_spill] sm:$0xff] %v12981_v29  ;;  %v3726_v13 = vpack.c.bf16 %v12977_v47, %v12981_v29  ;;  %11397 = vpow2.f32 %v3673_v2 }
 0x38e   : > { %10301 = vmatprep.mubr.bf16.mxu0 %v3725_v5 }
 0x38f   : > { %10302 = vmatmul.mubr.bf16.vlgmr.msra.gmra.mxu0 %v3726_v13  ;;  %v3642_v48 = vpop.xlane.xlu1 %3641 }
 0x390   : > { %10318 = vmatpush3.bf16.xpose.msra.mxu0 %v4197_v44  ;;  %v3659_v15 = vsub.f32 %v12880_v40, %v3642_v48 }
 0x391   : > { %10678 = vmatprep.subr.msk.bf16.mxu0 %vm14995_vm12, %v4148_v34  ;;  %v12990_v6 = vpop.eup %11391  ;;  %v4191_v34 = vsel %vm14994_vm10, %v12762_v61, 0  ;;  %vm15003_vm12 = vmmov %vm14994_vm10 }
 0x392   : > { %14996 = vst [vmem:[#allocation33_spill] sm:$0xff] %v12990_v6  ;;  %v4188_v22 = vsel %vm15003_vm12, %v4144_v50, 0  ;;  %v3689_v13 = vmul.f32 1.442695, %v3659_v15  ;;  %vm15009_vm12 = vmmov %vm14994_vm10 }
 0x393   : > { %v3638_v41 = vpop.xlane.xlu1 %3637 }
 0x394   : > { %v3657_v45 = vsub.f32 %v12892_v4, %v3638_v41 }
 0x395   : > { %v12993_v49 = vpop.eup %11393 }
 0x396   : > { %14998 = vst [vmem:[#allocation34_spill] sm:$0xff] %v12993_v49  ;;  %v3685_v2 = vmul.f32 1.442695, %v3657_v45 }
 0x397   : > { %v3644_v31 = vpop.xlane.xlu1 %3643 }
 0x398   : > { %10320 = vmatpush3.bf16.xpose.msra.mxu0 %v4194_v30  ;;  %v3660_v60 = vsub.f32 %v12903_v42, %v3644_v31 }
 0x399   : > { %v12995_v20 = vpop.eup %11395  ;;  %10679 = vmatprep.subr.msk.bf16.mxu0 %vm15000_vm13, %v12762_v61  ;;  %vm15004_vm13 = vmmov %vm14994_vm10  ;;  %v3679_v61 = vmul.f32 1.442695, %v3654_v8 }
 0x39a   : > { %14999 = vst [vmem:[#allocation35_spill] sm:$0xff] %v12995_v20  ;;  %v12999_v62 = vpop.eup %11397  ;;  %v3727_v36 = vpack.c.bf16 %v12995_v20, %v12990_v6 }
 0x39b   : > { %15001 = vst [vmem:[#allocation36_spill] sm:$0xff] %v12999_v62  ;;  %v3728_v63 = vpack.c.bf16 %v12993_v49, %v12999_v62  ;;  %v3640_v35 = vpop.xlane.xlu1 %3639  ;;  %11399 = vpow2.f32 %v3679_v61  ;;  %v11195_v62 = vld [vmem:[#allocation2 + $0x58] ss:$36 sps:$4 sm:$0xff]  }
 0x39c   : > { %10305 = vmatprep.mubr.bf16.mxu0 %v3727_v36  ;;  %v3658_v17 = vsub.f32 %v12913_v33, %v3640_v35 }
 0x39d   : > { %10306 = vmatmul.mubr.bf16.gmra.mxu0 %v3728_v63 }
 0x39e   : > { %v3687_v57 = vmul.f32 1.442695, %v3658_v17 }
 0x39f   : > { %v4142_v43 = vpop.permute.xlu1 %4141 }
 0x3a0   : > { %10322 = vmatpush3.bf16.xpose.msra.mxu0 %v4191_v34  ;;  %v4185_v52 = vsel %vm15005_vm14, %v4142_v43, 0  ;;  %vm15006_vm14 = vmmov %vm14994_vm10 }
 0x3a1   : > { %10680 = vmatprep.subr.msk.bf16.mxu0 %vm15002_vm11, %v4144_v50  ;;  %vm15007_vm11 = vmmov %vm14994_vm10 }
 0x3a8   : > { %10324 = vmatpush3.bf16.xpose.msra.mxu0 %v4188_v22  ;;  %v13022_v44 = vpop.eup %11399 }
 0x3a9   : > { %10681 = vmatprep.subr.msk.bf16.mxu0 %vm15004_vm13, %v4142_v43  ;;  %15008 = vst [vmem:[#allocation37_spill] sm:$0xff] %v13022_v44  ;;  %vm15011_vm13 = vmmov %vm14994_vm10 }
 0x3ae   : > { %v3634_v10 = vpop.xlane.xlu0 %3633 }
 0x3af   : > { %v3655_v46 = vsub.f32 %v12926_v59, %v3634_v10  ;;  %v11157_v10 = vld [vmem:[#allocation2 + $0x214] ss:$36 sps:$4 sm:$0xff]  }
 0x3b0   : > { %10326 = vmatpush3.bf16.xpose.msra.mxu0 %v4185_v52 }
 0x3b1   : > { %v3681_v28 = vmul.f32 1.442695, %v3655_v46 }
 0x3b2   : > { %v3630_v51 = vpop.xlane.xlu0 %3629 }
 0x3b3   : > { %v3653_v11 = vsub.f32 %v12938_v14, %v3630_v51  ;;  %v3691_v14 = vmul.f32 1.442695, %v3660_v60  ;;  %v11160_v60 = vld [vmem:[#allocation2 + $0x13c] ss:$36 sps:$4 sm:$0xff]  }
 0x3b5   : > { %v3677_v19 = vmul.f32 1.442695, %v3653_v11 }
 0x3b6   : > { %v3636_v25 = vpop.xlane.xlu0 %3635 }
 0x3b7   : > { %11401 = vpow2.f32 %v3677_v19  ;;  %v3656_v1 = vsub.f32 %v12949_v12, %v3636_v25  ;;  %v4082_v12 = vpop.permute.xlu1 %4081  ;;  %v11158_v25 = vld [vmem:[#allocation2 + $0x1cc] ss:$36 sps:$4 sm:$0xff]  }
 0x3b8   : > { %11403 = vpow2.f32 %v3687_v57 }
 0x3b9   : > { %v3683_v33 = vmul.f32 1.442695, %v3656_v1  ;;  %11405 = vpow2.f32 %v3681_v28 }
 0x3ba   : > { %v4140_v59 = vpop.permute.xlu0 %4139 }
 0x3bb   : > { %11407 = vpow2.f32 %v3683_v33  ;;  %10682 = vmatprep.subr.msk.bf16.mxu0 %vm15006_vm14, %v4140_v59  ;;  %v4182_v4 = vsel %vm14994_vm10, %v4140_v59, 0  ;;  %v4086_v36 = vpop.permute.xlu1 %4085  ;;  %vm15016_vm14 = vmmov %vm14994_vm10  ;;  %v11161_v59 = vld [vmem:[#allocation2 + $0xf4] ss:$36 sps:$4 sm:$0xff]  }
 0x3bc   : > { %11409 = vpow2.f32 %v3685_v2  ;;  %10328 = vmatpush3.bf16.xpose.msra.mxu0 %v4182_v4  ;;  %v11159_v2 = vld [vmem:[#allocation2 + $0x184] ss:$36 sps:$4 sm:$0xff]   ;;  %v11162_v4 = vld [vmem:[#allocation2 + $0xac] ss:$36 sps:$4 sm:$0xff]  }
 0x3bd   : > { %11411 = vpow2.f32 %v3691_v14  ;;  %v11163_v14 = vld [vmem:[#allocation2 + $0x64] ss:$36 sps:$4 sm:$0xff]  }
 0x3be   : > { %v4138_v5 = vpop.permute.xlu0 %4137  ;;  %11413 = vpow2.f32 %v3689_v13 }
 0x3bf   : > { %10683 = vmatprep.subr.msk.bf16.mxu0 %vm15007_vm11, %v4138_v5  ;;  %v4179_v40 = vsel %vm15009_vm12, %v4138_v5, 0  ;;  %v4090_v52 = vpop.permute.xlu1 %4089  ;;  %vm15019_vm11 = vmmov %vm14994_vm10  ;;  %v11164_v5 = vld [vmem:[#allocation2 + $0x1c] ss:$36 sps:$4 sm:$0xff]  }
 0x3c0   : > { %vm15020_vm12 = vmmov %vm14994_vm10 }
 0x3c2   : > { %v4136_v42 = vpop.permute.xlu0 %4135 }
 0x3c3   : > { %v4176_v8 = vsel %vm15016_vm14, %v4136_v42, 0  ;;  %v4094_v11 = vpop.permute.xlu1 %4093  ;;  %vm15022_vm14 = vmmov %vm14994_vm10 }
 0x3c4   : > { %v13025_v48 = vpop.eup %11401  ;;  %10330 = vmatpush3.bf16.xpose.msra.mxu0 %v4179_v40 }
 0x3c5   : > { %15010 = vst [vmem:[#allocation38_spill] sm:$0xff] %v13025_v48  ;;  %10684 = vmatprep.subr.msk.bf16.mxu0 %vm15011_vm13, %v4136_v42  ;;  %v3729_v41 = vpack.c.bf16 %v13022_v44, %v13025_v48  ;;  %v13030_v30 = vpop.eup %11403  ;;  %vm15021_vm13 = vmmov %vm14994_vm10  ;;  %v11188_v48 = vld [vmem:[#allocation2 + $0x4c] ss:$36 sps:$4 sm:$0xff]  }
 0x3c6   : > { %15012 = vst [vmem:[#allocation39_spill] sm:$0xff] %v13030_v30  ;;  %v4080_v63 = vpop.permute.xlu0 %4079  ;;  %v13032_v31 = vpop.eup %11405 }
 0x3c7   : > { %15013 = vst [vmem:[#allocation40_spill] sm:$0xff] %v13032_v31  ;;  %10309 = vmatprep.mubr.bf16.mxu0 %v3729_v41  ;;  %v4485_v19 = vpop.permute.xlu1 %4484 }
 0x3c8   : > { %v13034_v34 = vpop.eup %11407 }
 0x3c9   : > { %15014 = vst [vmem:[#allocation41_spill] sm:$0xff] %v13034_v34  ;;  %v13036_v50 = vpop.eup %11409  ;;  %v3730_v35 = vpack.c.bf16 %v13034_v34, %v13032_v31 }
 0x3ca   : > { %15015 = vst [vmem:[#allocation42_spill] sm:$0xff] %v13036_v50  ;;  %v4084_v22 = vpop.permute.xlu0 %4083  ;;  %v3731_v43 = vpack.c.bf16 %v13030_v30, %v13036_v50  ;;  %v13043_v17 = vpop.eup %11411 }
 0x3cb   : > { %10310 = vmatmul.mubr.bf16.gmra.mxu0 %v3730_v35  ;;  %15017 = vst [vmem:[#allocation43_spill] sm:$0xff] %v13043_v17  ;;  %v13045_v46 = vpop.eup %11413  ;;  %v4477_v15 = vpop.permute.xlu1 %4476 }
 0x3cc   : > { %10313 = vmatprep.mubr.bf16.mxu0 %v3731_v43  ;;  %10332 = vmatpush3.bf16.xpose.msra.mxu0 %v4176_v8  ;;  %15018 = vst [vmem:[#allocation44_spill] sm:$0xff] %v13045_v46  ;;  %v3732_v51 = vpack.c.bf16 %v13043_v17, %v13045_v46 }
 0x3cd   : > { %10413 = vmatprep.subr.bf16.mxu0 %v11157_v10 }
 0x3ce   : > { %v4088_v61 = vpop.permute.xlu0 %4087 }
 0x3d2   : > { %v4092_v45 = vpop.permute.xlu0 %4091 }
 0x3d3   : > { %10314 = vmatmul.mubr.bf16.gmra.mxu0 %v3732_v51 }
 0x3d4   : > { %10333 = vmatprep.mubr.msk.bf16.mxu0 %vm14994_vm10, %v4080_v63 }
 0x3d6   : > { %v4487_v57 = vpop.permute.xlu0 %4486 }
 0x3d7   : > { %10349 = vmatprep.subr.bf16.mxu1 %v4487_v57 }
 0x3d8   : > { %10350 = vmatpush3.bf16.msra.mxu1 %v4487_v57 }
 0x3d9   : > { %10351 = vmatprep.subr.bf16.mxu1 %v4485_v19 }
 0x3da   : > { %v4483_v28 = vpop.permute.xlu0 %4482 }
 0x3db   : > { %10334 = vmatmul.mubr.msk.bf16.vlgmr.msra.gmra.mxu0 %vm15019_vm11, %v4082_v12  ;;  %vm15023_vm11 = vmmov %vm14994_vm10 }
 0x3dc   : > { %10414 = vmatpush3.bf16.msra.mxu0 %v11157_v10  ;;  %10337 = vmatprep.mubr.msk.bf16.mxu0 %vm15020_vm12, %v4084_v22  ;;  %vm15024_vm12 = vmmov %vm14994_vm10 }
 0x3dd   : > { %10352 = vmatpush3.bf16.msra.mxu1 %v4485_v19  ;;  %10415 = vmatprep.subr.bf16.mxu0 %v11158_v25 }
 0x3de   : > { %10353 = vmatprep.subr.bf16.mxu1 %v4483_v28  ;;  %v4481_v1 = vpop.permute.xlu0 %4480 }
 0x3e0   : > { %10416 = vmatpush3.bf16.msra.mxu0 %v11158_v25 }
 0x3e1   : > { %10354 = vmatpush3.bf16.msra.mxu1 %v4483_v28  ;;  %10417 = vmatprep.subr.bf16.mxu0 %v11159_v2 }
 0x3e2   : > { %10355 = vmatprep.subr.bf16.mxu1 %v4481_v1  ;;  %v4479_v33 = vpop.permute.xlu0 %4478 }
 0x3e3   : > { %10338 = vmatmul.mubr.msk.bf16.gmra.mxu0 %vm15021_vm13, %v4086_v36  ;;  %vm15041_vm13 = vnez %v14982_v16 }
 0x3e4   : > { %10418 = vmatpush3.bf16.msra.mxu0 %v11159_v2  ;;  %10341 = vmatprep.mubr.msk.bf16.mxu0 %vm15022_vm14, %v4088_v61  ;;  %vm15042_vm14 = vnez %v14980_v39 }
 0x3e5   : > { %10356 = vmatpush3.bf16.msra.mxu1 %v4481_v1  ;;  %10419 = vmatprep.subr.bf16.mxu0 %v11160_v60 }
 0x3e6   : > { %10357 = vmatprep.subr.bf16.mxu1 %v4479_v33 }
 0x3e8   : > { %10420 = vmatpush3.bf16.msra.mxu0 %v11160_v60 }
 0x3e9   : > { %10358 = vmatpush3.bf16.msra.mxu1 %v4479_v33  ;;  %10421 = vmatprep.subr.bf16.mxu0 %v11161_v59  ;;  %v11165_v33 = vld [vmem:[#allocation2 + $0x60] ss:$36 sps:$4 sm:$0xff]  }
 0x3ea   : > { %10359 = vmatprep.subr.bf16.mxu1 %v4477_v15 }
 0x3eb   : > { %10342 = vmatmul.mubr.msk.bf16.gmra.mxu0 %vm14994_vm10, %v4090_v52  ;;  %vm15043_vm10 = vnez %v14975_v9 }
 0x3ec   : > { %10422 = vmatpush3.bf16.msra.mxu0 %v11161_v59  ;;  %10345 = vmatprep.mubr.msk.bf16.mxu0 %vm15023_vm11, %v4092_v45  ;;  %v11166_v59 = vld [vmem:[#allocation2 + $0x18] ss:$36 sps:$4 sm:$0xff]   ;;  %vm15044_vm11 = vnez %v14978_v23 }
 0x3ed   : > { %10360 = vmatpush3.bf16.msra.mxu1 %v4477_v15  ;;  %10423 = vmatprep.subr.bf16.mxu0 %v11162_v4 }
 0x3f0   : > { %10424 = vmatpush3.bf16.msra.mxu0 %v11162_v4 }
 0x3f1   : > { %10425 = vmatprep.subr.bf16.mxu0 %v11163_v14 }
 0x3f3   : > { %10346 = vmatmul.mubr.msk.bf16.gmra.mxu0 %vm15024_vm12, %v4094_v11  ;;  %vm15045_vm12 = vnez %v14972_v38 }
 0x3f4   : > { %10426 = vmatpush3.bf16.msra.mxu0 %v11163_v14 }
 0x3f5   : > { %10427 = vmatprep.subr.bf16.mxu0 %v11164_v5 }
 0x3f8   : > { %10428 = vmatpush3.bf16.msra.mxu0 %v11164_v5 }
 0x44f   : > { %v13057_v13 = vpop.f32.mrf.mxu0 }
 0x450   : > { %15025 = vst [vmem:[#allocation45_spill] sm:$0xff] %v13057_v13 }
 0x451   : > { %v13059_v12 = vpop.f32.mrf.mxu0 }
 0x452   : > { %15026 = vst [vmem:[#allocation46_spill] sm:$0xff] %v13059_v12  ;;  %v11186_v12 = vld [vmem:[#allocation2 + $0x130] ss:$36 sps:$4 sm:$0xff]  }
 0x453   : > { %v13061_v42 = vpop.f32.mrf.mxu0 }
 0x454   : > { %15027 = vst [vmem:[#allocation47_spill] sm:$0xff] %v13061_v42 }
 0x455   : > { %v13063_v40 = vpop.f32.mrf.mxu0 }
 0x456   : > { %15028 = vst [vmem:[#allocation48_spill] sm:$0xff] %v13063_v40  ;;  %v11187_v40 = vld [vmem:[#allocation2 + $0xe8] ss:$36 sps:$4 sm:$0xff]  }
 0x45d   : > { %v13065_v41 = vpop.f32.mrf.mxu0 }
 0x45e   : > { %15029 = vst [vmem:[#allocation49_spill] sm:$0xff] %v13065_v41 }
 0x45f   : > { %v13067_v36 = vpop.f32.mrf.mxu0 }
 0x460   : > { %15030 = vst [vmem:[#allocation50_spill] sm:$0xff] %v13067_v36 }
 0x461   : > { %v13069_v63 = vpop.f32.mrf.mxu0 }
 0x462   : > { %15031 = vst [vmem:[#allocation51_spill] sm:$0xff] %v13069_v63 }
 0x463   : > { %v13071_v35 = vpop.f32.mrf.mxu0 }
 0x464   : > { %15032 = vst [vmem:[#allocation52_spill] sm:$0xff] %v13071_v35 }
 0x48b   : > { %v13073_v22 = vpop.f32.mrf.mxu0 }
 0x48c   : > { %15033 = vst [vmem:[#allocation53_spill] sm:$0xff] %v13073_v22 }
 0x48d   : > { %v13075_v43 = vpop.f32.mrf.mxu0 }
 0x48e   : > { %15034 = vst [vmem:[#allocation54_spill] sm:$0xff] %v13075_v43 }
 0x48f   : > { %v13077_v8 = vpop.f32.mrf.mxu0 }
 0x490   : > { %15035 = vst [vmem:[#allocation55_spill] sm:$0xff] %v13077_v8 }
 0x491   : > { %v13079_v10 = vpop.f32.mrf.mxu0 }
 0x492   : > { %15036 = vst [vmem:[#allocation56_spill] sm:$0xff] %v13079_v10 }
 0x493   : > { %v13081_v52 = vpop.f32.mrf.mxu0 }
 0x494   : > { %15037 = vst [vmem:[#allocation57_spill] sm:$0xff] %v13081_v52 }
 0x495   : > { %v13083_v61 = vpop.f32.mrf.mxu0 }
 0x496   : > { %15038 = vst [vmem:[#allocation58_spill] sm:$0xff] %v13083_v61  ;;  %v11168_v61 = vld [vmem:[#allocation2 + $0x208] ss:$36 sps:$4 sm:$0xff]  }
 0x497   : > { %v13085_v51 = vpop.f32.mrf.mxu0 }
 0x498   : > { %15039 = vst [vmem:[#allocation59_spill] sm:$0xff] %v13085_v51 }
 0x499   : > { %v13087_v11 = vpop.f32.mrf.mxu0 }
 0x49a   : > { %15040 = vst [vmem:[#allocation60_spill] sm:$0xff] %v13087_v11 }
 0x49b   : > { %v10335_v45 = vpop.f32.mrf.mxu0 }
 0x49c   : > { %v13091_v57 = vsel %vm12774_vm1, %v10335_v45, -inf }
 0x49d   : > { %4316 = vmax.xlane.f32.xlu1 %v13091_v57  ;;  %v4233_v19 = vpop.f32.mrf.mxu0 }
 0x49e   : > { %v4296_v28 = vsel %vm12781_vm2, %v4233_v19, -inf }
 0x49f   : > { %4312 = vmax.xlane.f32.xlu0 %v4296_v28  ;;  %v10336_v25 = vpop.f32.mrf.mxu0 }
 0x4a0   : > { %v4299_v1 = vsel %vm12792_vm3, %v10336_v25, -inf }
 0x4a1   : > { %4318 = vmax.xlane.f32.xlu1 %v4299_v1  ;;  %v4236_v2 = vpop.f32.mrf.mxu0 }
 0x4a2   : > { %v13100_v60 = vsel %vm12803_vm4, %v4236_v2, -inf }
 0x4a3   : > { %v10339_v15 = vpop.f32.mrf.mxu0 }
 0x4a5   : > { %4314 = vmax.xlane.f32.xlu1 %v13100_v60  ;;  %v4249_v4 = vpop.f32.mrf.mxu0 }
 0x4a6   : > { %v13107_v2 = vsel %vm12829_vm6, %v4249_v4, -inf }
 0x4a7   : > { %v10340_v14 = vpop.f32.mrf.mxu0 }
 0x4a8   : > { %v13122_v4 = vsel %vm12840_vm7, %v10340_v14, -inf }
 0x4a9   : > { %v4252_v5 = vpop.f32.mrf.mxu0 }
 0x4ab   : > { %v10343_v45 = vpop.f32.mrf.mxu0 }
 0x4ad   : > { %v4265_v19 = vpop.f32.mrf.mxu0 }
 0x4af   : > { %v10344_v25 = vpop.f32.mrf.mxu0 }
 0x4b0   : > { %v13137_v52 = vsel %vm12942_vm0, %v10344_v25, -inf  ;;  %vm15046_vm0 = vcmask 523264  }
 0x4b1   : > { %v4268_v0 = vpop.f32.mrf.mxu0 }
 0x4b2   : > { %v13127_v17 = vsel %vm12862_vm9, %v4268_v0, -inf  ;;  %v13142_v0 = vsel %vm15041_vm13, %v10343_v45, -inf  ;;  %vm15048_vm13 = vmmov %vm15046_vm0 }
 0x4b3   : > { %v10347_v3 = vpop.f32.mrf.mxu0 }
 0x4b4   : > { %v13162_v45 = vsel %vm15045_vm12, %v10347_v3, -inf  ;;  %vm15052_vm12 = vmmov %vm15046_vm0 }
 0x4b5   : > { %4474 = vrot.lane.b32.xlu0 %v11165_v33, %s11927_s21  ;;  %v13112_v33 = vsel %vm12813_vm5, %v10339_v15, -inf  ;;  %v4281_v51 = vpop.f32.mrf.mxu0 }
 0x4b6   : > { %4472 = vrot.lane.b32.xlu1 %v11166_v59, %s11927_s21  ;;  %v13117_v59 = vsel %vm12851_vm8, %v4252_v5, -inf  ;;  %v13132_v5 = vsel %vm12930_vm15, %v4265_v19, -inf  ;;  %v13152_v19 = vsel %vm15043_vm10, %v4281_v51, -inf  ;;  %v11169_v51 = vld [vmem:[#allocation2 + $0x178] ss:$36 sps:$4 sm:$0xff]   ;;  %vm15047_vm15 = vmmov %vm15046_vm0 }
 0x4b7   : > { %v10348_v15 = vpop.f32.mrf.mxu0  ;;  %vm15051_vm10 = vmmov %vm15046_vm0 }
 0x4b8   : > { %v13157_v25 = vsel %vm15044_vm11, %v10348_v15, -inf  ;;  %vm15050_vm11 = vmmov %vm15046_vm0 }
 0x4b9   : > { %v4284_v14 = vpop.f32.mrf.mxu0 }
 0x4ba   : > { %v13147_v11 = vsel %vm15042_vm14, %v4284_v14, -inf  ;;  %v11167_v14 = vld [vmem:[#allocation2 + $0x1c0] ss:$36 sps:$4 sm:$0xff]   ;;  %vm15049_vm14 = vmmov %vm15046_vm0 }
 0x4d4   : > { %4320 = vmax.xlane.f32.xlu0 %v13107_v2 }
 0x4d8   : > { %4324 = vmax.xlane.f32.xlu0 %v13112_v33 }
 0x4da   : > { %4322 = vmax.xlane.f32.xlu1 %v13117_v59 }
 0x4dc   : > { %4326 = vmax.xlane.f32.xlu0 %v13122_v4 }
 0x4de   : > { %4330 = vmax.xlane.f32.xlu1 %v13127_v17 }
 0x4e0   : > { %4328 = vmax.xlane.f32.xlu0 %v13132_v5 }
 0x4e2   : > { %4334 = vmax.xlane.f32.xlu1 %v13137_v52 }
 0x4e4   : > { %4332 = vmax.xlane.f32.xlu0 %v13142_v0 }
 0x4e6   : > { %4338 = vmax.xlane.f32.xlu1 %v13147_v11 }
 0x4e8   : > { %4336 = vmax.xlane.f32.xlu0 %v13152_v19 }
 0x4ea   : > { %4342 = vmax.xlane.f32.xlu1 %v13157_v25 }
 0x4ec   : > { %4340 = vmax.xlane.f32.xlu0 %v13162_v45 }
 0x4fb   : > { %5560 = vrot.lane.b32.xlu1 %v11167_v14, %s11927_s21 }
 0x502   : > { %5562 = vrot.lane.b32.xlu0 %v11168_v61, %s11927_s21 }
 0x506   : > { %5558 = vrot.lane.b32.xlu0 %v11169_v51, %s11927_s21 }
 0x526   : > { %v4317_v8 = vpop.xlane.xlu1 %4316 }
 0x527   : > { %v4346_v50 = vsub.f32 %v13091_v57, %v4317_v8  ;;  %v11172_v57 = vld [vmem:[#allocation2 + $0x178] ss:$36 sps:$4 sm:$0xff]  }
 0x528   : > { %v4313_v15 = vpop.xlane.xlu0 %4312 }
 0x529   : > { %v4344_v22 = vsub.f32 %v4296_v28, %v4313_v15  ;;  %v4364_v43 = vmul.f32 1.442695, %v4346_v50  ;;  %v11170_v28 = vld [vmem:[#allocation2 + $0x208] ss:$36 sps:$4 sm:$0xff]  }
 0x52a   : > { %v4319_v46 = vpop.xlane.xlu1 %4318  ;;  %v4912_v50 = vsel %vm15047_vm15, %v11170_v28, 0  ;;  %vm15053_vm15 = vmmov %vm15046_vm0 }
 0x52b   : > { %v4347_v30 = vsub.f32 %v4299_v1, %v4319_v46  ;;  %v4360_v34 = vmul.f32 1.442695, %v4344_v22  ;;  %v4906_v1 = vsel %vm15050_vm11, %v11172_v57, 0  ;;  %vm15057_vm11 = vmmov %vm15046_vm0 }
 0x52c   : > { %v4475_v3 = vpop.permute.xlu0 %4474 }
 0x52d   : > { %10361 = vmatprep.subr.bf16.mxu1 %v4475_v3  ;;  %v4366_v31 = vmul.f32 1.442695, %v4347_v30  ;;  %11415 = vpow2.f32 %v4360_v34 }
 0x52e   : > { %10362 = vmatpush3.bf16.msra.mxu1 %v4475_v3  ;;  %v4315_v10 = vpop.xlane.xlu1 %4314  ;;  %v11174_v3 = vld [vmem:[#allocation2 + $0xe8] ss:$36 sps:$4 sm:$0xff]  }
 0x52f   : > { %v4345_v14 = vsub.f32 %v13100_v60, %v4315_v10  ;;  %11417 = vpow2.f32 %v4366_v31  ;;  %v11173_v60 = vld [vmem:[#allocation2 + $0x130] ss:$36 sps:$4 sm:$0xff]  }
 0x530   : > { %v4903_v15 = vsel %vm15052_vm12, %v11173_v60, 0  ;;  %vm15058_vm12 = vmmov %vm15046_vm0 }
 0x531   : > { %v4362_v61 = vmul.f32 1.442695, %v4345_v14 }
 0x532   : > { %v4473_v51 = vpop.permute.xlu1 %4472 }
 0x533   : > { %11419 = vpow2.f32 %v4362_v61  ;;  %10363 = vmatprep.subr.bf16.mxu1 %v4473_v51 }
 0x534   : > { %11421 = vpow2.f32 %v4364_v43  ;;  %10364 = vmatpush3.bf16.msra.mxu1 %v4473_v51  ;;  %v11171_v43 = vld [vmem:[#allocation2 + $0x1c0] ss:$36 sps:$4 sm:$0xff]  }
 0x535   : > { %10685 = vmatprep.subr.msk.bf16.mxu1 %vm15046_vm0, %v11170_v28  ;;  %v4909_v10 = vsel %vm15048_vm13, %v11171_v43, 0  ;;  %vm15054_vm13 = vmmov %vm15046_vm0 }
 0x53a   : > { %v13171_v46 = vpop.eup %11415 }
 0x53c   : > { %v13173_v22 = vpop.eup %11417 }
 0x540   : > { %v13175_v30 = vpop.eup %11419 }
 0x541   : > { %v13177_v8 = vpop.eup %11421  ;;  %v4424_v34 = vpack.c.bf16 %v13175_v30, %v13171_v46 }
 0x542   : > { %v4425_v31 = vpack.c.bf16 %v13173_v22, %v13177_v8 }
 0x543   : > { %10365 = vmatprep.mubr.bf16.mxu1 %v4424_v34 }
 0x544   : > { %10366 = vmatmul.mubr.bf16.vlgmr.msra.gmra.mxu1 %v4425_v31 }
 0x545   : > { %10382 = vmatpush3.bf16.xpose.msra.mxu1 %v4912_v50 }
 0x546   : > { %10686 = vmatprep.subr.msk.bf16.mxu1 %vm15046_vm0, %v11171_v43  ;;  %v4900_v43 = vsel %vm15054_vm13, %v11174_v3, 0  ;;  %vm15060_vm13 = vmmov %vm15046_vm0 }
 0x54d   : > { %10384 = vmatpush3.bf16.xpose.msra.mxu1 %v4909_v10  ;;  %v11175_v10 = vld [vmem:[#allocation2 + $0xa0] ss:$36 sps:$4 sm:$0xff]  }
 0x54e   : > { %10687 = vmatprep.subr.msk.bf16.mxu1 %vm15049_vm14, %v11172_v57  ;;  %vm15055_vm14 = vmmov %vm15046_vm0 }
 0x555   : > { %10386 = vmatpush3.bf16.xpose.msra.mxu1 %v4906_v1 }
 0x556   : > { %10688 = vmatprep.subr.msk.bf16.mxu1 %vm15051_vm10, %v11173_v60  ;;  %vm15056_vm10 = vmmov %vm15046_vm0 }
 0x55d   : > { %10388 = vmatpush3.bf16.xpose.msra.mxu1 %v4903_v15  ;;  %v4321_v14 = vpop.xlane.xlu0 %4320 }
 0x55e   : > { %10689 = vmatprep.subr.msk.bf16.mxu1 %vm15053_vm15, %v11174_v3  ;;  %v4348_v61 = vsub.f32 %v13107_v2, %v4321_v14  ;;  %vm15059_vm15 = vmmov %vm15046_vm0 }
 0x560   : > { %v4368_v34 = vmul.f32 1.442695, %v4348_v61 }
 0x561   : > { %v4325_v51 = vpop.xlane.xlu0 %4324 }
 0x562   : > { %v4350_v28 = vsub.f32 %v13112_v33, %v4325_v51  ;;  %11423 = vpow2.f32 %v4368_v34 }
 0x563   : > { %v4323_v31 = vpop.xlane.xlu1 %4322 }
 0x564   : > { %v4349_v50 = vsub.f32 %v13117_v59, %v4323_v31  ;;  %v4372_v57 = vmul.f32 1.442695, %v4350_v28 }
 0x565   : > { %10390 = vmatpush3.bf16.xpose.msra.mxu1 %v4900_v43  ;;  %v4327_v1 = vpop.xlane.xlu0 %4326 }
 0x566   : > { %v4370_v60 = vmul.f32 1.442695, %v4349_v50  ;;  %v4351_v15 = vsub.f32 %v13122_v4, %v4327_v1  ;;  %10690 = vmatprep.subr.msk.bf16.mxu1 %vm15055_vm14, %v11175_v10  ;;  %v4897_v4 = vsel %vm15056_vm10, %v11175_v10, 0  ;;  %v11176_v50 = vld [vmem:[#allocation2 + $0x58] ss:$36 sps:$4 sm:$0xff]   ;;  %vm15063_vm14 = vmmov %vm15046_vm0 }
 0x567   : > { %v4331_v2 = vpop.xlane.xlu1 %4330  ;;  %vm15064_vm10 = vmmov %vm15046_vm0 }
 0x568   : > { %11425 = vpow2.f32 %v4370_v60  ;;  %v4374_v14 = vmul.f32 1.442695, %v4351_v15  ;;  %v4353_v33 = vsub.f32 %v13127_v17, %v4331_v2 }
 0x569   : > { %11427 = vpow2.f32 %v4372_v57  ;;  %v4329_v61 = vpop.xlane.xlu0 %4328 }
 0x56a   : > { %11429 = vpow2.f32 %v4374_v14  ;;  %v4378_v59 = vmul.f32 1.442695, %v4353_v33  ;;  %v4352_v3 = vsub.f32 %v13132_v5, %v4329_v61  ;;  %v11177_v61 = vld [vmem:[#allocation2 + $0x10] ss:$36 sps:$4 sm:$0xff]  }
 0x56b   : > { %v4335_v51 = vpop.xlane.xlu1 %4334 }
 0x56c   : > { %v4376_v28 = vmul.f32 1.442695, %v4352_v3  ;;  %v4355_v31 = vsub.f32 %v13137_v52, %v4335_v51  ;;  %11431 = vpow2.f32 %v4378_v59 }
 0x56d   : > { %10392 = vmatpush3.bf16.xpose.msra.mxu1 %v4897_v4  ;;  %v4333_v34 = vpop.xlane.xlu0 %4332 }
 0x56e   : > { %11433 = vpow2.f32 %v4376_v28  ;;  %v4382_v43 = vmul.f32 1.442695, %v4355_v31  ;;  %v4354_v17 = vsub.f32 %v13142_v0, %v4333_v34  ;;  %10691 = vmatprep.subr.msk.bf16.mxu1 %vm15057_vm11, %v11176_v50  ;;  %v4894_v0 = vsel %vm15058_vm12, %v11176_v50, 0  ;;  %vm15065_vm11 = vmmov %vm15046_vm0 }
 0x56f   : > { %v4339_v57 = vpop.xlane.xlu1 %4338  ;;  %v13205_v2 = vpop.eup %11423  ;;  %vm15066_vm12 = vmmov %vm15046_vm0 }
 0x570   : > { %v4380_v1 = vmul.f32 1.442695, %v4354_v17  ;;  %v4357_v5 = vsub.f32 %v13147_v11, %v4339_v57  ;;  %11435 = vpow2.f32 %v4382_v43  ;;  %v4891_v43 = vsel %vm15060_vm13, %v11177_v61, 0  ;;  %vm15068_vm13 = vmmov %vm15046_vm0 }
 0x571   : > { %v4337_v60 = vpop.xlane.xlu0 %4336 }
 0x572   : > { %11437 = vpow2.f32 %v4380_v1  ;;  %v4386_v52 = vmul.f32 1.442695, %v4357_v5  ;;  %v4356_v10 = vsub.f32 %v13152_v19, %v4337_v60 }
 0x573   : > { %v4343_v15 = vpop.xlane.xlu1 %4342 }
 0x574   : > { %v4384_v14 = vmul.f32 1.442695, %v4356_v10  ;;  %v4359_v33 = vsub.f32 %v13157_v25, %v4343_v15  ;;  %11439 = vpow2.f32 %v4386_v52 }
 0x575   : > { %v13209_v59 = vpop.eup %11425  ;;  %10394 = vmatpush3.bf16.xpose.msra.mxu1 %v4894_v0  ;;  %v4341_v11 = vpop.xlane.xlu0 %4340  ;;  %v11178_v0 = vld [vmem:[#allocation2 + $0x4] ss:$36 sps:$4 sm:$0xff]  }
 0x576   : > { %v13211_v3 = vpop.eup %11427  ;;  %11441 = vpow2.f32 %v4384_v14  ;;  %v4390_v51 = vmul.f32 1.442695, %v4359_v33  ;;  %v4358_v19 = vsub.f32 %v13162_v45, %v4341_v11  ;;  %10692 = vmatprep.subr.msk.bf16.mxu1 %vm15046_vm0, %v11177_v61  ;;  %v4426_v28 = vpack.c.bf16 %v13209_v59, %v13205_v2  ;;  %v11179_v61 = vld [vmem:[#allocation2 + $0x4c] ss:$36 sps:$4 sm:$0xff]   ;;  %v11180_v11 = vld [vmem:[#allocation2 + $0x94] ss:$36 sps:$4 sm:$0xff]  }
 0x577   : > { %v13217_v25 = vpop.eup %11429 }
 0x578   : > { %v4388_v31 = vmul.f32 1.442695, %v4358_v19  ;;  %10369 = vmatprep.mubr.bf16.mxu1 %v4426_v28  ;;  %v4427_v4 = vpack.c.bf16 %v13217_v25, %v13211_v3  ;;  %11443 = vpow2.f32 %v4390_v51  ;;  %v11181_v51 = vld [vmem:[#allocation2 + $0xdc] ss:$36 sps:$4 sm:$0xff]   ;;  %v11182_v19 = vld [vmem:[#allocation2 + $0x124] ss:$36 sps:$4 sm:$0xff]  }
 0x579   : > { %v13221_v50 = vpop.permute.xlu0 %5562  ;;  %v13223_v34 = vpop.eup %11431  ;;  %v11183_v28 = vld [vmem:[#allocation2 + $0x16c] ss:$36 sps:$4 sm:$0xff]  }
 0x57a   : > { %11445 = vpow2.f32 %v4388_v31  ;;  %10370 = vmatmul.mubr.bf16.gmra.mxu1 %v4427_v4  ;;  %10693 = vmatprep.subr.msk.bf16.mxu0 %vm15059_vm15, %v13221_v50  ;;  %v11184_v31 = vld [vmem:[#allocation2 + $0x1b4] ss:$36 sps:$4 sm:$0xff]   ;;  %vm15067_vm15 = vmmov %vm15046_vm0  ;;  %v11185_v4 = vld [vmem:[#allocation2 + $0x1fc] ss:$36 sps:$4 sm:$0xff]  }
 0x57b   : > { %v13227_v45 = vpop.eup %11433 }
 0x57c   : > { %v4428_v17 = vpack.c.bf16 %v13223_v34, %v13227_v45 }
 0x57d   : > { %10396 = vmatpush3.bf16.xpose.msra.mxu1 %v4891_v43  ;;  %v13232_v57 = vpop.eup %11435 }
 0x57e   : > { %10373 = vmatprep.mubr.bf16.mxu1 %v4428_v17 }
 0x57f   : > { %v13234_v1 = vpop.eup %11437 }
 0x580   : > { %v4429_v5 = vpack.c.bf16 %v13232_v57, %v13234_v1 }
 0x581   : > { %v13238_v60 = vpop.eup %11439 }
 0x582   : > { %10374 = vmatmul.mubr.bf16.gmra.mxu1 %v4429_v5 }
 0x583   : > { %v13240_v52 = vpop.eup %11441 }
 0x584   : > { %15061 = vst [vmem:[#allocation61_spill] sm:$0xff] %v13240_v52  ;;  %v4430_v10 = vpack.c.bf16 %v13238_v60, %v13240_v52 }
 0x585   : > { %v13244_v15 = vpop.eup %11443 }
 0x586   : > { %10377 = vmatprep.mubr.bf16.mxu1 %v4430_v10 }
 0x587   : > { %v13246_v14 = vpop.eup %11445 }
 0x588   : > { %15062 = vst [vmem:[#allocation62_spill] sm:$0xff] %v13246_v14  ;;  %v4431_v33 = vpack.c.bf16 %v13244_v15, %v13246_v14 }
 0x58a   : > { %10378 = vmatmul.mubr.bf16.gmra.mxu1 %v4431_v33 }
 0x58b   : > { %10397 = vmatprep.mubr.msk.bf16.mxu1 %vm15063_vm14, %v11178_v0  ;;  %vm15069_vm14 = vmmov %vm15046_vm0 }
 0x592   : > { %10398 = vmatmul.mubr.msk.bf16.vlgmr.msra.gmra.mxu1 %vm15064_vm10, %v11179_v61  ;;  %vm15086_vm10 = vnez %v14972_v38 }
 0x593   : > { %10401 = vmatprep.mubr.msk.bf16.mxu1 %vm15065_vm11, %v11180_v11  ;;  %vm15087_vm11 = vnez %v14975_v9 }
 0x59a   : > { %10402 = vmatmul.mubr.msk.bf16.gmra.mxu1 %vm15066_vm12, %v11181_v51  ;;  %vm15088_vm12 = vnez %v14978_v23 }
 0x59b   : > { %10405 = vmatprep.mubr.msk.bf16.mxu1 %vm15046_vm0, %v11182_v19  ;;  %vm15089_vm0 = vnez %v14980_v39 }
 0x5a2   : > { %10406 = vmatmul.mubr.msk.bf16.gmra.mxu1 %vm15067_vm15, %v11183_v28  ;;  %vm15090_vm15 = vnez %v14982_v16 }
 0x5a3   : > { %10409 = vmatprep.mubr.msk.bf16.mxu1 %vm15068_vm13, %v11184_v31  ;;  %vm15091_vm13 = vnez %v14985_v18 }
 0x5aa   : > { %10410 = vmatmul.mubr.msk.bf16.gmra.mxu1 %vm15069_vm14, %v11185_v4  ;;  %vm15092_vm14 = vnez %v14988_v24 }
 0x604   : > { %v13258_v43 = vpop.f32.mrf.mxu1 }
 0x605   : > { %15070 = vst [vmem:[#allocation63_spill] sm:$0xff] %v13258_v43 }
 0x606   : > { %v13260_v17 = vpop.f32.mrf.mxu1 }
 0x607   : > { %15071 = vst [vmem:[#allocation64_spill] sm:$0xff] %v13260_v17  ;;  %v11192_v17 = vld [vmem:[#allocation2 + $0x1cc] ss:$36 sps:$4 sm:$0xff]  }
 0x608   : > { %v13262_v5 = vpop.f32.mrf.mxu1 }
 0x609   : > { %15072 = vst [vmem:[#allocation65_spill] sm:$0xff] %v13262_v5 }
 0x60a   : > { %v13264_v10 = vpop.f32.mrf.mxu1 }
 0x60b   : > { %15073 = vst [vmem:[#allocation66_spill] sm:$0xff] %v13264_v10  ;;  %v11190_v10 = vld [vmem:[#allocation2 + $0x16c] ss:$36 sps:$4 sm:$0xff]  }
 0x63a   : > { %v13266_v33 = vpop.f32.mrf.mxu1 }
 0x63b   : > { %15074 = vst [vmem:[#allocation67_spill] sm:$0xff] %v13266_v33 }
 0x63c   : > { %v13268_v0 = vpop.f32.mrf.mxu1 }
 0x63d   : > { %15075 = vst [vmem:[#allocation68_spill] sm:$0xff] %v13268_v0 }
 0x63e   : > { %v13270_v61 = vpop.f32.mrf.mxu1 }
 0x63f   : > { %15076 = vst [vmem:[#allocation69_spill] sm:$0xff] %v13270_v61 }
 0x640   : > { %v13272_v11 = vpop.f32.mrf.mxu1 }
 0x641   : > { %15077 = vst [vmem:[#allocation70_spill] sm:$0xff] %v13272_v11 }
 0x642   : > { %v13274_v51 = vpop.f32.mrf.mxu1 }
 0x643   : > { %15078 = vst [vmem:[#allocation71_spill] sm:$0xff] %v13274_v51 }
 0x644   : > { %v13276_v19 = vpop.f32.mrf.mxu1 }
 0x645   : > { %15079 = vst [vmem:[#allocation72_spill] sm:$0xff] %v13276_v19 }
 0x646   : > { %v13278_v28 = vpop.f32.mrf.mxu1 }
 0x647   : > { %15080 = vst [vmem:[#allocation73_spill] sm:$0xff] %v13278_v28 }
 0x648   : > { %v13280_v31 = vpop.f32.mrf.mxu1 }
 0x649   : > { %15081 = vst [vmem:[#allocation74_spill] sm:$0xff] %v13280_v31 }
 0x64a   : > { %v13282_v4 = vpop.f32.mrf.mxu1 }
 0x64b   : > { %15082 = vst [vmem:[#allocation75_spill] sm:$0xff] %v13282_v4 }
 0x64c   : > { %v13284_v5 = vpop.f32.mrf.mxu1 }
 0x64d   : > { %15083 = vst [vmem:[#allocation76_spill] sm:$0xff] %v13284_v5 }
 0x64e   : > { %v13286_v43 = vpop.f32.mrf.mxu1 }
 0x64f   : > { %15084 = vst [vmem:[#allocation77_spill] sm:$0xff] %v13286_v43 }
 0x650   : > { %v13288_v33 = vpop.f32.mrf.mxu1 }
 0x651   : > { %15085 = vst [vmem:[#allocation78_spill] sm:$0xff] %v13288_v33 }
 0x652   : > { %v10399_v0 = vpop.f32.mrf.mxu1 }
 0x653   : > { %v13292_v61 = vsel %vm12774_vm1, %v10399_v0, -inf }
 0x654   : > { %5031 = vmax.xlane.f32.xlu0 %v13292_v61  ;;  %v4948_v51 = vpop.f32.mrf.mxu1 }
 0x655   : > { %v13297_v28 = vsel %vm12781_vm2, %v4948_v51, -inf }
 0x656   : > { %v10400_v19 = vpop.f32.mrf.mxu1 }
 0x657   : > { %v13301_v4 = vsel %vm12792_vm3, %v10400_v19, -inf }
 0x658   : > { %5027 = vmax.xlane.f32.xlu0 %v13297_v28  ;;  %5033 = vmax.xlane.f32.xlu1 %v13301_v4  ;;  %v4951_v43 = vpop.f32.mrf.mxu1 }
 0x659   : > { %v13307_v0 = vsel %vm12803_vm4, %v4951_v43, -inf }
 0x65a   : > { %v10403_v33 = vpop.f32.mrf.mxu1 }
 0x65b   : > { %v13312_v51 = vsel %vm12813_vm5, %v10403_v33, -inf }
 0x65c   : > { %5029 = vmax.xlane.f32.xlu1 %v13307_v0  ;;  %v4964_v5 = vpop.f32.mrf.mxu1 }
 0x65d   : > { %v13317_v41 = vsel %vm12829_vm6, %v4964_v5, -inf }
 0x65e   : > { %v10404_v31 = vpop.f32.mrf.mxu1 }
 0x65f   : > { %v13322_v36 = vsel %vm12840_vm7, %v10404_v31, -inf }
 0x660   : > { %5039 = vmax.xlane.f32.xlu1 %v13312_v51  ;;  %v4967_v19 = vpop.f32.mrf.mxu1 }
 0x661   : > { %v13327_v33 = vsel %vm12851_vm8, %v4967_v19, -inf }
 0x662   : > { %v10407_v11 = vpop.f32.mrf.mxu1 }
 0x664   : > { %5035 = vmax.xlane.f32.xlu1 %v13317_v41  ;;  %v4980_v43 = vpop.f32.mrf.mxu1 }
 0x666   : > { %v10408_v13 = vpop.f32.mrf.mxu1 }
 0x668   : > { %5041 = vmax.xlane.f32.xlu1 %v13322_v36  ;;  %v4983_v63 = vpop.f32.mrf.mxu1 }
 0x669   : > { %v13333_v5 = vsel %vm12862_vm9, %v4983_v63, -inf }
 0x66a   : > { %v10411_v35 = vpop.f32.mrf.mxu1 }
 0x66b   : > { %v13338_v31 = vsel %vm15086_vm10, %v10411_v35, -inf  ;;  %vm15094_vm10 = vcmask 523264  }
 0x66c   : > { %5037 = vmax.xlane.f32.xlu1 %v13327_v33  ;;  %v4996_v42 = vpop.f32.mrf.mxu1 }
 0x66d   : > { %v13343_v19 = vsel %vm15087_vm11, %v4996_v42, -inf  ;;  %v13358_v42 = vsel %vm15090_vm15, %v10407_v11, -inf  ;;  %v11189_v11 = vld [vmem:[#allocation2 + $0xdc] ss:$36 sps:$4 sm:$0xff]   ;;  %vm15096_vm11 = vmmov %vm15094_vm10 }
 0x66e   : > { %5556 = vrot.lane.b32.xlu0 %v11186_v12, %s11927_s21  ;;  %v10412_v44 = vpop.f32.mrf.mxu1 }
 0x66f   : > { %v13348_v12 = vsel %vm15088_vm12, %v10412_v44, -inf  ;;  %v13363_v44 = vsel %vm15091_vm13, %v4980_v43, -inf  ;;  %v11191_v43 = vld [vmem:[#allocation2 + $0x1fc] ss:$36 sps:$4 sm:$0xff]   ;;  %vm15095_vm12 = vmmov %vm15094_vm10 }
 0x670   : > { %5045 = vmax.xlane.f32.xlu1 %v13333_v5  ;;  %v4999_v63 = vpop.f32.mrf.mxu1 }
 0x671   : > { %v13353_v35 = vsel %vm15089_vm0, %v4999_v63, -inf  ;;  %v13369_v63 = vsel %vm15092_vm14, %v10408_v13, -inf  ;;  %v11194_v13 = vld [vmem:[#allocation2 + $0xa0] ss:$36 sps:$4 sm:$0xff]   ;;  %vm15098_vm0 = vmmov %vm15094_vm10 }
 0x674   : > { %5055 = vmax.xlane.f32.xlu1 %v13338_v31 }
 0x678   : > { %5051 = vmax.xlane.f32.xlu1 %v13343_v19 }
 0x67c   : > { %5057 = vmax.xlane.f32.xlu1 %v13348_v12 }
 0x680   : > { %5053 = vmax.xlane.f32.xlu1 %v13353_v35 }
 0x68d   : > { %5047 = vmax.xlane.f32.xlu0 %v13358_v42 }
 0x691   : > { %5043 = vmax.xlane.f32.xlu0 %v13363_v44  ;;  %5554 = vrot.lane.b32.xlu1 %v11187_v40, %s11927_s21  ;;  %v11193_v40 = vld [vmem:[#allocation2 + $0xac] ss:$36 sps:$4 sm:$0xff]  }
 0x695   : > { %5049 = vmax.xlane.f32.xlu0 %v13369_v63  ;;  %5494 = vrot.lane.b32.xlu1 %v11188_v48, %s11927_s21  ;;  %v11196_v48 = vld [vmem:[#allocation2 + $0x10] ss:$36 sps:$4 sm:$0xff]  }
 0x699   : > { %5498 = vrot.lane.b32.xlu1 %v11189_v11, %s11927_s21  ;;  %v11197_v11 = vld [vmem:[#allocation2 + $0x4] ss:$36 sps:$4 sm:$0xff]  }
 0x69d   : > { %5502 = vrot.lane.b32.xlu1 %v11190_v10, %s11927_s21  ;;  %v11198_v10 = vld [vmem:[#allocation2 + $0x94] ss:$36 sps:$4 sm:$0xff]  }
 0x6a1   : > { %5506 = vrot.lane.b32.xlu1 %v11191_v43, %s11927_s21  ;;  %v11199_v43 = vld [vmem:[#allocation2 + $0x124] ss:$36 sps:$4 sm:$0xff]  }
 0x6a5   : > { %5897 = vrot.lane.b32.xlu1 %v11192_v17, %s11927_s21  ;;  %v11200_v17 = vld [vmem:[#allocation2 + $0x1b4] ss:$36 sps:$4 sm:$0xff]  }
 0x6a9   : > { %5889 = vrot.lane.b32.xlu1 %v11193_v40, %s11927_s21  ;;  %v11201_v40 = vld [vmem:[#allocation2 + $0x214] ss:$36 sps:$4 sm:$0xff]  }
 0x6ab   : > { %5552 = vrot.lane.b32.xlu0 %v11194_v13, %s11927_s21  ;;  %v11202_v13 = vld [vmem:[#allocation2 + $0x184] ss:$36 sps:$4 sm:$0xff]  }
 0x6af   : > { %5550 = vrot.lane.b32.xlu0 %v11195_v62, %s11927_s21  ;;  %v11203_v62 = vld [vmem:[#allocation2 + $0x13c] ss:$36 sps:$4 sm:$0xff]  }
 0x6b3   : > { %5548 = vrot.lane.b32.xlu0 %v11196_v48, %s11927_s21  ;;  %v11204_v48 = vld [vmem:[#allocation2 + $0xf4] ss:$36 sps:$4 sm:$0xff]  }
 0x6b7   : > { %5492 = vrot.lane.b32.xlu0 %v11197_v11, %s11927_s21  ;;  %v5559_v11 = vpop.permute.xlu0 %5558 }
 0x6bb   : > { %5496 = vrot.lane.b32.xlu0 %v11198_v10, %s11927_s21  ;;  %v5561_v10 = vpop.permute.xlu1 %5560 }
 0x6bf   : > { %5500 = vrot.lane.b32.xlu0 %v11199_v43, %s11927_s21 }
 0x6c3   : > { %5504 = vrot.lane.b32.xlu0 %v11200_v17, %s11927_s21 }
 0x6c7   : > { %5899 = vrot.lane.b32.xlu0 %v11201_v40, %s11927_s21 }
 0x6cb   : > { %5895 = vrot.lane.b32.xlu0 %v11202_v13, %s11927_s21 }
 0x6cf   : > { %5893 = vrot.lane.b32.xlu0 %v11203_v62, %s11927_s21 }
 0x6d3   : > { %5891 = vrot.lane.b32.xlu0 %v11204_v48, %s11927_s21 }
 0x6dd   : > { %v5032_v6 = vpop.xlane.xlu0 %5031 }
 0x6de   : > { %v5061_v40 = vsub.f32 %v13292_v61, %v5032_v6 }
 0x6e0   : > { %v5079_v62 = vmul.f32 1.442695, %v5061_v40  ;;  %v5607_v40 = vsel %vm15096_vm11, %v5561_v10, 0  ;;  %vm15102_vm11 = vmmov %vm15098_vm0 }
 0x6e1   : > { %v5028_v29 = vpop.xlane.xlu0 %5027  ;;  %v5034_v43 = vpop.xlane.xlu1 %5033 }
 0x6e2   : > { %v5059_v49 = vsub.f32 %v13297_v28, %v5028_v29  ;;  %v5062_v17 = vsub.f32 %v13301_v4, %v5034_v43 }
 0x6e4   : > { %v5075_v21 = vmul.f32 1.442695, %v5059_v49  ;;  %v5081_v20 = vmul.f32 1.442695, %v5062_v17 }
 0x6e5   : > { %v5030_v13 = vpop.xlane.xlu1 %5029 }
 0x6e6   : > { %v5060_v14 = vsub.f32 %v13307_v0, %v5030_v13  ;;  %11447 = vpow2.f32 %v5075_v21 }
 0x6e7   : > { %11449 = vpow2.f32 %v5081_v20 }
 0x6e8   : > { %v5077_v47 = vmul.f32 1.442695, %v5060_v14 }
 0x6e9   : > { %v5040_v48 = vpop.xlane.xlu1 %5039 }
 0x6ea   : > { %11451 = vpow2.f32 %v5077_v47  ;;  %v5065_v6 = vsub.f32 %v13312_v51, %v5040_v48  ;;  %v5610_v51 = vsel %vm15094_vm10, %v13221_v50, 0  ;;  %vm15101_vm10 = vmmov %vm15098_vm0 }
 0x6eb   : > { %11453 = vpow2.f32 %v5079_v62 }
 0x6ec   : > { %v5087_v47 = vmul.f32 1.442695, %v5065_v6 }
 0x6ed   : > { %v5036_v52 = vpop.xlane.xlu1 %5035 }
 0x6ee   : > { %v5063_v37 = vsub.f32 %v13317_v41, %v5036_v52 }
 0x6f0   : > { %v5083_v49 = vmul.f32 1.442695, %v5063_v37 }
 0x6f1   : > { %v5042_v29 = vpop.xlane.xlu1 %5041 }
 0x6f2   : > { %v5066_v28 = vsub.f32 %v13322_v36, %v5042_v29  ;;  %11455 = vpow2.f32 %v5083_v49  ;;  %v5557_v49 = vpop.permute.xlu0 %5556 }
 0x6f3   : > { %v13396_v61 = vpop.eup %11447 }
 0x6f4   : > { %v5089_v4 = vmul.f32 1.442695, %v5066_v28  ;;  %v13398_v43 = vpop.eup %11449 }
 0x6f5   : > { %v5038_v0 = vpop.xlane.xlu1 %5037 }
 0x6f6   : > { %v5064_v21 = vsub.f32 %v13327_v33, %v5038_v0  ;;  %11457 = vpow2.f32 %v5089_v4 }
 0x6f7   : > { %v13401_v20 = vpop.eup %11451 }
 0x6f8   : > { %v13403_v14 = vpop.eup %11453  ;;  %v5085_v41 = vmul.f32 1.442695, %v5064_v21  ;;  %v5139_v36 = vpack.c.bf16 %v13401_v20, %v13396_v61 }
 0x6f9   : > { %15093 = vst [vmem:[#allocation79_spill] sm:$0xff] %v13403_v14  ;;  %v5140_v37 = vpack.c.bf16 %v13398_v43, %v13403_v14  ;;  %v5046_v52 = vpop.xlane.xlu1 %5045 }
 0x6fa   : > { %11459 = vpow2.f32 %v5085_v41  ;;  %10429 = vmatprep.mubr.bf16.mxu0 %v5139_v36 }
 0x6fb   : > { %11461 = vpow2.f32 %v5087_v47  ;;  %10430 = vmatmul.mubr.bf16.vlgmr.msra.gmra.mxu0 %v5140_v37  ;;  %v5068_v47 = vsub.f32 %v13333_v5, %v5046_v52 }
 0x6fc   : > { %10446 = vmatpush3.bf16.xpose.msra.mxu0 %v5610_v51 }
 0x6fd   : > { %10694 = vmatprep.subr.msk.bf16.mxu0 %vm15095_vm12, %v5561_v10  ;;  %v5056_v33 = vpop.xlane.xlu1 %5055  ;;  %v5604_v10 = vsel %vm15101_vm10, %v5559_v11, 0  ;;  %vm15103_vm12 = vmmov %vm15098_vm0  ;;  %v5093_v37 = vmul.f32 1.442695, %v5068_v47 }
 0x6fe   : > { %v5601_v0 = vsel %vm15103_vm12, %v5557_v49, 0  ;;  %vm15104_vm10 = vmmov %vm15098_vm0 }
 0x6ff   : > { %v13413_v13 = vpop.eup %11455  ;;  %11463 = vpow2.f32 %v5093_v37  ;;  %vm15106_vm12 = vmmov %vm15098_vm0 }
 0x700   : > { %15097 = vst [vmem:[#allocation80_spill] sm:$0xff] %v13413_v13 }
 0x701   : > { %v5052_v17 = vpop.xlane.xlu1 %5051 }
 0x703   : > { %v13416_v62 = vpop.eup %11457 }
 0x704   : > { %10448 = vmatpush3.bf16.xpose.msra.mxu0 %v5607_v40  ;;  %15099 = vst [vmem:[#allocation81_spill] sm:$0xff] %v13416_v62 }
 0x705   : > { %10695 = vmatprep.subr.msk.bf16.mxu0 %vm15098_vm0, %v5559_v11  ;;  %v5058_v28 = vpop.xlane.xlu1 %5057 }
 0x706   : > { %v5074_v52 = vsub.f32 %v13348_v12, %v5058_v28 }
 0x707   : > { %v13418_v48 = vpop.eup %11459 }
 0x708   : > { %v13420_v29 = vpop.eup %11461  ;;  %v5141_v50 = vpack.c.bf16 %v13418_v48, %v13413_v13 }
 0x709   : > { %15100 = vst [vmem:[#allocation82_spill] sm:$0xff] %v13420_v29  ;;  %v5142_v6 = vpack.c.bf16 %v13416_v62, %v13420_v29  ;;  %v5054_v4 = vpop.xlane.xlu1 %5053 }
 0x70a   : > { %10433 = vmatprep.mubr.bf16.mxu0 %v5141_v50  ;;  %v5072_v36 = vsub.f32 %v13353_v35, %v5054_v4  ;;  %v5073_v4 = vsub.f32 %v13338_v31, %v5056_v33 }
 0x70b   : > { %10434 = vmatmul.mubr.bf16.gmra.mxu0 %v5142_v6  ;;  %v5071_v6 = vsub.f32 %v13343_v19, %v5052_v17  ;;  %v5105_v17 = vmul.f32 1.442695, %v5074_v52 }
 0x70c   : > { %10450 = vmatpush3.bf16.xpose.msra.mxu0 %v5604_v10  ;;  %v5101_v10 = vmul.f32 1.442695, %v5072_v36  ;;  %v5103_v47 = vmul.f32 1.442695, %v5073_v4 }
 0x70d   : > { %10696 = vmatprep.subr.msk.bf16.mxu0 %vm15102_vm11, %v5557_v49  ;;  %v5555_v21 = vpop.permute.xlu1 %5554  ;;  %v5099_v35 = vmul.f32 1.442695, %v5071_v6  ;;  %vm15105_vm11 = vmmov %vm15098_vm0 }
 0x70e   : > { %v5598_v50 = vsel %vm15104_vm10, %v5555_v21, 0  ;;  %vm15108_vm10 = vmmov %vm15098_vm0 }
 0x714   : > { %10452 = vmatpush3.bf16.xpose.msra.mxu0 %v5601_v0 }
 0x715   : > { %10697 = vmatprep.subr.msk.bf16.mxu0 %vm15098_vm0, %v5555_v21 }
 0x716   : > { %v5048_v41 = vpop.xlane.xlu0 %5047 }
 0x717   : > { %v5069_v51 = vsub.f32 %v13358_v42, %v5048_v41 }
 0x719   : > { %v5095_v0 = vmul.f32 1.442695, %v5069_v51 }
 0x71a   : > { %v5044_v11 = vpop.xlane.xlu0 %5043 }
 0x71b   : > { %v5067_v40 = vsub.f32 %v13363_v44, %v5044_v11 }
 0x71c   : > { %10454 = vmatpush3.bf16.xpose.msra.mxu0 %v5598_v50 }
 0x71d   : > { %v5091_v49 = vmul.f32 1.442695, %v5067_v40 }
 0x71e   : > { %v5050_v29 = vpop.xlane.xlu0 %5049 }
 0x71f   : > { %11465 = vpow2.f32 %v5091_v49  ;;  %v5070_v5 = vsub.f32 %v13369_v63, %v5050_v29  ;;  %v5495_v63 = vpop.permute.xlu1 %5494  ;;  %v13442_v29 = vpop.eup %11463 }
 0x720   : > { %11467 = vpow2.f32 %v5101_v10  ;;  %15107 = vst [vmem:[#allocation83_spill] sm:$0xff] %v13442_v29 }
 0x721   : > { %v5097_v42 = vmul.f32 1.442695, %v5070_v5  ;;  %11469 = vpow2.f32 %v5095_v0  ;;  %v11205_v0 = vld [vmem:[#allocation2 + $0x218] ss:$36 sps:$4 sm:$0xff]  }
 0x722   : > { %v5553_v44 = vpop.permute.xlu0 %5552 }
 0x723   : > { %11471 = vpow2.f32 %v5097_v42  ;;  %10698 = vmatprep.subr.msk.bf16.mxu0 %vm15105_vm11, %v5553_v44  ;;  %v5595_v19 = vsel %vm15106_vm12, %v5553_v44, 0  ;;  %vm15110_vm11 = vmmov %vm15098_vm0  ;;  %v5499_v36 = vpop.permute.xlu1 %5498 }
 0x724   : > { %11473 = vpow2.f32 %v5099_v35  ;;  %10456 = vmatpush3.bf16.xpose.msra.mxu0 %v5595_v19  ;;  %vm15115_vm12 = vmmov %vm15098_vm0 }
 0x725   : > { %11475 = vpow2.f32 %v5105_v17 }
 0x726   : > { %v5551_v21 = vpop.permute.xlu0 %5550  ;;  %11477 = vpow2.f32 %v5103_v47 }
 0x727   : > { %10699 = vmatprep.subr.msk.bf16.mxu0 %vm15098_vm0, %v5551_v21  ;;  %v5592_v31 = vsel %vm15108_vm10, %v5551_v21, 0  ;;  %v5503_v5 = vpop.permute.xlu1 %5502  ;;  %vm15118_vm10 = vmmov %vm15098_vm0 }
 0x72a   : > { %v5549_v12 = vpop.permute.xlu0 %5548 }
 0x72b   : > { %v5589_v49 = vsel %vm15115_vm12, %v5549_v12, 0  ;;  %v5507_v4 = vpop.permute.xlu1 %5506  ;;  %vm15120_vm12 = vmmov %vm15098_vm0 }
 0x72c   : > { %v13445_v33 = vpop.eup %11465  ;;  %10458 = vmatpush3.bf16.xpose.msra.mxu0 %v5592_v31 }
 0x72d   : > { %15109 = vst [vmem:[#allocation84_spill] sm:$0xff] %v13445_v33  ;;  %10700 = vmatprep.subr.msk.bf16.mxu0 %vm15110_vm11, %v5549_v12  ;;  %v5143_v28 = vpack.c.bf16 %v13442_v29, %v13445_v33  ;;  %v13450_v41 = vpop.eup %11467  ;;  %v11206_v12 = vld [vmem:[#allocation2 + $0x1d0] ss:$36 sps:$4 sm:$0xff]   ;;  %vm15119_vm11 = vmmov %vm15098_vm0 }
 0x72e   : > { %15111 = vst [vmem:[#allocation85_spill] sm:$0xff] %v13450_v41  ;;  %v5493_v37 = vpop.permute.xlu0 %5492  ;;  %v13452_v51 = vpop.eup %11469 }
 0x72f   : > { %15112 = vst [vmem:[#allocation86_spill] sm:$0xff] %v13452_v51  ;;  %10437 = vmatprep.mubr.bf16.mxu0 %v5143_v28  ;;  %v5898_v21 = vpop.permute.xlu1 %5897  ;;  %v11207_v28 = vld [vmem:[#allocation2 + $0x188] ss:$36 sps:$4 sm:$0xff]  }
 0x730   : > { %v13454_v11 = vpop.eup %11471 }
 0x731   : > { %15113 = vst [vmem:[#allocation87_spill] sm:$0xff] %v13454_v11  ;;  %v13456_v40 = vpop.eup %11473  ;;  %v5144_v50 = vpack.c.bf16 %v13454_v11, %v13452_v51 }
 0x732   : > { %15114 = vst [vmem:[#allocation88_spill] sm:$0xff] %v13456_v40  ;;  %v5497_v6 = vpop.permute.xlu0 %5496  ;;  %v5145_v10 = vpack.c.bf16 %v13450_v41, %v13456_v40  ;;  %v13463_v35 = vpop.eup %11475 }
 0x733   : > { %10438 = vmatmul.mubr.bf16.gmra.mxu0 %v5144_v50  ;;  %15116 = vst [vmem:[#allocation89_spill] sm:$0xff] %v13463_v35  ;;  %v13465_v42 = vpop.eup %11477  ;;  %v11209_v50 = vld [vmem:[#allocation2 + $0xf8] ss:$36 sps:$4 sm:$0xff]  }
 0x734   : > { %10441 = vmatprep.mubr.bf16.mxu0 %v5145_v10  ;;  %10460 = vmatpush3.bf16.xpose.msra.mxu0 %v5589_v49  ;;  %15117 = vst [vmem:[#allocation90_spill] sm:$0xff] %v13465_v42  ;;  %v5146_v44 = vpack.c.bf16 %v13463_v35, %v13465_v42  ;;  %v11210_v10 = vld [vmem:[#allocation2 + $0xb0] ss:$36 sps:$4 sm:$0xff]   ;;  %v11212_v49 = vld [vmem:[#allocation2 + $0x20] ss:$36 sps:$4 sm:$0xff]  }
 0x735   : > { %10541 = vmatprep.subr.bf16.mxu0 %v11205_v0 }
 0x736   : > { %v5501_v52 = vpop.permute.xlu0 %5500 }
 0x73a   : > { %v5505_v19 = vpop.permute.xlu0 %5504 }
 0x73b   : > { %10442 = vmatmul.mubr.bf16.gmra.mxu0 %v5146_v44 }
 0x73c   : > { %10461 = vmatprep.mubr.msk.bf16.mxu0 %vm15098_vm0, %v5493_v37  ;;  %v11208_v37 = vld [vmem:[#allocation2 + $0x140] ss:$36 sps:$4 sm:$0xff]  }
 0x73e   : > { %v5900_v17 = vpop.permute.xlu0 %5899 }
 0x73f   : > { %10477 = vmatprep.subr.bf16.mxu1 %v5900_v17 }
 0x740   : > { %10478 = vmatpush3.bf16.msra.mxu1 %v5900_v17 }
 0x741   : > { %10479 = vmatprep.subr.bf16.mxu1 %v5898_v21 }
 0x742   : > { %v5896_v47 = vpop.permute.xlu0 %5895 }
 0x743   : > { %10462 = vmatmul.mubr.msk.bf16.vlgmr.msra.gmra.mxu0 %vm15118_vm10, %v5495_v63  ;;  %vm15121_vm10 = vmmov %vm15098_vm0 }
 0x744   : > { %10542 = vmatpush3.bf16.msra.mxu0 %v11205_v0  ;;  %10465 = vmatprep.mubr.msk.bf16.mxu0 %vm15119_vm11, %v5497_v6  ;;  %v5890_v6 = vpop.permute.xlu1 %5889  ;;  %vm15122_vm11 = vmmov %vm15098_vm0 }
 0x745   : > { %10480 = vmatpush3.bf16.msra.mxu1 %v5898_v21  ;;  %10543 = vmatprep.subr.bf16.mxu0 %v11206_v12 }
 0x746   : > { %10481 = vmatprep.subr.bf16.mxu1 %v5896_v47  ;;  %v5894_v31 = vpop.permute.xlu0 %5893 }
 0x748   : > { %10544 = vmatpush3.bf16.msra.mxu0 %v11206_v12 }
 0x749   : > { %10482 = vmatpush3.bf16.msra.mxu1 %v5896_v47  ;;  %10545 = vmatprep.subr.bf16.mxu0 %v11207_v28 }
 0x74a   : > { %10483 = vmatprep.subr.bf16.mxu1 %v5894_v31  ;;  %v5892_v63 = vpop.permute.xlu0 %5891 }
 0x74b   : > { %10466 = vmatmul.mubr.msk.bf16.gmra.mxu0 %vm15120_vm12, %v5499_v36  ;;  %v11211_v36 = vld [vmem:[#allocation2 + $0x68] ss:$36 sps:$4 sm:$0xff]   ;;  %vm15123_vm12 = vmmov %vm15098_vm0 }
 0x74c   : > { %10546 = vmatpush3.bf16.msra.mxu0 %v11207_v28  ;;  %10469 = vmatprep.mubr.msk.bf16.mxu0 %vm15098_vm0, %v5501_v52  ;;  %vm15140_vm0 = vnez %v14980_v39 }
 0x74d   : > { %10484 = vmatpush3.bf16.msra.mxu1 %v5894_v31  ;;  %10547 = vmatprep.subr.bf16.mxu0 %v11208_v37 }
 0x74e   : > { %10485 = vmatprep.subr.bf16.mxu1 %v5892_v63 }
 0x750   : > { %10548 = vmatpush3.bf16.msra.mxu0 %v11208_v37 }
 0x751   : > { %10486 = vmatpush3.bf16.msra.mxu1 %v5892_v63  ;;  %10549 = vmatprep.subr.bf16.mxu0 %v11209_v50 }
 0x752   : > { %10487 = vmatprep.subr.bf16.mxu1 %v5890_v6 }
 0x753   : > { %10470 = vmatmul.mubr.msk.bf16.gmra.mxu0 %vm15121_vm10, %v5503_v5  ;;  %vm15141_vm10 = vnez %v14975_v9 }
 0x754   : > { %10550 = vmatpush3.bf16.msra.mxu0 %v11209_v50  ;;  %10473 = vmatprep.mubr.msk.bf16.mxu0 %vm15122_vm11, %v5505_v19  ;;  %vm15142_vm11 = vnez %v14978_v23 }
 0x755   : > { %10488 = vmatpush3.bf16.msra.mxu1 %v5890_v6  ;;  %10551 = vmatprep.subr.bf16.mxu0 %v11210_v10 }
 0x758   : > { %10552 = vmatpush3.bf16.msra.mxu0 %v11210_v10 }
 0x759   : > { %10553 = vmatprep.subr.bf16.mxu0 %v11211_v36 }
 0x75b   : > { %10474 = vmatmul.mubr.msk.bf16.gmra.mxu0 %vm15123_vm12, %v5507_v4  ;;  %vm15143_vm12 = vnez %v14972_v38 }
 0x75c   : > { %10554 = vmatpush3.bf16.msra.mxu0 %v11211_v36 }
 0x75d   : > { %10555 = vmatprep.subr.bf16.mxu0 %v11212_v49 }
 0x760   : > { %10556 = vmatpush3.bf16.msra.mxu0 %v11212_v49 }
 0x7bb   : > { %v13477_v0 = vpop.f32.mrf.mxu0 }
 0x7bc   : > { %15124 = vst [vmem:[#allocation91_spill] sm:$0xff] %v13477_v0  ;;  %v11218_v0 = vld [vmem:[#allocation2 + $0x17c] ss:$36 sps:$4 sm:$0xff]  }
 0x7bd   : > { %v13479_v52 = vpop.f32.mrf.mxu0 }
 0x7be   : > { %15125 = vst [vmem:[#allocation92_spill] sm:$0xff] %v13479_v52 }
 0x7bf   : > { %v13481_v5 = vpop.f32.mrf.mxu0 }
 0x7c0   : > { %15126 = vst [vmem:[#allocation93_spill] sm:$0xff] %v13481_v5 }
 0x7c1   : > { %v13483_v44 = vpop.f32.mrf.mxu0 }
 0x7c2   : > { %15127 = vst [vmem:[#allocation94_spill] sm:$0xff] %v13483_v44 }
 0x7cb   : > { %v13485_v19 = vpop.f32.mrf.mxu0 }
 0x7cc   : > { %15128 = vst [vmem:[#allocation95_spill] sm:$0xff] %v13485_v19 }
 0x7cd   : > { %v13487_v17 = vpop.f32.mrf.mxu0 }
 0x7ce   : > { %15129 = vst [vmem:[#allocation96_spill] sm:$0xff] %v13487_v17  ;;  %v11216_v17 = vld [vmem:[#allocation2 + $0xec] ss:$36 sps:$4 sm:$0xff]  }
 0x7cf   : > { %v13489_v21 = vpop.f32.mrf.mxu0 }
 0x7d0   : > { %15130 = vst [vmem:[#allocation97_spill] sm:$0xff] %v13489_v21 }
 0x7d1   : > { %v13491_v47 = vpop.f32.mrf.mxu0 }
 0x7d2   : > { %15131 = vst [vmem:[#allocation98_spill] sm:$0xff] %v13491_v47 }
 0x7f3   : > { %v13493_v4 = vpop.f32.mrf.mxu0 }
 0x7f4   : > { %15132 = vst [vmem:[#allocation99_spill] sm:$0xff] %v13493_v4 }
 0x7f5   : > { %v13495_v12 = vpop.f32.mrf.mxu0 }
 0x7f6   : > { %15133 = vst [vmem:[#allocation100_spill] sm:$0xff] %v13495_v12 }
 0x7f7   : > { %v13497_v31 = vpop.f32.mrf.mxu0 }
 0x7f8   : > { %15134 = vst [vmem:[#allocation101_spill] sm:$0xff] %v13497_v31 }
 0x7f9   : > { %v13499_v28 = vpop.f32.mrf.mxu0 }
 0x7fa   : > { %15135 = vst [vmem:[#allocation102_spill] sm:$0xff] %v13499_v28 }
 0x7fb   : > { %v13501_v37 = vpop.f32.mrf.mxu0 }
 0x7fc   : > { %15136 = vst [vmem:[#allocation103_spill] sm:$0xff] %v13501_v37 }
 0x7fd   : > { %v13503_v63 = vpop.f32.mrf.mxu0 }
 0x7fe   : > { %15137 = vst [vmem:[#allocation104_spill] sm:$0xff] %v13503_v63  ;;  %v11214_v63 = vld [vmem:[#allocation2 + $0x1c] ss:$36 sps:$4 sm:$0xff]  }
 0x7ff   : > { %v13505_v50 = vpop.f32.mrf.mxu0 }
 0x800   : > { %15138 = vst [vmem:[#allocation105_spill] sm:$0xff] %v13505_v50 }
 0x801   : > { %v13507_v6 = vpop.f32.mrf.mxu0 }
 0x802   : > { %15139 = vst [vmem:[#allocation106_spill] sm:$0xff] %v13507_v6 }
 0x803   : > { %v10463_v10 = vpop.f32.mrf.mxu0 }
 0x804   : > { %v13511_v36 = vsel %vm12774_vm1, %v10463_v10, -inf  ;;  %v11213_v10 = vld [vmem:[#allocation2 + $0x64] ss:$36 sps:$4 sm:$0xff]  }
 0x805   : > { %5729 = vmax.xlane.f32.xlu1 %v13511_v36  ;;  %v5646_v49 = vpop.f32.mrf.mxu0 }
 0x806   : > { %v13516_v35 = vsel %vm12781_vm2, %v5646_v49, -inf }
 0x807   : > { %5725 = vmax.xlane.f32.xlu0 %v13516_v35  ;;  %v10464_v37 = vpop.f32.mrf.mxu0 }
 0x808   : > { %v5712_v50 = vsel %vm12792_vm3, %v10464_v37, -inf }
 0x809   : > { %5731 = vmax.xlane.f32.xlu1 %v5712_v50  ;;  %v5649_v42 = vpop.f32.mrf.mxu0 }
 0x80a   : > { %v13523_v6 = vsel %vm12803_vm4, %v5649_v42, -inf }
 0x80b   : > { %v10467_v49 = vpop.f32.mrf.mxu0 }
 0x80d   : > { %5727 = vmax.xlane.f32.xlu1 %v13523_v6  ;;  %v5662_v31 = vpop.f32.mrf.mxu0 }
 0x80e   : > { %v13530_v42 = vsel %vm12829_vm6, %v5662_v31, -inf }
 0x80f   : > { %v10468_v4 = vpop.f32.mrf.mxu0 }
 0x810   : > { %v13545_v31 = vsel %vm12840_vm7, %v10468_v4, -inf }
 0x811   : > { %v5665_v28 = vpop.f32.mrf.mxu0 }
 0x813   : > { %v10471_v41 = vpop.f32.mrf.mxu0 }
 0x815   : > { %v5678_v37 = vpop.f32.mrf.mxu0 }
 0x817   : > { %v10472_v40 = vpop.f32.mrf.mxu0 }
 0x818   : > { %v13560_v33 = vsel %vm15092_vm14, %v10472_v40, -inf }
 0x819   : > { %v5681_v12 = vpop.f32.mrf.mxu0 }
 0x81a   : > { %v13550_v29 = vsel %vm12862_vm9, %v5681_v12, -inf  ;;  %v13565_v12 = vsel %vm15090_vm15, %v10471_v41, -inf }
 0x81b   : > { %v10475_v11 = vpop.f32.mrf.mxu0 }
 0x81c   : > { %v13585_v41 = vsel %vm15143_vm12, %v10475_v11, -inf }
 0x81d   : > { %5887 = vrot.lane.b32.xlu0 %v11213_v10, %s11927_s21  ;;  %v13535_v10 = vsel %vm12813_vm5, %v10467_v49, -inf  ;;  %v5694_v51 = vpop.f32.mrf.mxu0 }
 0x81e   : > { %5885 = vrot.lane.b32.xlu1 %v11214_v63, %s11927_s21  ;;  %v13540_v63 = vsel %vm12851_vm8, %v5665_v28, -inf  ;;  %v13555_v28 = vsel %vm15091_vm13, %v5678_v37, -inf  ;;  %v13575_v37 = vsel %vm15141_vm10, %v5694_v51, -inf  ;;  %v11217_v51 = vld [vmem:[#allocation2 + $0x20c] ss:$36 sps:$4 sm:$0xff]  }
 0x81f   : > { %v10476_v49 = vpop.f32.mrf.mxu0 }
 0x820   : > { %v13580_v40 = vsel %vm15142_vm11, %v10476_v49, -inf }
 0x821   : > { %v5697_v4 = vpop.f32.mrf.mxu0 }
 0x822   : > { %v13570_v19 = vsel %vm15140_vm0, %v5697_v4, -inf  ;;  %v11215_v4 = vld [vmem:[#allocation2 + $0x1c4] ss:$36 sps:$4 sm:$0xff]   ;;  %vm15144_vm0 = vcmask 523264  }
 0x823   : > { %vm15145_vm11 = vmmov %vm15144_vm0 }
 0x824   : > { %vm15146_vm10 = vmmov %vm15144_vm0 }
 0x825   : > { %vm15147_vm12 = vmmov %vm15144_vm0 }
 0x826   : > { %vm15148_vm9 = vmmov %vm15144_vm0 }
 0x827   : > { %vm15149_vm14 = vmmov %vm15144_vm0 }
 0x828   : > { %vm15150_vm13 = vmmov %vm15144_vm0 }
 0x83c   : > { %5733 = vmax.xlane.f32.xlu0 %v13530_v42 }
 0x840   : > { %5737 = vmax.xlane.f32.xlu0 %v13535_v10 }
 0x842   : > { %5735 = vmax.xlane.f32.xlu1 %v13540_v63 }
 0x844   : > { %5739 = vmax.xlane.f32.xlu0 %v13545_v31 }
 0x846   : > { %5743 = vmax.xlane.f32.xlu1 %v13550_v29 }
 0x848   : > { %5741 = vmax.xlane.f32.xlu0 %v13555_v28 }
 0x84a   : > { %5747 = vmax.xlane.f32.xlu1 %v13560_v33 }
 0x84c   : > { %5745 = vmax.xlane.f32.xlu0 %v13565_v12 }
 0x84e   : > { %5751 = vmax.xlane.f32.xlu1 %v13570_v19 }
 0x850   : > { %5749 = vmax.xlane.f32.xlu0 %v13575_v37 }
 0x852   : > { %5755 = vmax.xlane.f32.xlu1 %v13580_v40 }
 0x854   : > { %5753 = vmax.xlane.f32.xlu0 %v13585_v41 }
 0x863   : > { %6972 = vrot.lane.b32.xlu1 %v11215_v4, %s11927_s21 }
 0x867   : > { %6966 = vrot.lane.b32.xlu1 %v11216_v17, %s11927_s21 }
 0x86a   : > { %6974 = vrot.lane.b32.xlu0 %v11217_v51, %s11927_s21 }
 0x86e   : > { %6970 = vrot.lane.b32.xlu0 %v11218_v0, %s11927_s21 }
 0x88e   : > { %v5730_v49 = vpop.xlane.xlu1 %5729 }
 0x88f   : > { %v5759_v5 = vsub.f32 %v13511_v36, %v5730_v49  ;;  %v11222_v49 = vld [vmem:[#allocation2 + $0x134] ss:$36 sps:$4 sm:$0xff]  }
 0x890   : > { %v5726_v21 = vpop.xlane.xlu0 %5725 }
 0x891   : > { %v5757_v52 = vsub.f32 %v13516_v35, %v5726_v21  ;;  %v5777_v51 = vmul.f32 1.442695, %v5759_v5  ;;  %v11219_v35 = vld [vmem:[#allocation2 + $0x20c] ss:$36 sps:$4 sm:$0xff]   ;;  %v11220_v5 = vld [vmem:[#allocation2 + $0x1c4] ss:$36 sps:$4 sm:$0xff]  }
 0x892   : > { %v5732_v11 = vpop.xlane.xlu1 %5731 }
 0x893   : > { %v5760_v47 = vsub.f32 %v5712_v50, %v5732_v11  ;;  %v5773_v13 = vmul.f32 1.442695, %v5757_v52  ;;  %v6321_v50 = vsel %vm15146_vm10, %v11220_v5, 0  ;;  %v6315_v11 = vsel %vm15150_vm13, %v11222_v49, 0  ;;  %vm15153_vm13 = vmmov %vm15144_vm0 }
 0x894   : > { %v5888_v44 = vpop.permute.xlu0 %5887  ;;  %vm15155_vm10 = vmmov %vm15144_vm0 }
 0x895   : > { %10489 = vmatprep.subr.bf16.mxu1 %v5888_v44  ;;  %v5779_v4 = vmul.f32 1.442695, %v5760_v47  ;;  %11479 = vpow2.f32 %v5773_v13 }
 0x896   : > { %10490 = vmatpush3.bf16.msra.mxu1 %v5888_v44  ;;  %v5728_v17 = vpop.xlane.xlu1 %5727 }
 0x897   : > { %v5758_v14 = vsub.f32 %v13523_v6, %v5728_v17  ;;  %11481 = vpow2.f32 %v5779_v4  ;;  %v11221_v6 = vld [vmem:[#allocation2 + $0x17c] ss:$36 sps:$4 sm:$0xff]   ;;  %v11223_v4 = vld [vmem:[#allocation2 + $0xec] ss:$36 sps:$4 sm:$0xff]  }
 0x898   : > { %v6318_v36 = vsel %vm15148_vm9, %v11221_v6, 0  ;;  %vm15152_vm9 = vmmov %vm15144_vm0 }
 0x899   : > { %v5775_v62 = vmul.f32 1.442695, %v5758_v14 }
 0x89a   : > { %v5886_v0 = vpop.permute.xlu1 %5885 }
 0x89b   : > { %11483 = vpow2.f32 %v5775_v62  ;;  %10491 = vmatprep.subr.bf16.mxu1 %v5886_v0  ;;  %v6324_v62 = vsel %vm15145_vm11, %v11219_v35, 0  ;;  %vm15151_vm11 = vmmov %vm15144_vm0 }
 0x89c   : > { %11485 = vpow2.f32 %v5777_v51  ;;  %10492 = vmatpush3.bf16.msra.mxu1 %v5886_v0 }
 0x89d   : > { %10701 = vmatprep.subr.msk.bf16.mxu1 %vm15144_vm0, %v11219_v35 }
 0x8a2   : > { %v13596_v21 = vpop.eup %11479 }
 0x8a4   : > { %v13598_v52 = vpop.eup %11481 }
 0x8a8   : > { %v13600_v44 = vpop.eup %11483 }
 0x8a9   : > { %v13602_v47 = vpop.eup %11485  ;;  %v5837_v14 = vpack.c.bf16 %v13600_v44, %v13596_v21 }
 0x8aa   : > { %v5838_v13 = vpack.c.bf16 %v13598_v52, %v13602_v47 }
 0x8ab   : > { %10493 = vmatprep.mubr.bf16.mxu1 %v5837_v14 }
 0x8ac   : > { %10494 = vmatmul.mubr.bf16.vlgmr.msra.gmra.mxu1 %v5838_v13 }
 0x8ad   : > { %10510 = vmatpush3.bf16.xpose.msra.mxu1 %v6324_v62 }
 0x8ae   : > { %10702 = vmatprep.subr.msk.bf16.mxu1 %vm15144_vm0, %v11220_v5  ;;  %v6312_v5 = vsel %vm15152_vm9, %v11223_v4, 0  ;;  %vm15158_vm9 = vmmov %vm15144_vm0 }
 0x8b5   : > { %10512 = vmatpush3.bf16.xpose.msra.mxu1 %v6321_v50  ;;  %v11224_v50 = vld [vmem:[#allocation2 + $0xa4] ss:$36 sps:$4 sm:$0xff]  }
 0x8b6   : > { %10703 = vmatprep.subr.msk.bf16.mxu1 %vm15147_vm12, %v11221_v6  ;;  %vm15156_vm12 = vmmov %vm15144_vm0 }
 0x8bd   : > { %10514 = vmatpush3.bf16.xpose.msra.mxu1 %v6318_v36 }
 0x8be   : > { %10704 = vmatprep.subr.msk.bf16.mxu1 %vm15149_vm14, %v11222_v49  ;;  %vm15154_vm14 = vmmov %vm15144_vm0 }
 0x8c5   : > { %10516 = vmatpush3.bf16.xpose.msra.mxu1 %v6315_v11  ;;  %v5734_v17 = vpop.xlane.xlu0 %5733 }
 0x8c6   : > { %10705 = vmatprep.subr.msk.bf16.mxu1 %vm15151_vm11, %v11223_v4  ;;  %v5761_v51 = vsub.f32 %v13530_v42, %v5734_v17  ;;  %vm15157_vm11 = vmmov %vm15144_vm0 }
 0x8c8   : > { %v5781_v14 = vmul.f32 1.442695, %v5761_v51 }
 0x8c9   : > { %v5738_v0 = vpop.xlane.xlu0 %5737 }
 0x8ca   : > { %v5763_v35 = vsub.f32 %v13535_v10, %v5738_v0  ;;  %11487 = vpow2.f32 %v5781_v14 }
 0x8cb   : > { %v5736_v13 = vpop.xlane.xlu1 %5735 }
 0x8cc   : > { %v5762_v62 = vsub.f32 %v13540_v63, %v5736_v13  ;;  %v5785_v6 = vmul.f32 1.442695, %v5763_v35 }
 0x8cd   : > { %10518 = vmatpush3.bf16.xpose.msra.mxu1 %v6312_v5  ;;  %v5740_v36 = vpop.xlane.xlu0 %5739 }
 0x8ce   : > { %v5783_v49 = vmul.f32 1.442695, %v5762_v62  ;;  %v5764_v11 = vsub.f32 %v13545_v31, %v5740_v36  ;;  %10706 = vmatprep.subr.msk.bf16.mxu1 %vm15153_vm13, %v11224_v50  ;;  %v6309_v31 = vsel %vm15154_vm14, %v11224_v50, 0  ;;  %v11225_v62 = vld [vmem:[#allocation2 + $0x5c] ss:$36 sps:$4 sm:$0xff]   ;;  %vm15159_vm13 = vmmov %vm15144_vm0 }
 0x8cf   : > { %v5744_v42 = vpop.xlane.xlu1 %5743  ;;  %vm15160_vm14 = vmmov %vm15144_vm0 }
 0x8d0   : > { %11489 = vpow2.f32 %v5783_v49  ;;  %v5787_v17 = vmul.f32 1.442695, %v5764_v11  ;;  %v5766_v10 = vsub.f32 %v13550_v29, %v5744_v42 }
 0x8d1   : > { %11491 = vpow2.f32 %v5785_v6  ;;  %v5742_v51 = vpop.xlane.xlu0 %5741 }
 0x8d2   : > { %11493 = vpow2.f32 %v5787_v17  ;;  %v5791_v63 = vmul.f32 1.442695, %v5766_v10  ;;  %v5765_v4 = vsub.f32 %v13555_v28, %v5742_v51  ;;  %v11226_v51 = vld [vmem:[#allocation2 + $0x14] ss:$36 sps:$4 sm:$0xff]  }
 0x8d3   : > { %v5748_v0 = vpop.xlane.xlu1 %5747 }
 0x8d4   : > { %v5789_v35 = vmul.f32 1.442695, %v5765_v4  ;;  %v5768_v13 = vsub.f32 %v13560_v33, %v5748_v0  ;;  %11495 = vpow2.f32 %v5791_v63 }
 0x8d5   : > { %10520 = vmatpush3.bf16.xpose.msra.mxu1 %v6309_v31  ;;  %v5746_v14 = vpop.xlane.xlu0 %5745 }
 0x8d6   : > { %11497 = vpow2.f32 %v5789_v35  ;;  %v5795_v5 = vmul.f32 1.442695, %v5768_v13  ;;  %v5767_v29 = vsub.f32 %v13565_v12, %v5746_v14  ;;  %10707 = vmatprep.subr.msk.bf16.mxu1 %vm15155_vm10, %v11225_v62  ;;  %v6306_v12 = vsel %vm15156_vm12, %v11225_v62, 0  ;;  %vm15161_vm10 = vmmov %vm15144_vm0 }
 0x8d7   : > { %v5752_v6 = vpop.xlane.xlu1 %5751  ;;  %v13630_v42 = vpop.eup %11487  ;;  %vm15162_vm12 = vmmov %vm15144_vm0 }
 0x8d8   : > { %v5793_v36 = vmul.f32 1.442695, %v5767_v29  ;;  %v5770_v28 = vsub.f32 %v13570_v19, %v5752_v6  ;;  %11499 = vpow2.f32 %v5795_v5  ;;  %v6303_v5 = vsel %vm15158_vm9, %v11226_v51, 0  ;;  %vm15164_vm9 = vmmov %vm15144_vm0 }
 0x8d9   : > { %v5750_v49 = vpop.xlane.xlu0 %5749 }
 0x8da   : > { %11501 = vpow2.f32 %v5793_v36  ;;  %v5799_v33 = vmul.f32 1.442695, %v5770_v28  ;;  %v5769_v50 = vsub.f32 %v13575_v37, %v5750_v49 }
 0x8db   : > { %v5756_v11 = vpop.xlane.xlu1 %5755 }
 0x8dc   : > { %v5797_v17 = vmul.f32 1.442695, %v5769_v50  ;;  %v5772_v10 = vsub.f32 %v13580_v40, %v5756_v11  ;;  %11503 = vpow2.f32 %v5799_v33 }
 0x8dd   : > { %v13634_v63 = vpop.eup %11489  ;;  %10522 = vmatpush3.bf16.xpose.msra.mxu1 %v6306_v12  ;;  %v5754_v19 = vpop.xlane.xlu0 %5753  ;;  %v11227_v12 = vld [vmem:[#allocation2 + $0x8] ss:$36 sps:$4 sm:$0xff]  }
 0x8de   : > { %v13636_v4 = vpop.eup %11491  ;;  %11505 = vpow2.f32 %v5797_v17  ;;  %v5803_v0 = vmul.f32 1.442695, %v5772_v10  ;;  %v5771_v37 = vsub.f32 %v13585_v41, %v5754_v19  ;;  %10708 = vmatprep.subr.msk.bf16.mxu1 %vm15144_vm0, %v11226_v51  ;;  %v5839_v35 = vpack.c.bf16 %v13634_v63, %v13630_v42  ;;  %v11228_v51 = vld [vmem:[#allocation2 + $0x50] ss:$36 sps:$4 sm:$0xff]   ;;  %v11229_v19 = vld [vmem:[#allocation2 + $0x98] ss:$36 sps:$4 sm:$0xff]  }
 0x8df   : > { %v13642_v40 = vpop.eup %11493 }
 0x8e0   : > { %v5801_v13 = vmul.f32 1.442695, %v5771_v37  ;;  %10497 = vmatprep.mubr.bf16.mxu1 %v5839_v35  ;;  %v5840_v31 = vpack.c.bf16 %v13642_v40, %v13636_v4  ;;  %11507 = vpow2.f32 %v5803_v0  ;;  %v11230_v0 = vld [vmem:[#allocation2 + $0xe0] ss:$36 sps:$4 sm:$0xff]   ;;  %v11231_v37 = vld [vmem:[#allocation2 + $0x128] ss:$36 sps:$4 sm:$0xff]  }
 0x8e1   : > { %v13646_v62 = vpop.permute.xlu0 %6974  ;;  %v13648_v14 = vpop.eup %11495  ;;  %v11232_v35 = vld [vmem:[#allocation2 + $0x170] ss:$36 sps:$4 sm:$0xff]  }
 0x8e2   : > { %11509 = vpow2.f32 %v5801_v13  ;;  %10498 = vmatmul.mubr.bf16.gmra.mxu1 %v5840_v31  ;;  %10709 = vmatprep.subr.msk.bf16.mxu0 %vm15157_vm11, %v13646_v62  ;;  %v11233_v13 = vld [vmem:[#allocation2 + $0x1b8] ss:$36 sps:$4 sm:$0xff]   ;;  %vm15163_vm11 = vmmov %vm15144_vm0  ;;  %v11234_v31 = vld [vmem:[#allocation2 + $0x200] ss:$36 sps:$4 sm:$0xff]  }
 0x8e3   : > { %v13652_v41 = vpop.eup %11497 }
 0x8e4   : > { %v5841_v29 = vpack.c.bf16 %v13648_v14, %v13652_v41 }
 0x8e5   : > { %10524 = vmatpush3.bf16.xpose.msra.mxu1 %v6303_v5  ;;  %v13657_v6 = vpop.eup %11499 }
 0x8e6   : > { %10501 = vmatprep.mubr.bf16.mxu1 %v5841_v29 }
 0x8e7   : > { %v13659_v36 = vpop.eup %11501 }
 0x8e8   : > { %v5842_v28 = vpack.c.bf16 %v13657_v6, %v13659_v36 }
 0x8e9   : > { %v13663_v49 = vpop.eup %11503 }
 0x8ea   : > { %10502 = vmatmul.mubr.bf16.gmra.mxu1 %v5842_v28 }
 0x8eb   : > { %v13665_v33 = vpop.eup %11505 }
 0x8ec   : > { %v5843_v50 = vpack.c.bf16 %v13663_v49, %v13665_v33 }
 0x8ed   : > { %v13669_v11 = vpop.eup %11507 }
 0x8ee   : > { %10505 = vmatprep.mubr.bf16.mxu1 %v5843_v50 }
 0x8ef   : > { %v13671_v17 = vpop.eup %11509 }
 0x8f0   : > { %v5844_v10 = vpack.c.bf16 %v13669_v11, %v13671_v17 }
 0x8f2   : > { %10506 = vmatmul.mubr.bf16.gmra.mxu1 %v5844_v10 }
 0x8f3   : > { %10525 = vmatprep.mubr.msk.bf16.mxu1 %vm15159_vm13, %v11227_v12  ;;  %vm15165_vm13 = vmmov %vm15144_vm0 }
 0x8fa   : > { %10526 = vmatmul.mubr.msk.bf16.vlgmr.msra.gmra.mxu1 %vm15160_vm14, %v11228_v51  ;;  %vm15181_vm14 = vnez %v14985_v18  ;;  %v11247_v18 = vld [vmem:[#allocation2 + $0x5c] ss:$36 sps:$4 sm:$0xff]  }
 0x8fb   : > { %10529 = vmatprep.mubr.msk.bf16.mxu1 %vm15161_vm10, %v11229_v19  ;;  %vm15182_vm10 = vnez %v14988_v24  ;;  %v11250_v24 = vld [vmem:[#allocation2 + $0x98] ss:$36 sps:$4 sm:$0xff]  }
 0x902   : > { %10530 = vmatmul.mubr.msk.bf16.gmra.mxu1 %vm15162_vm12, %v11230_v0  ;;  %vm15183_vm12 = vnez %v14969_v32 }
 0x903   : > { %10533 = vmatprep.mubr.msk.bf16.mxu1 %vm15144_vm0, %v11231_v37  ;;  %vm15184_vm0 = vnez %v14972_v38 }
 0x90a   : > { %10534 = vmatmul.mubr.msk.bf16.gmra.mxu1 %vm15163_vm11, %v11232_v35  ;;  %vm15185_vm11 = vnez %v14975_v9 }
 0x90b   : > { %10537 = vmatprep.mubr.msk.bf16.mxu1 %vm15164_vm9, %v11233_v13  ;;  %vm15186_vm9 = vnez %v14978_v23 }
 0x912   : > { %10538 = vmatmul.mubr.msk.bf16.gmra.mxu1 %vm15165_vm13, %v11234_v31  ;;  %vm15187_vm13 = vnez %v14980_v39 }
 0x96c   : > { %v13683_v5 = vpop.f32.mrf.mxu1 }
 0x96d   : > { %15166 = vst [vmem:[#allocation107_spill] sm:$0xff] %v13683_v5 }
 0x96e   : > { %v13685_v29 = vpop.f32.mrf.mxu1 }
 0x970   : > { %v13687_v28 = vpop.f32.mrf.mxu1 }
 0x971   : > { %15167 = vst [vmem:[#allocation108_spill] sm:$0xff] %v13687_v28 }
 0x972   : > { %v13689_v50 = vpop.f32.mrf.mxu1 }
 0x973   : > { %15168 = vst [vmem:[#allocation109_spill] sm:$0xff] %v13689_v50 }
 0x9a2   : > { %v13691_v10 = vpop.f32.mrf.mxu1 }
 0x9a3   : > { %15169 = vst [vmem:[#allocation110_spill] sm:$0xff] %v13691_v10 }
 0x9a4   : > { %v13693_v12 = vpop.f32.mrf.mxu1 }
 0x9a5   : > { %15170 = vst [vmem:[#allocation111_spill] sm:$0xff] %v13693_v12 }
 0x9a6   : > { %v13695_v51 = vpop.f32.mrf.mxu1 }
 0x9a7   : > { %15171 = vst [vmem:[#allocation112_spill] sm:$0xff] %v13695_v51 }
 0x9a8   : > { %v13697_v19 = vpop.f32.mrf.mxu1 }
 0x9a9   : > { %15172 = vst [vmem:[#allocation113_spill] sm:$0xff] %v13697_v19 }
 0x9aa   : > { %v13699_v0 = vpop.f32.mrf.mxu1 }
 0x9ab   : > { %15173 = vst [vmem:[#allocation114_spill] sm:$0xff] %v13699_v0 }
 0x9ac   : > { %v13701_v37 = vpop.f32.mrf.mxu1 }
 0x9ad   : > { %15174 = vst [vmem:[#allocation115_spill] sm:$0xff] %v13701_v37 }
 0x9ae   : > { %v13703_v35 = vpop.f32.mrf.mxu1 }
 0x9af   : > { %15175 = vst [vmem:[#allocation116_spill] sm:$0xff] %v13703_v35 }
 0x9b0   : > { %v13705_v13 = vpop.f32.mrf.mxu1 }
 0x9b1   : > { %15176 = vst [vmem:[#allocation117_spill] sm:$0xff] %v13705_v13 }
 0x9b2   : > { %v13707_v31 = vpop.f32.mrf.mxu1 }
 0x9b3   : > { %15177 = vst [vmem:[#allocation118_spill] sm:$0xff] %v13707_v31 }
 0x9b4   : > { %v13709_v28 = vpop.f32.mrf.mxu1 }
 0x9b5   : > { %15178 = vst [vmem:[#allocation119_spill] sm:$0xff] %v13709_v28 }
 0x9b6   : > { %v13711_v5 = vpop.f32.mrf.mxu1 }
 0x9b7   : > { %15179 = vst [vmem:[#allocation120_spill] sm:$0xff] %v13711_v5 }
 0x9b8   : > { %v13713_v10 = vpop.f32.mrf.mxu1 }
 0x9b9   : > { %15180 = vst [vmem:[#allocation121_spill] sm:$0xff] %v13713_v10 }
 0x9ba   : > { %v10527_v12 = vpop.f32.mrf.mxu1 }
 0x9bb   : > { %v13717_v51 = vsel %vm12774_vm1, %v10527_v12, -inf }
 0x9bc   : > { %6443 = vmax.xlane.f32.xlu0 %v13717_v51  ;;  %v6360_v0 = vpop.f32.mrf.mxu1 }
 0x9bd   : > { %v13722_v35 = vsel %vm12781_vm2, %v6360_v0, -inf }
 0x9be   : > { %v10528_v37 = vpop.f32.mrf.mxu1 }
 0x9bf   : > { %v13726_v31 = vsel %vm12792_vm3, %v10528_v37, -inf }
 0x9c0   : > { %6439 = vmax.xlane.f32.xlu0 %v13722_v35  ;;  %6445 = vmax.xlane.f32.xlu1 %v13726_v31  ;;  %v6363_v5 = vpop.f32.mrf.mxu1 }
 0x9c1   : > { %v13732_v12 = vsel %vm12803_vm4, %v6363_v5, -inf }
 0x9c2   : > { %v10531_v10 = vpop.f32.mrf.mxu1 }
 0x9c3   : > { %v13737_v0 = vsel %vm12813_vm5, %v10531_v10, -inf }
 0x9c4   : > { %6441 = vmax.xlane.f32.xlu1 %v13732_v12  ;;  %v6376_v28 = vpop.f32.mrf.mxu1 }
 0x9c5   : > { %v13742_v37 = vsel %vm12829_vm6, %v6376_v28, -inf  ;;  %v11236_v28 = vld [vmem:[#allocation2 + $0x50] ss:$36 sps:$4 sm:$0xff]  }
 0x9c6   : > { %v10532_v13 = vpop.f32.mrf.mxu1 }
 0x9c7   : > { %v13747_v5 = vsel %vm12840_vm7, %v10532_v13, -inf  ;;  %v11238_v13 = vld [vmem:[#allocation2 + $0x170] ss:$36 sps:$4 sm:$0xff]  }
 0x9c8   : > { %6451 = vmax.xlane.f32.xlu1 %v13737_v0  ;;  %v6379_v19 = vpop.f32.mrf.mxu1 }
 0x9c9   : > { %v13752_v10 = vsel %vm12851_vm8, %v6379_v19, -inf  ;;  %v11240_v19 = vld [vmem:[#allocation2 + $0x1d0] ss:$36 sps:$4 sm:$0xff]  }
 0x9ca   : > { %v10535_v53 = vpop.f32.mrf.mxu1 }
 0x9cb   : > { %v13762_v27 = vsel %vm15090_vm15, %v10535_v53, -inf }
 0x9cc   : > { %6447 = vmax.xlane.f32.xlu1 %v13742_v37  ;;  %v6392_v56 = vpop.f32.mrf.mxu1 }
 0x9d0   : > { %6453 = vmax.xlane.f32.xlu1 %v13747_v5 }
 0x9d4   : > { %6449 = vmax.xlane.f32.xlu1 %v13752_v10 }
 0x9d6   : > { %6968 = vrot.lane.b32.xlu0 %v11235_v58, %s11927_s21  ;;  %v11241_v58 = vld [vmem:[#allocation2 + $0x188] ss:$36 sps:$4 sm:$0xff]  }
 0x9e5   : > { %6906 = vrot.lane.b32.xlu1 %v11236_v28, %s11927_s21  ;;  %v10536_v28 = vpop.f32.mrf.mxu1 }
 0x9e6   : > { %v13774_v53 = vsel %vm15182_vm10, %v10536_v28, -inf  ;;  %v11248_v28 = vld [vmem:[#allocation2 + $0x14] ss:$36 sps:$4 sm:$0xff]  }
 0x9e9   : > { %6910 = vrot.lane.b32.xlu1 %v11237_v54, %s11927_s21  ;;  %v13768_v54 = vsel %vm15181_vm14, %v6392_v56, -inf  ;;  %v11245_v56 = vld [vmem:[#allocation2 + $0x20] ss:$36 sps:$4 sm:$0xff]  }
 0x9ed   : > { %6914 = vrot.lane.b32.xlu1 %v11238_v13, %s11927_s21  ;;  %v11243_v13 = vld [vmem:[#allocation2 + $0xb0] ss:$36 sps:$4 sm:$0xff]  }
 0x9f1   : > { %6918 = vrot.lane.b32.xlu1 %v11239_v26, %s11927_s21  ;;  %v11242_v26 = vld [vmem:[#allocation2 + $0x140] ss:$36 sps:$4 sm:$0xff]  }
 0x9f5   : > { %7309 = vrot.lane.b32.xlu1 %v11240_v19, %s11927_s21  ;;  %6459 = vmax.xlane.f32.xlu0 %v13762_v27  ;;  %v11244_v19 = vld [vmem:[#allocation2 + $0x68] ss:$36 sps:$4 sm:$0xff]  }
 0x9f9   : > { %7307 = vrot.lane.b32.xlu1 %v11241_v58, %s11927_s21  ;;  %6455 = vmax.xlane.f32.xlu0 %v13768_v54  ;;  %v11246_v58 = vld [vmem:[#allocation2 + $0xa4] ss:$36 sps:$4 sm:$0xff]  }
 0x9fd   : > { %7305 = vrot.lane.b32.xlu1 %v11242_v26, %s11927_s21  ;;  %6461 = vmax.xlane.f32.xlu0 %v13774_v53  ;;  %v11249_v26 = vld [vmem:[#allocation2 + $0x8] ss:$36 sps:$4 sm:$0xff]  }
 0xa01   : > { %7301 = vrot.lane.b32.xlu1 %v11243_v13, %s11927_s21  ;;  %v11251_v13 = vld [vmem:[#allocation2 + $0x128] ss:$36 sps:$4 sm:$0xff]  }
 0xa05   : > { %7299 = vrot.lane.b32.xlu1 %v11244_v19, %s11927_s21  ;;  %v11252_v19 = vld [vmem:[#allocation2 + $0x1b8] ss:$36 sps:$4 sm:$0xff]  }
 0xa09   : > { %7297 = vrot.lane.b32.xlu1 %v11245_v56, %s11927_s21  ;;  %v11253_v56 = vld [vmem:[#allocation2 + $0x218] ss:$36 sps:$4 sm:$0xff]  }
 0xa13   : > { %6964 = vrot.lane.b32.xlu0 %v11246_v58, %s11927_s21  ;;  %v13795_v58 = vpop.permute.xlu1 %6972 }
 0xa17   : > { %6962 = vrot.lane.b32.xlu0 %v11247_v18, %s11927_s21  ;;  %v11254_v18 = vld [vmem:[#allocation2 + $0xf8] ss:$36 sps:$4 sm:$0xff]  }
 0xa1b   : > { %6960 = vrot.lane.b32.xlu0 %v11248_v28, %s11927_s21 }
 0xa1f   : > { %6904 = vrot.lane.b32.xlu0 %v11249_v26, %s11927_s21  ;;  %v13801_v26 = vpop.permute.xlu0 %6970 }
 0xa23   : > { %6908 = vrot.lane.b32.xlu0 %v11250_v24, %s11927_s21  ;;  %v6395_v24 = vpop.f32.mrf.mxu1 }
 0xa25   : > { %v10539_v28 = vpop.f32.mrf.mxu1 }
 0xa27   : > { %6912 = vrot.lane.b32.xlu0 %v11251_v13, %s11927_s21 }
 0xa2b   : > { %6916 = vrot.lane.b32.xlu0 %v11252_v19, %s11927_s21 }
 0xa2d   : > { %4394 = vadd.xlane.f32.xlu1 %v13175_v30  ;;  %v13799_v30 = vsel %vm15183_vm12, %v6395_v24, -inf }
 0xa2f   : > { %7311 = vrot.lane.b32.xlu0 %v11253_v56, %s11927_s21 }
 0xa31   : > { %5807 = vadd.xlane.f32.xlu1 %v13600_v44  ;;  %v13806_v44 = vsel %vm15184_vm0, %v10539_v28, -inf }
 0xa33   : > { %7303 = vrot.lane.b32.xlu0 %v11254_v18, %s11927_s21 }
 0xa35   : > { %4398 = vadd.xlane.f32.xlu1 %v13173_v22  ;;  %v6408_v22 = vpop.f32.mrf.mxu1 }
 0xa37   : > { %v10540_v19 = vpop.f32.mrf.mxu1 }
 0xa38   : > { %v13821_v38 = vsel %vm15186_vm9, %v10540_v19, -inf  ;;  %v15199_v19 = vld [vmem:[#allocation62_spill] sm:$0xff] }
 0xa39   : > { %5811 = vadd.xlane.f32.xlu1 %v13598_v52  ;;  %v13808_v52 = vpop.permute.xlu1 %6966  ;;  %v6411_v55 = vpop.f32.mrf.mxu1 }
 0xa3d   : > { %4402 = vadd.xlane.f32.xlu1 %v13209_v59  ;;  %v13813_v59 = vsel %vm15185_vm11, %v6408_v22, -inf }
 0xa41   : > { %6457 = vmax.xlane.f32.xlu1 %v13799_v30 }
 0xa45   : > { %v6444_v13 = vpop.xlane.xlu0 %6443  ;;  %6467 = vmax.xlane.f32.xlu1 %v13806_v44 }
 0xa46   : > { %v6473_v32 = vsub.f32 %v13717_v51, %v6444_v13 }
 0xa48   : > { %v6491_v50 = vmul.f32 1.442695, %v6473_v32 }
 0xa49   : > { %v6440_v56 = vpop.xlane.xlu0 %6439  ;;  %6463 = vmax.xlane.f32.xlu1 %v13813_v59  ;;  %v6446_v18 = vpop.xlane.xlu1 %6445 }
 0xa4a   : > { %v6471_v24 = vsub.f32 %v13722_v35, %v6440_v56  ;;  %v6474_v28 = vsub.f32 %v13726_v31, %v6446_v18  ;;  %v13827_v35 = vsel %vm15187_vm13, %v6411_v55, -inf  ;;  %vm15188_vm13 = vcmask 523264  }
 0xa4b   : > { %vm15189_vm9 = vmmov %vm15188_vm13 }
 0xa4c   : > { %v6487_v16 = vmul.f32 1.442695, %v6471_v24  ;;  %v6493_v9 = vmul.f32 1.442695, %v6474_v28  ;;  %vm15190_vm12 = vmmov %vm15189_vm9  ;;  %v15203_v24 = vld [vmem:[#allocation29_spill] sm:$0xff] }
 0xa4d   : > { %6469 = vmax.xlane.f32.xlu1 %v13821_v38  ;;  %v6442_v22 = vpop.xlane.xlu1 %6441  ;;  %vm15194_vm8 = vmmov %vm15189_vm9 }
 0xa4e   : > { %v6472_v7 = vsub.f32 %v13732_v12, %v6442_v22  ;;  %11511 = vpow2.f32 %v6487_v16 }
 0xa4f   : > { %11513 = vpow2.f32 %v6493_v9 }
 0xa50   : > { %v6489_v31 = vmul.f32 1.442695, %v6472_v7 }
 0xa51   : > { %6465 = vmax.xlane.f32.xlu1 %v13827_v35  ;;  %v6452_v51 = vpop.xlane.xlu1 %6451 }
 0xa52   : > { %11515 = vpow2.f32 %v6489_v31  ;;  %4392 = vadd.xlane.f32.xlu0 %v13171_v46  ;;  %v6477_v9 = vsub.f32 %v13737_v0, %v6452_v51 }
 0xa53   : > { %11517 = vpow2.f32 %v6491_v50 }
 0xa55   : > { %5815 = vadd.xlane.f32.xlu1 %v13634_v63  ;;  %v6448_v13 = vpop.xlane.xlu1 %6447 }
 0xa56   : > { %5805 = vadd.xlane.f32.xlu0 %v13596_v21  ;;  %v6475_v32 = vsub.f32 %v13742_v37, %v6448_v13  ;;  %v6499_v37 = vmul.f32 1.442695, %v6477_v9  ;;  %v15206_v13 = vld [vmem:[#allocation32_spill] sm:$0xff]  ;;  %v15209_v9 = vld [vmem:[#allocation79_spill] sm:$0xff] }
 0xa58   : > { %v6495_v16 = vmul.f32 1.442695, %v6475_v32 }
 0xa59   : > { %4406 = vadd.xlane.f32.xlu1 %v13217_v25  ;;  %v6454_v55 = vpop.xlane.xlu1 %6453 }
 0xa5a   : > { %v6478_v7 = vsub.f32 %v13747_v5, %v6454_v55  ;;  %4396 = vadd.xlane.f32.xlu0 %v13177_v8  ;;  %11519 = vpow2.f32 %v6495_v16 }
 0xa5b   : > { %v13838_v12 = vpop.eup %11511 }
 0xa5c   : > { %v6501_v46 = vmul.f32 1.442695, %v6478_v7  ;;  %v13841_v50 = vpop.eup %11513  ;;  %v15208_v7 = vld [vmem:[#allocation81_spill] sm:$0xff] }
 0xa5d   : > { %5819 = vadd.xlane.f32.xlu1 %v13642_v40  ;;  %v6450_v63 = vpop.xlane.xlu1 %6449 }
 0xa5e   : > { %v6476_v21 = vsub.f32 %v13752_v10, %v6450_v63  ;;  %5809 = vadd.xlane.f32.xlu0 %v13602_v47  ;;  %11521 = vpow2.f32 %v6501_v46  ;;  %v7022_v47 = vsel %vm15188_vm13, %v13646_v62, 0  ;;  %vm15191_vm13 = vmmov %vm15189_vm9 }
 0xa5f   : > { %v13845_v25 = vpop.eup %11515 }
 0xa60   : > { %v13847_v5 = vpop.eup %11517  ;;  %v6497_v8 = vmul.f32 1.442695, %v6476_v21  ;;  %v6551_v0 = vpack.c.bf16 %v13845_v25, %v13838_v12  ;;  %v15211_v21 = vld [vmem:[#allocation80_spill] sm:$0xff] }
 0xa61   : > { %v6552_v40 = vpack.c.bf16 %v13841_v50, %v13847_v5  ;;  %4410 = vadd.xlane.f32.xlu1 %v13223_v34 }
 0xa62   : > { %11523 = vpow2.f32 %v6497_v8  ;;  %4400 = vadd.xlane.f32.xlu0 %v13205_v2  ;;  %10557 = vmatprep.mubr.bf16.mxu0 %v6551_v0  ;;  %v7019_v2 = vsel %vm15190_vm12, %v13795_v58, 0  ;;  %vm15192_vm12 = vmmov %vm15189_vm9  ;;  %v15212_v8 = vld [vmem:[#allocation36_spill] sm:$0xff] }
 0xa63   : > { %11525 = vpow2.f32 %v6499_v37  ;;  %10558 = vmatmul.mubr.bf16.vlgmr.msra.gmra.mxu0 %v6552_v40  ;;  %v15213_v40 = vld [vmem:[#allocation82_spill] sm:$0xff] }
 0xa64   : > { %10574 = vmatpush3.bf16.xpose.msra.mxu0 %v7022_v47 }
 0xa65   : > { %10710 = vmatprep.subr.msk.bf16.mxu0 %vm15189_vm9, %v13795_v58  ;;  %5823 = vadd.xlane.f32.xlu1 %v13648_v14 }
 0xa66   : > { %5813 = vadd.xlane.f32.xlu0 %v13630_v42 }
 0xa67   : > { %v13865_v34 = vpop.eup %11519 }
 0xa69   : > { %4414 = vadd.xlane.f32.xlu1 %v13232_v57 }
 0xa6a   : > { %4404 = vadd.xlane.f32.xlu0 %v13211_v3 }
 0xa6b   : > { %v13870_v62 = vpop.eup %11521 }
 0xa6c   : > { %10576 = vmatpush3.bf16.xpose.msra.mxu0 %v7019_v2 }
 0xa6d   : > { %10711 = vmatprep.subr.msk.bf16.mxu0 %vm15191_vm13, %v13801_v26  ;;  %5827 = vadd.xlane.f32.xlu1 %v13657_v6  ;;  %v7016_v6 = vsel %vm15192_vm12, %v13801_v26, 0  ;;  %vm15193_vm13 = vmmov %vm15189_vm9 }
 0xa6e   : > { %5817 = vadd.xlane.f32.xlu0 %v13636_v4  ;;  %v6969_v4 = vpop.permute.xlu0 %6968  ;;  %vm15197_vm12 = vmmov %vm15194_vm8 }
 0xa6f   : > { %v13873_v42 = vpop.eup %11523  ;;  %v7010_v58 = vsel %vm15197_vm12, %v13808_v52, 0  ;;  %vm15204_vm12 = vmmov %vm15194_vm8 }
 0xa70   : > { %v13875_v57 = vpop.eup %11525  ;;  %v6553_v3 = vpack.c.bf16 %v13873_v42, %v13865_v34 }
 0xa71   : > { %4418 = vadd.xlane.f32.xlu1 %v13238_v60  ;;  %v6554_v14 = vpack.c.bf16 %v13870_v62, %v13875_v57  ;;  %v7013_v60 = vsel %vm15193_vm13, %v6969_v4, 0  ;;  %vm15201_vm13 = vmmov %vm15194_vm8 }
 0xa72   : > { %4408 = vadd.xlane.f32.xlu0 %v13227_v45  ;;  %10561 = vmatprep.mubr.bf16.mxu0 %v6553_v3  ;;  %v13891_v45 = vpop.permute.xlu1 %6906 }
 0xa73   : > { %10562 = vmatmul.mubr.bf16.gmra.mxu0 %v6554_v14 }
 0xa74   : > { %10578 = vmatpush3.bf16.xpose.msra.mxu0 %v7016_v6 }
 0xa75   : > { %10712 = vmatprep.subr.msk.bf16.mxu0 %vm15189_vm9, %v6969_v4  ;;  %5831 = vadd.xlane.f32.xlu1 %v13663_v49  ;;  %v15195_v49 = vld [vmem:[#allocation31_spill] sm:$0xff]  ;;  %vm15200_vm9 = vmmov %vm15194_vm8 }
 0xa76   : > { %5821 = vadd.xlane.f32.xlu0 %v13652_v41  ;;  %v13900_v41 = vpop.permute.xlu1 %6910 }
 0xa79   : > { %4422 = vadd.xlane.f32.xlu1 %v13244_v15 }
 0xa7a   : > { %4412 = vadd.xlane.f32.xlu0 %v13234_v1  ;;  %v15196_v1 = vld [vmem:[#allocation61_spill] sm:$0xff]  ;;  %v13911_v26 = vpop.permute.xlu1 %6914 }
 0xa7c   : > { %10580 = vmatpush3.bf16.xpose.msra.mxu0 %v7013_v60 }
 0xa7d   : > { %10713 = vmatprep.subr.msk.bf16.mxu0 %vm15194_vm8, %v13808_v52  ;;  %5835 = vadd.xlane.f32.xlu1 %v13669_v11 }
 0xa7e   : > { %v13896_v10 = vpop.xlane.xlu0 %6459  ;;  %5825 = vadd.xlane.f32.xlu0 %v13659_v36  ;;  %v15198_v36 = vld [vmem:[#allocation30_spill] sm:$0xff]  ;;  %v13918_v52 = vpop.permute.xlu1 %6918 }
 0xa81   : > { %3695 = vadd.xlane.f32.xlu1 %v15195_v49 }
 0xa82   : > { %v13902_v15 = vpop.xlane.xlu0 %6455  ;;  %4416 = vadd.xlane.f32.xlu0 %v15196_v1  ;;  %v7310_v31 = vpop.permute.xlu1 %7309 }
 0xa83   : > { %v6479_v60 = vsub.f32 %v13768_v54, %v13902_v15 }
 0xa84   : > { %10582 = vmatpush3.bf16.xpose.msra.mxu0 %v7010_v58  ;;  %v6481_v58 = vsub.f32 %v13762_v27, %v13896_v10 }
 0xa85   : > { %5109 = vadd.xlane.f32.xlu1 %v13401_v20 }
 0xa86   : > { %5829 = vadd.xlane.f32.xlu0 %v13665_v33  ;;  %v13909_v11 = vpop.xlane.xlu0 %6461  ;;  %v15202_v33 = vld [vmem:[#allocation35_spill] sm:$0xff]  ;;  %v7308_v51 = vpop.permute.xlu1 %7307 }
 0xa87   : > { %v6482_v49 = vsub.f32 %v13774_v53, %v13909_v11 }
 0xa89   : > { %3699 = vadd.xlane.f32.xlu1 %v15198_v36  ;;  %v6503_v36 = vmul.f32 1.442695, %v6479_v60 }
 0xa8a   : > { %4420 = vadd.xlane.f32.xlu0 %v15199_v19  ;;  %v6965_v56 = vpop.permute.xlu0 %6964  ;;  %v7306_v16 = vpop.permute.xlu1 %7305  ;;  %v6509_v19 = vmul.f32 1.442695, %v6482_v49 }
 0xa8b   : > { %10714 = vmatprep.subr.msk.bf16.mxu0 %vm15194_vm8, %v6965_v56  ;;  %v7007_v18 = vsel %vm15200_vm9, %v6965_v56, 0  ;;  %vm15207_vm9 = vmmov %vm15194_vm8  ;;  %11527 = vpow2.f32 %v6503_v36  ;;  %v15215_v36 = vld [vmem:[#allocation66_spill] sm:$0xff] }
 0xa8c   : > { %10584 = vmatpush3.bf16.xpose.msra.mxu0 %v7007_v18  ;;  %11529 = vpow2.f32 %v6509_v19 }
 0xa8d   : > { %5113 = vadd.xlane.f32.xlu1 %v13398_v43 }
 0xa8e   : > { %5833 = vadd.xlane.f32.xlu0 %v13671_v17  ;;  %v6963_v20 = vpop.permute.xlu0 %6962  ;;  %v15205_v17 = vld [vmem:[#allocation34_spill] sm:$0xff]  ;;  %v7302_v63 = vpop.permute.xlu1 %7301 }
 0xa8f   : > { %10715 = vmatprep.subr.msk.bf16.mxu0 %vm15201_vm13, %v6963_v20  ;;  %v7004_v22 = vsel %vm15204_vm12, %v6963_v20, 0  ;;  %v6507_v20 = vmul.f32 1.442695, %v6481_v58  ;;  %vm15217_vm13 = vmmov %vm15194_vm8 }
 0xa90   : > { %vm15218_vm12 = vmmov %vm15194_vm8 }
 0xa91   : > { %3703 = vadd.xlane.f32.xlu1 %v15202_v33 }
 0xa92   : > { %3693 = vadd.xlane.f32.xlu0 %v15203_v24  ;;  %v6961_v28 = vpop.permute.xlu0 %6960  ;;  %v7300_v0 = vpop.permute.xlu1 %7299 }
 0xa93   : > { %v7001_v55 = vsel %vm15207_vm9, %v6961_v28, 0  ;;  %vm15219_vm9 = vmmov %vm15194_vm8 }
 0xa94   : > { %10586 = vmatpush3.bf16.xpose.msra.mxu0 %v7004_v22 }
 0xa95   : > { %5117 = vadd.xlane.f32.xlu1 %v13418_v48  ;;  %10716 = vmatprep.subr.msk.bf16.mxu0 %vm15194_vm8, %v6961_v28 }
 0xa96   : > { %5107 = vadd.xlane.f32.xlu0 %v13396_v61  ;;  %v13928_v43 = vpop.permute.xlu0 %6904  ;;  %v15210_v61 = vld [vmem:[#allocation33_spill] sm:$0xff]  ;;  %v7298_v47 = vpop.permute.xlu1 %7297 }
 0xa98   : > { %v13961_v28 = vpop.eup %11527 }
 0xa99   : > { %3707 = vadd.xlane.f32.xlu1 %v15205_v17 }
 0xa9a   : > { %3697 = vadd.xlane.f32.xlu0 %v15206_v13  ;;  %v13932_v32 = vpop.permute.xlu0 %6908 }
 0xa9c   : > { %10588 = vmatpush3.bf16.xpose.msra.mxu0 %v7001_v55 }
 0xa9d   : > { %5121 = vadd.xlane.f32.xlu1 %v15208_v7 }
 0xa9e   : > { %5111 = vadd.xlane.f32.xlu0 %v15209_v9  ;;  %v13937_v48 = vpop.permute.xlu0 %6912 }
 0xaa2   : > { %3701 = vadd.xlane.f32.xlu0 %v15210_v61  ;;  %v13940_v46 = vpop.permute.xlu0 %6916 }
 0xaa6   : > { %5115 = vadd.xlane.f32.xlu0 %v15211_v21  ;;  %v7312_v37 = vpop.permute.xlu0 %7311 }
 0xaa7   : > { %10605 = vmatprep.subr.bf16.mxu1 %v7312_v37 }
 0xaa8   : > { %10606 = vmatpush3.bf16.msra.mxu1 %v7312_v37 }
 0xaa9   : > { %10607 = vmatprep.subr.bf16.mxu1 %v7310_v31 }
 0xaaa   : > { %3705 = vadd.xlane.f32.xlu0 %v15212_v8  ;;  %v7304_v2 = vpop.permute.xlu0 %7303 }
 0xaac   : > { %10608 = vmatpush3.bf16.msra.mxu1 %v7310_v31  ;;  %v13963_v31 = vpop.eup %11529 }
 0xaad   : > { %10609 = vmatprep.subr.bf16.mxu1 %v7308_v51 }
 0xaae   : > { %5119 = vadd.xlane.f32.xlu0 %v15213_v40 }
 0xab0   : > { %10610 = vmatpush3.bf16.msra.mxu1 %v7308_v51 }
 0xab1   : > { %10611 = vmatprep.subr.bf16.mxu1 %v7306_v16 }
 0xab4   : > { %10612 = vmatpush3.bf16.msra.mxu1 %v7306_v16 }
 0xab5   : > { %10613 = vmatprep.subr.bf16.mxu1 %v7304_v2 }
 0xab6   : > { %v4395_v3 = vpop.xlane.xlu1 %4394 }
 0xab8   : > { %10614 = vmatpush3.bf16.msra.mxu1 %v7304_v2  ;;  %v15214_v2 = vld [vmem:[#allocation64_spill] sm:$0xff] }
 0xab9   : > { %10615 = vmatprep.subr.bf16.mxu1 %v7302_v63 }
 0xaba   : > { %v5808_v14 = vpop.xlane.xlu1 %5807 }
 0xabc   : > { %10616 = vmatpush3.bf16.msra.mxu1 %v7302_v63 }
 0xabd   : > { %10617 = vmatprep.subr.bf16.mxu1 %v7300_v0 }
 0xabe   : > { %v13945_v6 = vpop.xlane.xlu1 %4398 }
 0xac0   : > { %10618 = vmatpush3.bf16.msra.mxu1 %v7300_v0 }
 0xac1   : > { %10619 = vmatprep.subr.bf16.mxu1 %v7298_v47 }
 0xac2   : > { %v13947_v4 = vpop.xlane.xlu1 %5811 }
 0xac4   : > { %10620 = vmatpush3.bf16.msra.mxu1 %v7298_v47 }
 0xac6   : > { %v13953_v1 = vpop.xlane.xlu1 %4402 }
 0xaca   : > { %v6458_v56 = vpop.xlane.xlu1 %6457 }
 0xacb   : > { %v6480_v18 = vsub.f32 %v13799_v30, %v6458_v56 }
 0xacd   : > { %v6505_v33 = vmul.f32 1.442695, %v6480_v18 }
 0xace   : > { %v6468_v24 = vpop.xlane.xlu1 %6467 }
 0xacf   : > { %11531 = vpow2.f32 %v6505_v33  ;;  %v6485_v27 = vsub.f32 %v13806_v44, %v6468_v24 }
 0xad0   : > { %11533 = vpow2.f32 %v6507_v20 }
 0xad1   : > { %11535 = vrcp.f32 %v4395_v3 }
 0xad2   : > { %v6464_v54 = vpop.xlane.xlu1 %6463  ;;  %11537 = vrcp.f32 %v5808_v14 }
 0xad3   : > { %v6483_v53 = vsub.f32 %v13813_v59, %v6464_v54  ;;  %v6515_v59 = vmul.f32 1.442695, %v6485_v27 }
 0xad5   : > { %v6511_v10 = vmul.f32 1.442695, %v6483_v53 }
 0xad6   : > { %v6470_v15 = vpop.xlane.xlu1 %6469 }
 0xad7   : > { %v6486_v11 = vsub.f32 %v13821_v38, %v6470_v15 }
 0xad9   : > { %v6517_v30 = vmul.f32 1.442695, %v6486_v11  ;;  %v15216_v11 = vld [vmem:[#allocation109_spill] sm:$0xff] }
 0xada   : > { %v6466_v22 = vpop.xlane.xlu1 %6465 }
 0xadb   : > { %v6484_v17 = vsub.f32 %v13827_v35, %v6466_v22  ;;  %v4393_v51 = vpop.xlane.xlu0 %4392 }
 0xadc   : > { %v13966_v13 = vpop.eup %11531  ;;  %11539 = vrcp.f32 %v4393_v51 }
 0xadd   : > { %v13968_v55 = vpop.eup %11533  ;;  %11541 = vpow2.f32 %v6511_v10  ;;  %v6513_v38 = vmul.f32 1.442695, %v6484_v17  ;;  %v6555_v44 = vpack.c.bf16 %v13966_v13, %v13961_v28 }
 0xade   : > { %11543 = vpow2.f32 %v6517_v30  ;;  %v13972_v7 = vpop.xlane.xlu1 %5815  ;;  %v6556_v9 = vpack.c.bf16 %v13963_v31, %v13968_v55  ;;  %v11536_v21 = vpop.eup %11535 }
 0xadf   : > { %11545 = vpow2.f32 %v6513_v38  ;;  %v5806_v35 = vpop.xlane.xlu0 %5805  ;;  %10565 = vmatprep.mubr.bf16.mxu0 %v6555_v44  ;;  %v11538_v8 = vpop.eup %11537  ;;  %v4610_v19 = vmul.f32 %v11536_v21, %v15215_v36 }
 0xae0   : > { %11547 = vpow2.f32 %v6515_v59  ;;  %10566 = vmatmul.mubr.bf16.gmra.mxu0 %v6556_v9  ;;  %v6023_v27 = vmul.f32 %v11538_v8, %v15216_v11 }
 0xae1   : > { %11549 = vrcp.f32 %v5806_v35  ;;  %v9758_v15 = vpack.c.bf16 %v4610_v19, %v4610_v19  ;;  %v15225_v19 = vld [vmem:[#allocation48_spill] sm:$0xff] }
 0xae2   : > { %v13976_v16 = vpop.xlane.xlu1 %4406  ;;  %v9790_v17 = vpack.c.bf16 %v6023_v27, %v6023_v27 }
 0xae3   : > { %v13978_v61 = vpop.xlane.xlu0 %4396 }
 0xae6   : > { %v13980_v63 = vpop.xlane.xlu1 %5819 }
 0xae7   : > { %v13982_v37 = vpop.xlane.xlu0 %5809 }
 0xae9   : > { %v11540_v0 = vpop.eup %11539 }
 0xaea   : > { %v13984_v40 = vpop.eup %11541  ;;  %v13986_v47 = vpop.xlane.xlu1 %4410  ;;  %v4609_v3 = vmul.f32 %v11540_v0, %v15214_v2  ;;  %v15223_v0 = vmov 0   ;;  %v15224_v2 = vld [vmem:[#allocation38_spill] sm:$0xff] }
 0xaeb   : > { %v13989_v14 = vpop.eup %11543  ;;  %v13991_v60 = vpop.xlane.xlu0 %4400 }
 0xaec   : > { %v13993_v49 = vpop.eup %11545  ;;  %v9757_v58 = vpack.c.bf16 %v4609_v3, %v4609_v3 }
 0xaed   : > { %v13996_v56 = vpop.eup %11547  ;;  %v6557_v18 = vpack.c.bf16 %v13993_v49, %v13984_v40 }
 0xaee   : > { %v11550_v20 = vpop.eup %11549  ;;  %4673 = vrot.lane.b32.xlu1 %v9757_v58, %s11927_s21  ;;  %v14001_v33 = vpop.xlane.xlu1 %5823  ;;  %v6558_v24 = vpack.c.bf16 %v13989_v14, %v13996_v56 }
 0xaef   : > { %v14005_v54 = vpop.xlane.xlu0 %5813  ;;  %10569 = vmatprep.mubr.bf16.mxu0 %v6557_v18  ;;  %v6022_v53 = vmul.f32 %v11550_v20, %v13685_v29 }
 0xaf0   : > { %10570 = vmatmul.mubr.bf16.gmra.mxu0 %v6558_v24 }
 0xaf1   : > { %10589 = vmatprep.mubr.msk.bf16.mxu0 %vm15217_vm13, %v13928_v43  ;;  %v9789_v10 = vpack.c.bf16 %v6022_v53, %v6022_v53  ;;  %vm15220_vm13 = vmmov %vm15194_vm8 }
 0xaf2   : > { %4675 = vrot.lane.b32.xlu1 %v9758_v15, %s11927_s21  ;;  %v14012_v30 = vpop.xlane.xlu1 %4414 }
 0xaf3   : > { %6086 = vrot.lane.b32.xlu0 %v9789_v10, %s11927_s21  ;;  %v14015_v22 = vpop.xlane.xlu0 %4404 }
 0xaf6   : > { %6088 = vrot.lane.b32.xlu1 %v9790_v17, %s11927_s21  ;;  %v14018_v29 = vpop.xlane.xlu1 %5827 }
 0xaf7   : > { %v14020_v51 = vpop.xlane.xlu0 %5817 }
 0xaf8   : > { %10590 = vmatmul.mubr.msk.bf16.vlgmr.msra.gmra.mxu0 %vm15218_vm12, %v13891_v45  ;;  %vm15221_vm12 = vmmov %vm15194_vm8 }
 0xaf9   : > { %10593 = vmatprep.mubr.msk.bf16.mxu0 %vm15194_vm8, %v13932_v32 }
 0xafa   : > { %v14026_v43 = vpop.xlane.xlu1 %4418 }
 0xafb   : > { %v14028_v59 = vpop.xlane.xlu0 %4408 }
 0xafe   : > { %v14030_v38 = vpop.xlane.xlu1 %5831 }
 0xaff   : > { %v14032_v44 = vpop.xlane.xlu0 %5821 }
 0xb00   : > { %10594 = vmatmul.mubr.msk.bf16.gmra.mxu0 %vm15219_vm9, %v13900_v41  ;;  %vm15222_vm9 = vmmov %vm15194_vm8 }
 0xb01   : > { %10597 = vmatprep.mubr.msk.bf16.mxu0 %vm15220_vm13, %v13937_v48  ;;  %vm3974_vm13 = vcmask 519168  }
 0xb02   : > { %v14038_v9 = vpop.xlane.xlu1 %4422 }
 0xb03   : > { %v14040_v45 = vpop.xlane.xlu0 %4412 }
 0xb06   : > { %v14042_v35 = vpop.xlane.xlu1 %5835 }
 0xb07   : > { %v14044_v32 = vpop.xlane.xlu0 %5825 }
 0xb08   : > { %10598 = vmatmul.mubr.msk.bf16.gmra.mxu0 %vm15221_vm12, %v13911_v26  ;;  %vm4721_vm12 = vcmask 1043968  }
 0xb09   : > { %10601 = vmatprep.mubr.msk.bf16.mxu0 %vm15194_vm8, %v13940_v46 }
 0xb0a   : > { %v3696_v21 = vpop.xlane.xlu1 %3695 }
 0xb0b   : > { %11551 = vrcp.f32 %v3696_v21  ;;  %v14050_v41 = vpop.xlane.xlu0 %4416  ;;  %v15228_v21 = vld [vmem:[#allocation47_spill] sm:$0xff] }
 0xb0e   : > { %v5110_v8 = vpop.xlane.xlu1 %5109 }
 0xb0f   : > { %11553 = vrcp.f32 %v5110_v8  ;;  %v14052_v48 = vpop.xlane.xlu0 %5829 }
 0xb10   : > { %10602 = vmatmul.mubr.msk.bf16.gmra.mxu0 %vm15222_vm9, %v13918_v52  ;;  %v15226_v52 = vld [vmem:[#allocation37_spill] sm:$0xff] }
 0xb11   : > { %8364 = vmatprep.mubr.bf16.mxu0 %v15223_v0 }
 0xb12   : > { %3709 = vadd.xlane.f32.xlu0 %v15224_v2  ;;  %v3700_v3 = vpop.xlane.xlu1 %3699 }
 0xb13   : > { %11555 = vrcp.f32 %v3700_v3  ;;  %v14058_v26 = vpop.xlane.xlu0 %4420 }
 0xb16   : > { %6523 = vadd.xlane.f32.xlu0 %v13847_v5  ;;  %v5114_v46 = vpop.xlane.xlu1 %5113  ;;  %v15227_v5 = vld [vmem:[#allocation94_spill] sm:$0xff] }
 0xb17   : > { %11557 = vrcp.f32 %v5114_v46  ;;  %v14061_v58 = vpop.xlane.xlu0 %5833 }
 0xb18   : > { %v11552_v36 = vpop.eup %11551 }
 0xb19   : > { %v3895_v18 = vmul.f32 %v11552_v36, %v15225_v19 }
 0xb1a   : > { %6519 = vadd.xlane.f32.xlu0 %v13838_v12  ;;  %3711 = vadd.xlane.f32.xlu1 %v15226_v52  ;;  %v3704_v20 = vpop.xlane.xlu1 %3703 }
 0xb1b   : > { %11559 = vrcp.f32 %v3704_v20  ;;  %v3694_v24 = vpop.xlane.xlu0 %3693  ;;  %v9742_v53 = vpack.c.bf16 %v3895_v18, %v3895_v18  ;;  %v15230_v20 = vld [vmem:[#allocation52_spill] sm:$0xff] }
 0xb1c   : > { %v11554_v15 = vpop.eup %11553  ;;  %11561 = vrcp.f32 %v3694_v24 }
 0xb1d   : > { %3976 = vst.msk [vmem:[#allocation3 + $0xc] sm:$0xf] %vm3974_vm13, %v9742_v53  ;;  %v5309_v11 = vmul.f32 %v11554_v15, %v15227_v5  ;;  %v15231_v53 = vld [vmem:[#allocation46_spill] sm:$0xff] }
 0xb1e   : > { %6531 = vadd.xlane.f32.xlu0 %v13875_v57  ;;  %6525 = vadd.xlane.f32.xlu1 %v13841_v50  ;;  %v5118_v27 = vpop.xlane.xlu1 %5117  ;;  %v15229_v50 = vld [vmem:[#allocation93_spill] sm:$0xff] }
 0xb1f   : > { %11563 = vrcp.f32 %v5118_v27  ;;  %v5108_v12 = vpop.xlane.xlu0 %5107  ;;  %v9774_v10 = vpack.c.bf16 %v5309_v11, %v5309_v11 }
 0xb20   : > { %v11556_v17 = vpop.eup %11555  ;;  %11565 = vrcp.f32 %v5108_v12  ;;  %v15232_v12 = vld [vmem:[#allocation98_spill] sm:$0xff] }
 0xb21   : > { %5389 = vst.msk [vmem:[#allocation3 + $0x10] sm:$0xf] %vm3974_vm13, %v9774_v10  ;;  %v3897_v8 = vmul.f32 %v11556_v17, %v15228_v21 }
 0xb22   : > { %6527 = vadd.xlane.f32.xlu0 %v13865_v34  ;;  %6521 = vadd.xlane.f32.xlu1 %v13845_v25  ;;  %v3708_v2 = vpop.xlane.xlu1 %3707 }
 0xb23   : > { %11567 = vrcp.f32 %v3708_v2  ;;  %v3698_v3 = vpop.xlane.xlu0 %3697  ;;  %v9744_v57 = vpack.c.bf16 %v3897_v8, %v3897_v8 }
 0xb24   : > { %v11558_v46 = vpop.eup %11557  ;;  %11569 = vrcp.f32 %v3698_v3 }
 0xb25   : > { %3978 = vst.msk [vmem:[#allocation3 + $0x24] sm:$0xf] %vm3974_vm13, %v9744_v57  ;;  %v5311_v36 = vmul.f32 %v11558_v46, %v15229_v50  ;;  %v15234_v57 = vld [vmem:[#allocation51_spill] sm:$0xff] }
 0xb26   : > { %6541 = vadd.xlane.f32.xlu0 %v13963_v31  ;;  %6533 = vadd.xlane.f32.xlu1 %v13870_v62  ;;  %v5122_v19 = vpop.xlane.xlu1 %5121 }
 0xb27   : > { %11571 = vrcp.f32 %v5122_v19  ;;  %v5112_v18 = vpop.xlane.xlu0 %5111  ;;  %v9776_v34 = vpack.c.bf16 %v5311_v36, %v5311_v36 }
 0xb28   : > { %v11560_v52 = vpop.eup %11559  ;;  %11573 = vrcp.f32 %v5112_v18 }
 0xb29   : > { %v11562_v25 = vpop.eup %11561  ;;  %5391 = vst.msk [vmem:[#allocation3 + $0x28] sm:$0xf] %vm3974_vm13, %v9776_v34  ;;  %v3899_v24 = vmul.f32 %v11560_v52, %v15230_v20  ;;  %v15236_v52 = vld [vmem:[#allocation97_spill] sm:$0xff] }
 0xb2a   : > { %6537 = vadd.xlane.f32.xlu0 %v13966_v13  ;;  %6529 = vadd.xlane.f32.xlu1 %v13873_v42  ;;  %v3894_v15 = vmul.f32 %v11562_v25, %v15231_v53  ;;  %v15233_v13 = vld [vmem:[#allocation92_spill] sm:$0xff] }
 0xb2b   : > { %v3702_v31 = vpop.xlane.xlu0 %3701  ;;  %v9746_v5 = vpack.c.bf16 %v3899_v24, %v3899_v24 }
 0xb2c   : > { %v11564_v62 = vpop.eup %11563  ;;  %11575 = vrcp.f32 %v3702_v31  ;;  %v9741_v11 = vpack.c.bf16 %v3894_v15, %v3894_v15  ;;  %v15238_v31 = vld [vmem:[#allocation50_spill] sm:$0xff] }
 0xb2d   : > { %v11566_v27 = vpop.eup %11565  ;;  %3980 = vst.msk [vmem:[#allocation3 + $0x3c] sm:$0xf] %vm3974_vm13, %v9746_v5  ;;  %v5313_v10 = vmul.f32 %v11564_v62, %v15232_v12 }
 0xb2e   : > { %6549 = vadd.xlane.f32.xlu0 %v13989_v14  ;;  %6539 = vadd.xlane.f32.xlu1 %v13968_v55  ;;  %3975 = vst.msk [vmem:[#allocation3] sm:$0xf] %vm3974_vm13, %v9741_v11  ;;  %v5308_v42 = vmul.f32 %v11566_v27, %v15233_v13  ;;  %v15235_v55 = vld [vmem:[#allocation45_spill] sm:$0xff] }
 0xb2f   : > { %v5116_v17 = vpop.xlane.xlu0 %5115  ;;  %v9778_v21 = vpack.c.bf16 %v5313_v10, %v5313_v10  ;;  %v15240_v13 = vld [vmem:[#allocation49_spill] sm:$0xff] }
 0xb30   : > { %v11568_v8 = vpop.eup %11567  ;;  %11577 = vrcp.f32 %v5116_v17  ;;  %v9773_v2 = vpack.c.bf16 %v5308_v42, %v5308_v42 }
 0xb31   : > { %v11570_v3 = vpop.eup %11569  ;;  %5393 = vst.msk [vmem:[#allocation3 + $0x40] sm:$0xf] %vm3974_vm13, %v9778_v21  ;;  %v3901_v46 = vmul.f32 %v11568_v8, %v15234_v57  ;;  %v15241_v8 = vld [vmem:[#allocation95_spill] sm:$0xff] }
 0xb32   : > { %6545 = vadd.xlane.f32.xlu0 %v13993_v49  ;;  %6535 = vadd.xlane.f32.xlu1 %v13961_v28  ;;  %5388 = vst.msk [vmem:[#allocation3 + $0x4] sm:$0xf] %vm3974_vm13, %v9773_v2  ;;  %v3896_v14 = vmul.f32 %v11570_v3, %v15235_v55  ;;  %v15237_v49 = vld [vmem:[#allocation91_spill] sm:$0xff] }
 0xb33   : > { %v3706_v50 = vpop.xlane.xlu0 %3705  ;;  %v9748_v36 = vpack.c.bf16 %v3901_v46, %v3901_v46 }
 0xb34   : > { %v11572_v19 = vpop.eup %11571  ;;  %11579 = vrcp.f32 %v3706_v50  ;;  %v9743_v18 = vpack.c.bf16 %v3896_v14, %v3896_v14  ;;  %v10559_v14 = vpop.f32.mrf.mxu0 }
 0xb35   : > { %v11574_v34 = vpop.eup %11573  ;;  %3982 = vst.msk [vmem:[#allocation3 + $0x54] sm:$0xf] %vm3974_vm13, %v9748_v36  ;;  %v5315_v25 = vmul.f32 %v11572_v19, %v15236_v52 }
 0xb36   : > { %6547 = vadd.xlane.f32.xlu1 %v13996_v56  ;;  %3977 = vst.msk [vmem:[#allocation3 + $0x18] sm:$0xf] %vm3974_vm13, %v9743_v18  ;;  %v5310_v28 = vmul.f32 %v11574_v34, %v15237_v49  ;;  %v15239_v56 = vld [vmem:[#allocation96_spill] sm:$0xff]  ;;  %v6641_v50 = vpop.f32.mrf.mxu0 }
 0xb37   : > { %v5120_v20 = vpop.xlane.xlu0 %5119  ;;  %v9780_v24 = vpack.c.bf16 %v5315_v25, %v5315_v25 }
 0xb38   : > { %11581 = vrcp.f32 %v5120_v20  ;;  %v9775_v53 = vpack.c.bf16 %v5310_v28, %v5310_v28  ;;  %v10560_v36 = vpop.f32.mrf.mxu0 }
 0xb39   : > { %v11576_v15 = vpop.eup %11575  ;;  %5395 = vst.msk [vmem:[#allocation3 + $0x58] sm:$0xf] %vm3974_vm13, %v9780_v24 }
 0xb3a   : > { %6543 = vadd.xlane.f32.xlu1 %v13984_v40  ;;  %5390 = vst.msk [vmem:[#allocation3 + $0x1c] sm:$0xf] %vm3974_vm13, %v9775_v53  ;;  %v3898_v5 = vmul.f32 %v11576_v15, %v15238_v31  ;;  %v14115_v19 = vpop.f32.mrf.mxu0 }
 0xb3c   : > { %v9745_v62 = vpack.c.bf16 %v3898_v5, %v3898_v5  ;;  %v10563_v18 = vpop.f32.mrf.mxu0 }
 0xb3d   : > { %v11578_v11 = vpop.eup %11577 }
 0xb3e   : > { %v5312_v27 = vmul.f32 %v11578_v11, %v15239_v56  ;;  %3979 = vst.msk [vmem:[#allocation3 + $0x30] sm:$0xf] %vm3974_vm13, %v9745_v62  ;;  %v14117_v34 = vpop.f32.mrf.mxu0  ;;  %v15242_v56 = vld [vmem:[#allocation54_spill] sm:$0xff] }
 0xb40   : > { %v9777_v12 = vpack.c.bf16 %v5312_v27, %v5312_v27  ;;  %v14119_v25 = vpop.f32.mrf.mxu0 }
 0xb41   : > { %v11580_v10 = vpop.eup %11579 }
 0xb42   : > { %5392 = vst.msk [vmem:[#allocation3 + $0x34] sm:$0xf] %vm3974_vm13, %v9777_v12  ;;  %v3900_v42 = vmul.f32 %v11580_v10, %v15240_v13  ;;  %v14121_v28 = vpop.f32.mrf.mxu0 }
 0xb44   : > { %v9747_v17 = vpack.c.bf16 %v3900_v42, %v3900_v42 }
 0xb45   : > { %v11582_v21 = vpop.eup %11581 }
 0xb46   : > { %v5314_v40 = vmul.f32 %v11582_v21, %v15241_v8  ;;  %3981 = vst.msk [vmem:[#allocation3 + $0x48] sm:$0xf] %vm3974_vm13, %v9747_v17 }
 0xb48   : > { %v9779_v2 = vpack.c.bf16 %v5314_v40, %v5314_v40 }
 0xb4a   : > { %5394 = vst.msk [vmem:[#allocation3 + $0x4c] sm:$0xf] %vm3974_vm13, %v9779_v2 }
 0xb60   : > { %v4674_v3 = vpop.permute.xlu1 %4673 }
 0xb61   : > { %4722 = vst.msk [vmem:[#allocation3] sm:$0xf] %vm4721_vm12, %v4674_v3 }
 0xb64   : > { %v4676_v57 = vpop.permute.xlu1 %4675 }
 0xb65   : > { %v6087_v46 = vpop.permute.xlu0 %6086  ;;  %4723 = vst.msk [vmem:[#allocation3 + $0xc] sm:$0xf] %vm4721_vm12, %v4676_v57 }
 0xb66   : > { %6134 = vst.msk [vmem:[#allocation3 + $0x4] sm:$0xf] %vm4721_vm12, %v6087_v46 }
 0xb68   : > { %v6089_v55 = vpop.permute.xlu1 %6088 }
 0xb69   : > { %6135 = vst.msk [vmem:[#allocation3 + $0x10] sm:$0xf] %vm4721_vm12, %v6089_v55 }
 0xb9b   : > { %v3710_v52 = vpop.xlane.xlu0 %3709 }
 0xb9c   : > { %11583 = vrcp.f32 %v3710_v52 }
 0xb9f   : > { %v6524_v49 = vpop.xlane.xlu0 %6523 }
 0xba0   : > { %11585 = vrcp.f32 %v6524_v49  ;;  %v14123_v20 = vpop.f32.mrf.mxu0 }
 0xba2   : > { %v14125_v15 = vpop.f32.mrf.mxu0 }
 0xba3   : > { %v6520_v24 = vpop.xlane.xlu0 %6519  ;;  %v3712_v53 = vpop.xlane.xlu1 %3711 }
 0xba4   : > { %11587 = vrcp.f32 %v6520_v24  ;;  %v14127_v11 = vpop.f32.mrf.mxu0 }
 0xba5   : > { %11589 = vrcp.f32 %v3712_v53  ;;  %v15243_v53 = vld [vmem:[#allocation56_spill] sm:$0xff] }
 0xba6   : > { %v14130_v17 = vpop.f32.mrf.mxu0 }
 0xba7   : > { %v6532_v31 = vpop.xlane.xlu0 %6531  ;;  %v6526_v5 = vpop.xlane.xlu1 %6525 }
 0xba8   : > { %11591 = vrcp.f32 %v6532_v31 }
 0xba9   : > { %v11584_v62 = vpop.eup %11583  ;;  %11593 = vrcp.f32 %v6526_v5 }
 0xbaa   : > { %v3902_v27 = vmul.f32 %v11584_v62, %v15242_v56 }
 0xbab   : > { %v6528_v12 = vpop.xlane.xlu0 %6527  ;;  %v6522_v10 = vpop.xlane.xlu1 %6521 }
 0xbac   : > { %11595 = vrcp.f32 %v6528_v12  ;;  %v9749_v13 = vpack.c.bf16 %v3902_v27, %v3902_v27 }
 0xbad   : > { %v11586_v42 = vpop.eup %11585  ;;  %11597 = vrcp.f32 %v6522_v10 }
 0xbae   : > { %v6722_v21 = vmul.f32 %v11586_v42, %v10559_v14  ;;  %3983 = vst.msk [vmem:[#allocation3 + $0x60] sm:$0xf] %vm3974_vm13, %v9749_v13 }
 0xbaf   : > { %v6542_v8 = vpop.xlane.xlu0 %6541  ;;  %v6534_v40 = vpop.xlane.xlu1 %6533 }
 0xbb0   : > { %11599 = vrcp.f32 %v6542_v8  ;;  %v14133_v2 = vpop.f32.mrf.mxu0  ;;  %v9807_v3 = vpack.c.bf16 %v6722_v21, %v6722_v21 }
 0xbb1   : > { %v11588_v57 = vpop.eup %11587  ;;  %11601 = vrcp.f32 %v6534_v40 }
 0xbb2   : > { %v11590_v46 = vpop.eup %11589  ;;  %v14135_v55 = vpop.f32.mrf.mxu0  ;;  %6802 = vst.msk [vmem:[#allocation3 + $0x20] sm:$0xf] %vm3974_vm13, %v9807_v3  ;;  %v6720_v52 = vmul.f32 %v11588_v57, %v6641_v50 }
 0xbb3   : > { %v6538_v49 = vpop.xlane.xlu0 %6537  ;;  %v6530_v24 = vpop.xlane.xlu1 %6529  ;;  %v3903_v14 = vmul.f32 %v11590_v46, %v15243_v53 }
 0xbb4   : > { %11603 = vrcp.f32 %v6538_v49  ;;  %v14139_v31 = vpop.f32.mrf.mxu0  ;;  %v9805_v5 = vpack.c.bf16 %v6720_v52, %v6720_v52 }
 0xbb5   : > { %v11592_v62 = vpop.eup %11591  ;;  %11605 = vrcp.f32 %v6530_v24  ;;  %v9750_v56 = vpack.c.bf16 %v3903_v14, %v3903_v14 }
 0xbb6   : > { %v11594_v27 = vpop.eup %11593  ;;  %v14141_v12 = vpop.f32.mrf.mxu0  ;;  %6800 = vst.msk [vmem:[#allocation3 + $0x8] sm:$0xf] %vm3974_vm13, %v9805_v5  ;;  %v6726_v10 = vmul.f32 %v11592_v62, %v10563_v18 }
 0xbb7   : > { %v6550_v13 = vpop.xlane.xlu0 %6549  ;;  %v6540_v42 = vpop.xlane.xlu1 %6539  ;;  %v6723_v50 = vmul.f32 %v11594_v27, %v10560_v36  ;;  %3984 = vst.msk [vmem:[#allocation3 + $0x6c] sm:$0xf] %vm3974_vm13, %v9750_v56 }
 0xbb8   : > { %11607 = vrcp.f32 %v6550_v13  ;;  %v10591_v21 = vpop.f32.mrf.mxu0  ;;  %v9811_v8 = vpack.c.bf16 %v6726_v10, %v6726_v10 }
 0xbb9   : > { %v11596_v40 = vpop.eup %11595  ;;  %11609 = vrcp.f32 %v6540_v42  ;;  %v14147_v57 = vsel %vm12774_vm1, %v10591_v21, -inf  ;;  %v9808_v46 = vpack.c.bf16 %v6723_v50, %v6723_v50 }
 0xbba   : > { %v11598_v52 = vpop.eup %11597  ;;  %7141 = vmax.xlane.f32.xlu0 %v14147_v57  ;;  %v7058_v49 = vpop.f32.mrf.mxu0  ;;  %6806 = vst.msk [vmem:[#allocation3 + $0x50] sm:$0xf] %vm3974_vm13, %v9811_v8  ;;  %v6724_v36 = vmul.f32 %v11596_v40, %v14117_v34  ;;  %11611 = vrcp.f32 %v13978_v61 }
 0xbbb   : > { %v6546_v18 = vpop.xlane.xlu0 %6545  ;;  %v6536_v24 = vpop.xlane.xlu1 %6535  ;;  %6803 = vst.msk [vmem:[#allocation3 + $0x2c] sm:$0xf] %vm3974_vm13, %v9808_v46  ;;  %v6721_v53 = vmul.f32 %v11598_v52, %v14115_v19  ;;  %v14157_v27 = vsel %vm12781_vm2, %v7058_v49, -inf }
 0xbbc   : > { %11613 = vrcp.f32 %v6546_v18  ;;  %v10592_v14 = vpop.f32.mrf.mxu0  ;;  %v9809_v5 = vpack.c.bf16 %v6724_v36, %v6724_v36 }
 0xbbd   : > { %v11600_v62 = vpop.eup %11599  ;;  %11615 = vrcp.f32 %v6536_v24  ;;  %v9806_v10 = vpack.c.bf16 %v6721_v53, %v6721_v53  ;;  %v14172_v46 = vsel %vm12792_vm3, %v10592_v14, -inf  ;;  %vm15276_vm3 = vnez %v14978_v23  ;;  %v11269_v23 = vld [vmem:[#allocation9 + $0x4c] ss:$12 sps:$4 sm:$0xff]  }
 0xbbe   : > { %v11602_v13 = vpop.eup %11601  ;;  %7137 = vmax.xlane.f32.xlu0 %v14157_v27  ;;  %v7061_v61 = vpop.f32.mrf.mxu0  ;;  %6804 = vst.msk [vmem:[#allocation3 + $0x38] sm:$0xf] %vm3974_vm13, %v9809_v5  ;;  %v6731_v34 = vmul.f32 %v11600_v62, %v14127_v11  ;;  %11617 = vrcp.f32 %v13945_v6  ;;  %v15248_v62 = vld [vmem:[#allocation84_spill] sm:$0xff] }
 0xbbf   : > { %v14165_v42 = vsel %vm12803_vm4, %v7061_v61, -inf  ;;  %v6548_v50 = vpop.xlane.xlu1 %6547  ;;  %6801 = vst.msk [vmem:[#allocation3 + $0x14] sm:$0xf] %vm3974_vm13, %v9806_v10  ;;  %v6727_v21 = vmul.f32 %v11602_v13, %v14119_v25  ;;  %vm15277_vm4 = vnez %v14980_v39 }
 0xbc0   : > { %11619 = vrcp.f32 %v6548_v50  ;;  %7139 = vmax.xlane.f32.xlu1 %v14165_v42  ;;  %v9816_v8 = vpack.c.bf16 %v6731_v34, %v6731_v34  ;;  %v10595_v52 = vpop.f32.mrf.mxu0 }
 0xbc1   : > { %v11604_v40 = vpop.eup %11603  ;;  %v9812_v11 = vpack.c.bf16 %v6727_v21, %v6727_v21  ;;  %v14186_v34 = vsel %vm12813_vm5, %v10595_v52, -inf }
 0xbc2   : > { %v11606_v6 = vpop.eup %11605  ;;  %7143 = vmax.xlane.f32.xlu0 %v14172_v46  ;;  %6811 = vst.msk [vmem:[#allocation3 + $0x8c] sm:$0xf] %vm3974_vm13, %v9816_v8  ;;  %v6729_v49 = vmul.f32 %v11604_v40, %v14130_v17  ;;  %v7074_v5 = vpop.f32.mrf.mxu0  ;;  %v15250_v8 = vld [vmem:[#allocation63_spill] sm:$0xff] }
 0xbc3   : > { %v6544_v36 = vpop.xlane.xlu1 %6543  ;;  %6807 = vst.msk [vmem:[#allocation3 + $0x5c] sm:$0xf] %vm3974_vm13, %v9812_v11  ;;  %v6725_v25 = vmul.f32 %v11606_v6, %v14121_v28 }
 0xbc4   : > { %11621 = vrcp.f32 %v6544_v36  ;;  %v9814_v18 = vpack.c.bf16 %v6729_v49, %v6729_v49  ;;  %v10596_v21 = vpop.f32.mrf.mxu0  ;;  %v14196_v49 = vsel %vm12829_vm6, %v7074_v5, -inf }
 0xbc5   : > { %v11608_v24 = vpop.eup %11607  ;;  %v9810_v53 = vpack.c.bf16 %v6725_v25, %v6725_v25  ;;  %11623 = vrcp.f32 %v13982_v37 }
 0xbc6   : > { %v11610_v14 = vpop.eup %11609  ;;  %5123 = vadd.xlane.f32.xlu0 %v15248_v62  ;;  %6809 = vst.msk [vmem:[#allocation3 + $0x74] sm:$0xf] %vm3974_vm13, %v9814_v18  ;;  %v6735_v56 = vmul.f32 %v11608_v24, %v14139_v31  ;;  %v7077_v25 = vpop.f32.mrf.mxu0  ;;  %v15252_v24 = vld [vmem:[#allocation65_spill] sm:$0xff]  ;;  %11625 = vrcp.f32 %v13947_v4 }
 0xbc7   : > { %v6730_v10 = vmul.f32 %v11610_v14, %v14123_v20  ;;  %6805 = vst.msk [vmem:[#allocation3 + $0x44] sm:$0xf] %vm3974_vm13, %v9810_v53  ;;  %v11612_v17 = vpop.eup %11611  ;;  %11627 = vrcp.f32 %v14005_v54 }
 0xbc8   : > { %v9820_v13 = vpack.c.bf16 %v6735_v56, %v6735_v56  ;;  %v4611_v20 = vmul.f32 %v11612_v17, %v15250_v8  ;;  %v14205_v56 = vsel %vm12840_vm7, %v10596_v21, -inf  ;;  %v10599_v5 = vpop.f32.mrf.mxu0  ;;  %11629 = vrcp.f32 %v13991_v60 }
 0xbc9   : > { %v11614_v61 = vpop.eup %11613  ;;  %v9815_v19 = vpack.c.bf16 %v6730_v10, %v6730_v10 }
 0xbca   : > { %v11616_v50 = vpop.eup %11615  ;;  %7149 = vmax.xlane.f32.xlu0 %v14186_v34  ;;  %6815 = vst.msk [vmem:[#allocation3 + $0xbc] sm:$0xf] %vm3974_vm13, %v9820_v13  ;;  %v6733_v31 = vmul.f32 %v11614_v61, %v14141_v12  ;;  %v9759_v12 = vpack.c.bf16 %v4611_v20, %v4611_v20  ;;  %v7090_v13 = vpop.f32.mrf.mxu0  ;;  %v15254_v61 = vld [vmem:[#allocation83_spill] sm:$0xff] }
 0xbcb   : > { %6810 = vst.msk [vmem:[#allocation3 + $0x80] sm:$0xf] %vm3974_vm13, %v9815_v19  ;;  %v6728_v40 = vmul.f32 %v11616_v50, %v14125_v15  ;;  %v11618_v3 = vpop.eup %11617  ;;  %v14216_v19 = vsel %vm15090_vm15, %v10599_v5, -inf }
 0xbcc   : > { %v9818_v11 = vpack.c.bf16 %v6733_v31, %v6733_v31  ;;  %v4612_v53 = vmul.f32 %v11618_v3, %v15252_v24  ;;  %v10600_v50 = vpop.f32.mrf.mxu0  ;;  %v14221_v31 = vsel %vm15181_vm14, %v7090_v13, -inf  ;;  %v15268_v13 = vld [vmem:[#allocation87_spill] sm:$0xff] }
 0xbcd   : > { %v11620_v6 = vpop.eup %11619  ;;  %v9813_v36 = vpack.c.bf16 %v6728_v40, %v6728_v40  ;;  %v14226_v20 = vsel %vm15182_vm10, %v10600_v50, -inf  ;;  %v15270_v50 = vld [vmem:[#allocation111_spill] sm:$0xff] }
 0xbce   : > { %7145 = vmax.xlane.f32.xlu0 %v14196_v49  ;;  %v6734_v18 = vmul.f32 %v11620_v6, %v14133_v2  ;;  %6813 = vst.msk [vmem:[#allocation3 + $0xa4] sm:$0xf] %vm3974_vm13, %v9818_v11  ;;  %v9760_v10 = vpack.c.bf16 %v4612_v53, %v4612_v53  ;;  %v15262_v53 = vld [vmem:[#allocation107_spill] sm:$0xff] }
 0xbcf   : > { %6808 = vst.msk [vmem:[#allocation3 + $0x68] sm:$0xf] %vm3974_vm13, %v9813_v36 }
 0xbd0   : > { %v9819_v15 = vpack.c.bf16 %v6734_v18, %v6734_v18 }
 0xbd1   : > { %v11622_v14 = vpop.eup %11621  ;;  %4677 = vrot.lane.b32.xlu1 %v9759_v12, %s11927_s21  ;;  %v15260_v12 = vld [vmem:[#allocation22_spill] sm:$0xff] }
 0xbd2   : > { %7151 = vmax.xlane.f32.xlu0 %v14205_v56  ;;  %6814 = vst.msk [vmem:[#allocation3 + $0xb0] sm:$0xf] %vm3974_vm13, %v9819_v15  ;;  %v6732_v2 = vmul.f32 %v11622_v14, %v14135_v55  ;;  %v7093_v55 = vpop.f32.mrf.mxu0  ;;  %v11624_v18 = vpop.eup %11623  ;;  %vm15261_vm1 = vnez %v15260_v12  ;;  %v15263_v14 = vld [vmem:[#allocation23_spill] sm:$0xff] }
 0xbd3   : > { %v14243_v24 = vsel %vm15261_vm1, %v7077_v25, -inf  ;;  %v6024_v15 = vmul.f32 %v11624_v18, %v15262_v53  ;;  %vm15264_vm2 = vnez %v15263_v14  ;;  %v11626_v5 = vpop.eup %11625  ;;  %v15266_v25 = vld [vmem:[#allocation40_spill] sm:$0xff] }
 0xbd4   : > { %v9817_v17 = vpack.c.bf16 %v6732_v2, %v6732_v2  ;;  %v10603_v40 = vpop.f32.mrf.mxu0  ;;  %v14249_v62 = vsel %vm15264_vm2, %v7093_v55, -inf  ;;  %v15265_v2 = vld [vmem:[#allocation108_spill] sm:$0xff]  ;;  %v11628_v28 = vpop.eup %11627 }
 0xbd5   : > { %4679 = vrot.lane.b32.xlu1 %v9760_v10, %s11927_s21  ;;  %v14231_v11 = vsel %vm15184_vm0, %v10603_v40, -inf  ;;  %v9791_v37 = vpack.c.bf16 %v6024_v15, %v6024_v15  ;;  %v6025_v4 = vmul.f32 %v11626_v5, %v15265_v2  ;;  %v6026_v21 = vmul.f32 %v11628_v28, %v15270_v50  ;;  %v11630_v55 = vpop.eup %11629  ;;  %v15271_v40 = vld [vmem:[#allocation68_spill] sm:$0xff] }
 0xbd6   : > { %5125 = vadd.xlane.f32.xlu0 %v15254_v61  ;;  %6812 = vst.msk [vmem:[#allocation3 + $0x98] sm:$0xf] %vm3974_vm13, %v9817_v17  ;;  %v7106_v6 = vpop.f32.mrf.mxu0  ;;  %v15267_v17 = vld [vmem:[#allocation86_spill] sm:$0xff]  ;;  %v15269_v61 = vld [vmem:[#allocation41_spill] sm:$0xff]  ;;  %v4613_v3 = vmul.f32 %v11630_v55, %v15271_v40  ;;  %v11255_v40 = vld [vmem:[#allocation9 + $0xa8] ss:$12 sps:$4 sm:$0xff]  }
 0xbd7   : > { %v14236_v36 = vsel %vm15185_vm11, %v7106_v6, -inf  ;;  %v9792_v10 = vpack.c.bf16 %v6025_v4, %v6025_v4  ;;  %v9793_v8 = vpack.c.bf16 %v6026_v21, %v6026_v21  ;;  %v11257_v6 = vld [vmem:[#allocation9 + $0xac] ss:$12 sps:$4 sm:$0xff]   ;;  %v15272_v21 = vld [vmem:[#allocation42_spill] sm:$0xff] }
 0xbd8   : > { %v9761_v52 = vpack.c.bf16 %v4613_v3, %v4613_v3  ;;  %8219 = vmatprep.subr.bf16.mxu1 %v11257_v6 }
 0xbda   : > { %7157 = vmax.xlane.f32.xlu0 %v14216_v19 }
 0xbde   : > { %7153 = vmax.xlane.f32.xlu0 %v14221_v31 }
 0xbe2   : > { %7159 = vmax.xlane.f32.xlu0 %v14226_v20 }
 0xbe6   : > { %7165 = vmax.xlane.f32.xlu0 %v14231_v11 }
 0xbea   : > { %7161 = vmax.xlane.f32.xlu0 %v14236_v36 }
 0xbf9   : > { %7147 = vmax.xlane.f32.xlu1 %v14243_v24 }
 0xbfd   : > { %7155 = vmax.xlane.f32.xlu1 %v14249_v62 }
 0xc00   : > { %6090 = vrot.lane.b32.xlu0 %v9791_v37, %s11927_s21 }
 0xc0e   : > { %6092 = vrot.lane.b32.xlu1 %v9792_v10, %s11927_s21 }
 0xc1f   : > { %3713 = vadd.xlane.f32.xlu0 %v15266_v25 }
 0xc23   : > { %5127 = vadd.xlane.f32.xlu0 %v15267_v17 }
 0xc27   : > { %5129 = vadd.xlane.f32.xlu0 %v15268_v13 }
 0xc32   : > { %3715 = vadd.xlane.f32.xlu1 %v15269_v61 }
 0xc3d   : > { %6094 = vrot.lane.b32.xlu0 %v9793_v8, %s11927_s21 }
 0xc43   : > { %v7142_v18 = vpop.xlane.xlu0 %7141  ;;  %4681 = vrot.lane.b32.xlu1 %v9761_v52, %s11927_s21 }
 0xc44   : > { %v7171_v54 = vsub.f32 %v14147_v57, %v7142_v18 }
 0xc46   : > { %v7189_v37 = vmul.f32 1.442695, %v7171_v54 }
 0xc47   : > { %v7138_v60 = vpop.xlane.xlu0 %7137 }
 0xc48   : > { %v7169_v12 = vsub.f32 %v14157_v27, %v7138_v60  ;;  %v15273_v60 = vld [vmem:[#allocation100_spill] sm:$0xff] }
 0xc49   : > { %v7140_v53 = vpop.xlane.xlu1 %7139 }
 0xc4a   : > { %v7185_v15 = vmul.f32 1.442695, %v7169_v12  ;;  %v7170_v14 = vsub.f32 %v14165_v42, %v7140_v53  ;;  %v15274_v53 = vld [vmem:[#allocation88_spill] sm:$0xff] }
 0xc4b   : > { %v7144_v5 = vpop.xlane.xlu0 %7143 }
 0xc4c   : > { %v7187_v2 = vmul.f32 1.442695, %v7170_v14  ;;  %v7172_v4 = vsub.f32 %v14172_v46, %v7144_v5  ;;  %11631 = vpow2.f32 %v7185_v15  ;;  %v11258_v15 = vld [vmem:[#allocation9 + $0x90] ss:$12 sps:$4 sm:$0xff]  }
 0xc4d   : > { %v4678_v10 = vpop.permute.xlu1 %4677  ;;  %v11263_v5 = vld [vmem:[#allocation9 + $0x7c] ss:$12 sps:$4 sm:$0xff]  }
 0xc4e   : > { %11633 = vpow2.f32 %v7187_v2  ;;  %v7191_v25 = vmul.f32 1.442695, %v7172_v4  ;;  %4724 = vst.msk [vmem:[#allocation3 + $0x18] sm:$0xf] %vm4721_vm12, %v4678_v10  ;;  %v10604_v2 = vpop.f32.mrf.mxu0  ;;  %v11261_v10 = vld [vmem:[#allocation9 + $0x78] ss:$12 sps:$4 sm:$0xff]  }
 0xc4f   : > { %11635 = vpow2.f32 %v7189_v37  ;;  %v5124_v57 = vpop.xlane.xlu0 %5123 }
 0xc50   : > { %11637 = vpow2.f32 %v7191_v25  ;;  %v14291_v25 = vsel %vm15276_vm3, %v10604_v2, -inf }
 0xc51   : > { %11639 = vrcp.f32 %v5124_v57  ;;  %v4680_v27 = vpop.permute.xlu1 %4679  ;;  %v11266_v57 = vld [vmem:[#allocation9 + $0x64] ss:$12 sps:$4 sm:$0xff]  }
 0xc52   : > { %4725 = vst.msk [vmem:[#allocation3 + $0x24] sm:$0xf] %vm4721_vm12, %v4680_v27  ;;  %v7109_v27 = vpop.f32.mrf.mxu0 }
 0xc53   : > { %v7150_v17 = vpop.xlane.xlu0 %7149 }
 0xc54   : > { %v7175_v61 = vsub.f32 %v14186_v34, %v7150_v17  ;;  %v11260_v34 = vld [vmem:[#allocation9 + $0x94] ss:$12 sps:$4 sm:$0xff]  }
 0xc56   : > { %v7197_v52 = vmul.f32 1.442695, %v7175_v61 }
 0xc57   : > { %v7146_v42 = vpop.xlane.xlu0 %7145 }
 0xc58   : > { %v7173_v18 = vsub.f32 %v14196_v49, %v7146_v42  ;;  %v15275_v49 = vld [vmem:[#allocation85_spill] sm:$0xff]  ;;  %v11264_v42 = vld [vmem:[#allocation9 + $0x60] ss:$12 sps:$4 sm:$0xff]  }
 0xc59   : > { %v11632_v13 = vpop.eup %11631 }
 0xc5a   : > { %v7193_v37 = vmul.f32 1.442695, %v7173_v18 }
 0xc5b   : > { %v14272_v28 = vpop.eup %11633  ;;  %v14274_v46 = vpop.xlane.xlu0 %7151 }
 0xc5c   : > { %v11636_v50 = vpop.eup %11635  ;;  %3717 = vadd.xlane.f32.xlu0 %v15272_v21  ;;  %v7249_v55 = vpack.c.bf16 %v14272_v28, %v11632_v13  ;;  %v11267_v21 = vld [vmem:[#allocation9 + $0x48] ss:$12 sps:$4 sm:$0xff]  }
 0xc5d   : > { %v14278_v8 = vpop.eup %11637 }
 0xc5e   : > { %v11640_v3 = vpop.eup %11639  ;;  %v7250_v6 = vpack.c.bf16 %v14278_v8, %v11636_v50  ;;  %10621 = vmatprep.mubr.bf16.mxu1 %v7249_v55 }
 0xc5f   : > { %v5126_v54 = vpop.xlane.xlu0 %5125  ;;  %v5316_v12 = vmul.f32 %v11640_v3, %v15273_v60  ;;  %v11273_v60 = vld [vmem:[#allocation9 + $0x18] ss:$12 sps:$4 sm:$0xff]  }
 0xc60   : > { %5131 = vadd.xlane.f32.xlu0 %v15274_v53  ;;  %10622 = vmatmul.mubr.bf16.vlgmr.msra.gmra.mxu1 %v7250_v6  ;;  %11641 = vrcp.f32 %v5126_v54  ;;  %v11270_v6 = vld [vmem:[#allocation9 + $0x30] ss:$12 sps:$4 sm:$0xff]  }
 0xc61   : > { %8220 = vmatpush1.bf16.msra.mxu1 %v11255_v40  ;;  %v9781_v14 = vpack.c.bf16 %v5316_v12, %v5316_v12  ;;  %11643 = vpow2.f32 %v7197_v52  ;;  %v15279_v12 = vld [vmem:[#allocation70_spill] sm:$0xff] }
 0xc62   : > { %8221 = vmatprep.subr.bf16.mxu1 %v11260_v34  ;;  %11645 = vrcp.f32 %v13953_v1  ;;  %v14299_v1 = vsel %vm15277_vm4, %v7109_v27, -inf  ;;  %v11275_v34 = vld [vmem:[#allocation9 + $0x1c] ss:$12 sps:$4 sm:$0xff]   ;;  %v7176_v27 = vsub.f32 %v14205_v56, %v14274_v46  ;;  %v11285_v46 = vld [vmem:[#allocation9 + $0x138] ss:$12 sps:$4 sm:$0xff]  }
 0xc63   : > { %v14284_v4 = vpop.xlane.xlu0 %7157  ;;  %5396 = vst.msk [vmem:[#allocation3 + $0x64] sm:$0xf] %vm3974_vm13, %v9781_v14  ;;  %11647 = vpow2.f32 %v7193_v37 }
 0xc64   : > { %5133 = vadd.xlane.f32.xlu0 %v15275_v49  ;;  %11649 = vrcp.f32 %v13972_v7  ;;  %v15278_v7 = vld [vmem:[#allocation102_spill] sm:$0xff]  ;;  %v15280_v49 = vld [vmem:[#allocation113_spill] sm:$0xff] }
 0xc65   : > { %8222 = vmatpush1.bf16.msra.mxu1 %v11258_v15  ;;  %11651 = vrcp.f32 %v14020_v51  ;;  %v11278_v15 = vld [vmem:[#allocation9 + $0x4] ss:$12 sps:$4 sm:$0xff]   ;;  %v11279_v51 = vld [vmem:[#allocation9 + $0x168] ss:$12 sps:$4 sm:$0xff]  }
 0xc66   : > { %8223 = vmatprep.subr.bf16.mxu1 %v11263_v5  ;;  %v11276_v5 = vld [vmem:[#allocation9] ss:$12 sps:$4 sm:$0xff]  }
 0xc67   : > { %v14293_v17 = vpop.xlane.xlu0 %7153  ;;  %7167 = vmax.xlane.f32.xlu1 %v14291_v25 }
 0xc68   : > { %7221 = vadd.xlane.f32.xlu0 %v11636_v50  ;;  %v11272_v50 = vld [vmem:[#allocation9 + $0x34] ss:$12 sps:$4 sm:$0xff]  }
 0xc69   : > { %8224 = vmatpush1.bf16.msra.mxu1 %v11261_v10 }
 0xc6a   : > { %8225 = vmatprep.subr.bf16.mxu1 %v11266_v57  ;;  %v11281_v57 = vld [vmem:[#allocation9 + $0x16c] ss:$12 sps:$4 sm:$0xff]  }
 0xc6b   : > { %v14301_v61 = vpop.xlane.xlu0 %7159  ;;  %7163 = vmax.xlane.f32.xlu1 %v14299_v1 }
 0xc6c   : > { %7217 = vadd.xlane.f32.xlu0 %v11632_v13 }
 0xc6d   : > { %8226 = vmatpush1.bf16.msra.mxu1 %v11264_v42  ;;  %v11642_v55 = vpop.eup %11641 }
 0xc6e   : > { %8227 = vmatprep.subr.bf16.mxu1 %v11269_v23  ;;  %v14304_v40 = vpop.eup %11643  ;;  %v5317_v39 = vmul.f32 %v11642_v55, %v15278_v7  ;;  %v11284_v23 = vld [vmem:[#allocation9 + $0x154] ss:$12 sps:$4 sm:$0xff]   ;;  %v11282_v55 = vld [vmem:[#allocation9 + $0x150] ss:$12 sps:$4 sm:$0xff]   ;;  %v7177_v7 = vsub.f32 %v14221_v31, %v14293_v17  ;;  %v7179_v17 = vsub.f32 %v14216_v19, %v14284_v4 }
 0xc6f   : > { %v14306_v3 = vpop.xlane.xlu0 %7165  ;;  %v11646_v18 = vpop.eup %11645  ;;  %v11296_v19 = vld [vmem:[#allocation9 + $0xf4] ss:$12 sps:$4 sm:$0xff]   ;;  %v11294_v4 = vld [vmem:[#allocation9 + $0xf0] ss:$12 sps:$4 sm:$0xff]  }
 0xc70   : > { %7229 = vadd.xlane.f32.xlu0 %v14304_v40  ;;  %v9782_v52 = vpack.c.bf16 %v5317_v39, %v5317_v39  ;;  %v14310_v13 = vpop.eup %11647  ;;  %v4614_v53 = vmul.f32 %v11646_v18, %v15279_v12  ;;  %v15281_v18 = vld [vmem:[#allocation110_spill] sm:$0xff]  ;;  %v7180_v12 = vsub.f32 %v14226_v20, %v14301_v61  ;;  %v11293_v20 = vld [vmem:[#allocation9 + $0x10c] ss:$12 sps:$4 sm:$0xff]   ;;  %v7205_v61 = vmul.f32 1.442695, %v7179_v17 }
 0xc71   : > { %8228 = vmatpush1.bf16.msra.mxu1 %v11267_v21  ;;  %v11650_v14 = vpop.eup %11649 }
 0xc72   : > { %8229 = vmatprep.subr.bf16.mxu1 %v11272_v50  ;;  %5397 = vst.msk [vmem:[#allocation3 + $0x70] sm:$0xf] %vm3974_vm13, %v9782_v52  ;;  %v9762_v2 = vpack.c.bf16 %v4614_v53, %v4614_v53  ;;  %v6027_v10 = vmul.f32 %v11650_v14, %v15280_v49  ;;  %v11652_v21 = vpop.eup %11651  ;;  %v7199_v50 = vmul.f32 1.442695, %v7176_v27  ;;  %v11299_v49 = vld [vmem:[#allocation9 + $0xdc] ss:$12 sps:$4 sm:$0xff]  }
 0xc73   : > { %v14312_v54 = vpop.xlane.xlu0 %7161  ;;  %v11297_v27 = vld [vmem:[#allocation9 + $0xd8] ss:$12 sps:$4 sm:$0xff]  }
 0xc74   : > { %7225 = vadd.xlane.f32.xlu0 %v14310_v13  ;;  %v9794_v42 = vpack.c.bf16 %v6027_v10, %v6027_v10  ;;  %11653 = vpow2.f32 %v7199_v50 }
 0xc75   : > { %8230 = vmatpush1.bf16.msra.mxu1 %v11270_v6  ;;  %v11287_v6 = vld [vmem:[#allocation9 + $0x13c] ss:$12 sps:$4 sm:$0xff]  }
 0xc76   : > { %8231 = vmatprep.subr.bf16.mxu1 %v11275_v34  ;;  %v6028_v34 = vmul.f32 %v11652_v21, %v15281_v18  ;;  %v7181_v18 = vsub.f32 %v14236_v36, %v14312_v54  ;;  %v15285_v54 = vld [vmem:[#allocation69_spill] sm:$0xff] }
 0xc77   : > { %v6091_v37 = vpop.permute.xlu0 %6090 }
 0xc78   : > { %6136 = vst.msk [vmem:[#allocation3 + $0x1c] sm:$0xf] %vm4721_vm12, %v6091_v37  ;;  %v11288_v37 = vld [vmem:[#allocation9 + $0x120] ss:$12 sps:$4 sm:$0xff]  }
 0xc79   : > { %8232 = vmatpush1.bf16.msra.mxu1 %v11273_v60  ;;  %v7201_v60 = vmul.f32 1.442695, %v7177_v7  ;;  %v11303_v7 = vld [vmem:[#allocation9 + $0xc0] ss:$12 sps:$4 sm:$0xff]  }
 0xc7a   : > { %8233 = vmatprep.subr.bf16.mxu1 %v11278_v15  ;;  %v11290_v15 = vld [vmem:[#allocation9 + $0x124] ss:$12 sps:$4 sm:$0xff]  }
 0xc7c   : > { %4683 = vrot.lane.b32.xlu1 %v9762_v2, %s11927_s21 }
 0xc7d   : > { %8234 = vmatpush1.bf16.msra.mxu1 %v11276_v5  ;;  %v7207_v5 = vmul.f32 1.442695, %v7180_v12 }
 0xc7e   : > { %8235 = vmatprep.subr.bf16.mxu1 %v11281_v57 }
 0xc80   : > { %6096 = vrot.lane.b32.xlu1 %v9794_v42, %s11927_s21 }
 0xc81   : > { %8236 = vmatpush2.bf16.msra.mxu1 %v11279_v51  ;;  %v14335_v10 = vpop.eup %11653 }
 0xc82   : > { %v7148_v39 = vpop.xlane.xlu1 %7147  ;;  %8237 = vmatprep.subr.bf16.mxu1 %v11284_v23  ;;  %v7252_v42 = vpack.c.bf16 %v14335_v10, %v14304_v40  ;;  %v11305_v23 = vld [vmem:[#allocation9 + $0xc4] ss:$12 sps:$4 sm:$0xff]   ;;  %v7183_v40 = vsub.f32 %v14231_v11, %v14306_v3  ;;  %v15284_v11 = vld [vmem:[#allocation67_spill] sm:$0xff] }
 0xc83   : > { %v7174_v52 = vsub.f32 %v14243_v24, %v7148_v39  ;;  %v9795_v24 = vpack.c.bf16 %v6028_v34, %v6028_v34  ;;  %v15282_v34 = vld [vmem:[#allocation39_spill] sm:$0xff] }
 0xc85   : > { %v7195_v56 = vmul.f32 1.442695, %v7174_v52  ;;  %8238 = vmatpush2.bf16.msra.mxu1 %v11282_v55  ;;  %v7213_v52 = vmul.f32 1.442695, %v7183_v40 }
 0xc86   : > { %v7156_v53 = vpop.xlane.xlu1 %7155  ;;  %8239 = vmatprep.subr.bf16.mxu1 %v11287_v6 }
 0xc87   : > { %11655 = vpow2.f32 %v7195_v56  ;;  %v7178_v31 = vsub.f32 %v14249_v62, %v7156_v53  ;;  %v11291_v62 = vld [vmem:[#allocation9 + $0x108] ss:$12 sps:$4 sm:$0xff]   ;;  %v7209_v56 = vmul.f32 1.442695, %v7181_v18 }
 0xc88   : > { %11657 = vpow2.f32 %v7201_v60  ;;  %v15283_v60 = vld [vmem:[#allocation44_spill] sm:$0xff] }
 0xc89   : > { %v7203_v14 = vmul.f32 1.442695, %v7178_v31  ;;  %8240 = vmatpush2.bf16.msra.mxu1 %v11285_v46 }
 0xc8a   : > { %6098 = vrot.lane.b32.xlu0 %v9795_v24, %s11927_s21  ;;  %v6093_v2 = vpop.permute.xlu1 %6092  ;;  %8241 = vmatprep.subr.bf16.mxu1 %v11290_v15 }
 0xc8b   : > { %11659 = vpow2.f32 %v7203_v14  ;;  %6137 = vst.msk [vmem:[#allocation3 + $0x28] sm:$0xf] %vm4721_vm12, %v6093_v2 }
 0xc8c   : > { %11661 = vpow2.f32 %v7207_v5 }
 0xc8d   : > { %8242 = vmatpush2.bf16.msra.mxu1 %v11288_v37  ;;  %11663 = vpow2.f32 %v7205_v61  ;;  %v15286_v37 = vld [vmem:[#allocation53_spill] sm:$0xff] }
 0xc8e   : > { %8243 = vmatprep.subr.bf16.mxu1 %v11293_v20  ;;  %11665 = vrcp.f32 %v14015_v22 }
 0xc8f   : > { %11667 = vrcp.f32 %v13976_v16 }
 0xc90   : > { %11669 = vpow2.f32 %v7213_v52 }
 0xc91   : > { %8244 = vmatpush2.bf16.msra.mxu1 %v11291_v62 }
 0xc92   : > { %8245 = vmatprep.subr.bf16.mxu1 %v11296_v19  ;;  %v15287_v19 = vld [vmem:[#allocation99_spill] sm:$0xff] }
 0xc94   : > { %v14337_v57 = vpop.eup %11655 }
 0xc95   : > { %v7251_v51 = vpack.c.bf16 %v14337_v57, %v14310_v13  ;;  %8246 = vmatpush2.bf16.msra.mxu1 %v11294_v4  ;;  %v11658_v21 = vpop.eup %11657 }
 0xc96   : > { %8247 = vmatprep.subr.bf16.mxu1 %v11299_v49 }
 0xc97   : > { %10625 = vmatprep.mubr.bf16.mxu1 %v7251_v51 }
 0xc98   : > { %v14343_v55 = vpop.eup %11659  ;;  %10626 = vmatmul.mubr.bf16.gmra.mxu1 %v7252_v42  ;;  %v15288_v42 = vld [vmem:[#allocation101_spill] sm:$0xff] }
 0xc99   : > { %v7253_v50 = vpack.c.bf16 %v14343_v55, %v11658_v21  ;;  %8248 = vmatpush2.bf16.msra.mxu1 %v11297_v27  ;;  %v14346_v39 = vpop.eup %11661 }
 0xc9a   : > { %8249 = vmatprep.subr.bf16.mxu1 %v11305_v23  ;;  %v11664_v13 = vpop.eup %11663 }
 0xc9b   : > { %10629 = vmatprep.mubr.bf16.mxu1 %v7253_v50  ;;  %v7254_v6 = vpack.c.bf16 %v14346_v39, %v11664_v13  ;;  %v11666_v22 = vpop.eup %11665 }
 0xc9c   : > { %v4615_v3 = vmul.f32 %v11666_v22, %v15284_v11  ;;  %v11668_v16 = vpop.eup %11667 }
 0xc9d   : > { %8250 = vmatpush2.bf16.msra.mxu1 %v11303_v7  ;;  %v4616_v15 = vmul.f32 %v11668_v16, %v15285_v54  ;;  %v14359_v31 = vpop.eup %11669  ;;  %v15289_v7 = vld [vmem:[#allocation55_spill] sm:$0xff] }
 0xc9e   : > { %v9763_v36 = vpack.c.bf16 %v4615_v3, %v4615_v3 }
 0xc9f   : > { %v9764_v14 = vpack.c.bf16 %v4616_v15, %v4616_v15 }
 0xca0   : > { %10630 = vmatmul.mubr.bf16.gmra.mxu1 %v7254_v6 }
 0xca4   : > { %3719 = vadd.xlane.f32.xlu1 %v15282_v34  ;;  %v15290_v34 = vld [vmem:[#allocation112_spill] sm:$0xff] }
 0xca8   : > { %v3714_v46 = vpop.xlane.xlu0 %3713 }
 0xca9   : > { %11671 = vrcp.f32 %v3714_v46  ;;  %3721 = vadd.xlane.f32.xlu0 %v15283_v60 }
 0xcaa   : > { %11673 = vpow2.f32 %v7209_v56 }
 0xcac   : > { %v5128_v12 = vpop.xlane.xlu0 %5127 }
 0xcad   : > { %11675 = vrcp.f32 %v5128_v12  ;;  %7237 = vadd.xlane.f32.xlu0 %v11664_v13 }
 0xcb0   : > { %v5130_v53 = vpop.xlane.xlu0 %5129 }
 0xcb1   : > { %11677 = vrcp.f32 %v5130_v53  ;;  %7233 = vadd.xlane.f32.xlu0 %v11658_v21 }
 0xcb4   : > { %v6095_v17 = vpop.permute.xlu0 %6094 }
 0xcb5   : > { %6138 = vst.msk [vmem:[#allocation3 + $0x34] sm:$0xf] %vm4721_vm12, %v6095_v17  ;;  %7245 = vadd.xlane.f32.xlu0 %v14359_v31  ;;  %4685 = vrot.lane.b32.xlu1 %v9763_v36, %s11927_s21 }
 0xcb6   : > { %v11672_v24 = vpop.eup %11671 }
 0xcb7   : > { %v3904_v5 = vmul.f32 %v11672_v24, %v15286_v37  ;;  %v14365_v2 = vpop.eup %11673 }
 0xcb9   : > { %7241 = vadd.xlane.f32.xlu0 %v14365_v2  ;;  %4687 = vrot.lane.b32.xlu1 %v9764_v14, %s11927_s21  ;;  %v9751_v20 = vpack.c.bf16 %v3904_v5, %v3904_v5  ;;  %v15292_v14 = vld [vmem:[#allocation104_spill] sm:$0xff] }
 0xcba   : > { %v11676_v61 = vpop.eup %11675 }
 0xcbb   : > { %v3716_v62 = vpop.xlane.xlu1 %3715  ;;  %3985 = vst.msk [vmem:[#allocation3 + $0x78] sm:$0xf] %vm3974_vm13, %v9751_v20  ;;  %v5318_v4 = vmul.f32 %v11676_v61, %v15287_v19 }
 0xcbc   : > { %11679 = vrcp.f32 %v3716_v62 }
 0xcbd   : > { %v9783_v49 = vpack.c.bf16 %v5318_v4, %v5318_v4  ;;  %11681 = vrcp.f32 %v13980_v63 }
 0xcbe   : > { %v11678_v51 = vpop.eup %11677 }
 0xcbf   : > { %v4682_v27 = vpop.permute.xlu1 %4681  ;;  %5398 = vst.msk [vmem:[#allocation3 + $0x7c] sm:$0xf] %vm3974_vm13, %v9783_v49  ;;  %v5319_v23 = vmul.f32 %v11678_v51, %v15288_v42 }
 0xcc0   : > { %4726 = vst.msk [vmem:[#allocation3 + $0x30] sm:$0xf] %vm4721_vm12, %v4682_v27 }
 0xcc1   : > { %v9784_v21 = vpack.c.bf16 %v5319_v23, %v5319_v23 }
 0xcc3   : > { %5399 = vst.msk [vmem:[#allocation3 + $0x88] sm:$0xf] %vm3974_vm13, %v9784_v21  ;;  %v14397_v21 = vld [vmem:[#allocation3 + $0x4] ss:$12 sps:$4 sm:$0xff]  }
 0xcc9   : > { %v11680_v50 = vpop.eup %11679 }
 0xcca   : > { %v3905_v13 = vmul.f32 %v11680_v50, %v15289_v7  ;;  %v11682_v52 = vpop.eup %11681  ;;  %v14400_v50 = vld [vmem:[#allocation3] ss:$12 sps:$4 sm:$0xff]   ;;  %v14402_v7 = vld [vmem:[#allocation3 + $0x1c] ss:$12 sps:$4 sm:$0xff]  }
 0xccb   : > { %v6029_v56 = vmul.f32 %v11682_v52, %v15290_v34 }
 0xccc   : > { %v9752_v6 = vpack.c.bf16 %v3905_v13, %v3905_v13 }
 0xccd   : > { %v9796_v22 = vpack.c.bf16 %v6029_v56, %v6029_v56 }
 0xcce   : > { %3986 = vst.msk [vmem:[#allocation3 + $0x84] sm:$0xf] %vm3974_vm13, %v9752_v6 }
 0xcdd   : > { %7223 = vadd.xlane.f32.xlu1 %v14278_v8 }
 0xce1   : > { %7219 = vadd.xlane.f32.xlu1 %v14272_v28  ;;  %v15291_v28 = vld [vmem:[#allocation58_spill] sm:$0xff] }
 0xce5   : > { %v3718_v40 = vpop.xlane.xlu0 %3717 }
 0xce6   : > { %11683 = vrcp.f32 %v3718_v40 }
 0xce9   : > { %v5132_v18 = vpop.xlane.xlu0 %5131 }
 0xcea   : > { %11685 = vrcp.f32 %v5132_v18 }
 0xced   : > { %v5134_v46 = vpop.xlane.xlu0 %5133 }
 0xcee   : > { %11687 = vrcp.f32 %v5134_v46 }
 0xcf0   : > { %v7168_v60 = vpop.xlane.xlu1 %7167 }
 0xcf1   : > { %v7184_v12 = vsub.f32 %v14291_v25, %v7168_v60  ;;  %v7222_v11 = vpop.xlane.xlu0 %7221 }
 0xcf2   : > { %6100 = vrot.lane.b32.xlu1 %v9796_v22, %s11927_s21 }
 0xcf3   : > { %v11684_v63 = vpop.eup %11683  ;;  %v7215_v8 = vmul.f32 1.442695, %v7184_v12  ;;  %v15294_v12 = vld [vmem:[#allocation60_spill] sm:$0xff] }
 0xcf4   : > { %v7164_v3 = vpop.xlane.xlu1 %7163  ;;  %v3906_v16 = vmul.f32 %v11684_v63, %v15291_v28 }
 0xcf5   : > { %v7182_v53 = vsub.f32 %v14299_v1, %v7164_v3  ;;  %v7218_v36 = vpop.xlane.xlu0 %7217  ;;  %11689 = vpow2.f32 %v7215_v8  ;;  %v15293_v1 = vld [vmem:[#allocation106_spill] sm:$0xff]  ;;  %v15295_v3 = vld [vmem:[#allocation57_spill] sm:$0xff] }
 0xcf6   : > { %v9753_v54 = vpack.c.bf16 %v3906_v16, %v3906_v16 }
 0xcf7   : > { %v11686_v15 = vpop.eup %11685  ;;  %v7211_v17 = vmul.f32 1.442695, %v7182_v53 }
 0xcf8   : > { %v4684_v24 = vpop.permute.xlu1 %4683  ;;  %3987 = vst.msk [vmem:[#allocation3 + $0x90] sm:$0xf] %vm3974_vm13, %v9753_v54  ;;  %v5320_v25 = vmul.f32 %v11686_v15, %v15292_v14 }
 0xcf9   : > { %11691 = vpow2.f32 %v7211_v17  ;;  %4727 = vst.msk [vmem:[#allocation3 + $0x3c] sm:$0xf] %vm4721_vm12, %v4684_v24  ;;  %v14388_v37 = vpop.xlane.xlu0 %7229 }
 0xcfa   : > { %v9785_v5 = vpack.c.bf16 %v5320_v25, %v5320_v25  ;;  %11693 = vrcp.f32 %v7222_v11  ;;  %v11317_v25 = vld [vmem:[#allocation9 + $0x22c] ss:$12 sps:$4 sm:$0xff]  }
 0xcfb   : > { %v11688_v20 = vpop.eup %11687  ;;  %11695 = vrcp.f32 %v7218_v36  ;;  %8332 = vmatprep.subr.bf16.mxu0 %v11317_v25 }
 0xcfc   : > { %v6097_v61 = vpop.permute.xlu1 %6096  ;;  %5400 = vst.msk [vmem:[#allocation3 + $0x94] sm:$0xf] %vm3974_vm13, %v9785_v5  ;;  %v5321_v62 = vmul.f32 %v11688_v20, %v15293_v1 }
 0xcfd   : > { %6139 = vst.msk [vmem:[#allocation3 + $0x40] sm:$0xf] %vm4721_vm12, %v6097_v61  ;;  %v7226_v19 = vpop.xlane.xlu0 %7225  ;;  %v11315_v61 = vld [vmem:[#allocation9 + $0x228] ss:$12 sps:$4 sm:$0xff]  }
 0xcfe   : > { %v9786_v4 = vpack.c.bf16 %v5321_v62, %v5321_v62  ;;  %8333 = vmatpush1.bf16.msra.mxu0 %v11315_v61 }
 0xd00   : > { %5401 = vst.msk [vmem:[#allocation3 + $0xa0] sm:$0xf] %vm3974_vm13, %v9786_v4  ;;  %v14415_v6 = vld [vmem:[#allocation3 + $0x30] ss:$12 sps:$4 sm:$0xff]  }
 0xd01   : > { %v6099_v49 = vpop.permute.xlu0 %6098 }
 0xd02   : > { %6140 = vst.msk [vmem:[#allocation3 + $0x4c] sm:$0xf] %vm4721_vm12, %v6099_v49  ;;  %v11690_v51 = vpop.eup %11689  ;;  %v11318_v49 = vld [vmem:[#allocation9 + $0x210] ss:$12 sps:$4 sm:$0xff]  }
 0xd03   : > { %v7256_v23 = vpack.c.bf16 %v11690_v51, %v14359_v31 }
 0xd04   : > { %v14409_v31 = vld [vmem:[#allocation3 + $0x34] ss:$12 sps:$4 sm:$0xff]  }
 0xd06   : > { %v11692_v27 = vpop.eup %11691 }
 0xd07   : > { %v7255_v42 = vpack.c.bf16 %v11692_v27, %v14365_v2  ;;  %v14407_v2 = vld [vmem:[#allocation3 + $0x18] ss:$12 sps:$4 sm:$0xff]   ;;  %v11694_v13 = vpop.eup %11693 }
 0xd08   : > { %v11696_v18 = vpop.eup %11695 }
 0xd09   : > { %10633 = vmatprep.mubr.bf16.mxu1 %v7255_v42 }
 0xd0a   : > { %10634 = vmatmul.mubr.bf16.gmra.mxu1 %v7256_v23 }
 0xd0b   : > { %8251 = vmatprep.mubr.bf16.mxu1 %v14397_v21 }
 0xd12   : > { %8252 = vmatmul.mubr.bf16.vlgmr.msra.gmra.mxu1 %v14400_v50 }
 0xd13   : > { %8261 = vmatprep.mubr.bf16.mxu1 %v14402_v7 }
 0xd16   : > { %7231 = vadd.xlane.f32.xlu1 %v14335_v10 }
 0xd1a   : > { %7227 = vadd.xlane.f32.xlu1 %v14337_v57  ;;  %8262 = vmatmul.mubr.bf16.gmra.mxu1 %v14407_v2 }
 0xd1b   : > { %8271 = vmatprep.mubr.bf16.mxu1 %v14409_v31 }
 0xd1e   : > { %7239 = vadd.xlane.f32.xlu1 %v14346_v39 }
 0xd20   : > { %v10623_v40 = vpop.f32.mrf.mxu1 }
 0xd21   : > { %v7436_v52 = vmul.f32 %v11694_v13, %v10623_v40  ;;  %v11323_v13 = vld [vmem:[#allocation9 + $0x1fc] ss:$12 sps:$4 sm:$0xff]  }
 0xd22   : > { %v7355_v34 = vpop.f32.mrf.mxu1  ;;  %7235 = vadd.xlane.f32.xlu1 %v14343_v55  ;;  %8272 = vmatmul.mubr.bf16.gmra.mxu1 %v14415_v6 }
 0xd23   : > { %v9823_v10 = vpack.c.bf16 %v7436_v52, %v7436_v52  ;;  %v7434_v56 = vmul.f32 %v11696_v18, %v7355_v34  ;;  %v11321_v18 = vld [vmem:[#allocation9 + $0x1f8] ss:$12 sps:$4 sm:$0xff]  }
 0xd24   : > { %v14428_v36 = vpop.f32.mrf.mxu1 }
 0xd25   : > { %7502 = vrot.lane.b32.xlu0 %v9823_v10, %s11927_s21  ;;  %v9821_v57 = vpack.c.bf16 %v7434_v56, %v7434_v56  ;;  %v11326_v56 = vld [vmem:[#allocation9 + $0x1e4] ss:$12 sps:$4 sm:$0xff]  }
 0xd26   : > { %7247 = vadd.xlane.f32.xlu1 %v11690_v51  ;;  %v14430_v15 = vpop.f32.mrf.mxu1 }
 0xd29   : > { %7498 = vrot.lane.b32.xlu0 %v9821_v57, %s11927_s21 }
 0xd2a   : > { %7243 = vadd.xlane.f32.xlu1 %v11692_v27 }
 0xd2d   : > { %v3720_v39 = vpop.xlane.xlu1 %3719 }
 0xd2e   : > { %11697 = vrcp.f32 %v3720_v39  ;;  %v11324_v39 = vld [vmem:[#allocation9 + $0x1e0] ss:$12 sps:$4 sm:$0xff]  }
 0xd31   : > { %v4686_v46 = vpop.permute.xlu1 %4685 }
 0xd32   : > { %4728 = vst.msk [vmem:[#allocation3 + $0x48] sm:$0xf] %vm4721_vm12, %v4686_v46  ;;  %v3722_v60 = vpop.xlane.xlu0 %3721 }
 0xd33   : > { %11699 = vrcp.f32 %v3722_v60  ;;  %v11327_v60 = vld [vmem:[#allocation9 + $0x1c8] ss:$12 sps:$4 sm:$0xff]  }
 0xd34   : > { %11701 = vrcp.f32 %v14388_v37 }
 0xd35   : > { %v4688_v22 = vpop.permute.xlu1 %4687  ;;  %11703 = vrcp.f32 %v7226_v19  ;;  %v11320_v19 = vld [vmem:[#allocation9 + $0x214] ss:$12 sps:$4 sm:$0xff]  }
 0xd36   : > { %4729 = vst.msk [vmem:[#allocation3 + $0x54] sm:$0xf] %vm4721_vm12, %v4688_v22  ;;  %v7238_v53 = vpop.xlane.xlu0 %7237  ;;  %8334 = vmatprep.subr.bf16.mxu0 %v11320_v19  ;;  %v11329_v22 = vld [vmem:[#allocation9 + $0x1cc] ss:$12 sps:$4 sm:$0xff]  }
 0xd37   : > { %11705 = vrcp.f32 %v7238_v53  ;;  %8335 = vmatpush1.bf16.msra.mxu0 %v11318_v49  ;;  %v11336_v53 = vld [vmem:[#allocation9 + $0x180] ss:$12 sps:$4 sm:$0xff]  }
 0xd38   : > { %8336 = vmatprep.subr.bf16.mxu0 %v11323_v13 }
 0xd3a   : > { %v7234_v54 = vpop.xlane.xlu0 %7233 }
 0xd3b   : > { %v11698_v55 = vpop.eup %11697  ;;  %11707 = vrcp.f32 %v7234_v54  ;;  %8337 = vmatpush1.bf16.msra.mxu0 %v11321_v18 }
 0xd3c   : > { %v3907_v11 = vmul.f32 %v11698_v55, %v15294_v12  ;;  %8338 = vmatprep.subr.bf16.mxu0 %v11326_v56  ;;  %v11330_v12 = vld [vmem:[#allocation9 + $0x1b0] ss:$12 sps:$4 sm:$0xff]  }
 0xd3e   : > { %v9754_v63 = vpack.c.bf16 %v3907_v11, %v3907_v11  ;;  %v11332_v11 = vld [vmem:[#allocation9 + $0x1b4] ss:$12 sps:$4 sm:$0xff]  }
 0xd3f   : > { %8339 = vmatpush1.bf16.msra.mxu0 %v11324_v39 }
 0xd40   : > { %v11700_v8 = vpop.eup %11699  ;;  %3988 = vst.msk [vmem:[#allocation3 + $0x9c] sm:$0xf] %vm3974_vm13, %v9754_v63  ;;  %8340 = vmatprep.subr.bf16.mxu0 %v11329_v22 }
 0xd41   : > { %v3908_v28 = vmul.f32 %v11700_v8, %v15295_v3  ;;  %v11702_v17 = vpop.eup %11701  ;;  %v11333_v8 = vld [vmem:[#allocation9 + $0x198] ss:$12 sps:$4 sm:$0xff]   ;;  %v11335_v3 = vld [vmem:[#allocation9 + $0x19c] ss:$12 sps:$4 sm:$0xff]  }
 0xd42   : > { %v11704_v5 = vpop.eup %11703 }
 0xd43   : > { %v9755_v16 = vpack.c.bf16 %v3908_v28, %v3908_v28  ;;  %8341 = vmatpush1.bf16.msra.mxu0 %v11327_v60  ;;  %v11338_v28 = vld [vmem:[#allocation9 + $0x184] ss:$12 sps:$4 sm:$0xff]  }
 0xd44   : > { %v11706_v27 = vpop.eup %11705  ;;  %8342 = vmatprep.subr.bf16.mxu0 %v11332_v11 }
 0xd45   : > { %3989 = vst.msk [vmem:[#allocation3 + $0xa8] sm:$0xf] %vm3974_vm13, %v9755_v16 }
 0xd47   : > { %8343 = vmatpush1.bf16.msra.mxu0 %v11330_v12 }
 0xd48   : > { %v11708_v40 = vpop.eup %11707  ;;  %8344 = vmatprep.subr.bf16.mxu0 %v11335_v3 }
 0xd4b   : > { %8345 = vmatpush1.bf16.msra.mxu0 %v11333_v8 }
 0xd4c   : > { %8346 = vmatprep.subr.bf16.mxu0 %v11338_v28 }
 0xd4f   : > { %8347 = vmatpush1.bf16.msra.mxu0 %v11336_v53 }
 0xd58   : > { %v10627_v24 = vpop.f32.mrf.mxu1 }
 0xd59   : > { %v7440_v14 = vmul.f32 %v11702_v17, %v10627_v24  ;;  %v14442_v17 = vld [vmem:[#allocation3 + $0x48] ss:$12 sps:$4 sm:$0xff]  }
 0xd5a   : > { %v7371_v20 = vpop.f32.mrf.mxu1 }
 0xd5b   : > { %v9827_v1 = vpack.c.bf16 %v7440_v14, %v7440_v14  ;;  %v7438_v62 = vmul.f32 %v11704_v5, %v7371_v20 }
 0xd5c   : > { %v14432_v37 = vpop.f32.mrf.mxu1 }
 0xd5d   : > { %7510 = vrot.lane.b32.xlu0 %v9827_v1, %s11927_s21  ;;  %v9825_v51 = vpack.c.bf16 %v7438_v62, %v7438_v62 }
 0xd5e   : > { %v14435_v4 = vpop.f32.mrf.mxu1 }
 0xd60   : > { %v10631_v42 = vpop.f32.mrf.mxu1 }
 0xd61   : > { %v7444_v23 = vmul.f32 %v11706_v27, %v10631_v42  ;;  %7506 = vrot.lane.b32.xlu0 %v9825_v51, %s11927_s21 }
 0xd62   : > { %v7387_v52 = vpop.f32.mrf.mxu1 }
 0xd63   : > { %v9831_v34 = vpack.c.bf16 %v7444_v23, %v7444_v23  ;;  %v7442_v10 = vmul.f32 %v11708_v40, %v7387_v52 }
 0xd65   : > { %7518 = vrot.lane.b32.xlu0 %v9831_v34, %s11927_s21  ;;  %v9829_v46 = vpack.c.bf16 %v7442_v10, %v7442_v10  ;;  %v10632_v34 = vpop.f32.mrf.mxu1 }
 0xd66   : > { %v7224_v57 = vpop.xlane.xlu1 %7223 }
 0xd67   : > { %11709 = vrcp.f32 %v7224_v57  ;;  %v7390_v39 = vpop.f32.mrf.mxu1 }
 0xd69   : > { %7514 = vrot.lane.b32.xlu0 %v9829_v46, %s11927_s21 }
 0xd6a   : > { %v7220_v55 = vpop.xlane.xlu1 %7219 }
 0xd6b   : > { %11711 = vrcp.f32 %v7220_v55 }
 0xd6e   : > { %v6101_v63 = vpop.permute.xlu1 %6100 }
 0xd6f   : > { %6141 = vst.msk [vmem:[#allocation3 + $0x58] sm:$0xf] %vm4721_vm12, %v6101_v63 }
 0xd74   : > { %v11710_v16 = vpop.eup %11709 }
 0xd75   : > { %v7437_v54 = vmul.f32 %v11710_v16, %v14428_v36  ;;  %v7246_v36 = vpop.xlane.xlu0 %7245 }
 0xd76   : > { %v14444_v24 = vld [vmem:[#allocation3 + $0x4c] ss:$12 sps:$4 sm:$0xff]  }
 0xd77   : > { %v9824_v14 = vpack.c.bf16 %v7437_v54, %v7437_v54  ;;  %8281 = vmatprep.mubr.bf16.mxu1 %v14444_v24 }
 0xd78   : > { %v11712_v25 = vpop.eup %11711  ;;  %8282 = vmatmul.mubr.bf16.gmra.mxu1 %v14442_v17 }
 0xd79   : > { %7504 = vrot.lane.b32.xlu1 %v9824_v14, %s11927_s21  ;;  %v7435_v5 = vmul.f32 %v11712_v25, %v14430_v15  ;;  %v7242_v61 = vpop.xlane.xlu0 %7241 }
 0xd7b   : > { %v9822_v20 = vpack.c.bf16 %v7435_v5, %v7435_v5 }
 0xd7d   : > { %7500 = vrot.lane.b32.xlu1 %v9822_v20, %s11927_s21 }
 0xd97   : > { %v7503_v1 = vpop.permute.xlu0 %7502 }
 0xd98   : > { %7548 = vst.msk [vmem:[#allocation3 + $0x20] sm:$0xf] %vm4721_vm12, %v7503_v1 }
 0xd9b   : > { %v7499_v62 = vpop.permute.xlu0 %7498 }
 0xd9c   : > { %7546 = vst.msk [vmem:[#allocation3 + $0x8] sm:$0xf] %vm4721_vm12, %v7499_v62 }
 0xd9f   : > { %v7232_v19 = vpop.xlane.xlu1 %7231 }
 0xda0   : > { %11713 = vrcp.f32 %v7232_v19 }
 0xda3   : > { %v7228_v49 = vpop.xlane.xlu1 %7227 }
 0xda4   : > { %11715 = vrcp.f32 %v7228_v49 }
 0xda7   : > { %v7240_v51 = vpop.xlane.xlu1 %7239 }
 0xda8   : > { %11717 = vrcp.f32 %v7240_v51 }
 0xdab   : > { %v7236_v27 = vpop.xlane.xlu1 %7235 }
 0xdac   : > { %11719 = vrcp.f32 %v7236_v27 }
 0xdad   : > { %v11714_v15 = vpop.eup %11713  ;;  %11721 = vrcp.f32 %v7246_v36 }
 0xdae   : > { %v7441_v42 = vmul.f32 %v11714_v15, %v14432_v37  ;;  %11723 = vrcp.f32 %v7242_v61  ;;  %v15296_v15 = vld [vmem:[#allocation90_spill] sm:$0xff] }
 0xdaf   : > { %v7248_v46 = vpop.xlane.xlu1 %7247 }
 0xdb0   : > { %v9828_v23 = vpack.c.bf16 %v7441_v42, %v7441_v42  ;;  %11725 = vrcp.f32 %v7248_v46  ;;  %v15297_v42 = vld [vmem:[#allocation89_spill] sm:$0xff] }
 0xdb1   : > { %v11716_v13 = vpop.eup %11715 }
 0xdb2   : > { %7512 = vrot.lane.b32.xlu1 %v9828_v23, %s11927_s21  ;;  %v7439_v40 = vmul.f32 %v11716_v13, %v14435_v4  ;;  %v11344_v4 = vld [vmem:[#allocation9 + $0x170] ss:$12 sps:$4 sm:$0xff]  }
 0xdb3   : > { %v7244_v22 = vpop.xlane.xlu1 %7243  ;;  %10141 = vmatprep.subr.bf16.mxu0 %v11344_v4  ;;  %v11345_v23 = vld [vmem:[#allocation9 + $0xb0] ss:$12 sps:$4 sm:$0xff]   ;;  %v11356_v4 = vld [vmem:[#allocation9 + $0xf8] ss:$12 sps:$4 sm:$0xff]  }
 0xdb4   : > { %v9826_v52 = vpack.c.bf16 %v7439_v40, %v7439_v40  ;;  %11727 = vrcp.f32 %v7244_v22  ;;  %v11346_v40 = vld [vmem:[#allocation9 + $0x158] ss:$12 sps:$4 sm:$0xff]   ;;  %v11355_v22 = vld [vmem:[#allocation9 + $0x50] ss:$12 sps:$4 sm:$0xff]  }
 0xdb5   : > { %v11718_v18 = vpop.eup %11717  ;;  %11729 = vrcp.f32 %v13986_v47  ;;  %v11349_v47 = vld [vmem:[#allocation9 + $0x140] ss:$12 sps:$4 sm:$0xff]  }
 0xdb6   : > { %7508 = vrot.lane.b32.xlu1 %v9826_v52, %s11927_s21  ;;  %v7445_v10 = vmul.f32 %v11718_v18, %v10632_v34  ;;  %11731 = vrcp.f32 %v14028_v59  ;;  %v11347_v52 = vld [vmem:[#allocation9 + $0x98] ss:$12 sps:$4 sm:$0xff]   ;;  %v15298_v18 = vld [vmem:[#allocation43_spill] sm:$0xff]  ;;  %v11363_v59 = vld [vmem:[#allocation9 + $0x230] ss:$12 sps:$4 sm:$0xff]  }
 0xdb7   : > { %11733 = vrcp.f32 %v14032_v44  ;;  %v11350_v34 = vld [vmem:[#allocation9 + $0x80] ss:$12 sps:$4 sm:$0xff]   ;;  %10637 = vmatprep.subr.bf16.mxu1 %v11363_v59 }
 0xdb8   : > { %v9832_v56 = vpack.c.bf16 %v7445_v10, %v7445_v10  ;;  %11735 = vrcp.f32 %v14040_v45  ;;  %v11351_v45 = vld [vmem:[#allocation9 + $0x128] ss:$12 sps:$4 sm:$0xff]   ;;  %10638 = vmatpush3.bf16.msra.mxu1 %v11363_v59 }
 0xdb9   : > { %v11720_v57 = vpop.eup %11719  ;;  %11737 = vrcp.f32 %v14001_v33  ;;  %v11352_v33 = vld [vmem:[#allocation9 + $0x68] ss:$12 sps:$4 sm:$0xff]  }
 0xdba   : > { %7520 = vrot.lane.b32.xlu1 %v9832_v56, %s11927_s21  ;;  %v7443_v60 = vmul.f32 %v11720_v57, %v7390_v39  ;;  %v11722_v55 = vpop.eup %11721  ;;  %11739 = vrcp.f32 %v14044_v32  ;;  %v11354_v56 = vld [vmem:[#allocation9 + $0x110] ss:$12 sps:$4 sm:$0xff]   ;;  %v11364_v57 = vld [vmem:[#allocation9 + $0x218] ss:$12 sps:$4 sm:$0xff]  }
 0xdbb   : > { %v11724_v63 = vpop.eup %11723  ;;  %11741 = vrcp.f32 %v14012_v30  ;;  %v15299_v39 = vld [vmem:[#allocation74_spill] sm:$0xff]  ;;  %v15300_v30 = vld [vmem:[#allocation72_spill] sm:$0xff]  ;;  %10639 = vmatprep.subr.bf16.mxu1 %v11364_v57 }
 0xdbc   : > { %v9830_v37 = vpack.c.bf16 %v7443_v60, %v7443_v60  ;;  %11743 = vrcp.f32 %v14050_v41  ;;  %10640 = vmatpush3.bf16.msra.mxu1 %v11364_v57  ;;  %v15308_v59 = vld [vmem:[#allocation116_spill] sm:$0xff] }
 0xdbd   : > { %v11726_v16 = vpop.eup %11725  ;;  %11745 = vrcp.f32 %v14018_v29 }
 0xdbe   : > { %7516 = vrot.lane.b32.xlu1 %v9830_v37, %s11927_s21  ;;  %11747 = vrcp.f32 %v14052_v48 }
 0xdbf   : > { %11749 = vrcp.f32 %v14026_v43  ;;  %v15303_v43 = vld [vmem:[#allocation117_spill] sm:$0xff] }
 0xdc0   : > { %11751 = vrcp.f32 %v14058_v26 }
 0xdc1   : > { %v11728_v25 = vpop.eup %11727  ;;  %11753 = vrcp.f32 %v14030_v38  ;;  %v15305_v38 = vld [vmem:[#allocation73_spill] sm:$0xff] }
 0xdc2   : > { %v11730_v10 = vpop.eup %11729  ;;  %11755 = vrcp.f32 %v14061_v58 }
 0xdc3   : > { %v11732_v32 = vpop.eup %11731  ;;  %v4618_v46 = vmul.f32 %v11730_v10, %v15299_v39  ;;  %11757 = vrcp.f32 %v14038_v9  ;;  %v15310_v39 = vld [vmem:[#allocation78_spill] sm:$0xff] }
 0xdc4   : > { %v11734_v60 = vpop.eup %11733  ;;  %v4617_v37 = vmul.f32 %v11732_v32, %v15300_v30  ;;  %11759 = vrcp.f32 %v14042_v35 }
 0xdc5   : > { %v11736_v41 = vpop.eup %11735 }
 0xdc6   : > { %v9765_v29 = vpack.c.bf16 %v4617_v37, %v4617_v37 }
 0xdca   : > { %v10635_v12 = vpop.f32.mrf.mxu1 }
 0xdcb   : > { %v7448_v11 = vmul.f32 %v11722_v55, %v10635_v12  ;;  %v9766_v55 = vpack.c.bf16 %v4618_v46, %v4618_v46  ;;  %v11738_v12 = vpop.eup %11737 }
 0xdcc   : > { %v7403_v8 = vpop.f32.mrf.mxu1 }
 0xdcd   : > { %v9835_v3 = vpack.c.bf16 %v7448_v11, %v7448_v11  ;;  %v7446_v28 = vmul.f32 %v11724_v63, %v7403_v8  ;;  %v15301_v11 = vld [vmem:[#allocation71_spill] sm:$0xff] }
 0xdce   : > { %v10636_v53 = vpop.f32.mrf.mxu1  ;;  %v4619_v63 = vmul.f32 %v11736_v41, %v15301_v11  ;;  %v15302_v8 = vld [vmem:[#allocation115_spill] sm:$0xff] }
 0xdcf   : > { %v7449_v54 = vmul.f32 %v11726_v16, %v10636_v53  ;;  %v7511_v14 = vpop.permute.xlu0 %7510  ;;  %7526 = vrot.lane.b32.xlu0 %v9835_v3, %s11927_s21  ;;  %v9833_v20 = vpack.c.bf16 %v7446_v28, %v7446_v28  ;;  %v6030_v48 = vmul.f32 %v11734_v60, %v15302_v8  ;;  %v11357_v3 = vld [vmem:[#allocation9 + $0x38] ss:$12 sps:$4 sm:$0xff]   ;;  %v11740_v28 = vpop.eup %11739  ;;  %v11359_v16 = vld [vmem:[#allocation9 + $0xe0] ss:$12 sps:$4 sm:$0xff]   ;;  %v11370_v60 = vld [vmem:[#allocation9 + $0x1d0] ss:$12 sps:$4 sm:$0xff]  }
 0xdd0   : > { %7552 = vst.msk [vmem:[#allocation3 + $0x50] sm:$0xf] %vm4721_vm12, %v7511_v14  ;;  %v7406_v5 = vpop.f32.mrf.mxu1  ;;  %v11365_v53 = vld [vmem:[#allocation9 + $0x200] ss:$12 sps:$4 sm:$0xff]   ;;  %v11742_v26 = vpop.eup %11741  ;;  %v9767_v14 = vpack.c.bf16 %v4619_v63, %v4619_v63  ;;  %v15313_v63 = vld [vmem:[#allocation77_spill] sm:$0xff] }
 0xdd1   : > { %v9836_v36 = vpack.c.bf16 %v7449_v54, %v7449_v54  ;;  %v7447_v61 = vmul.f32 %v11728_v25, %v7406_v5  ;;  %v6031_v54 = vmul.f32 %v11738_v12, %v15303_v43  ;;  %v9797_v25 = vpack.c.bf16 %v6030_v48, %v6030_v48  ;;  %v15304_v5 = vld [vmem:[#allocation114_spill] sm:$0xff]  ;;  %10641 = vmatprep.subr.bf16.mxu1 %v11365_v53 }
 0xdd2   : > { %10642 = vmatpush3.bf16.msra.mxu1 %v11365_v53  ;;  %v15314_v53 = vld [vmem:[#allocation120_spill] sm:$0xff] }
 0xdd3   : > { %v7507_v1 = vpop.permute.xlu0 %7506  ;;  %7522 = vrot.lane.b32.xlu0 %v9833_v20, %s11927_s21  ;;  %7528 = vrot.lane.b32.xlu1 %v9836_v36, %s11927_s21  ;;  %v9834_v62 = vpack.c.bf16 %v7447_v61, %v7447_v61  ;;  %v6032_v20 = vmul.f32 %v11740_v28, %v15304_v5  ;;  %v11360_v36 = vld [vmem:[#allocation9 + $0x20] ss:$12 sps:$4 sm:$0xff]   ;;  %v11744_v61 = vpop.eup %11743 }
 0xdd4   : > { %7550 = vst.msk [vmem:[#allocation3 + $0x38] sm:$0xf] %vm4721_vm12, %v7507_v1  ;;  %v11361_v1 = vld [vmem:[#allocation9 + $0xc8] ss:$12 sps:$4 sm:$0xff]  }
 0xdd5   : > { %v9799_v58 = vpack.c.bf16 %v6032_v20, %v6032_v20 }
 0xdd7   : > { %v7519_v19 = vpop.permute.xlu0 %7518  ;;  %7524 = vrot.lane.b32.xlu1 %v9834_v62, %s11927_s21  ;;  %v4620_v62 = vmul.f32 %v11742_v26, %v15305_v38 }
 0xdd8   : > { %7556 = vst.msk [vmem:[#allocation3 + $0x80] sm:$0xf] %vm4721_vm12, %v7519_v19  ;;  %v11746_v19 = vpop.eup %11745 }
 0xddb   : > { %v7515_v49 = vpop.permute.xlu0 %7514 }
 0xddc   : > { %7554 = vst.msk [vmem:[#allocation3 + $0x68] sm:$0xf] %vm4721_vm12, %v7515_v49  ;;  %v9798_v49 = vpack.c.bf16 %v6031_v54, %v6031_v54 }
 0xdeb   : > { %v7505_v51 = vpop.permute.xlu1 %7504 }
 0xdec   : > { %7549 = vst.msk [vmem:[#allocation3 + $0x2c] sm:$0xf] %vm4721_vm12, %v7505_v51  ;;  %v15306_v51 = vld [vmem:[#allocation76_spill] sm:$0xff] }
 0xdef   : > { %v7501_v27 = vpop.permute.xlu1 %7500 }
 0xdf0   : > { %7547 = vst.msk [vmem:[#allocation3 + $0x14] sm:$0xf] %vm4721_vm12, %v7501_v27  ;;  %v4621_v27 = vmul.f32 %v11744_v61, %v15306_v51 }
 0xdf2   : > { %5135 = vadd.xlane.f32.xlu0 %v15296_v15  ;;  %v11362_v15 = vld [vmem:[#allocation9 + $0x8] ss:$12 sps:$4 sm:$0xff]  }
 0xdf3   : > { %v14482_v44 = vld [vmem:[#allocation3 + $0x20] ss:$12 sps:$4 sm:$0xff]  }
 0xdf6   : > { %5137 = vadd.xlane.f32.xlu0 %v15297_v42  ;;  %v11748_v42 = vpop.eup %11747 }
 0xdf7   : > { %v14473_v13 = vld [vmem:[#allocation3 + $0x8] ss:$12 sps:$4 sm:$0xff]  }
 0xdf8   : > { %8365 = vmatmul.mubr.bf16.vlgmr.msra.gmra.mxu0 %v14473_v13 }
 0xdf9   : > { %8374 = vmatprep.mubr.bf16.mxu0 %v15223_v0  ;;  %10142 = vmatpush3.bf16.msra.mxu0 %v11345_v23  ;;  %v11366_v23 = vld [vmem:[#allocation9 + $0x1e8] ss:$12 sps:$4 sm:$0xff]  }
 0xdfa   : > { %10143 = vmatprep.subr.bf16.mxu0 %v11346_v40  ;;  %v9768_v40 = vpack.c.bf16 %v4620_v62, %v4620_v62  ;;  %10643 = vmatprep.subr.bf16.mxu1 %v11366_v23 }
 0xdfb   : > { %3723 = vadd.xlane.f32.xlu1 %v15298_v18  ;;  %v9769_v18 = vpack.c.bf16 %v4621_v27, %v4621_v27  ;;  %10644 = vmatpush3.bf16.msra.mxu1 %v11366_v23 }
 0xdfc   : > { %10645 = vmatprep.subr.bf16.mxu1 %v11370_v60 }
 0xdfd   : > { %10144 = vmatpush3.bf16.msra.mxu0 %v11347_v52  ;;  %v11750_v52 = vpop.eup %11749 }
 0xdfe   : > { %10145 = vmatprep.subr.bf16.mxu0 %v11349_v47  ;;  %v15307_v47 = vld [vmem:[#allocation119_spill] sm:$0xff]  ;;  %v4622_v35 = vmul.f32 %v11750_v52, %v15310_v39  ;;  %v15316_v52 = vld [vmem:[#allocation105_spill] sm:$0xff] }
 0xdff   : > { %v6034_v9 = vmul.f32 %v11748_v42, %v15307_v47  ;;  %10646 = vmatpush3.bf16.msra.mxu1 %v11370_v60 }
 0xe00   : > { %8375 = vmatmul.mubr.bf16.gmra.mxu0 %v14482_v44  ;;  %v9770_v37 = vpack.c.bf16 %v4622_v35, %v4622_v35 }
 0xe01   : > { %8384 = vmatprep.mubr.bf16.mxu0 %v15223_v0  ;;  %10146 = vmatpush3.bf16.msra.mxu0 %v11350_v34  ;;  %v6033_v34 = vmul.f32 %v11746_v19, %v15308_v59 }
 0xe02   : > { %10147 = vmatprep.subr.bf16.mxu0 %v11351_v45  ;;  %v11752_v45 = vpop.eup %11751 }
 0xe03   : > { %v11754_v10 = vpop.eup %11753  ;;  %v9800_v32 = vpack.c.bf16 %v6033_v34, %v6033_v34 }
 0xe04   : > { %v11756_v46 = vpop.eup %11755 }
 0xe05   : > { %10148 = vmatpush3.bf16.msra.mxu0 %v11352_v33  ;;  %v9801_v33 = vpack.c.bf16 %v6034_v9, %v6034_v9  ;;  %v11758_v12 = vpop.eup %11757 }
 0xe06   : > { %10149 = vmatprep.subr.bf16.mxu0 %v11354_v56  ;;  %v15309_v56 = vld [vmem:[#allocation75_spill] sm:$0xff]  ;;  %v4624_v8 = vmul.f32 %v11758_v12, %v15313_v63  ;;  %v11760_v48 = vpop.eup %11759 }
 0xe07   : > { %v4623_v57 = vmul.f32 %v11752_v45, %v15309_v56  ;;  %v6037_v43 = vmul.f32 %v11760_v48, %v15314_v53 }
 0xe09   : > { %10150 = vmatpush3.bf16.msra.mxu0 %v11355_v22  ;;  %v9771_v30 = vpack.c.bf16 %v4623_v57, %v4623_v57  ;;  %v15311_v22 = vld [vmem:[#allocation118_spill] sm:$0xff]  ;;  %v9804_v26 = vpack.c.bf16 %v6037_v43, %v6037_v43 }
 0xe0a   : > { %10151 = vmatprep.subr.bf16.mxu0 %v11356_v4  ;;  %v6036_v41 = vmul.f32 %v11756_v46, %v15311_v22  ;;  %v15312_v4 = vld [vmem:[#allocation121_spill] sm:$0xff]  ;;  %v14594_v43 = vld [vmem:[%s14858_s3] sm:$0x7] }
 0xe0c   : > { %4689 = vrot.lane.b32.xlu0 %v9765_v29, %s11927_s21  ;;  %4691 = vrot.lane.b32.xlu1 %v9766_v55, %s11927_s21  ;;  %v6035_v55 = vmul.f32 %v11754_v10, %v15312_v4  ;;  %v9803_v29 = vpack.c.bf16 %v6036_v41, %v6036_v41  ;;  %v15317_v10 = vld [vmem:[#allocation59_spill] sm:$0xff] }
 0xe0d   : > { %10152 = vmatpush3.bf16.msra.mxu0 %v11357_v3  ;;  %v11374_v3 = vld [vmem:[#allocation9 + $0x1b8] ss:$12 sps:$4 sm:$0xff]  }
 0xe0e   : > { %10153 = vmatprep.subr.bf16.mxu0 %v11359_v16  ;;  %v9802_v11 = vpack.c.bf16 %v6035_v55, %v6035_v55  ;;  %10647 = vmatprep.subr.bf16.mxu1 %v11374_v3  ;;  %v9772_v16 = vpack.c.bf16 %v4624_v8, %v4624_v8  ;;  %v8253_v55 = vpop.f32.mrf.mxu1 }
 0xe0f   : > { %10648 = vmatpush3.bf16.msra.mxu1 %v11374_v3 }
 0xe10   : > { %4693 = vrot.lane.b32.xlu0 %v9767_v14, %s11927_s21  ;;  %6102 = vrot.lane.b32.xlu1 %v9797_v25, %s11927_s21  ;;  %v11378_v14 = vld [vmem:[#allocation9 + $0x1a0] ss:$12 sps:$4 sm:$0xff]   ;;  %v8255_v63 = vpop.f32.mrf.mxu1 }
 0xe11   : > { %10154 = vmatpush3.bf16.msra.mxu0 %v11360_v36  ;;  %10649 = vmatprep.subr.bf16.mxu1 %v11378_v14  ;;  %v11382_v36 = vld [vmem:[#allocation9 + $0x188] ss:$12 sps:$4 sm:$0xff]  }
 0xe12   : > { %10155 = vmatprep.subr.bf16.mxu0 %v11361_v1  ;;  %v8257_v8 = vpop.f32.mrf.mxu1 }
 0xe13   : > { %10650 = vmatpush3.bf16.msra.mxu1 %v11378_v14 }
 0xe14   : > { %6106 = vrot.lane.b32.xlu0 %v9799_v58, %s11927_s21  ;;  %6104 = vrot.lane.b32.xlu1 %v9798_v49, %s11927_s21 }
 0xe15   : > { %10156 = vmatpush3.bf16.msra.mxu0 %v11362_v15  ;;  %10651 = vmatprep.subr.bf16.mxu1 %v11382_v36 }
 0xe17   : > { %10652 = vmatpush3.bf16.msra.mxu1 %v11382_v36 }
 0xe18   : > { %4697 = vrot.lane.b32.xlu0 %v9769_v18, %s11927_s21  ;;  %4695 = vrot.lane.b32.xlu1 %v9768_v40, %s11927_s21 }
 0xe1c   : > { %6110 = vrot.lane.b32.xlu0 %v9801_v33, %s11927_s21  ;;  %6108 = vrot.lane.b32.xlu1 %v9800_v32, %s11927_s21 }
 0xe20   : > { %4701 = vrot.lane.b32.xlu0 %v9771_v30, %s11927_s21  ;;  %4699 = vrot.lane.b32.xlu1 %v9770_v37, %s11927_s21 }
 0xe24   : > { %6114 = vrot.lane.b32.xlu0 %v9803_v29, %s11927_s21  ;;  %6112 = vrot.lane.b32.xlu1 %v9802_v11, %s11927_s21  ;;  %v7513_v28 = vpop.permute.xlu1 %7512 }
 0xe25   : > { %7553 = vst.msk [vmem:[#allocation3 + $0x5c] sm:$0xf] %vm4721_vm12, %v7513_v28  ;;  %v15318_v28 = vld [vmem:[#allocation14_spill] sm:$0xff] }
 0xe26   : > { %v7698_v53 = vsub.s32 1, %v15318_v28 }
 0xe28   : > { %4703 = vrot.lane.b32.xlu1 %v9772_v16, %s11927_s21  ;;  %v7509_v54 = vpop.permute.xlu1 %7508  ;;  %v7694_v16 = vsub.s32 0, %v15318_v28  ;;  %v14601_v14 = vrot.slane %v14594_v43, %v7698_v53 }
 0xe29   : > { %7551 = vst.msk [vmem:[#allocation3 + $0x44] sm:$0xf] %vm4721_vm12, %v7509_v54  ;;  %v8259_v54 = vpop.f32.mrf.mxu1 }
 0xe2c   : > { %6116 = vrot.lane.b32.xlu1 %v9804_v26, %s11927_s21  ;;  %v7521_v25 = vpop.permute.xlu1 %7520  ;;  %v14536_v61 = vld [vmem:[#allocation3 + $0x50] ss:$12 sps:$4 sm:$0xff]   ;;  %v14598_v26 = vrot.slane %v14594_v43, %v7694_v16 }
 0xe2d   : > { %7557 = vst.msk [vmem:[#allocation3 + $0x8c] sm:$0xf] %vm4721_vm12, %v7521_v25  ;;  %v8263_v25 = vpop.f32.mrf.mxu1 }
 0xe2e   : > { %v8254_v36 = vadd.f32 %v8253_v55, %v14598_v26 }
 0xe30   : > { %v7517_v5 = vpop.permute.xlu1 %7516  ;;  %v14531_v20 = vld [vmem:[#allocation3 + $0x38] ss:$12 sps:$4 sm:$0xff]  }
 0xe31   : > { %7555 = vst.msk [vmem:[#allocation3 + $0x74] sm:$0xf] %vm4721_vm12, %v7517_v5  ;;  %8385 = vmatmul.mubr.bf16.gmra.mxu0 %v14531_v20 }
 0xe32   : > { %8394 = vmatprep.mubr.bf16.mxu0 %v15223_v0 }
 0xe34   : > { %v14547_v58 = vld [vmem:[#allocation3 + $0x80] ss:$12 sps:$4 sm:$0xff]  }
 0xe38   : > { %v14540_v1 = vld [vmem:[#allocation3 + $0x68] ss:$12 sps:$4 sm:$0xff]  }
 0xe39   : > { %8395 = vmatmul.mubr.bf16.gmra.mxu0 %v14536_v61 }
 0xe3a   : > { %8404 = vmatprep.mubr.bf16.mxu0 %v15223_v0 }
 0xe41   : > { %v7527_v38 = vpop.permute.xlu0 %7526  ;;  %8405 = vmatmul.mubr.bf16.gmra.mxu0 %v14540_v1 }
 0xe42   : > { %7560 = vst.msk [vmem:[#allocation3 + $0xb0] sm:$0xf] %vm4721_vm12, %v7527_v38  ;;  %8414 = vmatprep.mubr.bf16.mxu0 %v15223_v0  ;;  %v8256_v38 = vadd.f32 %v8255_v63, %v14601_v14 }
 0xe45   : > { %v7523_v62 = vpop.permute.xlu0 %7522  ;;  %v7529_v19 = vpop.permute.xlu1 %7528 }
 0xe46   : > { %7558 = vst.msk [vmem:[#allocation3 + $0x98] sm:$0xf] %vm4721_vm12, %v7523_v62  ;;  %7561 = vst.msk [vmem:[#allocation3 + $0xbc] sm:$0xf] %vm4721_vm12, %v7529_v19  ;;  %v8265_v62 = vpop.f32.mrf.mxu1 }
 0xe49   : > { %v7525_v49 = vpop.permute.xlu1 %7524  ;;  %8415 = vmatmul.mubr.bf16.gmra.mxu0 %v14547_v58 }
 0xe4a   : > { %7559 = vst.msk [vmem:[#allocation3 + $0xa4] sm:$0xf] %vm4721_vm12, %v7525_v49  ;;  %8424 = vmatprep.mubr.bf16.mxu0 %v15223_v0 }
 0xe4d   : > { %v14556_v27 = vld [vmem:[#allocation3 + $0xb0] ss:$12 sps:$4 sm:$0xff]  }
 0xe51   : > { %v14552_v51 = vld [vmem:[#allocation3 + $0x98] ss:$12 sps:$4 sm:$0xff]  }
 0xe52   : > { %8425 = vmatmul.mubr.bf16.gmra.mxu0 %v14552_v51 }
 0xe53   : > { %8434 = vmatprep.mubr.bf16.mxu0 %v15223_v0 }
 0xe5a   : > { %8435 = vmatmul.mubr.bf16.gmra.mxu0 %v14556_v27 }
 0xe5b   : > { %8477 = vmatprep.mubr.bf16.mxu0 %v14397_v21 }
 0xe62   : > { %8478 = vmatmul.mubr.bf16.vlgmr.msra.gmra.mxu0 %v14400_v50 }
 0xe63   : > { %8485 = vmatprep.mubr.bf16.mxu0 %v14402_v7 }
 0xe6a   : > { %8486 = vmatmul.mubr.bf16.gmra.mxu0 %v14407_v2 }
 0xe6b   : > { %8493 = vmatprep.mubr.bf16.mxu0 %v14409_v31  ;;  %v15315_v31 = vld [vmem:[#allocation103_spill] sm:$0xff] }
 0xe72   : > { %8494 = vmatmul.mubr.bf16.gmra.mxu0 %v14415_v6 }
 0xe73   : > { %8501 = vmatprep.mubr.bf16.mxu0 %v14444_v24 }
 0xe7a   : > { %8502 = vmatmul.mubr.bf16.gmra.mxu0 %v14442_v17 }
 0xe7b   : > { %v5136_v15 = vpop.xlane.xlu0 %5135 }
 0xe7c   : > { %11761 = vrcp.f32 %v5136_v15 }
 0xe7f   : > { %v5138_v0 = vpop.xlane.xlu0 %5137 }
 0xe80   : > { %11763 = vrcp.f32 %v5138_v0  ;;  %v8258_v0 = vadd.f32 %v8257_v8, %v14598_v26 }
 0xe83   : > { %v4690_v42 = vpop.permute.xlu0 %4689 }
 0xe84   : > { %4730 = vst.msk [vmem:[#allocation3 + $0x60] sm:$0xf] %vm4721_vm12, %v4690_v42  ;;  %v3724_v21 = vpop.xlane.xlu1 %3723  ;;  %v8260_v42 = vadd.f32 %v8259_v54, %v14601_v14 }
 0xe85   : > { %11765 = vrcp.f32 %v3724_v21 }
 0xe87   : > { %v4694_v50 = vpop.permute.xlu0 %4693 }
 0xe88   : > { %4732 = vst.msk [vmem:[#allocation3 + $0x78] sm:$0xf] %vm4721_vm12, %v4694_v50  ;;  %v4692_v7 = vpop.permute.xlu1 %4691  ;;  %v8267_v50 = vpop.f32.mrf.mxu1 }
 0xe89   : > { %v11762_v2 = vpop.eup %11761  ;;  %4731 = vst.msk [vmem:[#allocation3 + $0x6c] sm:$0xf] %vm4721_vm12, %v4692_v7 }
 0xe8a   : > { %v5322_v6 = vmul.f32 %v11762_v2, %v15315_v31 }
 0xe8b   : > { %v6107_v24 = vpop.permute.xlu0 %6106 }
 0xe8c   : > { %6144 = vst.msk [vmem:[#allocation3 + $0x7c] sm:$0xf] %vm4721_vm12, %v6107_v24  ;;  %v6103_v17 = vpop.permute.xlu1 %6102  ;;  %v9787_v23 = vpack.c.bf16 %v5322_v6, %v5322_v6  ;;  %v8264_v6 = vadd.f32 %v8263_v25, %v14598_v26 }
 0xe8d   : > { %v11764_v40 = vpop.eup %11763  ;;  %6142 = vst.msk [vmem:[#allocation3 + $0x64] sm:$0xf] %vm4721_vm12, %v6103_v17  ;;  %v8269_v17 = vpop.f32.mrf.mxu1 }
 0xe8e   : > { %5402 = vst.msk [vmem:[#allocation3 + $0xac] sm:$0xf] %vm3974_vm13, %v9787_v23  ;;  %v5323_v18 = vmul.f32 %v11764_v40, %v15316_v52 }
 0xe8f   : > { %v4698_v47 = vpop.permute.xlu0 %4697 }
 0xe90   : > { %4734 = vst.msk [vmem:[#allocation3 + $0x90] sm:$0xf] %vm4721_vm12, %v4698_v47  ;;  %v6105_v9 = vpop.permute.xlu1 %6104  ;;  %v9788_v59 = vpack.c.bf16 %v5323_v18, %v5323_v18  ;;  %v11367_v35 = vld [vmem:[#allocation3 + $0x60] ss:$12 sps:$4 sm:$0xff]   ;;  %v8268_v47 = vadd.f32 %v8267_v50, %v14598_v26 }
 0xe91   : > { %6143 = vst.msk [vmem:[#allocation3 + $0x70] sm:$0xf] %vm4721_vm12, %v6105_v9  ;;  %v8270_v9 = vadd.f32 %v8269_v17, %v14601_v14 }
 0xe92   : > { %v11766_v34 = vpop.eup %11765  ;;  %5403 = vst.msk [vmem:[#allocation3 + $0xb8] sm:$0xf] %vm3974_vm13, %v9788_v59 }
 0xe93   : > { %v6111_v45 = vpop.permute.xlu0 %6110  ;;  %v3909_v33 = vmul.f32 %v11766_v34, %v15317_v10 }
 0xe94   : > { %6146 = vst.msk [vmem:[#allocation3 + $0x94] sm:$0xf] %vm4721_vm12, %v6111_v45  ;;  %v4696_v32 = vpop.permute.xlu1 %4695 }
 0xe95   : > { %4733 = vst.msk [vmem:[#allocation3 + $0x84] sm:$0xf] %vm4721_vm12, %v4696_v32  ;;  %v9756_v56 = vpack.c.bf16 %v3909_v33, %v3909_v33 }
 0xe97   : > { %v4702_v57 = vpop.permute.xlu0 %4701  ;;  %3990 = vst.msk [vmem:[#allocation3 + $0xb4] sm:$0xf] %vm3974_vm13, %v9756_v56 }
 0xe98   : > { %4736 = vst.msk [vmem:[#allocation3 + $0xa8] sm:$0xf] %vm4721_vm12, %v4702_v57  ;;  %v6109_v39 = vpop.permute.xlu1 %6108  ;;  %v11369_v46 = vld [vmem:[#allocation3 + $0x64] ss:$12 sps:$4 sm:$0xff]  }
 0xe99   : > { %6145 = vst.msk [vmem:[#allocation3 + $0x88] sm:$0xf] %vm4721_vm12, %v6109_v39  ;;  %8291 = vmatprep.mubr.bf16.mxu1 %v11369_v46  ;;  %8509 = vmatprep.mubr.bf16.mxu0 %v11369_v46 }
 0xe9a   : > { %8292 = vmatmul.mubr.bf16.gmra.mxu1 %v11367_v35  ;;  %8510 = vmatmul.mubr.bf16.gmra.mxu0 %v11367_v35 }
 0xe9b   : > { %v6115_v60 = vpop.permute.xlu0 %6114 }
 0xe9c   : > { %6148 = vst.msk [vmem:[#allocation3 + $0xac] sm:$0xf] %vm4721_vm12, %v6115_v60  ;;  %v4700_v30 = vpop.permute.xlu1 %4699  ;;  %v11371_v22 = vld [vmem:[#allocation3 + $0x78] ss:$12 sps:$4 sm:$0xff]  }
 0xe9d   : > { %4735 = vst.msk [vmem:[#allocation3 + $0x9c] sm:$0xf] %vm4721_vm12, %v4700_v30 }
 0xea0   : > { %v6113_v37 = vpop.permute.xlu1 %6112  ;;  %v11373_v41 = vld [vmem:[#allocation3 + $0x7c] ss:$12 sps:$4 sm:$0xff]  }
 0xea1   : > { %6147 = vst.msk [vmem:[#allocation3 + $0xa0] sm:$0xf] %vm4721_vm12, %v6113_v37  ;;  %8301 = vmatprep.mubr.bf16.mxu1 %v11373_v41  ;;  %8517 = vmatprep.mubr.bf16.mxu0 %v11373_v41 }
 0xea2   : > { %8302 = vmatmul.mubr.bf16.gmra.mxu1 %v11371_v22  ;;  %8518 = vmatmul.mubr.bf16.gmra.mxu0 %v11371_v22 }
 0xea4   : > { %v4704_v4 = vpop.permute.xlu1 %4703  ;;  %v11375_v29 = vld [vmem:[#allocation3 + $0x90] ss:$12 sps:$4 sm:$0xff]  }
 0xea5   : > { %4737 = vst.msk [vmem:[#allocation3 + $0xb4] sm:$0xf] %vm4721_vm12, %v4704_v4 }
 0xea8   : > { %v6117_v12 = vpop.permute.xlu1 %6116  ;;  %v11377_v11 = vld [vmem:[#allocation3 + $0x94] ss:$12 sps:$4 sm:$0xff]  }
 0xea9   : > { %6149 = vst.msk [vmem:[#allocation3 + $0xb8] sm:$0xf] %vm4721_vm12, %v6117_v12  ;;  %8311 = vmatprep.mubr.bf16.mxu1 %v11377_v11  ;;  %8525 = vmatprep.mubr.bf16.mxu0 %v11377_v11 }
 0xeaa   : > { %8312 = vmatmul.mubr.bf16.gmra.mxu1 %v11375_v29  ;;  %8526 = vmatmul.mubr.bf16.gmra.mxu0 %v11375_v29 }
 0xeac   : > { %v11379_v48 = vld [vmem:[#allocation3 + $0xa8] ss:$12 sps:$4 sm:$0xff]  }
 0xeb0   : > { %v11381_v3 = vld [vmem:[#allocation3 + $0xac] ss:$12 sps:$4 sm:$0xff]  }
 0xeb1   : > { %8321 = vmatprep.mubr.bf16.mxu1 %v11381_v3  ;;  %8533 = vmatprep.mubr.bf16.mxu0 %v11381_v3 }
 0xeb2   : > { %8322 = vmatmul.mubr.bf16.gmra.mxu1 %v11379_v48  ;;  %8534 = vmatmul.mubr.bf16.gmra.mxu0 %v11379_v48 }
 0xeb3   : > { %10653 = vmatprep.mubr.bf16.mxu1 %v14473_v13 }
 0xeb8   : > { %v8366_v5 = vpop.f32.mrf.mxu0 }
 0xeb9   : > { %v8367_v49 = vadd.f32 %v8366_v5, %v8254_v36 }
 0xeba   : > { %v8368_v19 = vpop.f32.mrf.mxu0  ;;  %10654 = vmatmul.mubr.bf16.vlgmr.msra.gmra.mxu1 %v14482_v44 }
 0xebb   : > { %v8369_v15 = vadd.f32 %v8368_v19, %v8256_v38  ;;  %10657 = vmatprep.mubr.bf16.mxu1 %v14531_v20  ;;  %v8266_v20 = vadd.f32 %v8265_v62, %v14601_v14 }
 0xebc   : > { %v8370_v13 = vpop.f32.mrf.mxu0 }
 0xebd   : > { %v9837_v21 = vpack.c.bf16 %v8369_v15, %v8367_v49  ;;  %v8371_v2 = vadd.f32 %v8370_v13, %v8258_v0 }
 0xebe   : > { %v8372_v7 = vpop.f32.mrf.mxu0 }
 0xebf   : > { %8799 = vst [vmem:[%s14610_s8] sm:$0xff] %v9837_v21  ;;  %v8373_v31 = vadd.f32 %v8372_v7, %v8260_v42 }
 0xec0   : > { %v8376_v44 = vpop.f32.mrf.mxu0 }
 0xec1   : > { %v9839_v24 = vpack.c.bf16 %v8373_v31, %v8371_v2  ;;  %v8377_v40 = vadd.f32 %v8376_v44, %v8264_v6 }
 0xec2   : > { %v8378_v23 = vpop.f32.mrf.mxu0  ;;  %10658 = vmatmul.mubr.bf16.gmra.mxu1 %v14536_v61  ;;  %v8273_v61 = vpop.f32.mrf.mxu1 }
 0xec3   : > { %8801 = vst [vmem:[%s14610_s8 + $0xc] sm:$0xff] %v9839_v24  ;;  %v8379_v52 = vadd.f32 %v8378_v23, %v8266_v20  ;;  %10661 = vmatprep.mubr.bf16.mxu1 %v14540_v1  ;;  %v8274_v35 = vadd.f32 %v8273_v61, %v14598_v26 }
 0xec4   : > { %v8380_v18 = vpop.f32.mrf.mxu0  ;;  %v8275_v1 = vpop.f32.mrf.mxu1 }
 0xec5   : > { %v9841_v59 = vpack.c.bf16 %v8379_v52, %v8377_v40  ;;  %v8381_v45 = vadd.f32 %v8380_v18, %v8268_v47  ;;  %v8276_v46 = vadd.f32 %v8275_v1, %v14601_v14 }
 0xec6   : > { %v8382_v34 = vpop.f32.mrf.mxu0  ;;  %v8277_v32 = vpop.f32.mrf.mxu1 }
 0xec7   : > { %8803 = vst [vmem:[%s14610_s8 + $0x18] sm:$0xff] %v9841_v59  ;;  %v8383_v10 = vadd.f32 %v8382_v34, %v8270_v9 }
 0xec8   : > { %v8279_v56 = vpop.f32.mrf.mxu1 }
 0xec9   : > { %v9843_v33 = vpack.c.bf16 %v8383_v10, %v8381_v45 }
 0xeca   : > { %10662 = vmatmul.mubr.bf16.gmra.mxu1 %v14547_v58  ;;  %v8283_v57 = vpop.f32.mrf.mxu1 }
 0xecb   : > { %8805 = vst [vmem:[%s14610_s8 + $0x24] sm:$0xff] %v9843_v33  ;;  %10665 = vmatprep.mubr.bf16.mxu1 %v14552_v51  ;;  %v8278_v51 = vadd.f32 %v8277_v32, %v14598_v26  ;;  %v8284_v63 = vadd.f32 %v8283_v57, %v14598_v26 }
 0xecc   : > { %v8285_v60 = vpop.f32.mrf.mxu1 }
 0xecd   : > { %v8286_v8 = vadd.f32 %v8285_v60, %v14601_v14 }
 0xece   : > { %v8287_v4 = vpop.f32.mrf.mxu1 }
 0xecf   : > { %v8288_v5 = vadd.f32 %v8287_v4, %v14598_v26 }
 0xed0   : > { %v8289_v3 = vpop.f32.mrf.mxu1 }
 0xed1   : > { %v8290_v36 = vadd.f32 %v8289_v3, %v14601_v14 }
 0xed2   : > { %10666 = vmatmul.mubr.bf16.gmra.mxu1 %v14556_v27  ;;  %v8280_v27 = vadd.f32 %v8279_v56, %v14601_v14 }
 0xef1   : > { %v8386_v39 = vpop.f32.mrf.mxu0 }
 0xef2   : > { %v8387_v37 = vadd.f32 %v8386_v39, %v8274_v35 }
 0xef3   : > { %v8388_v30 = vpop.f32.mrf.mxu0 }
 0xef4   : > { %v8389_v58 = vadd.f32 %v8388_v30, %v8276_v46 }
 0xef5   : > { %v8390_v22 = vpop.f32.mrf.mxu0 }
 0xef6   : > { %v9845_v41 = vpack.c.bf16 %v8389_v58, %v8387_v37  ;;  %v8391_v12 = vadd.f32 %v8390_v22, %v8278_v51 }
 0xef7   : > { %v8392_v55 = vpop.f32.mrf.mxu0 }
 0xef8   : > { %8807 = vst [vmem:[%s14610_s8 + $0x30] sm:$0xff] %v9845_v41  ;;  %v8393_v29 = vadd.f32 %v8392_v55, %v8280_v27 }
 0xef9   : > { %v8396_v11 = vpop.f32.mrf.mxu0 }
 0xefa   : > { %v9847_v48 = vpack.c.bf16 %v8393_v29, %v8391_v12  ;;  %v8397_v53 = vadd.f32 %v8396_v11, %v8284_v63 }
 0xefb   : > { %v8398_v16 = vpop.f32.mrf.mxu0 }
 0xefc   : > { %8809 = vst [vmem:[%s14610_s8 + $0x3c] sm:$0xff] %v9847_v48  ;;  %v8399_v54 = vadd.f32 %v8398_v16, %v8286_v8 }
 0xefd   : > { %v8400_v25 = vpop.f32.mrf.mxu0 }
 0xefe   : > { %v9849_v38 = vpack.c.bf16 %v8399_v54, %v8397_v53  ;;  %v8401_v19 = vadd.f32 %v8400_v25, %v8288_v5 }
 0xeff   : > { %v8402_v62 = vpop.f32.mrf.mxu0 }
 0xf00   : > { %8811 = vst [vmem:[%s14610_s8 + $0x48] sm:$0xff] %v9849_v38  ;;  %v8403_v49 = vadd.f32 %v8402_v62, %v8290_v36 }
 0xf01   : > { %v8406_v15 = vpop.f32.mrf.mxu0 }
 0xf02   : > { %v9851_v13 = vpack.c.bf16 %v8403_v49, %v8401_v19 }
 0xf03   : > { %v8408_v0 = vpop.f32.mrf.mxu0 }
 0xf04   : > { %8813 = vst [vmem:[%s14610_s8 + $0x54] sm:$0xff] %v9851_v13 }
 0xf05   : > { %v8410_v42 = vpop.f32.mrf.mxu0 }
 0xf07   : > { %v8412_v21 = vpop.f32.mrf.mxu0 }
 0xf09   : > { %v8416_v50 = vpop.f32.mrf.mxu0 }
 0xf0b   : > { %v8418_v7 = vpop.f32.mrf.mxu0 }
 0xf0d   : > { %v8420_v2 = vpop.f32.mrf.mxu0 }
 0xf0f   : > { %v8422_v31 = vpop.f32.mrf.mxu0 }
 0xf12   : > { %v14637_v44 = vpop.f32.mrf.mxu0 }
 0xf14   : > { %v14639_v6 = vpop.f32.mrf.mxu0 }
 0xf16   : > { %v14641_v20 = vpop.f32.mrf.mxu0 }
 0xf18   : > { %v14643_v24 = vpop.f32.mrf.mxu0 }
 0xf1a   : > { %v14645_v17 = vpop.f32.mrf.mxu0 }
 0xf1c   : > { %v14647_v23 = vpop.f32.mrf.mxu0 }
 0xf1e   : > { %v14649_v40 = vpop.f32.mrf.mxu0 }
 0xf20   : > { %v14651_v52 = vpop.f32.mrf.mxu0 }
 0xf22   : > { %v14653_v18 = vpop.f32.mrf.mxu0 }
 0xf24   : > { %v14655_v47 = vpop.f32.mrf.mxu0 }
 0xf26   : > { %v14657_v9 = vpop.f32.mrf.mxu0 }
 0xf28   : > { %v14659_v59 = vpop.f32.mrf.mxu0 }
 0xf2a   : > { %v14661_v34 = vpop.f32.mrf.mxu0 }
 0xf2c   : > { %v14663_v45 = vpop.f32.mrf.mxu0 }
 0xf2e   : > { %v14665_v10 = vpop.f32.mrf.mxu0 }
 0xf30   : > { %v14667_v33 = vpop.f32.mrf.mxu0 }
 0xf32   : > { %v14669_v61 = vpop.f32.mrf.mxu0 }
 0xf34   : > { %v14671_v1 = vpop.f32.mrf.mxu0 }
 0xf36   : > { %v14673_v32 = vpop.f32.mrf.mxu0 }
 0xf38   : > { %v14675_v56 = vpop.f32.mrf.mxu0 }
 0xf3a   : > { %v14677_v57 = vpop.f32.mrf.mxu0 }
 0xf3c   : > { %v14679_v39 = vpop.f32.mrf.mxu0 }
 0xf3e   : > { %v14681_v35 = vpop.f32.mrf.mxu0 }
 0xf40   : > { %v14683_v46 = vpop.f32.mrf.mxu0 }
 0xf5a   : > { %v8293_v60 = vpop.f32.mrf.mxu1  ;;  %v14685_v30 = vpop.f32.mrf.mxu0 }
 0xf5b   : > { %v8294_v37 = vadd.f32 %v8293_v60, %v14598_v26 }
 0xf5c   : > { %v8295_v58 = vpop.f32.mrf.mxu1  ;;  %v14688_v22 = vpop.f32.mrf.mxu0 }
 0xf5d   : > { %v8296_v51 = vadd.f32 %v8295_v58, %v14601_v14  ;;  %v8407_v4 = vadd.f32 %v8406_v15, %v8294_v37 }
 0xf5e   : > { %v8297_v27 = vpop.f32.mrf.mxu1  ;;  %v14691_v41 = vpop.f32.mrf.mxu0 }
 0xf5f   : > { %v8409_v55 = vadd.f32 %v8408_v0, %v8296_v51  ;;  %v8298_v12 = vadd.f32 %v8297_v27, %v14598_v26 }
 0xf60   : > { %v8299_v29 = vpop.f32.mrf.mxu1  ;;  %v14694_v11 = vpop.f32.mrf.mxu0 }
 0xf61   : > { %v9853_v63 = vpack.c.bf16 %v8409_v55, %v8407_v4  ;;  %v8300_v8 = vadd.f32 %v8299_v29, %v14601_v14  ;;  %v8411_v16 = vadd.f32 %v8410_v42, %v8298_v12 }
 0xf62   : > { %v8303_v48 = vpop.f32.mrf.mxu1  ;;  %v14697_v3 = vpop.f32.mrf.mxu0 }
 0xf63   : > { %8815 = vst [vmem:[%s14610_s8 + $0x60] sm:$0xff] %v9853_v63  ;;  %v8413_v53 = vadd.f32 %v8412_v21, %v8300_v8  ;;  %v8304_v54 = vadd.f32 %v8303_v48, %v14598_v26 }
 0xf64   : > { %v8305_v25 = vpop.f32.mrf.mxu1  ;;  %v14702_v38 = vpop.f32.mrf.mxu0 }
 0xf65   : > { %v9855_v5 = vpack.c.bf16 %v8413_v53, %v8411_v16  ;;  %v8306_v36 = vadd.f32 %v8305_v25, %v14601_v14  ;;  %v8417_v19 = vadd.f32 %v8416_v50, %v8304_v54  ;;  %v7702_v53 = vsub.s32 2, %v15318_v28 }
 0xf66   : > { %v8307_v62 = vpop.f32.mrf.mxu1  ;;  %v14707_v21 = vpop.f32.mrf.mxu0 }
 0xf67   : > { %8817 = vst [vmem:[%s14610_s8 + $0x6c] sm:$0xff] %v9855_v5  ;;  %v8419_v49 = vadd.f32 %v8418_v7, %v8306_v36  ;;  %v8308_v15 = vadd.f32 %v8307_v62, %v14598_v26  ;;  %v10165_v5 = vadd.f32 %v14663_v45, %v14661_v34  ;;  %v10168_v45 = vadd.f32 %v14667_v33, %v14665_v10 }
 0xf68   : > { %v8309_v13 = vpop.f32.mrf.mxu1  ;;  %v14712_v7 = vpop.f32.mrf.mxu0 }
 0xf69   : > { %v9857_v0 = vpack.c.bf16 %v8419_v49, %v8417_v19  ;;  %v8310_v42 = vadd.f32 %v8309_v13, %v14601_v14  ;;  %v8421_v37 = vadd.f32 %v8420_v2, %v8308_v15  ;;  %v10159_v19 = vadd.f32 %v14655_v47, %v14653_v18 }
 0xf6a   : > { %v8313_v60 = vpop.f32.mrf.mxu1  ;;  %v14719_v48 = vpop.f32.mrf.mxu0 }
 0xf6b   : > { %8819 = vst [vmem:[%s14610_s8 + $0x78] sm:$0xff] %v9857_v0  ;;  %v8423_v58 = vadd.f32 %v8422_v31, %v8310_v42  ;;  %v8314_v51 = vadd.f32 %v8313_v60, %v14598_v26 }
 0xf6c   : > { %v8315_v27 = vpop.f32.mrf.mxu1  ;;  %v14731_v49 = vpop.f32.mrf.mxu0 }
 0xf6d   : > { %v9859_v4 = vpack.c.bf16 %v8423_v58, %v8421_v37  ;;  %v8316_v50 = vadd.f32 %v8315_v27, %v14601_v14  ;;  %v8427_v12 = vadd.f32 %v14637_v44, %v8314_v51  ;;  %v10177_v37 = vadd.f32 %v14679_v39, %v14677_v57 }
 0xf6e   : > { %v8317_v55 = vpop.f32.mrf.mxu1  ;;  %v14744_v42 = vpop.f32.mrf.mxu0  ;;  %v10180_v57 = vadd.f32 %v14683_v46, %v14681_v35  ;;  %v10189_v35 = vadd.f32 %v14702_v38, %v14697_v3  ;;  %v10192_v3 = vadd.f32 %v14712_v7, %v14707_v21 }
 0xf6f   : > { %8821 = vst [vmem:[%s14610_s8 + $0x84] sm:$0xff] %v9859_v4  ;;  %v8429_v29 = vadd.f32 %v14639_v6, %v8316_v50  ;;  %v8318_v63 = vadd.f32 %v8317_v55, %v14598_v26 }
 0xf70   : > { %v8319_v8 = vpop.f32.mrf.mxu1  ;;  %v14755_v4 = vpop.f32.mrf.mxu0 }
 0xf71   : > { %v9861_v2 = vpack.c.bf16 %v8429_v29, %v8427_v12  ;;  %v8320_v31 = vadd.f32 %v8319_v8, %v14601_v14  ;;  %v8431_v54 = vadd.f32 %v14641_v20, %v8318_v63  ;;  %v14734_v20 = vrot.slane %v14594_v43, %v7702_v53 }
 0xf72   : > { %v8323_v16 = vpop.f32.mrf.mxu1  ;;  %v10199_v63 = vpop.f32.mrf.mxu0 }
 0xf73   : > { %8823 = vst [vmem:[%s14610_s8 + $0x90] sm:$0xff] %v9861_v2  ;;  %v8433_v25 = vadd.f32 %v14643_v24, %v8320_v31  ;;  %v8324_v44 = vadd.f32 %v8323_v16, %v14598_v26  ;;  %v8488_v47 = vadd.f32 %v10165_v5, %v14734_v20  ;;  %v8480_v60 = vadd.f32 %v10159_v19, %v14734_v20 }
 0xf74   : > { %v8325_v6 = vpop.f32.mrf.mxu1  ;;  %v8504_v29 = vadd.f32 %v10177_v37, %v14734_v20  ;;  %v8520_v19 = vadd.f32 %v10189_v35, %v14734_v20  ;;  %v10198_v37 = vadd.f32 %v14755_v4, %v14744_v42 }
 0xf75   : > { %v9863_v36 = vpack.c.bf16 %v8433_v25, %v8431_v54  ;;  %v8326_v62 = vadd.f32 %v8325_v6, %v14601_v14  ;;  %v8437_v24 = vadd.f32 %v14645_v17, %v8324_v44  ;;  %v10162_v17 = vadd.f32 %v14659_v59, %v14657_v9  ;;  %v10200_v25 = vpop.f32.mrf.mxu0 }
 0xf76   : > { %v8327_v28 = vpop.f32.mrf.mxu1  ;;  %v8507_v54 = vadd.f32 %v10180_v57, %v14734_v20 }
 0xf77   : > { %8825 = vst [vmem:[%s14610_s8 + $0x9c] sm:$0xff] %v9863_v36  ;;  %v8439_v15 = vadd.f32 %v14647_v23, %v8326_v62  ;;  %v8328_v34 = vadd.f32 %v8327_v28, %v14598_v26  ;;  %v8483_v59 = vadd.f32 %v10162_v17, %v14734_v20  ;;  %v10202_v28 = vpop.f32.mrf.mxu0 }
 0xf78   : > { %v8329_v13 = vpop.f32.mrf.mxu1 }
 0xf79   : > { %v9865_v0 = vpack.c.bf16 %v8439_v15, %v8437_v24  ;;  %v8330_v18 = vadd.f32 %v8329_v13, %v14601_v14  ;;  %v8441_v26 = vadd.f32 %v14649_v40, %v8328_v34  ;;  %v8491_v14 = vadd.f32 %v10168_v45, %v14734_v20 }
 0xf7a   : > { %v10655_v43 = vpop.f32.mrf.mxu1  ;;  %v10171_v40 = vadd.f32 %v14671_v1, %v14669_v61  ;;  %v10174_v61 = vadd.f32 %v14675_v56, %v14673_v32  ;;  %v10183_v32 = vadd.f32 %v14688_v22, %v14685_v30  ;;  %v10186_v30 = vadd.f32 %v14694_v11, %v14691_v41 }
 0xf7b   : > { %8827 = vst [vmem:[%s14610_s8 + $0xa8] sm:$0xff] %v9865_v0  ;;  %v8443_v23 = vadd.f32 %v14651_v52, %v8330_v18  ;;  %v8585_v10 = vadd.f32 %v10655_v43, %v8488_v47  ;;  %v10201_v13 = vadd.f32 %v10200_v25, %v10199_v63  ;;  %v8523_v0 = vadd.f32 %v10192_v3, %v14734_v20  ;;  %v10203_v18 = vpop.f32.mrf.mxu0 }
 0xf7c   : > { %v8576_v33 = vpop.f32.mrf.mxu1  ;;  %v8496_v31 = vadd.f32 %v10171_v40, %v14734_v20  ;;  %v8499_v5 = vadd.f32 %v10174_v61, %v14734_v20  ;;  %v8512_v34 = vadd.f32 %v10183_v32, %v14734_v20  ;;  %v10195_v43 = vadd.f32 %v14731_v49, %v14719_v48 }
 0xf7d   : > { %v9867_v58 = vpack.c.bf16 %v8443_v23, %v8441_v26  ;;  %v9842_v51 = vpack.c.bf16 %v8585_v10, %v8585_v10  ;;  %v8577_v27 = vadd.f32 %v8576_v33, %v8480_v60  ;;  %v8515_v60 = vadd.f32 %v10186_v30, %v14734_v20 }
 0xf7e   : > { %v10656_v50 = vpop.f32.mrf.mxu1  ;;  %v10204_v26 = vadd.f32 %v10203_v18, %v10202_v28  ;;  %v8536_v33 = vadd.f32 %v10201_v13, %v14734_v20 }
 0xf7f   : > { %8829 = vst [vmem:[%s14610_s8 + $0xb4] sm:$0xff] %v9867_v58  ;;  %8804 = vst [vmem:[%s14610_s8 + $0x20] sm:$0xf] %v9842_v51  ;;  %v9838_v52 = vpack.c.bf16 %v8577_v27, %v8577_v27  ;;  %v8588_v9 = vadd.f32 %v10656_v50, %v8491_v14  ;;  %v8528_v58 = vadd.f32 %v10195_v43, %v14734_v20 }
 0xf80   : > { %v8579_v55 = vpop.f32.mrf.mxu1  ;;  %v8539_v40 = vadd.f32 %v10204_v26, %v14734_v20 }
 0xf81   : > { %8800 = vst [vmem:[%s14610_s8 + $0x8] sm:$0xf] %v9838_v52  ;;  %v9844_v39 = vpack.c.bf16 %v8588_v9, %v8588_v9  ;;  %v8580_v12 = vadd.f32 %v8579_v55, %v8483_v59  ;;  %v8531_v9 = vadd.f32 %v10198_v37, %v14734_v20 }
 0xf82   : > { %v10659_v8 = vpop.f32.mrf.mxu1 }
 0xf83   : > { %8806 = vst [vmem:[%s14610_s8 + $0x2c] sm:$0xf] %v9844_v39  ;;  %v9840_v1 = vpack.c.bf16 %v8580_v12, %v8580_v12  ;;  %v8601_v2 = vadd.f32 %v10659_v8, %v8504_v29 }
 0xf84   : > { %v8592_v16 = vpop.f32.mrf.mxu1 }
 0xf85   : > { %8802 = vst [vmem:[%s14610_s8 + $0x14] sm:$0xf] %v9840_v1  ;;  %v9850_v46 = vpack.c.bf16 %v8601_v2, %v8601_v2  ;;  %v8593_v53 = vadd.f32 %v8592_v16, %v8496_v31 }
 0xf86   : > { %v10660_v44 = vpop.f32.mrf.mxu1 }
 0xf87   : > { %8812 = vst [vmem:[%s14610_s8 + $0x50] sm:$0xf] %v9850_v46  ;;  %v9846_v56 = vpack.c.bf16 %v8593_v53, %v8593_v53  ;;  %v8604_v6 = vadd.f32 %v10660_v44, %v8507_v54 }
 0xf88   : > { %v8595_v36 = vpop.f32.mrf.mxu1 }
 0xf89   : > { %8808 = vst [vmem:[%s14610_s8 + $0x38] sm:$0xf] %v9846_v56  ;;  %v9852_v38 = vpack.c.bf16 %v8604_v6, %v8604_v6  ;;  %v8596_v62 = vadd.f32 %v8595_v36, %v8499_v5 }
 0xf8a   : > { %v10663_v24 = vpop.f32.mrf.mxu1 }
 0xf8b   : > { %8814 = vst [vmem:[%s14610_s8 + $0x5c] sm:$0xf] %v9852_v38  ;;  %v9848_v22 = vpack.c.bf16 %v8596_v62, %v8596_v62  ;;  %v8617_v15 = vadd.f32 %v10663_v24, %v8520_v19 }
 0xf8c   : > { %v8608_v45 = vpop.f32.mrf.mxu1 }
 0xf8d   : > { %8810 = vst [vmem:[%s14610_s8 + $0x44] sm:$0xf] %v9848_v22  ;;  %v9858_v21 = vpack.c.bf16 %v8617_v15, %v8617_v15  ;;  %v8609_v7 = vadd.f32 %v8608_v45, %v8512_v34 }
 0xf8e   : > { %v10664_v47 = vpop.f32.mrf.mxu1 }
 0xf8f   : > { %8820 = vst [vmem:[%s14610_s8 + $0x80] sm:$0xf] %v9858_v21  ;;  %v9854_v41 = vpack.c.bf16 %v8609_v7, %v8609_v7  ;;  %v8620_v11 = vadd.f32 %v10664_v47, %v8523_v0 }
 0xf90   : > { %v8611_v17 = vpop.f32.mrf.mxu1 }
 0xf91   : > { %8816 = vst [vmem:[%s14610_s8 + $0x68] sm:$0xf] %v9854_v41  ;;  %v9860_v23 = vpack.c.bf16 %v8620_v11, %v8620_v11  ;;  %v8612_v10 = vadd.f32 %v8611_v17, %v8515_v60 }
 0xf92   : > { %v10667_v14 = vpop.f32.mrf.mxu1 }
 0xf93   : > { %8822 = vst [vmem:[%s14610_s8 + $0x8c] sm:$0xf] %v9860_v23  ;;  %v9856_v48 = vpack.c.bf16 %v8612_v10, %v8612_v10  ;;  %v8633_v49 = vadd.f32 %v10667_v14, %v8536_v33 }
 0xf94   : > { %v8624_v51 = vpop.f32.mrf.mxu1 }
 0xf95   : > { %8818 = vst [vmem:[%s14610_s8 + $0x74] sm:$0xf] %v9856_v48  ;;  %v9866_v27 = vpack.c.bf16 %v8633_v49, %v8633_v49  ;;  %v8625_v50 = vadd.f32 %v8624_v51, %v8528_v58 }
 0xf96   : > { %v10668_v52 = vpop.f32.mrf.mxu1 }
 0xf97   : > { %8828 = vst [vmem:[%s14610_s8 + $0xb0] sm:$0xf] %v9866_v27  ;;  %v9862_v42 = vpack.c.bf16 %v8625_v50, %v8625_v50  ;;  %v8636_v4 = vadd.f32 %v10668_v52, %v8539_v40 }
 0xf98   : > { %v8627_v59 = vpop.f32.mrf.mxu1 }
 0xf99   : > { %8824 = vst [vmem:[%s14610_s8 + $0x98] sm:$0xf] %v9862_v42  ;;  %v9868_v55 = vpack.c.bf16 %v8636_v4, %v8636_v4  ;;  %v8628_v57 = vadd.f32 %v8627_v59, %v8531_v9 }
 0xf9b   : > { %8830 = vst [vmem:[%s14610_s8 + $0xbc] sm:$0xf] %v9868_v55  ;;  %v9864_v39 = vpack.c.bf16 %v8628_v57, %v8628_v57 }
 0xf9d   : > { %8826 = vst [vmem:[%s14610_s8 + $0xa4] sm:$0xf] %v9864_v39 }
 0xf9e   : > { %11860 = shalt.err (!%p11857_p9)
}
 0xf9f   : > { %s11861_s14 = scalar_lea.hbm %s14808_s30, 3072  ;;  %s11865_s23 = scalar_lea.hbm %s14859_s4, 6144 }
 0xfa0   : > { %p11862_p13 = scmp.ne.s32.totalorder %s14808_s30, %s11861_s14  ;;  %p11866_p4 = scmp.lt.s32.totalorder %s14808_s30, %s14859_s4 }
 0xfa1   : > { %p11867_p8 = scmp.lt.s32.totalorder %s11865_s23, %s11861_s14 }
 0xfa2   : > { %p11863_p5 = pnand %p11862_p13, %p15319_p10 }
 0xfa3   : > { %p11868_p7 = por %p11867_p8, %p11866_p4 }
 0xfa4   : > { %p11864_p0 = pneg %p11863_p5 }
 0xfa6   : > { %p11869_p11 = pnand %p11868_p7, %p11864_p0 }
 0xfa8   : > { %11872 = shalt.err (!%p11869_p11)
}
 0xfa9   : > { %s11929_s8 = smov 192   ;;  %s11930_s9 = smov 12  }
 0xfaa   : > { %10732 = dma.vmem_to_hbm [thread:$0]  (%p15319_p10), %s14811_s28, 3072, %s14808_s30, %s8832_s19, %s11929_s8, %s11929_s8, %s11930_s9  }
 0xfab PF: > { %s8860_s26 = sand.u32 1, %s11903_s15   ;;  %p15320_p1 = scmp.ne.s32.totalorder %s14933_s22, 0 }
 0xfac   : > { %p15321_p2 = scmp.ge.s32.totalorder %s11915_s18, 2  ;;  %s8861_s27 = scalar_lea.sflag [#allocation6], %s8860_s26 }
 0xfae   : > { %p10746_p6 = pnand %p15321_p2, %p15320_p1 }
 0xfb0   : > { %p10747_p12 = pneg %p10746_p6 }
 0xfb2   : > { %11898 = dma.done.wait (%p10747_p12), %s8861_s27, 3072  }
 0xfb3   : > { %11900 = vsyncadd (%p10747_p12), %s8861_s27, 4294964224  ;;  %p18_p3 = scmp.ge.s32.totalorder %s12028_s13, 4   ;;  %s15322_s15 = smov %s11907_s16 }
 0xfb4   : > { %s15323_s16 = smov %s11911_s17  ;;  %s15324_s17 = smov %s12037_s24 }
 0xfb5   : > { %s15325_s18 = smov %s12028_s13  ;;  %20 = sbr.rel (!%p18_p3) target bundleno = 6 (0x6), region = 89 }
 0xfba   :  { %8866 = vsyncpa [#allocation5], 1 }
 0xfbb   :  { %8868 = vsyncpa [#allocation5 + $0x1], 1 }
 0xfbc   :  { %8869 = vsyncpa [#allocation8], 1 }
 0xfbd   :  { %8870 = vsyncpa [#allocation6], 1 }
 0xfbe   :  { %8872 = vsyncpa [#allocation6 + $0x1], 1 }

</bundles_post_ra>
